<compile_context>
chip_gen: v7x
topology: tpu7x:2x2x1
jax: 0.10.0
libtpu: 0.0.40
codegen_flags: <defaults>
</compile_context>

<pallas_src>
import math

import jax
import jax.numpy as jnp
import numpy as np
from jax.experimental import pallas as pl
from jax.experimental.pallas import tpu as pltpu

EMBED_DIM = 768
NUM_HEADS = 12
HEAD_DIM = EMBED_DIM // NUM_HEADS  # 64


def _pick_tkv(lkv):
    """Largest KV tile in {2048, 1024, 512} that divides Lkv (Lkv = n_context*512)."""
    for cand in (2048, 1024, 512):
        if lkv % cand == 0:
            return cand
    return lkv


def lca_attn_kernel(qt_ref, kv_ref, ctx_ref, m_sc, l_sc, acc_sc):
    """Flash-style online-softmax attention with W_k folded into Q and W_v deferred.

    qt_ref : (1, H*Lq, D) bf16   Q~ = Qp_h @ W_k_h / sqrt(hd), heads on sublanes
    kv_ref : (1, TKV,  D) bf16   raw encoder rows (K and V share this stream)
    ctx_ref: (1, H*Lq, D) f32    normalized  softmax(S) @ att  (per head rows)
    """
    k_idx = pl.program_id(1)

    @pl.when(k_idx == 0)
    def _init():
        m_sc[...] = jnp.full_like(m_sc, -jnp.inf)
        l_sc[...] = jnp.zeros_like(l_sc)
        acc_sc[...] = jnp.zeros_like(acc_sc)

    qt = qt_ref[0]                                               # (H*Lq, D) bf16
    kv = kv_ref[0]                                               # (TKV,  D) bf16

    # All heads at once: S_all = Q~_all @ att_tile^T  (NT matmul on the MXU).
    s = jnp.einsum("qd,kd->qk", qt, kv,
                   preferred_element_type=jnp.float32)           # (H*Lq, TKV)

    m_prev = m_sc[...]
    m_new = jnp.maximum(m_prev, jnp.max(s, axis=-1, keepdims=True))
    alpha = jnp.exp(m_prev - m_new)
    p = jnp.exp(s - m_new)
    l_sc[...] = alpha * l_sc[...] + jnp.sum(p, axis=-1, keepdims=True)
    # Deferred-V: accumulate P_all @ att_tile; W_v is applied after the kernel.
    acc_sc[...] = alpha * acc_sc[...] + jnp.dot(
        p.astype(jnp.bfloat16), kv, preferred_element_type=jnp.float32)
    m_sc[...] = m_new

    @pl.when(k_idx == pl.num_programs(1) - 1)
    def _finalize():
        inv_l = pl.reciprocal(l_sc[...], approx=True)            # softmax denom only
        ctx_ref[0] = (acc_sc[...] * inv_l).astype(ctx_ref.dtype)


def lca_forward(encoder_last_hidden_state, gen_tokens_embeddings, params, n_context):
    B = encoder_last_hidden_state.shape[0]
    D = EMBED_DIM
    H = NUM_HEADS
    Lq = gen_tokens_embeddings.shape[1]
    Lkv = n_context * 512

    # bf16 HBM stream for the dominant KV read (K and V share the raw rows).
    att_input = encoder_last_hidden_state.reshape(B, Lkv, D).astype(jnp.bfloat16)

    # ---- host-side algebra: fold W_k (and 1/sqrt(hd)) into Q ----------------
    #   S_h = (q W_q_h^T + b_q_h) @ (att W_k_h^T + b_k_h)^T / sqrt(hd)
    #       = [(q W_q_h^T + b_q_h) W_k_h / sqrt(hd)] @ att^T  + const-per-row
    # b_k adds a per-query-row constant -> dropped (softmax shift-invariant).
    w_in, b_in = params["w_in"], params["b_in"][0]
    W_q, W_k, W_v = w_in[:D], w_in[D:2 * D], w_in[2 * D:]
    b_q, b_v = b_in[:D], b_in[2 * D:]
    scale = 1.0 / math.sqrt(HEAD_DIM)

    qp = gen_tokens_embeddings @ W_q.T + b_q                       # (B, Lq, D) f32
    qp_h = qp.reshape(B, Lq, H, HEAD_DIM).transpose(0, 2, 1, 3)    # (B, H, Lq, hd)
    qt = jnp.einsum("bhqc,hcd->bhqd",
                    qp_h, W_k.reshape(H, HEAD_DIM, D)) * scale     # (B, H, Lq, D)
    qt = qt.reshape(B, H * Lq, D).astype(jnp.bfloat16)             # heads on sublanes

    tkv = _pick_tkv(Lkv)
    nkv = Lkv // tkv
    HLq = H * Lq

    ctx = pl.pallas_call(
        lca_attn_kernel,
        out_shape=jax.ShapeDtypeStruct((B, HLq, D), jnp.float32),
        grid_spec=pltpu.PrefetchScalarGridSpec(
            num_scalar_prefetch=0,
            grid=(B, nkv),
            in_specs=[
                pl.BlockSpec((1, HLq, D), lambda b, k: (b, 0, 0)),   # Q~ (all heads)
                pl.BlockSpec((1, tkv, D), lambda b, k: (b, k, 0)),   # KV tile (bf16)
            ],
            out_specs=pl.BlockSpec((1, HLq, D), lambda b, k: (b, 0, 0)),
            scratch_shapes=[
                pltpu.VMEM((HLq, 1), jnp.float32),   # running max  (per head row)
                pltpu.VMEM((HLq, 1), jnp.float32),   # running sum  (per head row)
                pltpu.VMEM((HLq, D), jnp.float32),   # P @ att accumulator
            ],
        ),
        compiler_params=pltpu.CompilerParams(
            dimension_semantics=("parallel", "arbitrary"),
        ),
    )(qt, att_input)

    # ---- post-softmax algebra, exact f32, outside the kernel ----------------
    ctx = ctx.reshape(B, H, Lq, D)
    # o_h = (P_h @ att) @ W_v_h^T + b_v_h   (rows of P sum to 1 -> bias exact)
    o_h = jnp.einsum("bhqd,hcd->bhqc", ctx, W_v.reshape(H, HEAD_DIM, D))
    o_h = o_h + b_v.reshape(1, H, 1, HEAD_DIM)
    attn_out = o_h.transpose(0, 2, 1, 3).reshape(B, Lq, D)
    out = attn_out @ params["w_out"].T + params["b_out"][0]
    post = out @ params["w_post"].T
    pooled = post.mean(axis=1)                                    # (B, D)
    logit = pooled @ params["w_pred"].T                           # (B, 1)
    pred = jax.nn.sigmoid(logit)[:, 0]                            # exact sigmoid
    # torch .squeeze(): (B,) for B > 1, 0-d scalar for B == 1.
    return jnp.squeeze(pred)


def lca_reference(encoder_last_hidden_state, gen_tokens_embeddings, params, n_context):
    """Pure-JAX f32 reference (mirrors torch.nn.MultiheadAttention semantics)."""
    B = encoder_last_hidden_state.shape[0]
    D = EMBED_DIM
    att = encoder_last_hidden_state.reshape(B, n_context * 512, D)
    q = gen_tokens_embeddings
    w_in, b_in = params["w_in"], params["b_in"][0]
    qp = q @ w_in[:D].T + b_in[:D]
    kp = att @ w_in[D:2 * D].T + b_in[D:2 * D]
    vp = att @ w_in[2 * D:].T + b_in[2 * D:]

    def split(x):
        b, l, _ = x.shape
        return x.reshape(b, l, NUM_HEADS, HEAD_DIM).transpose(0, 2, 1, 3)

    qh, kh, vh = split(qp), split(kp), split(vp)
    s = jnp.einsum("bhqd,bhkd->bhqk", qh, kh) / math.sqrt(HEAD_DIM)
    p = jax.nn.softmax(s, axis=-1)
    o = jnp.einsum("bhqk,bhkd->bhqd", p, vh)
    o = o.transpose(0, 2, 1, 3).reshape(B, -1, D)
    o = o @ params["w_out"].T + params["b_out"][0]
    post = o @ params["w_post"].T
    pooled = post.mean(axis=1)
    logit = pooled @ params["w_pred"].T  # (B, 1)
    return jax.nn.sigmoid(logit)[:, 0]


def init_params(key):
    ks = jax.random.split(key, 6)
    scale = 0.02
    return {
        # MultiheadAttention in-projection (packed q,k,v) + bias
        "w_in": scale * jax.random.normal(ks[0], (3 * EMBED_DIM, EMBED_DIM), jnp.float32),
        "b_in": scale * jax.random.normal(ks[1], (1, 3 * EMBED_DIM), jnp.float32),
        # MultiheadAttention out_proj (weight + bias)
        "w_out": scale * jax.random.normal(ks[2], (EMBED_DIM, EMBED_DIM), jnp.float32),
        "b_out": scale * jax.random.normal(ks[3], (1, EMBED_DIM), jnp.float32),
        # post_attention_layer (no bias)
        "w_post": scale * jax.random.normal(ks[4], (EMBED_DIM, EMBED_DIM), jnp.float32),
        # pred_layer: Linear(768, 1, bias=False) -> weight shape (1, 768)
        "w_pred": scale * jax.random.normal(ks[5], (1, EMBED_DIM), jnp.float32),
    }


if __name__ == "__main__":
    key = jax.random.PRNGKey(0)
    k_enc, k_gen, k_par = jax.random.split(key, 3)

    B = 2
    N_CONTEXT = 6            # Lkv = 3072 -> TKV=1024, 3 KV tiles (online softmax)
    LQ = 8                   # generated-token sequence length

    encoder_last_hidden_state = jax.random.normal(
        k_enc, (B, N_CONTEXT, 512, EMBED_DIM), jnp.float32)
    gen_tokens_embeddings = jax.random.normal(
        k_gen, (B, LQ, EMBED_DIM), jnp.float32)

    params = init_params(k_par)

    pred = lca_forward(encoder_last_hidden_state, gen_tokens_embeddings,
                       params, N_CONTEXT)
    pred = jax.block_until_ready(pred)

    ref = lca_reference(encoder_last_hidden_state, gen_tokens_embeddings,
                        params, N_CONTEXT)
    ref = jax.block_until_ready(ref)

    # bf16 MXU operands for the attention matmuls (f32 accumulation, approx
    # softmax reciprocal) vs f32 reference -> intentionally loosened tolerance.
    np.testing.assert_allclose(np.asarray(pred), np.asarray(ref),
                               rtol=1e-2, atol=2e-3)
    print("KERNEL_OK")
</pallas_src>

<mosaic_0001>
module attributes {stable_mosaic.version = 11 : i64} {
  func.func @lca_attn_kernel(%arg0: i32, %arg1: i32, %arg2: memref<1x96x768xbf16, #tpu.memory_space<vmem>>, %arg3: memref<1x1024x768xbf16, #tpu.memory_space<vmem>>, %arg4: memref<1x96x768xf32, #tpu.memory_space<vmem>>, %arg5: memref<96x1xf32, #tpu.memory_space<vmem>>, %arg6: memref<96x1xf32, #tpu.memory_space<vmem>>, %arg7: memref<96x768xf32, #tpu.memory_space<vmem>>) attributes {dimension_semantics = [#tpu.dimension_semantics<parallel>, #tpu.dimension_semantics<arbitrary>], iteration_bounds = array<i64: 2, 3>, scalar_prefetch = 0 : i64, scratch_operands = 3 : i64, tpu.core_type = #tpu.core_type<tc>, window_params = [{transform_indices = @transform_0, window_bounds = array<i64: 1, 96, 768>}, {transform_indices = @transform_1, window_bounds = array<i64: 1, 1024, 768>}, {transform_indices = @transform_2, window_bounds = array<i64: 1, 96, 768>}]} {
    %c0_i32 = arith.constant 0 : i32
    %0 = arith.cmpi eq, %arg1, %c0_i32 : i32
    %1 = arith.extui %0 : i1 to i32
    %c0_i32_0 = arith.constant 0 : i32
    %2 = arith.cmpi ne, %1, %c0_i32_0 : i32
    scf.if %2 {
      %cst_22 = arith.constant 0xFF800000 : f32
      %34 = vector.broadcast %cst_22 : f32 to vector<96x1xf32>
      %c0_23 = arith.constant 0 : index
      %c0_24 = arith.constant 0 : index
      %35 = vector.load %arg5[%c0_23, %c0_24] : memref<96x1xf32, #tpu.memory_space<vmem>>, vector<96x1xf32>
      tpu.vector_store %arg5[%c0_23, %c0_24], %34 {strides = array<i32>} : memref<96x1xf32, #tpu.memory_space<vmem>>, vector<96x1xf32>,
      %cst_25 = arith.constant 0.000000e+00 : f32
      %36 = vector.broadcast %cst_25 : f32 to vector<96x1xf32>
      %c0_26 = arith.constant 0 : index
      %c0_27 = arith.constant 0 : index
      %37 = vector.load %arg6[%c0_26, %c0_27] : memref<96x1xf32, #tpu.memory_space<vmem>>, vector<96x1xf32>
      tpu.vector_store %arg6[%c0_26, %c0_27], %36 {strides = array<i32>} : memref<96x1xf32, #tpu.memory_space<vmem>>, vector<96x1xf32>,
      %cst_28 = arith.constant 0.000000e+00 : f32
      %38 = vector.broadcast %cst_28 : f32 to vector<96x768xf32>
      %c0_29 = arith.constant 0 : index
      %c0_30 = arith.constant 0 : index
      %39 = vector.load %arg7[%c0_29, %c0_30] : memref<96x768xf32, #tpu.memory_space<vmem>>, vector<96x768xf32>
      tpu.vector_store %arg7[%c0_29, %c0_30], %38 {strides = array<i32>} : memref<96x768xf32, #tpu.memory_space<vmem>>, vector<96x768xf32>,
    } else {
    }
    %c0 = arith.constant 0 : index
    %c0_1 = arith.constant 0 : index
    %c0_2 = arith.constant 0 : index
    %3 = vector.load %arg2[%c0, %c0_1, %c0_2] : memref<1x96x768xbf16, #tpu.memory_space<vmem>>, vector<1x96x768xbf16>
    %4 = vector.shape_cast %3 : vector<1x96x768xbf16> to vector<96x768xbf16>
    %c0_3 = arith.constant 0 : index
    %c0_4 = arith.constant 0 : index
    %c0_5 = arith.constant 0 : index
    %5 = vector.load %arg3[%c0_3, %c0_4, %c0_5] : memref<1x1024x768xbf16, #tpu.memory_space<vmem>>, vector<1x1024x768xbf16>
    %6 = vector.shape_cast %5 : vector<1x1024x768xbf16> to vector<1024x768xbf16>
    "tpu.trace_start"() <{level = 10 : i32, message = "qd,kd->qk"}> : () -> ()
    %cst = arith.constant dense<0.000000e+00> : vector<96x1024xf32>
    %7 = tpu.matmul %4, %6, %cst {dimension_numbers = #tpu.dot_dimension_numbers<[1], [1], [0], [0], [0, 0, 1, 0], [], []>} : vector<96x768xbf16>, vector<1024x768xbf16>, vector<96x1024xf32> -> vector<96x1024xf32>
    "tpu.trace_stop"() : () -> ()
    %c0_6 = arith.constant 0 : index
    %c0_7 = arith.constant 0 : index
    %8 = vector.load %arg5[%c0_6, %c0_7] : memref<96x1xf32, #tpu.memory_space<vmem>>, vector<96x1xf32>
    %cst_8 = arith.constant dense<0xFF800000> : vector<96xf32>
    %9 = vector.multi_reduction <maximumf>, %7, %cst_8 [1] : vector<96x1024xf32> to vector<96xf32>
    %10 = vector.shape_cast %9 : vector<96xf32> to vector<96x1xf32>
    %11 = arith.maximumf %8, %10 : vector<96x1xf32>
    %12 = arith.subf %8, %11 : vector<96x1xf32>
    %13 = math.exp %12 : vector<96x1xf32>
    %14 = vector.broadcast %11 : vector<96x1xf32> to vector<96x1024xf32>
    %15 = arith.subf %7, %14 : vector<96x1024xf32>
    %16 = math.exp %15 : vector<96x1024xf32>
    %c0_9 = arith.constant 0 : index
    %c0_10 = arith.constant 0 : index
    %17 = vector.load %arg6[%c0_9, %c0_10] : memref<96x1xf32, #tpu.memory_space<vmem>>, vector<96x1xf32>
    %18 = arith.mulf %13, %17 : vector<96x1xf32>
    %cst_11 = arith.constant dense<0.000000e+00> : vector<96xf32>
    %19 = vector.multi_reduction <add>, %16, %cst_11 [1] : vector<96x1024xf32> to vector<96xf32>
    %20 = vector.shape_cast %19 : vector<96xf32> to vector<96x1xf32>
    %21 = arith.addf %18, %20 : vector<96x1xf32>
    %c0_12 = arith.constant 0 : index
    %c0_13 = arith.constant 0 : index
    %22 = vector.load %arg6[%c0_12, %c0_13] : memref<96x1xf32, #tpu.memory_space<vmem>>, vector<96x1xf32>
    tpu.vector_store %arg6[%c0_12, %c0_13], %21 {strides = array<i32>} : memref<96x1xf32, #tpu.memory_space<vmem>>, vector<96x1xf32>,
    %c0_14 = arith.constant 0 : index
    %c0_15 = arith.constant 0 : index
    %23 = vector.load %arg7[%c0_14, %c0_15] : memref<96x768xf32, #tpu.memory_space<vmem>>, vector<96x768xf32>
    %24 = vector.broadcast %13 : vector<96x1xf32> to vector<96x768xf32>
    %25 = arith.mulf %24, %23 : vector<96x768xf32>
    %26 = arith.truncf %16 : vector<96x1024xf32> to vector<96x1024xbf16>
    %cst_16 = arith.constant dense<0.000000e+00> : vector<96x768xf32>
    %27 = tpu.matmul %26, %6, %cst_16 {dimension_numbers = #tpu.dot_dimension_numbers<[1], [0], [0], [1], [0, 0, 1, 1], [], []>} : vector<96x1024xbf16>, vector<1024x768xbf16>, vector<96x768xf32> -> vector<96x768xf32>
    %28 = arith.addf %25, %27 : vector<96x768xf32>
    %c0_17 = arith.constant 0 : index
    %c0_18 = arith.constant 0 : index
    %29 = vector.load %arg7[%c0_17, %c0_18] : memref<96x768xf32, #tpu.memory_space<vmem>>, vector<96x768xf32>
    tpu.vector_store %arg7[%c0_17, %c0_18], %28 {strides = array<i32>} : memref<96x768xf32, #tpu.memory_space<vmem>>, vector<96x768xf32>,
    %c0_19 = arith.constant 0 : index
    %c0_20 = arith.constant 0 : index
    %30 = vector.load %arg5[%c0_19, %c0_20] : memref<96x1xf32, #tpu.memory_space<vmem>>, vector<96x1xf32>
    tpu.vector_store %arg5[%c0_19, %c0_20], %11 {strides = array<i32>} : memref<96x1xf32, #tpu.memory_space<vmem>>, vector<96x1xf32>,
    %c2_i32 = arith.constant 2 : i32
    %31 = arith.cmpi eq, %arg1, %c2_i32 : i32
    %32 = arith.extui %31 : i1 to i32
    %c0_i32_21 = arith.constant 0 : i32
    %33 = arith.cmpi ne, %32, %c0_i32_21 : i32
    scf.if %33 {
      %c0_22 = arith.constant 0 : index
      %c0_23 = arith.constant 0 : index
      %34 = vector.load %arg6[%c0_22, %c0_23] : memref<96x1xf32, #tpu.memory_space<vmem>>, vector<96x1xf32>
      %35 = tpu.reciprocal %34 {approx = true} : vector<96x1xf32> -> vector<96x1xf32>
      %c0_24 = arith.constant 0 : index
      %c0_25 = arith.constant 0 : index
      %36 = vector.load %arg7[%c0_24, %c0_25] : memref<96x768xf32, #tpu.memory_space<vmem>>, vector<96x768xf32>
      %37 = vector.broadcast %35 : vector<96x1xf32> to vector<96x768xf32>
      %38 = arith.mulf %36, %37 : vector<96x768xf32>
      %c0_26 = arith.constant 0 : index
      %c0_27 = arith.constant 0 : index
      %c0_28 = arith.constant 0 : index
      %39 = vector.load %arg4[%c0_26, %c0_27, %c0_28] : memref<1x96x768xf32, #tpu.memory_space<vmem>>, vector<1x96x768xf32>
      %40 = vector.shape_cast %39 : vector<1x96x768xf32> to vector<96x768xf32>
      %41 = vector.shape_cast %38 : vector<96x768xf32> to vector<1x96x768xf32>
      tpu.vector_store %arg4[%c0_26, %c0_27, %c0_28], %41 {strides = array<i32>} : memref<1x96x768xf32, #tpu.memory_space<vmem>>, vector<1x96x768xf32>,
    } else {
    }
    return
  }
  func.func @transform_0(%arg0: i32, %arg1: i32) -> (i32, i32, i32) {
    %c0_i32 = arith.constant 0 : i32
    %c0_i32_0 = arith.constant 0 : i32
    %c0_i32_1 = arith.constant 0 : i32
    return %arg0, %c0_i32, %c0_i32_0 : i32, i32, i32
  }
  func.func @transform_1(%arg0: i32, %arg1: i32) -> (i32, i32, i32) {
    %c0_i32 = arith.constant 0 : i32
    %c0_i32_0 = arith.constant 0 : i32
    return %arg0, %arg1, %c0_i32 : i32, i32, i32
  }
  func.func @transform_2(%arg0: i32, %arg1: i32) -> (i32, i32, i32) {
    %c0_i32 = arith.constant 0 : i32
    %c0_i32_0 = arith.constant 0 : i32
    %c0_i32_1 = arith.constant 0 : i32
    return %arg0, %c0_i32, %c0_i32_0 : i32, i32, i32
  }
}

</mosaic_0001>

<bundles_post_ra>
// kernel: tpu_custom_call.1
= control target key start
LH: loop header
LB: loop body
LE: loop exit
PB: predicated region body
PF: predicated region fallthrough
CT: control target
= control target key end

     0   :  { %s12189_s0 = inlined_call_operand.hbm [shape: bf16[2,96,768], index: 0, kind: input, shape index: {}]   ;;  %s12190_s1 = inlined_call_operand.hbm [shape: bf16[2,3072,768], index: 1, kind: input, shape index: {}]   ;;  %s12191_s2 = inlined_call_operand.hbm [shape: f32[2,96,768], index: 2, kind: output, shape index: {}]  }
   0x1   :  { %12310 = sst [smem:[#allocation95_spill]] %s12189_s0 }
   0x2   :  { %12311 = sst [smem:[#allocation96_spill]] %s12191_s2 }
   0x3   :  { %7 = vsyncpa [#allocation6], 0 }
   0x4   :  { %9 = vsyncpa [#allocation6 + $0x1], 0 }
   0x5   :  { %10 = vsyncpa [#allocation9], 0 }
   0x6   :  { %12 = vsyncpa [#allocation9 + $0x1], 0 }
   0x7   :  { %13 = vsyncpa [#allocation7], 0 }
   0x8   :  { %15 = vsyncpa [#allocation7 + $0x1], 0  ;;  %s9062_s9 = smov 0   ;;  %s9064_s10 = smov 0  }
   0x9   :  { %s9066_s11 = smov 0   ;;  %s9068_s12 = smov 0  }
   0xa   :  { %s9070_s13 = smov 0   ;;  %s9072_s14 = smov 0  }
   0xb   :  { %s9074_s15 = smov 0   ;;  %s9076_s16 = smov 0  }
   0xc   :  { %s9078_s17 = smov 0   ;;  %s9080_s18 = smov 0  }
   0xd   :  { %s9082_s19 = smov 0  }
   0xe LB: > { %12312 = sst [smem:[#allocation14_spill]] %s9006_s12  ;;  %s6582_s20 = sadd.s32 4294967295, %s9034_s19   ;;  %s9034_s19 = sphi %s9082_s19, %s21_s19   ;;  %s9030_s18 = sphi %s9080_s18, %s12589_s18   ;;  %s9026_s17 = sphi %s9078_s17, %s12581_s17   ;;  %s9022_s16 = sphi %s9076_s16, %s12588_s16   ;;  %s9018_s15 = sphi %s9074_s15, %s12580_s15   ;;  %s9014_s14 = sphi %s9072_s14, %s12587_s14   ;;  %s9010_s13 = sphi %s9070_s13, %s12586_s13   ;;  %s9006_s12 = sphi %s9068_s12, %s12585_s12   ;;  %s9002_s11 = sphi %s9066_s11, %s12584_s11   ;;  %s8998_s10 = sphi %s9064_s10, %s12583_s10   ;;  %s8994_s9 = sphi %s9062_s9, %s12582_s9  }
   0xf   : > { %12313 = sst [smem:[#allocation15_spill]] %s9022_s16  ;;  %s6583_s21 = sadd.s32 4294967294, %s9034_s19  }
  0x10   : > { %12314 = sst [smem:[#allocation16_spill]] %s9026_s17  ;;  %p47_p0 = scmp.ne.s32.totalorder %s9014_s14, %s9010_s13 }
  0x11   : > { %p12193_p1 = scmp.eq.s32.totalorder %s9034_s19, 0  ;;  %p53_p2 = scmp.ne.s32.totalorder %s9010_s13, %s9006_s12 }
  0x12   : > { %p9126_p3 = scmp.eq.s32.totalorder %s6582_s20, 0  ;;  %p105_p5 = scmp.eq.s32.totalorder %s6582_s20, 5 }
  0x13   : > { %p49_p4 = por %p12193_p1, %p47_p0  ;;  %p111_p7 = scmp.eq.s32.totalorder %s6583_s21, 5 }
  0x14   : > { %p9134_p6 = por %p9126_p3, %p53_p2  ;;  %p9138_p8 = por %p105_p5, %p47_p0 }
  0x15   : > { %p9142_p9 = por %p111_p7, %p53_p2  ;;  %p12192_p10 = scmp.lt.s32.totalorder %s9034_s19, 6 }
  0x16   : > { %s12316_s25 = scalar_select %p9134_p6, 1, 0 }
  0x17   : > { %s12317_s26 = scalar_select %p9138_p8, 1, 0 }
  0x18   : > { %s12319_s27 = scalar_select %p9142_p9, 1, 0 }
  0x19   : > { %12318 = sst [smem:[#allocation17_spill]] %s12317_s26  ;;  %s131_s28 = sand.u32 1, %s9014_s14  }
  0x1a   : > { %12320 = sst [smem:[#allocation18_spill]] %s12319_s27  ;;  %s7425_s29 = smul.u32 4608, %s9030_s18 }
  0x1b   : > { %s7424_s30 = smul.u32 288, %s131_s28  ;;  %s12321_s0 = sld [smem:[#allocation95_spill]] }
  0x1c   : > { %p9156_p11 = pnand %p12192_p10, %p49_p4  ;;  %s9162_s20 = scalar_lea.sflag [#allocation6], %s131_s28 }
  0x1d   : > { %s135_s7 = scalar_lea.vmem [#allocation5], %s7424_s30 }
  0x1e   : > { %s142_s8 = sshll.u32 %s135_s7, 4  ;;  %p8850_p13 = pneg %p9156_p11  ;;  %s9160_s8 = int_to_ptr.vmem [resolvable:$true] %s142_s8 }
  0x21   : > { %s9152_s5 = scalar_lea.hbm %s12321_s0, %s7425_s29  ;;  %s8853_s4 = scalar_lea.hbm %s12321_s0, 9216 }
  0x22   : > { %s8848_s21 = scalar_lea.hbm %s9152_s5, 4608  ;;  %p8854_p4 = scmp.lt.u32.totalorder %s9152_s5, %s12321_s0 }
  0x23   : > { %p8849_p12 = scmp.ne.s32.totalorder %s9152_s5, %s8848_s21  ;;  %p8855_p5 = scmp.lt.u32.totalorder %s8853_s4, %s8848_s21 }
  0x24   : > { %p8857_p10 = scmp.lt.u32.totalorder %s8848_s21, %s9152_s5 }
  0x25   : > { %p8851_p0 = pnand %p8850_p13, %p8849_p12  ;;  %p8856_p7 = por %p8855_p5, %p8854_p4 }
  0x27   : > { %p8852_p2 = pneg %p8851_p0  ;;  %p8858_p1 = por %p8857_p10, %p8856_p7 }
  0x29   : > { %p8859_p9 = pnand %p8858_p1, %p8852_p2 }
  0x2b   : > { %8862 = shalt.err (!%p8859_p9)
}
  0x2c   : > { %s8863_s28 = scalar_lea.vmem %s9160_s8, 4608  ;;  %s9036_s30 = smov [#allocation5]  }
  0x2d   : > { %p8864_p12 = scmp.ne.s32.totalorder %s9160_s8, %s8863_s28  ;;  %s8868_s7 = sshll.u32 %s9036_s30, 4  ;;  %s8869_s7 = int_to_ptr.vmem [resolvable:$false] %s8868_s7 }
  0x2e   : > { %s8870_s22 = scalar_lea.vmem %s8869_s7, 9216  ;;  %p8871_p6 = scmp.lt.s32.totalorder %s9160_s8, %s8869_s7 }
  0x2f   : > { %p8866_p0 = pnand %p8864_p12, %p8850_p13  ;;  %p8872_p4 = scmp.lt.s32.totalorder %s8870_s22, %s8863_s28 }
  0x31   : > { %p8867_p8 = pneg %p8866_p0  ;;  %p8873_p5 = por %p8872_p4, %p8871_p6 }
  0x33   : > { %p8874_p10 = pnand %p8873_p5, %p8867_p8 }
  0x35   : > { %8877 = shalt.err (!%p8874_p10)
}
  0x36   : > { %s12196_s23 = smov 384   ;;  %s12197_s21 = smov 24  }
  0x37   : > { %7442 = dma.hbm_to_vmem [thread:$0]  (!%p9156_p11), %s9152_s5, 4608, %s9160_s8, %s9162_s20, %s12196_s23, %s12196_s23, %s12197_s21  }
  0x38   : > { %p6590_p1 = scmp.ge.s32.totalorder %s9034_s19, 1  ;;  %p174_p6 = scmp.lt.s32.totalorder %s9034_s19, 7 }
  0x39   : > { %s30_s3 = sadd.s32 1, %s9026_s17  ;;  %s68_s4 = sadd.s32 1, %s9002_s11 }
  0x3a   : > { %p9195_p8 = pnand %p6590_p1, %p174_p6  ;;  %p31_p9 = scmp.ge.s32.totalorder %s30_s3, 3 }
  0x3b   : > { %p75_p13 = scmp.ne.s32.totalorder %s9002_s11, %s8998_s10  ;;  %p81_p2 = scmp.ne.s32.totalorder %s8998_s10, %s8994_s9 }
  0x3c   : > { %s12591_s3 = smov (%p31_p9, %s30_s3), 0  ;;  %s12325_s6 = sadd.s32 1, %s9030_s18 }
  0x3d   : > { %12324 = sst [smem:[#allocation19_spill]] %s12591_s3  ;;  %s12593_s6 = smov (!%p31_p9, %s12325_s6), %s9030_s18 }
  0x3e   : > { %s64_s5 = ssub.s32 %s9026_s17, %s12591_s3  ;;  %p12326_p11 = scmp.eq.s32.totalorder %s9034_s19, 0 }
  0x3f   : > { %p35_p12 = scmp.ge.s32.totalorder %s12593_s6, 2  ;;  %p9220_p0 = por %p81_p2, %p9126_p3 }
  0x40   : > { %p9214_p7 = por %p75_p13, %p12326_p11  ;;  %s152_s9 = sand.u32 1, %s9002_s11  }
  0x41   : > { %s12328_s20 = scalar_select %p9220_p0, 1, 0 }
  0x42   : > { %s7427_s28 = smul.u32 768, %s9026_s17  ;;  %s12595_s6 = smov (%p35_p12, %s12593_s6), 0 }
  0x43   : > { %s7426_s30 = smul.u32 3072, %s152_s9  ;;  %s37_s7 = ssub.s32 %s9030_s18, %s12595_s6 }
  0x44   : > { %s7428_s22 = smul.u32 2304, %s9030_s18  ;;  %p38_p4 = scmp.eq.s32.totalorder %s37_s7, 0 }
  0x45   : > { %s65_s23 = sor.u32 %s64_s5, %s37_s7  ;;  %s12329_s21 = sadd.s32 1, %s9014_s14 }
  0x46   : > { %p66_p5 = scmp.eq.s32.totalorder %s65_s23, 0  ;;  %s163_s3 = sadd.s32 %s7428_s22, %s7427_s28 }
  0x47   : > { %s9234_s0 = scalar_select %p38_p4, %s9014_s14, %s12329_s21  }
  0x48   : > { %s9237_s24 = scalar_select %p66_p5, %s9002_s11, %s68_s4  }
  0x49   : > { %s156_s27 = scalar_lea.vmem [#allocation8], %s7426_s30  ;;  %s6589_s17 = sshll.u32 %s163_s3, 6 }
  0x4a   : > { %s166_s12 = sshll.u32 %s156_s27, 4  ;;  %s9244_s16 = scalar_lea.hbm %s12190_s1, %s6589_s17  ;;  %s9239_s12 = int_to_ptr.vmem [resolvable:$true] %s166_s12 }
  0x4b   : > { %p12330_p3 = scmp.lt.s32.totalorder %s9034_s19, 6  ;;  %s9254_s27 = scalar_lea.sflag [#allocation9], %s152_s9 }
  0x4c   : > { %s8878_s21 = scalar_lea.hbm %s9244_s16, 49152  ;;  %s8883_s26 = scalar_lea.hbm %s12190_s1, 294912 }
  0x4d   : > { %p9250_p10 = pnand %p12330_p3, %p9214_p7  ;;  %p8879_p1 = scmp.ne.s32.totalorder %s9244_s16, %s8878_s21 }
  0x4e   : > { %p8884_p2 = scmp.lt.u32.totalorder %s9244_s16, %s12190_s1  ;;  %p8885_p11 = scmp.lt.u32.totalorder %s8883_s26, %s8878_s21 }
  0x4f   : > { %p8880_p6 = pneg %p9250_p10  ;;  %p8887_p12 = scmp.lt.u32.totalorder %s8878_s21, %s9244_s16 }
  0x50   : > { %p8886_p7 = por %p8885_p11, %p8884_p2 }
  0x51   : > { %p8881_p9 = pnand %p8880_p6, %p8879_p1 }
  0x52   : > { %p8888_p4 = por %p8887_p12, %p8886_p7 }
  0x53   : > { %p8882_p13 = pneg %p8881_p9 }
  0x55   : > { %p8889_p5 = pnand %p8888_p4, %p8882_p13 }
  0x57   : > { %8892 = shalt.err (!%p8889_p5)
}
  0x58   : > { %s8893_s5 = scalar_lea.vmem %s9239_s12, 49152  ;;  %s9039_s8 = smov [#allocation8]  }
  0x59   : > { %p8894_p3 = scmp.ne.s32.totalorder %s9239_s12, %s8893_s5  ;;  %s8898_s9 = sshll.u32 %s9039_s8, 4  ;;  %s8899_s9 = int_to_ptr.vmem [resolvable:$false] %s8898_s9 }
  0x5a   : > { %s8900_s28 = scalar_lea.vmem %s8899_s9, 98304  ;;  %p8901_p0 = scmp.lt.s32.totalorder %s9239_s12, %s8899_s9 }
  0x5b   : > { %p8896_p1 = pnand %p8894_p3, %p8880_p6  ;;  %p8902_p2 = scmp.lt.s32.totalorder %s8900_s28, %s8893_s5 }
  0x5d   : > { %p8897_p9 = pneg %p8896_p1  ;;  %p8903_p11 = por %p8902_p2, %p8901_p0 }
  0x5f   : > { %p8904_p7 = pnand %p8903_p11, %p8897_p9 }
  0x61   : > { %8907 = shalt.err (!%p8904_p7)
}
  0x62   : > { %s12332_s30 = smov 24   ;;  %s12333_s7 = smov 384  }
  0x63   : > { %7445 = dma.hbm_to_vmem [thread:$0]  (!%p9250_p10), %s9244_s16, 49152, %s9239_s12, %s9254_s27, %s12333_s7, %s12333_s7, %s12332_s30  }
  0x64   : > { %178 = sbr.rel (%p9195_p8) target bundleno = 2475 (0x9ab), region = 28 }
  0x6b   : > { %s9288_s22 = sand.u32 1, %s9010_s13   ;;  %p12334_p0 = scmp.ne.s32.totalorder %s12316_s25, 0 }
  0x6c   : > { %s7429_s21 = smul.u32 288, %s9288_s22  ;;  %s181_s2 = scalar_lea.sflag [#allocation6], %s9288_s22 }
  0x6e   : > { %s9292_s17 = scalar_lea.vmem [#allocation5], %s7429_s21 }
  0x6f   : > { %8981 = dma.done.wait (%p12334_p0), %s181_s2, 4608  }
  0x70   : > { %8983 = vsyncadd (%p12334_p0), %s181_s2, 4294962688  ;;  %s189_s12 = sand.u32 1, %s8998_s10   ;;  %p12335_p8 = scmp.ne.s32.totalorder %s12328_s20, 0 }
  0x71   : > { %s7430_s16 = smul.u32 3072, %s189_s12  ;;  %s190_s29 = scalar_lea.sflag [#allocation9], %s189_s12 }
  0x73   : > { %s9299_s23 = scalar_lea.vmem [#allocation8], %s7430_s16 }
  0x74   : > { %8985 = dma.done.wait (%p12335_p8), %s190_s29, 49152  }
  0x75   : > { %8987 = vsyncadd (%p12335_p8), %s190_s29, 4294918144  ;;  %s7431_s27 = smul.u32 576, %s9288_s22  ;;  %p6591_p10 = scmp.ne.s32.totalorder %s9018_s15, 0 }
  0x76   : > { %vm224_vm0 = vcmask (!%p6591_p10), 7168   ;;  %v9040_v0 = vmov (!%p6591_p10), -inf   ;;  %v9041_v1 = vmov (!%p6591_p10), 0.0  }
  0x77   : > { %s9306_s26 = scalar_lea.vmem [#allocation10], %s7431_s27  ;;  %223 = sbr.rel (%p6591_p10) target bundleno = 167 (0xa7), region = 40  ;;  %225 = vst.msk [vmem:[#allocation2] sm:$0xff] (!%p6591_p10), %vm224_vm0, %v9040_v0  ;;  %226 = vst.msk [vmem:[#allocation2 + $0x8] sm:$0xff] (!%p6591_p10), %vm224_vm0, %v9040_v0 }
  0x78   : > { %227 = vst.msk [vmem:[#allocation2 + $0x10] sm:$0xff] (!%p6591_p10), %vm224_vm0, %v9040_v0  ;;  %228 = vst.msk [vmem:[#allocation2 + $0x18] sm:$0xff] (!%p6591_p10), %vm224_vm0, %v9040_v0 }
  0x79   : > { %229 = vst.msk [vmem:[#allocation2 + $0x20] sm:$0xff] (!%p6591_p10), %vm224_vm0, %v9040_v0  ;;  %230 = vst.msk [vmem:[#allocation2 + $0x28] sm:$0xff] (!%p6591_p10), %vm224_vm0, %v9040_v0 }
  0x7a   : > { %231 = vst.msk [vmem:[#allocation2 + $0x30] sm:$0xff] (!%p6591_p10), %vm224_vm0, %v9040_v0  ;;  %232 = vst.msk [vmem:[#allocation2 + $0x38] sm:$0xff] (!%p6591_p10), %vm224_vm0, %v9040_v0 }
  0x7b   : > { %233 = vst.msk [vmem:[#allocation2 + $0x40] sm:$0xff] (!%p6591_p10), %vm224_vm0, %v9040_v0  ;;  %234 = vst.msk [vmem:[#allocation2 + $0x48] sm:$0xff] (!%p6591_p10), %vm224_vm0, %v9040_v0 }
  0x7c   : > { %235 = vst.msk [vmem:[#allocation2 + $0x50] sm:$0xff] (!%p6591_p10), %vm224_vm0, %v9040_v0  ;;  %236 = vst.msk [vmem:[#allocation2 + $0x58] sm:$0xff] (!%p6591_p10), %vm224_vm0, %v9040_v0 }
  0x7d   : > { %237 = vst.msk [vmem:[#allocation3] sm:$0xff] (!%p6591_p10), %vm224_vm0, %v9041_v1  ;;  %238 = vst.msk [vmem:[#allocation3 + $0x8] sm:$0xff] (!%p6591_p10), %vm224_vm0, %v9041_v1 }
  0x7e   : > { %239 = vst.msk [vmem:[#allocation3 + $0x10] sm:$0xff] %vm224_vm0, %v9041_v1  ;;  %240 = vst.msk [vmem:[#allocation3 + $0x18] sm:$0xff] %vm224_vm0, %v9041_v1 }
  0x7f   : > { %241 = vst.msk [vmem:[#allocation3 + $0x20] sm:$0xff] %vm224_vm0, %v9041_v1  ;;  %242 = vst.msk [vmem:[#allocation3 + $0x28] sm:$0xff] %vm224_vm0, %v9041_v1 }
  0x80   : > { %243 = vst.msk [vmem:[#allocation3 + $0x30] sm:$0xff] %vm224_vm0, %v9041_v1  ;;  %244 = vst.msk [vmem:[#allocation3 + $0x38] sm:$0xff] %vm224_vm0, %v9041_v1 }
  0x81   : > { %245 = vst.msk [vmem:[#allocation3 + $0x40] sm:$0xff] %vm224_vm0, %v9041_v1  ;;  %246 = vst.msk [vmem:[#allocation3 + $0x48] sm:$0xff] %vm224_vm0, %v9041_v1 }
  0x82   : > { %247 = vst.msk [vmem:[#allocation3 + $0x50] sm:$0xff] %vm224_vm0, %v9041_v1  ;;  %248 = vst.msk [vmem:[#allocation3 + $0x58] sm:$0xff] %vm224_vm0, %v9041_v1 }
  0x83   : > { %249 = vst [vmem:[#allocation4] sm:$0xff] %v9041_v1  ;;  %250 = vst [vmem:[#allocation4 + $0x8] sm:$0xff] %v9041_v1 }
  0x84   : > { %251 = vst [vmem:[#allocation4 + $0x10] sm:$0xff] %v9041_v1  ;;  %252 = vst [vmem:[#allocation4 + $0x18] sm:$0xff] %v9041_v1 }
  0x85   : > { %253 = vst [vmem:[#allocation4 + $0x20] sm:$0xff] %v9041_v1  ;;  %254 = vst [vmem:[#allocation4 + $0x28] sm:$0xff] %v9041_v1 }
  0x86   : > { %255 = vst [vmem:[#allocation4 + $0x30] sm:$0xff] %v9041_v1  ;;  %256 = vst [vmem:[#allocation4 + $0x38] sm:$0xff] %v9041_v1 }
  0x87   : > { %257 = vst [vmem:[#allocation4 + $0x40] sm:$0xff] %v9041_v1  ;;  %258 = vst [vmem:[#allocation4 + $0x48] sm:$0xff] %v9041_v1 }
  0x88   : > { %259 = vst [vmem:[#allocation4 + $0x50] sm:$0xff] %v9041_v1  ;;  %260 = vst [vmem:[#allocation4 + $0x58] sm:$0xff] %v9041_v1 }
  0x89   : > { %261 = vst [vmem:[#allocation4 + $0x60] sm:$0xff] %v9041_v1  ;;  %262 = vst [vmem:[#allocation4 + $0x68] sm:$0xff] %v9041_v1 }
  0x8a   : > { %263 = vst [vmem:[#allocation4 + $0x70] sm:$0xff] %v9041_v1  ;;  %264 = vst [vmem:[#allocation4 + $0x78] sm:$0xff] %v9041_v1 }
  0x8b   : > { %265 = vst [vmem:[#allocation4 + $0x80] sm:$0xff] %v9041_v1  ;;  %266 = vst [vmem:[#allocation4 + $0x88] sm:$0xff] %v9041_v1 }
  0x8c   : > { %267 = vst [vmem:[#allocation4 + $0x90] sm:$0xff] %v9041_v1  ;;  %268 = vst [vmem:[#allocation4 + $0x98] sm:$0xff] %v9041_v1 }
  0x8d   : > { %269 = vst [vmem:[#allocation4 + $0xa0] sm:$0xff] %v9041_v1  ;;  %270 = vst [vmem:[#allocation4 + $0xa8] sm:$0xff] %v9041_v1 }
  0x8e   : > { %271 = vst [vmem:[#allocation4 + $0xb0] sm:$0xff] %v9041_v1  ;;  %272 = vst [vmem:[#allocation4 + $0xb8] sm:$0xff] %v9041_v1 }
  0x8f   : > { %273 = vst [vmem:[#allocation4 + $0xc0] sm:$0xff] %v9041_v1  ;;  %274 = vst [vmem:[#allocation4 + $0xc8] sm:$0xff] %v9041_v1 }
  0x90   : > { %275 = vst [vmem:[#allocation4 + $0xd0] sm:$0xff] %v9041_v1  ;;  %276 = vst [vmem:[#allocation4 + $0xd8] sm:$0xff] %v9041_v1 }
  0x91   : > { %277 = vst [vmem:[#allocation4 + $0xe0] sm:$0xff] %v9041_v1  ;;  %278 = vst [vmem:[#allocation4 + $0xe8] sm:$0xff] %v9041_v1 }
  0x92   : > { %279 = vst [vmem:[#allocation4 + $0xf0] sm:$0xff] %v9041_v1  ;;  %280 = vst [vmem:[#allocation4 + $0xf8] sm:$0xff] %v9041_v1 }
  0x93   : > { %281 = vst [vmem:[#allocation4 + $0x100] sm:$0xff] %v9041_v1  ;;  %282 = vst [vmem:[#allocation4 + $0x108] sm:$0xff] %v9041_v1 }
  0x94   : > { %283 = vst [vmem:[#allocation4 + $0x110] sm:$0xff] %v9041_v1  ;;  %284 = vst [vmem:[#allocation4 + $0x118] sm:$0xff] %v9041_v1 }
  0x95   : > { %285 = vst [vmem:[#allocation4 + $0x120] sm:$0xff] %v9041_v1  ;;  %286 = vst [vmem:[#allocation4 + $0x128] sm:$0xff] %v9041_v1 }
  0x96   : > { %287 = vst [vmem:[#allocation4 + $0x130] sm:$0xff] %v9041_v1  ;;  %288 = vst [vmem:[#allocation4 + $0x138] sm:$0xff] %v9041_v1 }
  0x97   : > { %289 = vst [vmem:[#allocation4 + $0x140] sm:$0xff] %v9041_v1  ;;  %290 = vst [vmem:[#allocation4 + $0x148] sm:$0xff] %v9041_v1 }
  0x98   : > { %291 = vst [vmem:[#allocation4 + $0x150] sm:$0xff] %v9041_v1  ;;  %292 = vst [vmem:[#allocation4 + $0x158] sm:$0xff] %v9041_v1 }
  0x99   : > { %293 = vst [vmem:[#allocation4 + $0x160] sm:$0xff] %v9041_v1  ;;  %294 = vst [vmem:[#allocation4 + $0x168] sm:$0xff] %v9041_v1 }
  0x9a   : > { %295 = vst [vmem:[#allocation4 + $0x170] sm:$0xff] %v9041_v1  ;;  %296 = vst [vmem:[#allocation4 + $0x178] sm:$0xff] %v9041_v1 }
  0x9b   : > { %297 = vst [vmem:[#allocation4 + $0x180] sm:$0xff] %v9041_v1  ;;  %298 = vst [vmem:[#allocation4 + $0x188] sm:$0xff] %v9041_v1 }
  0x9c   : > { %299 = vst [vmem:[#allocation4 + $0x190] sm:$0xff] %v9041_v1  ;;  %300 = vst [vmem:[#allocation4 + $0x198] sm:$0xff] %v9041_v1 }
  0x9d   : > { %301 = vst [vmem:[#allocation4 + $0x1a0] sm:$0xff] %v9041_v1  ;;  %302 = vst [vmem:[#allocation4 + $0x1a8] sm:$0xff] %v9041_v1 }
  0x9e   : > { %303 = vst [vmem:[#allocation4 + $0x1b0] sm:$0xff] %v9041_v1  ;;  %304 = vst [vmem:[#allocation4 + $0x1b8] sm:$0xff] %v9041_v1 }
  0x9f   : > { %305 = vst [vmem:[#allocation4 + $0x1c0] sm:$0xff] %v9041_v1  ;;  %306 = vst [vmem:[#allocation4 + $0x1c8] sm:$0xff] %v9041_v1 }
  0xa0   : > { %307 = vst [vmem:[#allocation4 + $0x1d0] sm:$0xff] %v9041_v1  ;;  %308 = vst [vmem:[#allocation4 + $0x1d8] sm:$0xff] %v9041_v1 }
  0xa1   : > { %309 = vst [vmem:[#allocation4 + $0x1e0] sm:$0xff] %v9041_v1  ;;  %310 = vst [vmem:[#allocation4 + $0x1e8] sm:$0xff] %v9041_v1 }
  0xa2   : > { %311 = vst [vmem:[#allocation4 + $0x1f0] sm:$0xff] %v9041_v1  ;;  %312 = vst [vmem:[#allocation4 + $0x1f8] sm:$0xff] %v9041_v1 }
  0xa3   : > { %313 = vst [vmem:[#allocation4 + $0x200] sm:$0xff] %v9041_v1  ;;  %314 = vst [vmem:[#allocation4 + $0x208] sm:$0xff] %v9041_v1 }
  0xa4   : > { %315 = vst [vmem:[#allocation4 + $0x210] sm:$0xff] %v9041_v1  ;;  %316 = vst [vmem:[#allocation4 + $0x218] sm:$0xff] %v9041_v1 }
  0xa5   : > { %317 = vst [vmem:[#allocation4 + $0x220] sm:$0xff] %v9041_v1  ;;  %318 = vst [vmem:[#allocation4 + $0x228] sm:$0xff] %v9041_v1 }
  0xa6   : > { %319 = vst [vmem:[#allocation4 + $0x230] sm:$0xff] %v9041_v1  ;;  %320 = vst [vmem:[#allocation4 + $0x238] sm:$0xff] %v9041_v1 }
  0xa7 PF: > { %v7550_v2 = vld [vmem:[%s9299_s23 + $0x4] ss:$24 sps:$4 sm:$0xff]   ;;  %v7554_v4 = vld [vmem:[%s9299_s23] ss:$24 sps:$4 sm:$0xff]   ;;  %v7556_v6 = vld [vmem:[%s9299_s23 + $0x34] ss:$24 sps:$4 sm:$0xff]  }
  0xa8   : > { %v7552_v3 = vld [vmem:[%s9299_s23 + $0xc] ss:$24 sps:$4 sm:$0xff]   ;;  %2841 = vmatprep.subr.bf16.mxu1 %v7550_v2  ;;  %v7555_v5 = vld [vmem:[%s9299_s23 + $0x8] ss:$24 sps:$4 sm:$0xff]   ;;  %v7558_v7 = vld [vmem:[%s9299_s23 + $0x3c] ss:$24 sps:$4 sm:$0xff]  }
  0xa9   : > { %2934 = vmatprep.subr.bf16.mxu0 %v7552_v3  ;;  %2842 = vmatpush1.bf16.xpose.msra.mxu1 %v7554_v4  ;;  %v7560_v8 = vld [vmem:[%s9299_s23 + $0x30] ss:$24 sps:$4 sm:$0xff]   ;;  %v7562_v10 = vld [vmem:[%s9299_s23 + $0x64] ss:$24 sps:$4 sm:$0xff]   ;;  %v7566_v12 = vld [vmem:[%s9299_s23 + $0x60] ss:$24 sps:$4 sm:$0xff]  }
  0xaa   : > { %2935 = vmatpush1.bf16.xpose.msra.mxu0 %v7555_v5  ;;  %2843 = vmatprep.subr.bf16.mxu1 %v7556_v6  ;;  %v7561_v9 = vld [vmem:[%s9299_s23 + $0x38] ss:$24 sps:$4 sm:$0xff]   ;;  %v7564_v11 = vld [vmem:[%s9299_s23 + $0x6c] ss:$24 sps:$4 sm:$0xff]   ;;  %v7567_v13 = vld [vmem:[%s9299_s23 + $0x68] ss:$24 sps:$4 sm:$0xff]  }
  0xab   : > { %2936 = vmatprep.subr.bf16.mxu0 %v7558_v7  ;;  %v7568_v14 = vld [vmem:[%s9299_s23 + $0x94] ss:$24 sps:$4 sm:$0xff]   ;;  %v7572_v16 = vld [vmem:[%s9299_s23 + $0x90] ss:$24 sps:$4 sm:$0xff]   ;;  %v7574_v18 = vld [vmem:[%s9299_s23 + $0xc4] ss:$24 sps:$4 sm:$0xff]  }
  0xac   : > { %v7570_v15 = vld [vmem:[%s9299_s23 + $0x9c] ss:$24 sps:$4 sm:$0xff]   ;;  %v7573_v17 = vld [vmem:[%s9299_s23 + $0x98] ss:$24 sps:$4 sm:$0xff]   ;;  %v7576_v19 = vld [vmem:[%s9299_s23 + $0xcc] ss:$24 sps:$4 sm:$0xff]  }
  0xad   : > { %v7578_v20 = vld [vmem:[%s9299_s23 + $0xc0] ss:$24 sps:$4 sm:$0xff]   ;;  %v7580_v22 = vld [vmem:[%s9299_s23 + $0xf4] ss:$24 sps:$4 sm:$0xff]   ;;  %v7584_v24 = vld [vmem:[%s9299_s23 + $0xf0] ss:$24 sps:$4 sm:$0xff]  }
  0xae   : > { %v7579_v21 = vld [vmem:[%s9299_s23 + $0xc8] ss:$24 sps:$4 sm:$0xff]   ;;  %v7582_v23 = vld [vmem:[%s9299_s23 + $0xfc] ss:$24 sps:$4 sm:$0xff]   ;;  %v7585_v25 = vld [vmem:[%s9299_s23 + $0xf8] ss:$24 sps:$4 sm:$0xff]  }
  0xaf   : > { %v7586_v26 = vld [vmem:[%s9299_s23 + $0x124] ss:$24 sps:$4 sm:$0xff]   ;;  %v7590_v30 = vld [vmem:[%s9299_s23 + $0x120] ss:$24 sps:$4 sm:$0xff]   ;;  %v7592_v32 = vld [vmem:[%s9299_s23 + $0x154] ss:$24 sps:$4 sm:$0xff]  }
  0xb0   : > { %v7588_v27 = vld [vmem:[%s9299_s23 + $0x12c] ss:$24 sps:$4 sm:$0xff]   ;;  %v7591_v31 = vld [vmem:[%s9299_s23 + $0x128] ss:$24 sps:$4 sm:$0xff]   ;;  %v7594_v33 = vld [vmem:[%s9299_s23 + $0x15c] ss:$24 sps:$4 sm:$0xff]  }
  0xb1   : > { %2844 = vmatpush1.bf16.xpose.msra.mxu1 %v7560_v8  ;;  %v9444_v28 = vld [vmem:[%s9292_s17 + $0x4] ss:$24 sps:$4 sm:$0xff]   ;;  %v7596_v34 = vld [vmem:[%s9299_s23 + $0x150] ss:$24 sps:$4 sm:$0xff]   ;;  %v7602_v38 = vld [vmem:[%s9299_s23 + $0x180] ss:$24 sps:$4 sm:$0xff]  }
  0xb2   : > { %2937 = vmatpush1.bf16.xpose.msra.mxu0 %v7561_v9  ;;  %2845 = vmatprep.subr.bf16.mxu1 %v7562_v10  ;;  %v7649_v29 = vld [vmem:[%s9292_s17 + $0xc] ss:$24 sps:$4 sm:$0xff]   ;;  %v7597_v35 = vld [vmem:[%s9299_s23 + $0x158] ss:$24 sps:$4 sm:$0xff]   ;;  %v7603_v39 = vld [vmem:[%s9299_s23 + $0x188] ss:$24 sps:$4 sm:$0xff]  }
  0xb3   : > { %2938 = vmatprep.subr.bf16.mxu0 %v7564_v11  ;;  %2873 = vmatprep.mubr.bf16.mxu1 %v9444_v28  ;;  %v7598_v36 = vld [vmem:[%s9299_s23 + $0x184] ss:$24 sps:$4 sm:$0xff]   ;;  %v7604_v40 = vld [vmem:[%s9299_s23 + $0x1b4] ss:$24 sps:$4 sm:$0xff]   ;;  %v7608_v42 = vld [vmem:[%s9299_s23 + $0x1b0] ss:$24 sps:$4 sm:$0xff]  }
  0xb4   : > { %2966 = vmatprep.mubr.bf16.mxu0 %v7649_v29  ;;  %v7600_v37 = vld [vmem:[%s9299_s23 + $0x18c] ss:$24 sps:$4 sm:$0xff]   ;;  %v7606_v41 = vld [vmem:[%s9299_s23 + $0x1bc] ss:$24 sps:$4 sm:$0xff]   ;;  %v7609_v43 = vld [vmem:[%s9299_s23 + $0x1b8] ss:$24 sps:$4 sm:$0xff]  }
  0xb5   : > { %v7610_v44 = vld [vmem:[%s9299_s23 + $0x1e4] ss:$24 sps:$4 sm:$0xff]   ;;  %v7614_v46 = vld [vmem:[%s9299_s23 + $0x1e0] ss:$24 sps:$4 sm:$0xff]   ;;  %v7616_v48 = vld [vmem:[%s9299_s23 + $0x214] ss:$24 sps:$4 sm:$0xff]  }
  0xb6   : > { %v7612_v45 = vld [vmem:[%s9299_s23 + $0x1ec] ss:$24 sps:$4 sm:$0xff]   ;;  %v7615_v47 = vld [vmem:[%s9299_s23 + $0x1e8] ss:$24 sps:$4 sm:$0xff]   ;;  %v7618_v49 = vld [vmem:[%s9299_s23 + $0x21c] ss:$24 sps:$4 sm:$0xff]  }
  0xb7   : > { %v7620_v50 = vld [vmem:[%s9299_s23 + $0x210] ss:$24 sps:$4 sm:$0xff]   ;;  %v7622_v52 = vld [vmem:[%s9299_s23 + $0x244] ss:$24 sps:$4 sm:$0xff]   ;;  %v7626_v54 = vld [vmem:[%s9299_s23 + $0x240] ss:$24 sps:$4 sm:$0xff]  }
  0xb8   : > { %v7621_v51 = vld [vmem:[%s9299_s23 + $0x218] ss:$24 sps:$4 sm:$0xff]   ;;  %v7624_v53 = vld [vmem:[%s9299_s23 + $0x24c] ss:$24 sps:$4 sm:$0xff]   ;;  %v7627_v55 = vld [vmem:[%s9299_s23 + $0x248] ss:$24 sps:$4 sm:$0xff]  }
  0xb9   : > { %2846 = vmatpush1.bf16.xpose.msra.mxu1 %v7566_v12  ;;  %v7628_v56 = vld [vmem:[%s9299_s23 + $0x274] ss:$24 sps:$4 sm:$0xff]   ;;  %v7632_v58 = vld [vmem:[%s9299_s23 + $0x270] ss:$24 sps:$4 sm:$0xff]   ;;  %v7634_v60 = vld [vmem:[%s9299_s23 + $0x2a4] ss:$24 sps:$4 sm:$0xff]  }
  0xba   : > { %2939 = vmatpush1.bf16.xpose.msra.mxu0 %v7567_v13  ;;  %2847 = vmatprep.subr.bf16.mxu1 %v7568_v14  ;;  %v7630_v57 = vld [vmem:[%s9299_s23 + $0x27c] ss:$24 sps:$4 sm:$0xff]   ;;  %v7633_v59 = vld [vmem:[%s9299_s23 + $0x278] ss:$24 sps:$4 sm:$0xff]   ;;  %v7636_v61 = vld [vmem:[%s9299_s23 + $0x2ac] ss:$24 sps:$4 sm:$0xff]  }
  0xbb   : > { %2940 = vmatprep.subr.bf16.mxu0 %v7570_v15  ;;  %v7638_v62 = vld [vmem:[%s9299_s23 + $0x2a0] ss:$24 sps:$4 sm:$0xff]   ;;  %v7640_v0 = vld [vmem:[%s9299_s23 + $0x2d4] ss:$24 sps:$4 sm:$0xff]   ;;  %v7644_v2 = vld [vmem:[%s9299_s23 + $0x2d0] ss:$24 sps:$4 sm:$0xff]  }
  0xbc   : > { %v7639_v63 = vld [vmem:[%s9299_s23 + $0x2a8] ss:$24 sps:$4 sm:$0xff]   ;;  %v7642_v1 = vld [vmem:[%s9299_s23 + $0x2dc] ss:$24 sps:$4 sm:$0xff]   ;;  %v7645_v3 = vld [vmem:[%s9299_s23 + $0x2d8] ss:$24 sps:$4 sm:$0xff]  }
  0xbd   : > { %v7653_v4 = vld [vmem:[%s9299_s23 + $0x14] ss:$24 sps:$4 sm:$0xff]   ;;  %v7656_v5 = vld [vmem:[%s9299_s23 + $0x304] ss:$24 sps:$4 sm:$0xff]   ;;  %v9489_v6 = vld [vmem:[%s9292_s17] ss:$24 sps:$4 sm:$0xff]  }
  0xbe   : > { %v7657_v7 = vld [vmem:[%s9292_s17 + $0x8] ss:$24 sps:$4 sm:$0xff]   ;;  %v7660_v10 = vld [vmem:[%s9299_s23 + $0x44] ss:$24 sps:$4 sm:$0xff]   ;;  %v7663_v11 = vld [vmem:[%s9299_s23 + $0x334] ss:$24 sps:$4 sm:$0xff]  }
  0xbf   : > { %v7651_v8 = vld [vmem:[%s9299_s23 + $0x10] ss:$24 sps:$4 sm:$0xff]   ;;  %v7654_v9 = vld [vmem:[%s9299_s23 + $0x300] ss:$24 sps:$4 sm:$0xff]   ;;  %v9497_v12 = vld [vmem:[%s9292_s17 + $0x34] ss:$24 sps:$4 sm:$0xff]  }
  0xc0   : > { %v7721_v13 = vld [vmem:[%s9292_s17 + $0x3c] ss:$24 sps:$4 sm:$0xff]   ;;  %v9502_v14 = vld [vmem:[%s9292_s17 + $0x30] ss:$24 sps:$4 sm:$0xff]   ;;  %vm4617_vm1 = vcmask 7168   ;;  %p7012_p6 = scmp.ne.s32.totalorder %s9018_s15, 2 }
  0xc1   : > { %2848 = vmatpush1.bf16.xpose.msra.mxu1 %v7572_v16  ;;  %v7723_v15 = vld [vmem:[%s9292_s17 + $0x38] ss:$24 sps:$4 sm:$0xff]   ;;  %v9525_v29 = vld [vmem:[%s9292_s17 + $0x94] ss:$24 sps:$4 sm:$0xff]  }
  0xc2   : > { %2941 = vmatpush1.bf16.xpose.msra.mxu0 %v7573_v17  ;;  %2849 = vmatprep.subr.bf16.mxu1 %v7574_v18  ;;  %v7658_v16 = vld [vmem:[%s9299_s23 + $0x40] ss:$24 sps:$4 sm:$0xff]   ;;  %v7661_v17 = vld [vmem:[%s9299_s23 + $0x330] ss:$24 sps:$4 sm:$0xff]   ;;  %v7666_v18 = vld [vmem:[%s9299_s23 + $0x74] ss:$24 sps:$4 sm:$0xff]  }
  0xc3   : > { %2942 = vmatprep.subr.bf16.mxu0 %v7576_v19  ;;  %v7669_v19 = vld [vmem:[%s9299_s23 + $0x364] ss:$24 sps:$4 sm:$0xff]  }
  0xc9   : > { %2850 = vmatpush1.bf16.xpose.msra.mxu1 %v7578_v20  ;;  %v9511_v20 = vld [vmem:[%s9292_s17 + $0x64] ss:$24 sps:$4 sm:$0xff]  }
  0xca   : > { %2943 = vmatpush1.bf16.xpose.msra.mxu0 %v7579_v21  ;;  %2851 = vmatprep.subr.bf16.mxu1 %v7580_v22  ;;  %v7733_v21 = vld [vmem:[%s9292_s17 + $0x6c] ss:$24 sps:$4 sm:$0xff]   ;;  %v9516_v22 = vld [vmem:[%s9292_s17 + $0x60] ss:$24 sps:$4 sm:$0xff]  }
  0xcb   : > { %2944 = vmatprep.subr.bf16.mxu0 %v7582_v23  ;;  %v7735_v23 = vld [vmem:[%s9292_s17 + $0x68] ss:$24 sps:$4 sm:$0xff]  }
  0xd1   : > { %2852 = vmatpush1.bf16.xpose.msra.mxu1 %v7584_v24  ;;  %v7664_v24 = vld [vmem:[%s9299_s23 + $0x70] ss:$24 sps:$4 sm:$0xff]  }
  0xd2   : > { %2945 = vmatpush1.bf16.xpose.msra.mxu0 %v7585_v25  ;;  %2853 = vmatprep.subr.bf16.mxu1 %v7586_v26  ;;  %v7667_v25 = vld [vmem:[%s9299_s23 + $0x360] ss:$24 sps:$4 sm:$0xff]   ;;  %v7672_v26 = vld [vmem:[%s9299_s23 + $0xa4] ss:$24 sps:$4 sm:$0xff]  }
  0xd3   : > { %2946 = vmatprep.subr.bf16.mxu0 %v7588_v27  ;;  %v7675_v27 = vld [vmem:[%s9299_s23 + $0x394] ss:$24 sps:$4 sm:$0xff]  }
  0xd9   : > { %2854 = vmatpush1.bf16.xpose.msra.mxu1 %v7590_v30  ;;  %v9528_v30 = vld [vmem:[%s9292_s17 + $0x9c] ss:$24 sps:$4 sm:$0xff]  }
  0xda   : > { %2947 = vmatpush1.bf16.xpose.msra.mxu0 %v7591_v31  ;;  %2855 = vmatprep.subr.bf16.mxu1 %v7592_v32  ;;  %v9532_v31 = vld [vmem:[%s9292_s17 + $0x90] ss:$24 sps:$4 sm:$0xff]  }
  0xdb   : > { %2948 = vmatprep.subr.bf16.mxu0 %v7594_v33  ;;  %v9535_v32 = vld [vmem:[%s9292_s17 + $0x98] ss:$24 sps:$4 sm:$0xff]  }
  0xdc   : > { %v7670_v33 = vld [vmem:[%s9299_s23 + $0xa0] ss:$24 sps:$4 sm:$0xff]  }
  0xe1   : > { %2856 = vmatpush1.bf16.xpose.msra.mxu1 %v7596_v34  ;;  %v7673_v34 = vld [vmem:[%s9299_s23 + $0x390] ss:$24 sps:$4 sm:$0xff]  }
  0xe2   : > { %2949 = vmatpush1.bf16.xpose.msra.mxu0 %v7597_v35  ;;  %2857 = vmatprep.subr.bf16.mxu1 %v7598_v36  ;;  %v7678_v35 = vld [vmem:[%s9299_s23 + $0xd4] ss:$24 sps:$4 sm:$0xff]   ;;  %v7681_v36 = vld [vmem:[%s9299_s23 + $0x3c4] ss:$24 sps:$4 sm:$0xff]  }
  0xe3   : > { %2950 = vmatprep.subr.bf16.mxu0 %v7600_v37  ;;  %v9544_v37 = vld [vmem:[%s9292_s17 + $0xc4] ss:$24 sps:$4 sm:$0xff]  }
  0xe9   : > { %2858 = vmatpush1.bf16.xpose.msra.mxu1 %v7602_v38  ;;  %v9547_v38 = vld [vmem:[%s9292_s17 + $0xcc] ss:$24 sps:$4 sm:$0xff]  }
  0xea   : > { %2951 = vmatpush1.bf16.xpose.msra.mxu0 %v7603_v39  ;;  %2859 = vmatprep.subr.bf16.mxu1 %v7604_v40  ;;  %v9552_v39 = vld [vmem:[%s9292_s17 + $0xc0] ss:$24 sps:$4 sm:$0xff]  }
  0xeb   : > { %2952 = vmatprep.subr.bf16.mxu0 %v7606_v41  ;;  %v9555_v40 = vld [vmem:[%s9292_s17 + $0xc8] ss:$24 sps:$4 sm:$0xff]  }
  0xec   : > { %v7676_v41 = vld [vmem:[%s9299_s23 + $0xd0] ss:$24 sps:$4 sm:$0xff]  }
  0xf1   : > { %2860 = vmatpush1.bf16.xpose.msra.mxu1 %v7608_v42  ;;  %v7679_v42 = vld [vmem:[%s9299_s23 + $0x3c0] ss:$24 sps:$4 sm:$0xff]  }
  0xf2   : > { %2953 = vmatpush1.bf16.xpose.msra.mxu0 %v7609_v43  ;;  %2861 = vmatprep.subr.bf16.mxu1 %v7610_v44  ;;  %v7684_v43 = vld [vmem:[%s9299_s23 + $0x104] ss:$24 sps:$4 sm:$0xff]   ;;  %v7687_v44 = vld [vmem:[%s9299_s23 + $0x3f4] ss:$24 sps:$4 sm:$0xff]  }
  0xf3   : > { %2954 = vmatprep.subr.bf16.mxu0 %v7612_v45  ;;  %v9564_v45 = vld [vmem:[%s9292_s17 + $0xf4] ss:$24 sps:$4 sm:$0xff]  }
  0xf9   : > { %2862 = vmatpush1.bf16.xpose.msra.mxu1 %v7614_v46  ;;  %v9567_v46 = vld [vmem:[%s9292_s17 + $0xfc] ss:$24 sps:$4 sm:$0xff]  }
  0xfa   : > { %2955 = vmatpush1.bf16.xpose.msra.mxu0 %v7615_v47  ;;  %2863 = vmatprep.subr.bf16.mxu1 %v7616_v48  ;;  %v9572_v47 = vld [vmem:[%s9292_s17 + $0xf0] ss:$24 sps:$4 sm:$0xff]  }
  0xfb   : > { %2956 = vmatprep.subr.bf16.mxu0 %v7618_v49  ;;  %v9575_v48 = vld [vmem:[%s9292_s17 + $0xf8] ss:$24 sps:$4 sm:$0xff]  }
  0xfc   : > { %v7682_v49 = vld [vmem:[%s9299_s23 + $0x100] ss:$24 sps:$4 sm:$0xff]  }
 0x101   : > { %2864 = vmatpush1.bf16.xpose.msra.mxu1 %v7620_v50  ;;  %v7685_v50 = vld [vmem:[%s9299_s23 + $0x3f0] ss:$24 sps:$4 sm:$0xff]  }
 0x102   : > { %2957 = vmatpush1.bf16.xpose.msra.mxu0 %v7621_v51  ;;  %2865 = vmatprep.subr.bf16.mxu1 %v7622_v52  ;;  %v7690_v51 = vld [vmem:[%s9299_s23 + $0x134] ss:$24 sps:$4 sm:$0xff]   ;;  %v7693_v52 = vld [vmem:[%s9299_s23 + $0x424] ss:$24 sps:$4 sm:$0xff]  }
 0x103   : > { %2958 = vmatprep.subr.bf16.mxu0 %v7624_v53  ;;  %v9584_v53 = vld [vmem:[%s9292_s17 + $0x14] ss:$24 sps:$4 sm:$0xff]  }
 0x109   : > { %2866 = vmatpush1.bf16.xpose.msra.mxu1 %v7626_v54  ;;  %v7688_v54 = vld [vmem:[%s9299_s23 + $0x130] ss:$24 sps:$4 sm:$0xff]  }
 0x10a   : > { %2959 = vmatpush1.bf16.xpose.msra.mxu0 %v7627_v55  ;;  %2867 = vmatprep.subr.bf16.mxu1 %v7628_v56  ;;  %v7691_v55 = vld [vmem:[%s9299_s23 + $0x420] ss:$24 sps:$4 sm:$0xff]   ;;  %v7696_v56 = vld [vmem:[%s9299_s23 + $0x164] ss:$24 sps:$4 sm:$0xff]  }
 0x10b   : > { %2960 = vmatprep.subr.bf16.mxu0 %v7630_v57  ;;  %v7699_v57 = vld [vmem:[%s9299_s23 + $0x454] ss:$24 sps:$4 sm:$0xff]  }
 0x111   : > { %2868 = vmatpush1.bf16.xpose.msra.mxu1 %v7632_v58  ;;  %v7694_v58 = vld [vmem:[%s9299_s23 + $0x160] ss:$24 sps:$4 sm:$0xff]  }
 0x112   : > { %2961 = vmatpush1.bf16.xpose.msra.mxu0 %v7633_v59  ;;  %2869 = vmatprep.subr.bf16.mxu1 %v7634_v60  ;;  %v7697_v59 = vld [vmem:[%s9299_s23 + $0x450] ss:$24 sps:$4 sm:$0xff]   ;;  %v7702_v60 = vld [vmem:[%s9299_s23 + $0x194] ss:$24 sps:$4 sm:$0xff]  }
 0x113   : > { %2962 = vmatprep.subr.bf16.mxu0 %v7636_v61  ;;  %v7705_v61 = vld [vmem:[%s9299_s23 + $0x484] ss:$24 sps:$4 sm:$0xff]  }
 0x119   : > { %2870 = vmatpush1.bf16.xpose.msra.mxu1 %v7638_v62  ;;  %v7703_v62 = vld [vmem:[%s9299_s23 + $0x480] ss:$24 sps:$4 sm:$0xff]  }
 0x11a   : > { %2963 = vmatpush1.bf16.xpose.msra.mxu0 %v7639_v63  ;;  %2871 = vmatprep.subr.bf16.mxu1 %v7640_v0  ;;  %v7708_v63 = vld [vmem:[%s9299_s23 + $0x1c4] ss:$24 sps:$4 sm:$0xff]   ;;  %v7711_v0 = vld [vmem:[%s9299_s23 + $0x4b4] ss:$24 sps:$4 sm:$0xff]  }
 0x11b   : > { %2964 = vmatprep.subr.bf16.mxu0 %v7642_v1  ;;  %v7706_v1 = vld [vmem:[%s9299_s23 + $0x1c0] ss:$24 sps:$4 sm:$0xff]  }
 0x121   : > { %2872 = vmatpush1.bf16.xpose.msra.mxu1 %v7644_v2  ;;  %v7709_v2 = vld [vmem:[%s9299_s23 + $0x4b0] ss:$24 sps:$4 sm:$0xff]  }
 0x122   : > { %2965 = vmatpush1.bf16.xpose.msra.mxu0 %v7645_v3  ;;  %3120 = vmatprep.subr.bf16.mxu1 %v7656_v5  ;;  %v7714_v3 = vld [vmem:[%s9299_s23 + $0x1f4] ss:$24 sps:$4 sm:$0xff]   ;;  %v7712_v5 = vld [vmem:[%s9299_s23 + $0x1f0] ss:$24 sps:$4 sm:$0xff]  }
 0x123   : > { %3027 = vmatprep.subr.bf16.mxu0 %v7653_v4  ;;  %v7717_v4 = vld [vmem:[%s9299_s23 + $0x4e4] ss:$24 sps:$4 sm:$0xff]  }
 0x128   : > { %2874 = vmatmul.mubr.bf16.vlgmr.msra.gmra.mrb[0].mxu1 %v9489_v6 }
 0x129   : > { %2967 = vmatmul.mubr.bf16.vlgmr.msra.gmra.mrb[0].mxu0 %v7657_v7  ;;  %3121 = vmatpush1.bf16.xpose.msra.mxu1 %v7654_v9  ;;  %v7715_v7 = vld [vmem:[%s9299_s23 + $0x4e0] ss:$24 sps:$4 sm:$0xff]   ;;  %v7729_v9 = vld [vmem:[%s9299_s23 + $0x514] ss:$24 sps:$4 sm:$0xff]  }
 0x12a   : > { %3028 = vmatpush1.bf16.xpose.msra.mxu0 %v7651_v8  ;;  %3122 = vmatprep.subr.bf16.mxu1 %v7663_v11  ;;  %v7726_v8 = vld [vmem:[%s9299_s23 + $0x224] ss:$24 sps:$4 sm:$0xff]   ;;  %v7727_v11 = vld [vmem:[%s9299_s23 + $0x510] ss:$24 sps:$4 sm:$0xff]  }
 0x12b   : > { %3029 = vmatprep.subr.bf16.mxu0 %v7660_v10  ;;  %2883 = vmatprep.mubr.bf16.mxu1 %v9497_v12  ;;  %v7724_v10 = vld [vmem:[%s9299_s23 + $0x220] ss:$24 sps:$4 sm:$0xff]  }
 0x12c   : > { %2976 = vmatprep.mubr.bf16.mxu0 %v7721_v13  ;;  %v7738_v13 = vld [vmem:[%s9299_s23 + $0x254] ss:$24 sps:$4 sm:$0xff]  }
 0x130   : > { %2884 = vmatmul.mubr.bf16.gmra.mrb[4].mxu1 %v9502_v14 }
 0x131   : > { %2977 = vmatmul.mubr.bf16.gmra.mrb[4].mxu0 %v7723_v15  ;;  %3123 = vmatpush1.bf16.xpose.msra.mxu1 %v7661_v17  ;;  %v7741_v15 = vld [vmem:[%s9299_s23 + $0x544] ss:$24 sps:$4 sm:$0xff]   ;;  %v7739_v17 = vld [vmem:[%s9299_s23 + $0x540] ss:$24 sps:$4 sm:$0xff]  }
 0x132   : > { %3030 = vmatpush1.bf16.xpose.msra.mxu0 %v7658_v16  ;;  %3124 = vmatprep.subr.bf16.mxu1 %v7669_v19  ;;  %v7736_v16 = vld [vmem:[%s9299_s23 + $0x250] ss:$24 sps:$4 sm:$0xff]   ;;  %v7753_v19 = vld [vmem:[%s9299_s23 + $0x574] ss:$24 sps:$4 sm:$0xff]  }
 0x133   : > { %3031 = vmatprep.subr.bf16.mxu0 %v7666_v18  ;;  %2893 = vmatprep.mubr.bf16.mxu1 %v9511_v20  ;;  %v7750_v18 = vld [vmem:[%s9299_s23 + $0x284] ss:$24 sps:$4 sm:$0xff]  }
 0x134   : > { %2986 = vmatprep.mubr.bf16.mxu0 %v7733_v21  ;;  %v7748_v21 = vld [vmem:[%s9299_s23 + $0x280] ss:$24 sps:$4 sm:$0xff]  }
 0x138   : > { %2894 = vmatmul.mubr.bf16.gmra.mrb[8].mxu1 %v9516_v22 }
 0x139   : > { %2987 = vmatmul.mubr.bf16.gmra.mrb[8].mxu0 %v7735_v23  ;;  %3125 = vmatpush1.bf16.xpose.msra.mxu1 %v7667_v25  ;;  %v7751_v23 = vld [vmem:[%s9299_s23 + $0x570] ss:$24 sps:$4 sm:$0xff]   ;;  %v7765_v25 = vld [vmem:[%s9299_s23 + $0x5a4] ss:$24 sps:$4 sm:$0xff]  }
 0x13a   : > { %3032 = vmatpush1.bf16.xpose.msra.mxu0 %v7664_v24  ;;  %3126 = vmatprep.subr.bf16.mxu1 %v7675_v27  ;;  %v7762_v24 = vld [vmem:[%s9299_s23 + $0x2b4] ss:$24 sps:$4 sm:$0xff]   ;;  %v7763_v27 = vld [vmem:[%s9299_s23 + $0x5a0] ss:$24 sps:$4 sm:$0xff]  }
 0x13b   : > { %3033 = vmatprep.subr.bf16.mxu0 %v7672_v26  ;;  %2903 = vmatprep.mubr.bf16.mxu1 %v9525_v29  ;;  %v7760_v26 = vld [vmem:[%s9299_s23 + $0x2b0] ss:$24 sps:$4 sm:$0xff]  }
 0x13c   : > { %2996 = vmatprep.mubr.bf16.mxu0 %v9528_v30 }
 0x140   : > { %2904 = vmatmul.mubr.bf16.gmra.mrb[12].mxu1 %v9532_v31 }
 0x141   : > { %2997 = vmatmul.mubr.bf16.gmra.mrb[12].mxu0 %v9535_v32  ;;  %3127 = vmatpush1.bf16.xpose.msra.mxu1 %v7673_v34  ;;  %v7777_v34 = vld [vmem:[%s9299_s23 + $0x5d4] ss:$24 sps:$4 sm:$0xff]  }
 0x142   : > { %3034 = vmatpush1.bf16.xpose.msra.mxu0 %v7670_v33  ;;  %3128 = vmatprep.subr.bf16.mxu1 %v7681_v36  ;;  %v7774_v33 = vld [vmem:[%s9299_s23 + $0x2e4] ss:$24 sps:$4 sm:$0xff]   ;;  %v7775_v36 = vld [vmem:[%s9299_s23 + $0x5d0] ss:$24 sps:$4 sm:$0xff]  }
 0x143   : > { %3035 = vmatprep.subr.bf16.mxu0 %v7678_v35  ;;  %2913 = vmatprep.mubr.bf16.mxu1 %v9544_v37  ;;  %v7772_v35 = vld [vmem:[%s9299_s23 + $0x2e0] ss:$24 sps:$4 sm:$0xff]  }
 0x144   : > { %3006 = vmatprep.mubr.bf16.mxu0 %v9547_v38 }
 0x148   : > { %2914 = vmatmul.mubr.bf16.gmra.mrb[16].mxu1 %v9552_v39 }
 0x149   : > { %3007 = vmatmul.mubr.bf16.gmra.mrb[16].mxu0 %v9555_v40  ;;  %3129 = vmatpush1.bf16.xpose.msra.mxu1 %v7679_v42  ;;  %v7786_v42 = vld [vmem:[%s9299_s23 + $0x604] ss:$24 sps:$4 sm:$0xff]  }
 0x14a   : > { %3036 = vmatpush1.bf16.xpose.msra.mxu0 %v7676_v41  ;;  %3130 = vmatprep.subr.bf16.mxu1 %v7687_v44  ;;  %v7783_v41 = vld [vmem:[%s9299_s23 + $0x30c] ss:$24 sps:$4 sm:$0xff]   ;;  %v7781_v44 = vld [vmem:[%s9299_s23 + $0x308] ss:$24 sps:$4 sm:$0xff]  }
 0x14b   : > { %3037 = vmatprep.subr.bf16.mxu0 %v7684_v43  ;;  %2923 = vmatprep.mubr.bf16.mxu1 %v9564_v45  ;;  %v9631_v43 = vld [vmem:[%s9292_s17 + $0x10] ss:$24 sps:$4 sm:$0xff]  }
 0x14c   : > { %3016 = vmatprep.mubr.bf16.mxu0 %v9567_v46 }
 0x150   : > { %2924 = vmatmul.mubr.bf16.gmra.mrb[20].mxu1 %v9572_v47 }
 0x151   : > { %3017 = vmatmul.mubr.bf16.gmra.mrb[20].mxu0 %v9575_v48  ;;  %3131 = vmatpush1.bf16.xpose.msra.mxu1 %v7685_v50  ;;  %v9636_v50 = vld [vmem:[%s9292_s17 + $0x44] ss:$24 sps:$4 sm:$0xff]  }
 0x152   : > { %3038 = vmatpush1.bf16.xpose.msra.mxu0 %v7682_v49  ;;  %3132 = vmatprep.subr.bf16.mxu1 %v7693_v52  ;;  %v7784_v49 = vld [vmem:[%s9299_s23 + $0x600] ss:$24 sps:$4 sm:$0xff]   ;;  %v7795_v52 = vld [vmem:[%s9299_s23 + $0x634] ss:$24 sps:$4 sm:$0xff]  }
 0x153   : > { %3039 = vmatprep.subr.bf16.mxu0 %v7690_v51  ;;  %3059 = vmatprep.mubr.bf16.mxu0 %v9584_v53  ;;  %v7792_v51 = vld [vmem:[%s9299_s23 + $0x33c] ss:$24 sps:$4 sm:$0xff]  }
 0x154   : > { %3152 = vmatprep.mubr.bf16.mxu1 %v9444_v28  ;;  %v7700_v28 = vld [vmem:[%s9299_s23 + $0x190] ss:$24 sps:$4 sm:$0xff]  }
 0x159   : > { %3133 = vmatpush1.bf16.xpose.msra.mxu1 %v7691_v55  ;;  %v7790_v55 = vld [vmem:[%s9299_s23 + $0x338] ss:$24 sps:$4 sm:$0xff]  }
 0x15a   : > { %3040 = vmatpush1.bf16.xpose.msra.mxu0 %v7688_v54  ;;  %3134 = vmatprep.subr.bf16.mxu1 %v7699_v57  ;;  %v9645_v54 = vld [vmem:[%s9292_s17 + $0x40] ss:$24 sps:$4 sm:$0xff]   ;;  %v9650_v57 = vld [vmem:[%s9292_s17 + $0x74] ss:$24 sps:$4 sm:$0xff]  }
 0x15b   : > { %3041 = vmatprep.subr.bf16.mxu0 %v7696_v56  ;;  %v7793_v56 = vld [vmem:[%s9299_s23 + $0x630] ss:$24 sps:$4 sm:$0xff]  }
 0x161   : > { %3135 = vmatpush1.bf16.xpose.msra.mxu1 %v7697_v59  ;;  %v7799_v59 = vld [vmem:[%s9299_s23 + $0x368] ss:$24 sps:$4 sm:$0xff]  }
 0x162   : > { %3042 = vmatpush1.bf16.xpose.msra.mxu0 %v7694_v58  ;;  %3136 = vmatprep.subr.bf16.mxu1 %v7705_v61  ;;  %v7804_v58 = vld [vmem:[%s9299_s23 + $0x664] ss:$24 sps:$4 sm:$0xff]  }
 0x163   : > { %3043 = vmatprep.subr.bf16.mxu0 %v7702_v60  ;;  %v7802_v60 = vld [vmem:[%s9299_s23 + $0x660] ss:$24 sps:$4 sm:$0xff]   ;;  %v9664_v61 = vld [vmem:[%s9292_s17 + $0xa4] ss:$24 sps:$4 sm:$0xff]  }
 0x169   : > { %3137 = vmatpush1.bf16.xpose.msra.mxu1 %v7703_v62  ;;  %v7808_v62 = vld [vmem:[%s9299_s23 + $0x398] ss:$24 sps:$4 sm:$0xff]  }
 0x16a   : > { %3044 = vmatpush1.bf16.xpose.msra.mxu0 %v7700_v28  ;;  %3138 = vmatprep.subr.bf16.mxu1 %v7711_v0  ;;  %v7813_v28 = vld [vmem:[%s9299_s23 + $0x694] ss:$24 sps:$4 sm:$0xff]  }
 0x16b   : > { %3045 = vmatprep.subr.bf16.mxu0 %v7708_v63  ;;  %v7811_v63 = vld [vmem:[%s9299_s23 + $0x690] ss:$24 sps:$4 sm:$0xff]   ;;  %v9678_v0 = vld [vmem:[%s9292_s17 + $0xd4] ss:$24 sps:$4 sm:$0xff]  }
 0x171   : > { %3139 = vmatpush1.bf16.xpose.msra.mxu1 %v7709_v2  ;;  %v9687_v2 = vld [vmem:[%s9292_s17 + $0xd0] ss:$24 sps:$4 sm:$0xff]  }
 0x172   : > { %3046 = vmatpush1.bf16.xpose.msra.mxu0 %v7706_v1  ;;  %3140 = vmatprep.subr.bf16.mxu1 %v7717_v4  ;;  %v7822_v1 = vld [vmem:[%s9299_s23 + $0x6c4] ss:$24 sps:$4 sm:$0xff]   ;;  %v7820_v4 = vld [vmem:[%s9299_s23 + $0x6c0] ss:$24 sps:$4 sm:$0xff]  }
 0x173   : > { %3047 = vmatprep.subr.bf16.mxu0 %v7714_v3  ;;  %v7817_v3 = vld [vmem:[%s9299_s23 + $0x3c8] ss:$24 sps:$4 sm:$0xff]  }
 0x179   : > { %3141 = vmatpush1.bf16.xpose.msra.mxu1 %v7715_v7  ;;  %v7828_v7 = vld [vmem:[%s9299_s23 + $0x3fc] ss:$24 sps:$4 sm:$0xff]  }
 0x17a   : > { %3048 = vmatpush1.bf16.xpose.msra.mxu0 %v7712_v5  ;;  %3142 = vmatprep.subr.bf16.mxu1 %v7729_v9  ;;  %v9692_v5 = vld [vmem:[%s9292_s17 + $0x104] ss:$24 sps:$4 sm:$0xff]   ;;  %v9701_v9 = vld [vmem:[%s9292_s17 + $0x100] ss:$24 sps:$4 sm:$0xff]  }
 0x17b   : > { %3049 = vmatprep.subr.bf16.mxu0 %v7726_v8  ;;  %v7831_v8 = vld [vmem:[%s9299_s23 + $0x6f4] ss:$24 sps:$4 sm:$0xff]  }
 0x181   : > { %3143 = vmatpush1.bf16.xpose.msra.mxu1 %v7727_v11  ;;  %v7829_v11 = vld [vmem:[%s9299_s23 + $0x6f0] ss:$24 sps:$4 sm:$0xff]  }
 0x182   : > { %3050 = vmatpush1.bf16.xpose.msra.mxu0 %v7724_v10  ;;  %3144 = vmatprep.subr.bf16.mxu1 %v7741_v15  ;;  %v7826_v10 = vld [vmem:[%s9299_s23 + $0x3f8] ss:$24 sps:$4 sm:$0xff]   ;;  %v7837_v15 = vld [vmem:[%s9299_s23 + $0x724] ss:$24 sps:$4 sm:$0xff]  }
 0x183   : > { %3051 = vmatprep.subr.bf16.mxu0 %v7738_v13  ;;  %v7834_v13 = vld [vmem:[%s9299_s23 + $0x42c] ss:$24 sps:$4 sm:$0xff]  }
 0x189   : > { %3145 = vmatpush1.bf16.xpose.msra.mxu1 %v7739_v17  ;;  %v9714_v17 = vld [vmem:[%s9292_s17 + $0x4] ss:$24 sps:$4 sm:$0xff]  }
 0x18a   : > { %3052 = vmatpush1.bf16.xpose.msra.mxu0 %v7736_v16  ;;  %3146 = vmatprep.subr.bf16.mxu1 %v7753_v19  ;;  %v9710_v16 = vld [vmem:[%s9292_s17 + $0xc] ss:$24 sps:$4 sm:$0xff]   ;;  %v7835_v19 = vld [vmem:[%s9299_s23 + $0x720] ss:$24 sps:$4 sm:$0xff]  }
 0x18b   : > { %3053 = vmatprep.subr.bf16.mxu0 %v7750_v18  ;;  %v7832_v18 = vld [vmem:[%s9299_s23 + $0x428] ss:$24 sps:$4 sm:$0xff]  }
 0x191   : > { %3147 = vmatpush1.bf16.xpose.msra.mxu1 %v7751_v23  ;;  %v7843_v23 = vld [vmem:[%s9299_s23 + $0x754] ss:$24 sps:$4 sm:$0xff]  }
 0x192   : > { %3054 = vmatpush1.bf16.xpose.msra.mxu0 %v7748_v21  ;;  %3148 = vmatprep.subr.bf16.mxu1 %v7765_v25  ;;  %v7840_v21 = vld [vmem:[%s9299_s23 + $0x45c] ss:$24 sps:$4 sm:$0xff]   ;;  %v7841_v25 = vld [vmem:[%s9299_s23 + $0x750] ss:$24 sps:$4 sm:$0xff]  }
 0x193   : > { %3055 = vmatprep.subr.bf16.mxu0 %v7762_v24  ;;  %v7838_v24 = vld [vmem:[%s9299_s23 + $0x458] ss:$24 sps:$4 sm:$0xff]  }
 0x199   : > { %3149 = vmatpush1.bf16.xpose.msra.mxu1 %v7763_v27  ;;  %v7849_v27 = vld [vmem:[%s9299_s23 + $0x784] ss:$24 sps:$4 sm:$0xff]  }
 0x19a   : > { %3056 = vmatpush1.bf16.xpose.msra.mxu0 %v7760_v26  ;;  %3150 = vmatprep.subr.bf16.mxu1 %v7777_v34  ;;  %v7846_v26 = vld [vmem:[%s9299_s23 + $0x48c] ss:$24 sps:$4 sm:$0xff]   ;;  %v7847_v34 = vld [vmem:[%s9299_s23 + $0x780] ss:$24 sps:$4 sm:$0xff]  }
 0x19b   : > { %3057 = vmatprep.subr.bf16.mxu0 %v7774_v33  ;;  %v7844_v33 = vld [vmem:[%s9299_s23 + $0x488] ss:$24 sps:$4 sm:$0xff]  }
 0x1a1   : > { %3151 = vmatpush1.bf16.xpose.msra.mxu1 %v7775_v36  ;;  %v7855_v36 = vld [vmem:[%s9299_s23 + $0x7b4] ss:$24 sps:$4 sm:$0xff]  }
 0x1a2   : > { %3058 = vmatpush1.bf16.xpose.msra.mxu0 %v7772_v35  ;;  %3213 = vmatprep.subr.bf16.mxu1 %v7783_v41  ;;  %v7852_v35 = vld [vmem:[%s9299_s23 + $0x4bc] ss:$24 sps:$4 sm:$0xff]   ;;  %v7850_v41 = vld [vmem:[%s9299_s23 + $0x4b8] ss:$24 sps:$4 sm:$0xff]  }
 0x1a3   : > { %3399 = vmatprep.subr.bf16.mxu0 %v7786_v42  ;;  %v7853_v42 = vld [vmem:[%s9299_s23 + $0x7b0] ss:$24 sps:$4 sm:$0xff]  }
 0x1a8   : > { %3153 = vmatmul.mubr.bf16.vlgmr.msra.gmra.mrb[24].mxu1 %v9489_v6  ;;  %v7801_v6 = vld [vmem:[%s9299_s23 + $0x36c] ss:$24 sps:$4 sm:$0xff]  }
 0x1a9   : > { %3060 = vmatmul.mubr.bf16.vlgmr.msra.gmra.mrb[0].mxu0 %v9631_v43  ;;  %3214 = vmatpush1.bf16.xpose.msra.mxu1 %v7781_v44  ;;  %v7858_v44 = vld [vmem:[%s9299_s23 + $0x4ec] ss:$24 sps:$4 sm:$0xff]  }
 0x1aa   : > { %3400 = vmatpush1.bf16.xpose.msra.mxu0 %v7784_v49  ;;  %3069 = vmatprep.mubr.bf16.mxu0 %v9636_v50  ;;  %v7861_v49 = vld [vmem:[%s9299_s23 + $0x7e4] ss:$24 sps:$4 sm:$0xff]  }
 0x1ab   : > { %3215 = vmatprep.subr.bf16.mxu1 %v7792_v51  ;;  %3401 = vmatprep.subr.bf16.mxu0 %v7795_v52  ;;  %v7856_v51 = vld [vmem:[%s9299_s23 + $0x4e8] ss:$24 sps:$4 sm:$0xff]  }
 0x1ac   : > { %3162 = vmatprep.mubr.bf16.mxu1 %v9497_v12  ;;  %v9659_v12 = vld [vmem:[%s9292_s17 + $0x70] ss:$24 sps:$4 sm:$0xff]   ;;  %v7859_v52 = vld [vmem:[%s9299_s23 + $0x7e0] ss:$24 sps:$4 sm:$0xff]  }
 0x1b0   : > { %3163 = vmatmul.mubr.bf16.gmra.mrb[28].mxu1 %v9502_v14  ;;  %v7810_v14 = vld [vmem:[%s9299_s23 + $0x39c] ss:$24 sps:$4 sm:$0xff]  }
 0x1b1   : > { %3070 = vmatmul.mubr.bf16.gmra.mrb[4].mxu0 %v9645_v54  ;;  %3216 = vmatpush1.bf16.xpose.msra.mxu1 %v7790_v55  ;;  %v7864_v55 = vld [vmem:[%s9299_s23 + $0x51c] ss:$24 sps:$4 sm:$0xff]  }
 0x1b2   : > { %3402 = vmatpush1.bf16.xpose.msra.mxu0 %v7793_v56  ;;  %3079 = vmatprep.mubr.bf16.mxu0 %v9650_v57  ;;  %v7867_v56 = vld [vmem:[%s9299_s23 + $0x814] ss:$24 sps:$4 sm:$0xff]  }
 0x1b3   : > { %3217 = vmatprep.subr.bf16.mxu1 %v7801_v6  ;;  %3403 = vmatprep.subr.bf16.mxu0 %v7804_v58 }
 0x1b4   : > { %3172 = vmatprep.mubr.bf16.mxu1 %v9511_v20  ;;  %v9673_v20 = vld [vmem:[%s9292_s17 + $0xa0] ss:$24 sps:$4 sm:$0xff]  }
 0x1b8   : > { %3173 = vmatmul.mubr.bf16.gmra.mrb[32].mxu1 %v9516_v22  ;;  %v7819_v22 = vld [vmem:[%s9299_s23 + $0x3cc] ss:$24 sps:$4 sm:$0xff]  }
 0x1b9   : > { %3080 = vmatmul.mubr.bf16.gmra.mrb[8].mxu0 %v9659_v12  ;;  %3218 = vmatpush1.bf16.xpose.msra.mxu1 %v7799_v59 }
 0x1ba   : > { %3404 = vmatpush1.bf16.xpose.msra.mxu0 %v7802_v60  ;;  %3089 = vmatprep.mubr.bf16.mxu0 %v9664_v61  ;;  %v7862_v60 = vld [vmem:[%s9299_s23 + $0x518] ss:$24 sps:$4 sm:$0xff]  }
 0x1bb   : > { %3219 = vmatprep.subr.bf16.mxu1 %v7810_v14  ;;  %3405 = vmatprep.subr.bf16.mxu0 %v7813_v28  ;;  %v7865_v14 = vld [vmem:[%s9299_s23 + $0x810] ss:$24 sps:$4 sm:$0xff]  }
 0x1bc   : > { %3182 = vmatprep.mubr.bf16.mxu1 %v9525_v29 }
 0x1c0   : > { %3183 = vmatmul.mubr.bf16.gmra.mrb[36].mxu1 %v9532_v31 }
 0x1c1   : > { %3090 = vmatmul.mubr.bf16.gmra.mrb[12].mxu0 %v9673_v20  ;;  %3220 = vmatpush1.bf16.xpose.msra.mxu1 %v7808_v62  ;;  %v7870_v62 = vld [vmem:[%s9299_s23 + $0x54c] ss:$24 sps:$4 sm:$0xff]  }
 0x1c2   : > { %3406 = vmatpush1.bf16.xpose.msra.mxu0 %v7811_v63  ;;  %3099 = vmatprep.mubr.bf16.mxu0 %v9678_v0  ;;  %v7873_v63 = vld [vmem:[%s9299_s23 + $0x844] ss:$24 sps:$4 sm:$0xff]  }
 0x1c3   : > { %3221 = vmatprep.subr.bf16.mxu1 %v7819_v22  ;;  %3407 = vmatprep.subr.bf16.mxu0 %v7822_v1 }
 0x1c4   : > { %3192 = vmatprep.mubr.bf16.mxu1 %v9544_v37 }
 0x1c8   : > { %3193 = vmatmul.mubr.bf16.gmra.mrb[40].mxu1 %v9552_v39 }
 0x1c9   : > { %3100 = vmatmul.mubr.bf16.gmra.mrb[16].mxu0 %v9687_v2  ;;  %3222 = vmatpush1.bf16.xpose.msra.mxu1 %v7817_v3  ;;  %v7868_v3 = vld [vmem:[%s9299_s23 + $0x548] ss:$24 sps:$4 sm:$0xff]  }
 0x1ca   : > { %3408 = vmatpush1.bf16.xpose.msra.mxu0 %v7820_v4  ;;  %3109 = vmatprep.mubr.bf16.mxu0 %v9692_v5  ;;  %v7871_v4 = vld [vmem:[%s9299_s23 + $0x840] ss:$24 sps:$4 sm:$0xff]  }
 0x1cb   : > { %3223 = vmatprep.subr.bf16.mxu1 %v7828_v7  ;;  %3409 = vmatprep.subr.bf16.mxu0 %v7831_v8  ;;  %v7876_v8 = vld [vmem:[%s9299_s23 + $0x57c] ss:$24 sps:$4 sm:$0xff]  }
 0x1cc   : > { %3202 = vmatprep.mubr.bf16.mxu1 %v9564_v45 }
 0x1d0   : > { %3203 = vmatmul.mubr.bf16.gmra.mrb[44].mxu1 %v9572_v47 }
 0x1d1   : > { %3110 = vmatmul.mubr.bf16.gmra.mrb[20].mxu0 %v9701_v9  ;;  %3224 = vmatpush1.bf16.xpose.msra.mxu1 %v7826_v10  ;;  %v7879_v10 = vld [vmem:[%s9299_s23 + $0x874] ss:$24 sps:$4 sm:$0xff]  }
 0x1d2   : > { %3410 = vmatpush1.bf16.xpose.msra.mxu0 %v7829_v11  ;;  %3225 = vmatprep.subr.bf16.mxu1 %v7834_v13 }
 0x1d3   : > { %3411 = vmatprep.subr.bf16.mxu0 %v7837_v15  ;;  %3245 = vmatprep.mubr.bf16.mxu1 %v9710_v16 }
 0x1d4   : > { %3431 = vmatprep.mubr.bf16.mxu0 %v9714_v17 }
 0x1d9   : > { %3226 = vmatpush1.bf16.xpose.msra.mxu1 %v7832_v18  ;;  %v7874_v18 = vld [vmem:[%s9299_s23 + $0x578] ss:$24 sps:$4 sm:$0xff]  }
 0x1da   : > { %3412 = vmatpush1.bf16.xpose.msra.mxu0 %v7835_v19  ;;  %3227 = vmatprep.subr.bf16.mxu1 %v7840_v21  ;;  %v7877_v19 = vld [vmem:[%s9299_s23 + $0x870] ss:$24 sps:$4 sm:$0xff]  }
 0x1db   : > { %3413 = vmatprep.subr.bf16.mxu0 %v7843_v23  ;;  %v7882_v23 = vld [vmem:[%s9299_s23 + $0x5ac] ss:$24 sps:$4 sm:$0xff]  }
 0x1e1   : > { %3228 = vmatpush1.bf16.xpose.msra.mxu1 %v7838_v24  ;;  %v7885_v24 = vld [vmem:[%s9299_s23 + $0x8a4] ss:$24 sps:$4 sm:$0xff]  }
 0x1e2   : > { %3414 = vmatpush1.bf16.xpose.msra.mxu0 %v7841_v25  ;;  %3229 = vmatprep.subr.bf16.mxu1 %v7846_v26 }
 0x1e3   : > { %3415 = vmatprep.subr.bf16.mxu0 %v7849_v27 }
 0x1e9   : > { %3230 = vmatpush1.bf16.xpose.msra.mxu1 %v7844_v33  ;;  %v7880_v33 = vld [vmem:[%s9299_s23 + $0x5a8] ss:$24 sps:$4 sm:$0xff]  }
 0x1ea   : > { %3416 = vmatpush1.bf16.xpose.msra.mxu0 %v7847_v34  ;;  %3231 = vmatprep.subr.bf16.mxu1 %v7852_v35  ;;  %v7883_v34 = vld [vmem:[%s9299_s23 + $0x8a0] ss:$24 sps:$4 sm:$0xff]  }
 0x1eb   : > { %3417 = vmatprep.subr.bf16.mxu0 %v7855_v36  ;;  %v7888_v36 = vld [vmem:[%s9299_s23 + $0x5dc] ss:$24 sps:$4 sm:$0xff]  }
 0x1f1   : > { %3232 = vmatpush1.bf16.xpose.msra.mxu1 %v7850_v41  ;;  %v7891_v41 = vld [vmem:[%s9299_s23 + $0x8d4] ss:$24 sps:$4 sm:$0xff]  }
 0x1f2   : > { %3418 = vmatpush1.bf16.xpose.msra.mxu0 %v7853_v42  ;;  %3233 = vmatprep.subr.bf16.mxu1 %v7858_v44 }
 0x1f3   : > { %3419 = vmatprep.subr.bf16.mxu0 %v7861_v49 }
 0x1f9   : > { %3234 = vmatpush1.bf16.xpose.msra.mxu1 %v7856_v51  ;;  %v7886_v51 = vld [vmem:[%s9299_s23 + $0x5d8] ss:$24 sps:$4 sm:$0xff]  }
 0x1fa   : > { %3420 = vmatpush1.bf16.xpose.msra.mxu0 %v7859_v52  ;;  %3235 = vmatprep.subr.bf16.mxu1 %v7864_v55  ;;  %v7889_v52 = vld [vmem:[%s9299_s23 + $0x8d0] ss:$24 sps:$4 sm:$0xff]  }
 0x1fb   : > { %3421 = vmatprep.subr.bf16.mxu0 %v7867_v56  ;;  %v9737_v6 = vpop.f32.mrb[0].mxu1  ;;  %v7894_v56 = vld [vmem:[%s9299_s23 + $0x314] ss:$24 sps:$4 sm:$0xff]  }
 0x1fc   : > { %v9739_v58 = vpop.f32.mrb[1].mxu1 }
 0x1fd   : > { %v9741_v59 = vpop.f32.mrb[2].mxu1 }
 0x1fe   : > { %v9745_v28 = vpop.f32.mrb[3].mxu1 }
 0x201   : > { %3236 = vmatpush1.bf16.xpose.msra.mxu1 %v7862_v60  ;;  %v7897_v60 = vld [vmem:[%s9299_s23 + $0x60c] ss:$24 sps:$4 sm:$0xff]  }
 0x202   : > { %3422 = vmatpush1.bf16.xpose.msra.mxu0 %v7865_v14  ;;  %3237 = vmatprep.subr.bf16.mxu1 %v7870_v62 }
 0x203   : > { %3423 = vmatprep.subr.bf16.mxu0 %v7873_v63  ;;  %v9749_v22 = vpop.f32.mrb[4].mxu1 }
 0x204   : > { %v9751_v1 = vpop.f32.mrb[5].mxu1 }
 0x205   : > { %v9755_v7 = vpop.f32.mrb[6].mxu1 }
 0x206   : > { %v9759_v11 = vpop.f32.mrb[7].mxu1 }
 0x209   : > { %3238 = vmatpush1.bf16.xpose.msra.mxu1 %v7868_v3  ;;  %v7892_v3 = vld [vmem:[%s9299_s23 + $0x310] ss:$24 sps:$4 sm:$0xff]  }
 0x20a   : > { %3424 = vmatpush1.bf16.xpose.msra.mxu0 %v7871_v4  ;;  %3239 = vmatprep.subr.bf16.mxu1 %v7876_v8  ;;  %v7895_v4 = vld [vmem:[%s9299_s23 + $0x608] ss:$24 sps:$4 sm:$0xff]  }
 0x20b   : > { %3425 = vmatprep.subr.bf16.mxu0 %v7879_v10  ;;  %v9761_v13 = vpop.f32.mrb[8].mxu1  ;;  %v7900_v10 = vld [vmem:[%s9299_s23 + $0x344] ss:$24 sps:$4 sm:$0xff]  }
 0x20c   : > { %v9763_v15 = vpop.f32.mrb[9].mxu1 }
 0x20d   : > { %v9767_v21 = vpop.f32.mrb[10].mxu1 }
 0x20e   : > { %v9771_v25 = vpop.f32.mrb[11].mxu1 }
 0x211   : > { %3240 = vmatpush1.bf16.xpose.msra.mxu1 %v7874_v18  ;;  %v7903_v18 = vld [vmem:[%s9299_s23 + $0x63c] ss:$24 sps:$4 sm:$0xff]  }
 0x212   : > { %3426 = vmatpush1.bf16.xpose.msra.mxu0 %v7877_v19  ;;  %3241 = vmatprep.subr.bf16.mxu1 %v7882_v23  ;;  %v9810_v23 = vld [vmem:[%s9292_s17 + $0x8] ss:$24 sps:$4 sm:$0xff]  }
 0x213   : > { %3427 = vmatprep.subr.bf16.mxu0 %v7885_v24  ;;  %v9773_v26 = vpop.f32.mrb[12].mxu1  ;;  %v9814_v24 = vld [vmem:[%s9292_s17] ss:$24 sps:$4 sm:$0xff]  }
 0x214   : > { %v9775_v27 = vpop.f32.mrb[13].mxu1  ;;  %12336 = vst [vmem:[#allocation20_spill] sm:$0xff] %v9814_v24 }
 0x215   : > { %v9779_v35 = vpop.f32.mrb[14].mxu1 }
 0x216   : > { %v9783_v42 = vpop.f32.mrb[15].mxu1 }
 0x219   : > { %3242 = vmatpush1.bf16.xpose.msra.mxu1 %v7880_v33  ;;  %v9818_v33 = vld [vmem:[%s9292_s17 + $0x3c] ss:$24 sps:$4 sm:$0xff]  }
 0x21a   : > { %3428 = vmatpush1.bf16.xpose.msra.mxu0 %v7883_v34  ;;  %3243 = vmatprep.subr.bf16.mxu1 %v7888_v36  ;;  %v9822_v34 = vld [vmem:[%s9292_s17 + $0x34] ss:$24 sps:$4 sm:$0xff]   ;;  %v7898_v36 = vld [vmem:[%s9299_s23 + $0x340] ss:$24 sps:$4 sm:$0xff]  }
 0x21b   : > { %3429 = vmatprep.subr.bf16.mxu0 %v7891_v41  ;;  %v9785_v44 = vpop.f32.mrb[16].mxu1  ;;  %12337 = vst [vmem:[#allocation21_spill] sm:$0xff] %v9822_v34  ;;  %v7901_v41 = vld [vmem:[%s9299_s23 + $0x638] ss:$24 sps:$4 sm:$0xff]  }
 0x21c   : > { %v9787_v49 = vpop.f32.mrb[17].mxu1 }
 0x21d   : > { %v9791_v55 = vpop.f32.mrb[18].mxu1 }
 0x21e   : > { %v9795_v14 = vpop.f32.mrb[19].mxu1 }
 0x221   : > { %3244 = vmatpush1.bf16.xpose.msra.mxu1 %v7886_v51  ;;  %v7906_v51 = vld [vmem:[%s9299_s23 + $0x374] ss:$24 sps:$4 sm:$0xff]  }
 0x222   : > { %3430 = vmatpush1.bf16.xpose.msra.mxu0 %v7889_v52  ;;  %3306 = vmatprep.subr.bf16.mxu1 %v7894_v56  ;;  %v7909_v52 = vld [vmem:[%s9299_s23 + $0x66c] ss:$24 sps:$4 sm:$0xff]   ;;  %v9830_v56 = vld [vmem:[%s9292_s17 + $0x38] ss:$24 sps:$4 sm:$0xff]  }
 0x223   : > { %3492 = vmatprep.subr.bf16.mxu0 %v7897_v60  ;;  %v9797_v62 = vpop.f32.mrb[20].mxu1  ;;  %v9834_v60 = vld [vmem:[%s9292_s17 + $0x30] ss:$24 sps:$4 sm:$0xff]  }
 0x224   : > { %v9799_v63 = vpop.f32.mrb[21].mxu1  ;;  %12338 = vst [vmem:[#allocation22_spill] sm:$0xff] %v9834_v60 }
 0x225   : > { %v9803_v8 = vpop.f32.mrb[22].mxu1 }
 0x226   : > { %v9807_v19 = vpop.f32.mrb[23].mxu1 }
 0x228   : > { %3246 = vmatmul.mubr.bf16.vlgmr.msra.gmra.mrb[24].mxu1 %v9810_v23 }
 0x229   : > { %3432 = vmatmul.mubr.bf16.vlgmr.msra.gmra.mrb[24].mxu0 %v9814_v24  ;;  %3307 = vmatpush1.bf16.xpose.msra.mxu1 %v7892_v3  ;;  %v9838_v3 = vld [vmem:[%s9292_s17 + $0x6c] ss:$24 sps:$4 sm:$0xff]  }
 0x22a   : > { %3493 = vmatpush1.bf16.xpose.msra.mxu0 %v7895_v4  ;;  %3308 = vmatprep.subr.bf16.mxu1 %v7900_v10  ;;  %v9842_v4 = vld [vmem:[%s9292_s17 + $0x64] ss:$24 sps:$4 sm:$0xff]   ;;  %v7904_v10 = vld [vmem:[%s9299_s23 + $0x370] ss:$24 sps:$4 sm:$0xff]  }
 0x22b   : > { %3494 = vmatprep.subr.bf16.mxu0 %v7903_v18  ;;  %3255 = vmatprep.mubr.bf16.mxu1 %v9818_v33  ;;  %12339 = vst [vmem:[#allocation23_spill] sm:$0xff] %v9842_v4  ;;  %v7907_v18 = vld [vmem:[%s9299_s23 + $0x668] ss:$24 sps:$4 sm:$0xff]   ;;  %v7921_v24 = vld [vmem:[%s9299_s23 + $0x6cc] ss:$24 sps:$4 sm:$0xff]  }
 0x22c   : > { %3441 = vmatprep.mubr.bf16.mxu0 %v9822_v34  ;;  %v7912_v34 = vld [vmem:[%s9299_s23 + $0x3a4] ss:$24 sps:$4 sm:$0xff]  }
 0x230   : > { %3256 = vmatmul.mubr.bf16.gmra.mrb[28].mxu1 %v9830_v56 }
 0x231   : > { %3442 = vmatmul.mubr.bf16.gmra.mrb[28].mxu0 %v9834_v60  ;;  %3309 = vmatpush1.bf16.xpose.msra.mxu1 %v7898_v36  ;;  %v7915_v60 = vld [vmem:[%s9299_s23 + $0x69c] ss:$24 sps:$4 sm:$0xff]   ;;  %v9850_v36 = vld [vmem:[%s9292_s17 + $0x68] ss:$24 sps:$4 sm:$0xff]  }
 0x232   : > { %3495 = vmatpush1.bf16.xpose.msra.mxu0 %v7901_v41  ;;  %3310 = vmatprep.subr.bf16.mxu1 %v7906_v51  ;;  %v9854_v41 = vld [vmem:[%s9292_s17 + $0x60] ss:$24 sps:$4 sm:$0xff]  }
 0x233   : > { %3496 = vmatprep.subr.bf16.mxu0 %v7909_v52  ;;  %3265 = vmatprep.mubr.bf16.mxu1 %v9838_v3  ;;  %v7910_v51 = vld [vmem:[%s9299_s23 + $0x3a0] ss:$24 sps:$4 sm:$0xff]  }
 0x234   : > { %3451 = vmatprep.mubr.bf16.mxu0 %v9842_v4  ;;  %v7913_v52 = vld [vmem:[%s9299_s23 + $0x698] ss:$24 sps:$4 sm:$0xff]   ;;  %v7918_v4 = vld [vmem:[%s9299_s23 + $0x3d4] ss:$24 sps:$4 sm:$0xff]  }
 0x238   : > { %3266 = vmatmul.mubr.bf16.gmra.mrb[32].mxu1 %v9850_v36 }
 0x239   : > { %3452 = vmatmul.mubr.bf16.gmra.mrb[32].mxu0 %v9854_v41  ;;  %3311 = vmatpush1.bf16.xpose.msra.mxu1 %v7904_v10  ;;  %v7948_v10 = vld [vmem:[%s9299_s23 + $0x4c4] ss:$24 sps:$4 sm:$0xff]  }
 0x23a   : > { %3497 = vmatpush1.bf16.xpose.msra.mxu0 %v7907_v18  ;;  %3312 = vmatprep.subr.bf16.mxu1 %v7912_v34  ;;  %v7924_v34 = vld [vmem:[%s9299_s23 + $0x404] ss:$24 sps:$4 sm:$0xff]  }
 0x23b   : > { %3498 = vmatprep.subr.bf16.mxu0 %v7915_v60  ;;  %3275 = vmatprep.mubr.bf16.mxu1 %v9528_v30  ;;  %v7919_v30 = vld [vmem:[%s9299_s23 + $0x6c8] ss:$24 sps:$4 sm:$0xff]   ;;  %v7927_v60 = vld [vmem:[%s9299_s23 + $0x6fc] ss:$24 sps:$4 sm:$0xff]  }
 0x23c   : > { %3461 = vmatprep.mubr.bf16.mxu0 %v9525_v29  ;;  %v7916_v29 = vld [vmem:[%s9299_s23 + $0x3d0] ss:$24 sps:$4 sm:$0xff]   ;;  %v7951_v18 = vld [vmem:[%s9299_s23 + $0x7bc] ss:$24 sps:$4 sm:$0xff]  }
 0x240   : > { %3276 = vmatmul.mubr.bf16.gmra.mrb[36].mxu1 %v9535_v32  ;;  %v7925_v32 = vld [vmem:[%s9299_s23 + $0x6f8] ss:$24 sps:$4 sm:$0xff]  }
 0x241   : > { %3462 = vmatmul.mubr.bf16.gmra.mrb[36].mxu0 %v9532_v31  ;;  %3313 = vmatpush1.bf16.xpose.msra.mxu1 %v7910_v51  ;;  %v7922_v31 = vld [vmem:[%s9299_s23 + $0x400] ss:$24 sps:$4 sm:$0xff]  }
 0x242   : > { %3499 = vmatpush1.bf16.xpose.msra.mxu0 %v7913_v52  ;;  %3314 = vmatprep.subr.bf16.mxu1 %v7918_v4  ;;  %v7943_v4 = vld [vmem:[%s9299_s23 + $0x788] ss:$24 sps:$4 sm:$0xff]   ;;  %v7949_v52 = vld [vmem:[%s9299_s23 + $0x7b8] ss:$24 sps:$4 sm:$0xff]  }
 0x243   : > { %3500 = vmatprep.subr.bf16.mxu0 %v7921_v24  ;;  %3285 = vmatprep.mubr.bf16.mxu1 %v9547_v38  ;;  %v7933_v38 = vld [vmem:[%s9299_s23 + $0x72c] ss:$24 sps:$4 sm:$0xff]   ;;  %v7946_v51 = vld [vmem:[%s9299_s23 + $0x4c0] ss:$24 sps:$4 sm:$0xff]  }
 0x244   : > { %3471 = vmatprep.mubr.bf16.mxu0 %v9544_v37  ;;  %v7930_v37 = vld [vmem:[%s9299_s23 + $0x434] ss:$24 sps:$4 sm:$0xff]  }
 0x245   : > { %v7942_v24 = vld [vmem:[%s9299_s23 + $0x494] ss:$24 sps:$4 sm:$0xff]  }
 0x248   : > { %3286 = vmatmul.mubr.bf16.gmra.mrb[40].mxu1 %v9555_v40  ;;  %v7931_v40 = vld [vmem:[%s9299_s23 + $0x728] ss:$24 sps:$4 sm:$0xff]  }
 0x249   : > { %3472 = vmatmul.mubr.bf16.gmra.mrb[40].mxu0 %v9552_v39  ;;  %3315 = vmatpush1.bf16.xpose.msra.mxu1 %v7916_v29  ;;  %v7928_v39 = vld [vmem:[%s9299_s23 + $0x430] ss:$24 sps:$4 sm:$0xff]   ;;  %v7954_v29 = vld [vmem:[%s9299_s23 + $0x4f4] ss:$24 sps:$4 sm:$0xff]  }
 0x24a   : > { %3501 = vmatpush1.bf16.xpose.msra.mxu0 %v7919_v30  ;;  %3316 = vmatprep.subr.bf16.mxu1 %v7924_v34  ;;  %v7957_v30 = vld [vmem:[%s9299_s23 + $0x7ec] ss:$24 sps:$4 sm:$0xff]   ;;  %v7952_v34 = vld [vmem:[%s9299_s23 + $0x4f0] ss:$24 sps:$4 sm:$0xff]  }
 0x24b   : > { %3502 = vmatprep.subr.bf16.mxu0 %v7927_v60  ;;  %3295 = vmatprep.mubr.bf16.mxu1 %v9567_v46  ;;  %v7939_v46 = vld [vmem:[%s9299_s23 + $0x75c] ss:$24 sps:$4 sm:$0xff]   ;;  %v7955_v60 = vld [vmem:[%s9299_s23 + $0x7e8] ss:$24 sps:$4 sm:$0xff]  }
 0x24c   : > { %3481 = vmatprep.mubr.bf16.mxu0 %v9564_v45  ;;  %v7936_v45 = vld [vmem:[%s9299_s23 + $0x464] ss:$24 sps:$4 sm:$0xff]  }
 0x250   : > { %3296 = vmatmul.mubr.bf16.gmra.mrb[44].mxu1 %v9575_v48  ;;  %v7937_v48 = vld [vmem:[%s9299_s23 + $0x758] ss:$24 sps:$4 sm:$0xff]  }
 0x251   : > { %3482 = vmatmul.mubr.bf16.gmra.mrb[44].mxu0 %v9572_v47  ;;  %3317 = vmatpush1.bf16.xpose.msra.mxu1 %v7922_v31  ;;  %v7934_v47 = vld [vmem:[%s9299_s23 + $0x460] ss:$24 sps:$4 sm:$0xff]   ;;  %v7960_v31 = vld [vmem:[%s9299_s23 + $0x524] ss:$24 sps:$4 sm:$0xff]  }
 0x252   : > { %3503 = vmatpush1.bf16.xpose.msra.mxu0 %v7925_v32  ;;  %3318 = vmatprep.subr.bf16.mxu1 %v7930_v37  ;;  %v7963_v32 = vld [vmem:[%s9299_s23 + $0x81c] ss:$24 sps:$4 sm:$0xff]  }
 0x253   : > { %3504 = vmatprep.subr.bf16.mxu0 %v7933_v38  ;;  %3338 = vmatprep.mubr.bf16.mxu1 %v9584_v53  ;;  %v7945_v53 = vld [vmem:[%s9299_s23 + $0x78c] ss:$24 sps:$4 sm:$0xff]  }
 0x254   : > { %3524 = vmatprep.mubr.bf16.mxu0 %v9710_v16  ;;  %v7940_v16 = vld [vmem:[%s9299_s23 + $0x490] ss:$24 sps:$4 sm:$0xff]  }
 0x259   : > { %3319 = vmatpush1.bf16.xpose.msra.mxu1 %v7928_v39 }
 0x25a   : > { %3505 = vmatpush1.bf16.xpose.msra.mxu0 %v7931_v40  ;;  %3320 = vmatprep.subr.bf16.mxu1 %v7936_v45 }
 0x25b   : > { %3506 = vmatprep.subr.bf16.mxu0 %v7939_v46  ;;  %v7958_v46 = vld [vmem:[%s9299_s23 + $0x520] ss:$24 sps:$4 sm:$0xff]  }
 0x261   : > { %3321 = vmatpush1.bf16.xpose.msra.mxu1 %v7934_v47  ;;  %v7961_v47 = vld [vmem:[%s9299_s23 + $0x818] ss:$24 sps:$4 sm:$0xff]  }
 0x262   : > { %3507 = vmatpush1.bf16.xpose.msra.mxu0 %v7937_v48  ;;  %3322 = vmatprep.subr.bf16.mxu1 %v7942_v24 }
 0x263   : > { %3508 = vmatprep.subr.bf16.mxu0 %v7945_v53  ;;  %v7966_v53 = vld [vmem:[%s9299_s23 + $0x554] ss:$24 sps:$4 sm:$0xff]  }
 0x269   : > { %3323 = vmatpush1.bf16.xpose.msra.mxu1 %v7940_v16  ;;  %v7969_v16 = vld [vmem:[%s9299_s23 + $0x84c] ss:$24 sps:$4 sm:$0xff]  }
 0x26a   : > { %3509 = vmatpush1.bf16.xpose.msra.mxu0 %v7943_v4  ;;  %3324 = vmatprep.subr.bf16.mxu1 %v7948_v10 }
 0x26b   : > { %3510 = vmatprep.subr.bf16.mxu0 %v7951_v18 }
 0x271   : > { %3325 = vmatpush1.bf16.xpose.msra.mxu1 %v7946_v51  ;;  %v7964_v51 = vld [vmem:[%s9299_s23 + $0x550] ss:$24 sps:$4 sm:$0xff]  }
 0x272   : > { %3511 = vmatpush1.bf16.xpose.msra.mxu0 %v7949_v52  ;;  %3326 = vmatprep.subr.bf16.mxu1 %v7954_v29  ;;  %v7967_v52 = vld [vmem:[%s9299_s23 + $0x848] ss:$24 sps:$4 sm:$0xff]  }
 0x273   : > { %3512 = vmatprep.subr.bf16.mxu0 %v7957_v30  ;;  %v7972_v30 = vld [vmem:[%s9299_s23 + $0x584] ss:$24 sps:$4 sm:$0xff]  }
 0x279   : > { %3327 = vmatpush1.bf16.xpose.msra.mxu1 %v7952_v34  ;;  %v7975_v34 = vld [vmem:[%s9299_s23 + $0x87c] ss:$24 sps:$4 sm:$0xff]  }
 0x27a   : > { %3513 = vmatpush1.bf16.xpose.msra.mxu0 %v7955_v60  ;;  %3328 = vmatprep.subr.bf16.mxu1 %v7960_v31 }
 0x27b   : > { %3514 = vmatprep.subr.bf16.mxu0 %v7963_v32 }
 0x27c   : > { %v3061_v37 = vpop.f32.mrb[0].mxu0 }
 0x27d   : > { %v9904_v38 = vadd.f32 %v3061_v37, %v9737_v6  ;;  %v3063_v39 = vpop.f32.mrb[1].mxu0  ;;  %v7970_v37 = vld [vmem:[%s9299_s23 + $0x580] ss:$24 sps:$4 sm:$0xff]  }
 0x27e   : > { %v9907_v40 = vadd.f32 %v3063_v39, %v9739_v58  ;;  %v3065_v45 = vpop.f32.mrb[2].mxu0  ;;  %v7973_v39 = vld [vmem:[%s9299_s23 + $0x878] ss:$24 sps:$4 sm:$0xff]  }
 0x27f   : > { %v9912_v48 = vadd.f32 %v3065_v45, %v9741_v59  ;;  %v3067_v24 = vpop.f32.mrb[3].mxu0 }
 0x280   : > { %v9917_v6 = vadd.f32 %v3067_v24, %v9745_v28 }
 0x281   : > { %3329 = vmatpush1.bf16.xpose.msra.mxu1 %v7958_v46  ;;  %v7978_v46 = vld [vmem:[%s9299_s23 + $0x5b4] ss:$24 sps:$4 sm:$0xff]  }
 0x282   : > { %3515 = vmatpush1.bf16.xpose.msra.mxu0 %v7961_v47  ;;  %3330 = vmatprep.subr.bf16.mxu1 %v7966_v53  ;;  %v7981_v47 = vld [vmem:[%s9299_s23 + $0x8ac] ss:$24 sps:$4 sm:$0xff]  }
 0x283   : > { %3516 = vmatprep.subr.bf16.mxu0 %v7969_v16 }
 0x284   : > { %v3071_v58 = vpop.f32.mrb[4].mxu0 }
 0x285   : > { %v9920_v4 = vadd.f32 %v3071_v58, %v9749_v22  ;;  %v3073_v10 = vpop.f32.mrb[5].mxu0  ;;  %v7976_v58 = vld [vmem:[%s9299_s23 + $0x5b0] ss:$24 sps:$4 sm:$0xff]  }
 0x286   : > { %v9923_v59 = vadd.f32 %v3073_v10, %v9751_v1  ;;  %v3075_v18 = vpop.f32.mrb[6].mxu0  ;;  %v7979_v10 = vld [vmem:[%s9299_s23 + $0x8a8] ss:$24 sps:$4 sm:$0xff]  }
 0x287   : > { %v9928_v28 = vadd.f32 %v3075_v18, %v9755_v7  ;;  %v3077_v29 = vpop.f32.mrb[7].mxu0 }
 0x288   : > { %v9933_v22 = vadd.f32 %v3077_v29, %v9759_v11 }
 0x289   : > { %12340 = vst [vmem:[#allocation24_spill] sm:$0xff] %v9928_v28  ;;  %3331 = vmatpush1.bf16.xpose.msra.mxu1 %v7964_v51  ;;  %v7984_v51 = vld [vmem:[%s9299_s23 + $0x5e4] ss:$24 sps:$4 sm:$0xff]  }
 0x28a   : > { %3517 = vmatpush1.bf16.xpose.msra.mxu0 %v7967_v52  ;;  %3332 = vmatprep.subr.bf16.mxu1 %v7972_v30  ;;  %v7987_v52 = vld [vmem:[%s9299_s23 + $0x8dc] ss:$24 sps:$4 sm:$0xff]  }
 0x28b   : > { %3518 = vmatprep.subr.bf16.mxu0 %v7975_v34 }
 0x28c   : > { %v3081_v1 = vpop.f32.mrb[8].mxu0 }
 0x28d   : > { %v9936_v60 = vadd.f32 %v3081_v1, %v9761_v13  ;;  %v3083_v31 = vpop.f32.mrb[9].mxu0  ;;  %v7982_v1 = vld [vmem:[%s9299_s23 + $0x5e0] ss:$24 sps:$4 sm:$0xff]  }
 0x28e   : > { %v9939_v7 = vadd.f32 %v3083_v31, %v9763_v15  ;;  %v3085_v32 = vpop.f32.mrb[10].mxu0  ;;  %v7985_v31 = vld [vmem:[%s9299_s23 + $0x8d8] ss:$24 sps:$4 sm:$0xff]  }
 0x28f   : > { %12341 = vst [vmem:[#allocation25_spill] sm:$0xff] %v9936_v60  ;;  %v9944_v11 = vadd.f32 %v3085_v32, %v9767_v21  ;;  %v3087_v45 = vpop.f32.mrb[11].mxu0 }
 0x290   : > { %12342 = vst [vmem:[#allocation26_spill] sm:$0xff] %v9939_v7  ;;  %v9949_v13 = vadd.f32 %v3087_v45, %v9771_v25 }
 0x291   : > { %12343 = vst [vmem:[#allocation27_spill] sm:$0xff] %v9944_v11  ;;  %3333 = vmatpush1.bf16.xpose.msra.mxu1 %v7970_v37  ;;  %v7990_v37 = vld [vmem:[%s9299_s23 + $0x614] ss:$24 sps:$4 sm:$0xff]  }
 0x292   : > { %12344 = vst [vmem:[#allocation28_spill] sm:$0xff] %v9949_v13  ;;  %3519 = vmatpush1.bf16.xpose.msra.mxu0 %v7973_v39  ;;  %3334 = vmatprep.subr.bf16.mxu1 %v7978_v46  ;;  %v7993_v39 = vld [vmem:[%s9299_s23 + $0x904] ss:$24 sps:$4 sm:$0xff]  }
 0x293   : > { %3520 = vmatprep.subr.bf16.mxu0 %v7981_v47 }
 0x294   : > { %v3091_v15 = vpop.f32.mrb[12].mxu0 }
 0x295   : > { %v9952_v24 = vadd.f32 %v3091_v15, %v9773_v26  ;;  %v3093_v53 = vpop.f32.mrb[13].mxu0  ;;  %v7988_v15 = vld [vmem:[%s9299_s23 + $0x610] ss:$24 sps:$4 sm:$0xff]  }
 0x296   : > { %v9955_v21 = vadd.f32 %v3093_v53, %v9775_v27  ;;  %v3095_v16 = vpop.f32.mrb[14].mxu0  ;;  %v7991_v53 = vld [vmem:[%s9299_s23 + $0x900] ss:$24 sps:$4 sm:$0xff]  }
 0x297   : > { %12345 = vst [vmem:[#allocation29_spill] sm:$0xff] %v9952_v24  ;;  %v9960_v25 = vadd.f32 %v3095_v16, %v9779_v35  ;;  %v3097_v18 = vpop.f32.mrb[15].mxu0 }
 0x298   : > { %12346 = vst [vmem:[#allocation30_spill] sm:$0xff] %v9955_v21  ;;  %v9965_v26 = vadd.f32 %v3097_v18, %v9783_v42  ;;  %v8005_v18 = vld [vmem:[%s9299_s23 + $0x964] ss:$24 sps:$4 sm:$0xff]  }
 0x299   : > { %12347 = vst [vmem:[#allocation31_spill] sm:$0xff] %v9960_v25  ;;  %3335 = vmatpush1.bf16.xpose.msra.mxu1 %v7976_v58  ;;  %v7996_v58 = vld [vmem:[%s9299_s23 + $0x644] ss:$24 sps:$4 sm:$0xff]  }
 0x29a   : > { %12348 = vst [vmem:[#allocation32_spill] sm:$0xff] %v9965_v26  ;;  %3521 = vmatpush1.bf16.xpose.msra.mxu0 %v7979_v10  ;;  %3336 = vmatprep.subr.bf16.mxu1 %v7984_v51  ;;  %v8012_v51 = vld [vmem:[%s9299_s23 + $0x6d0] ss:$24 sps:$4 sm:$0xff]  }
 0x29b   : > { %3522 = vmatprep.subr.bf16.mxu0 %v7987_v52  ;;  %v8020_v52 = vld [vmem:[%s9299_s23 + $0x704] ss:$24 sps:$4 sm:$0xff]  }
 0x29c   : > { %v3101_v27 = vpop.f32.mrb[16].mxu0 }
 0x29d   : > { %v9968_v29 = vadd.f32 %v3101_v27, %v9785_v44  ;;  %v3103_v30 = vpop.f32.mrb[17].mxu0  ;;  %v8023_v27 = vld [vmem:[%s9299_s23 + $0x9f4] ss:$24 sps:$4 sm:$0xff]  }
 0x29e   : > { %v9971_v35 = vadd.f32 %v3103_v30, %v9787_v49  ;;  %v3105_v34 = vpop.f32.mrb[18].mxu0  ;;  %v10042_v30 = vld [vmem:[%s9292_s17 + $0xc8] ss:$24 sps:$4 sm:$0xff]  }
 0x29f   : > { %12349 = vst [vmem:[#allocation33_spill] sm:$0xff] %v9968_v29  ;;  %v9976_v42 = vadd.f32 %v3105_v34, %v9791_v55  ;;  %v3107_v32 = vpop.f32.mrb[19].mxu0  ;;  %v8018_v34 = vld [vmem:[%s9299_s23 + $0x700] ss:$24 sps:$4 sm:$0xff]  }
 0x2a0   : > { %12350 = vst [vmem:[#allocation34_spill] sm:$0xff] %v9971_v35  ;;  %v9981_v45 = vadd.f32 %v3107_v32, %v9795_v14  ;;  %v10056_v32 = vld [vmem:[%s9292_s17 + $0xf8] ss:$24 sps:$4 sm:$0xff]  }
 0x2a1   : > { %12351 = vst [vmem:[#allocation35_spill] sm:$0xff] %v9976_v42  ;;  %3337 = vmatpush1.bf16.xpose.msra.mxu1 %v7982_v1  ;;  %v8026_v1 = vld [vmem:[%s9299_s23 + $0x734] ss:$24 sps:$4 sm:$0xff]  }
 0x2a2   : > { %12352 = vst [vmem:[#allocation36_spill] sm:$0xff] %v9981_v45  ;;  %3523 = vmatpush1.bf16.xpose.msra.mxu0 %v7985_v31  ;;  %3678 = vmatprep.subr.bf16.mxu1 %v7993_v39  ;;  %v8029_v31 = vld [vmem:[%s9299_s23 + $0xa24] ss:$24 sps:$4 sm:$0xff]  }
 0x2a3   : > { %3585 = vmatprep.subr.bf16.mxu0 %v7990_v37  ;;  %v8024_v37 = vld [vmem:[%s9299_s23 + $0x730] ss:$24 sps:$4 sm:$0xff]   ;;  %v8032_v39 = vld [vmem:[%s9299_s23 + $0x764] ss:$24 sps:$4 sm:$0xff]  }
 0x2a4   : > { %v3111_v44 = vpop.f32.mrb[20].mxu0 }
 0x2a5   : > { %v9984_v49 = vadd.f32 %v3111_v44, %v9797_v62  ;;  %v3113_v46 = vpop.f32.mrb[21].mxu0  ;;  %v7999_v62 = vld [vmem:[%s9299_s23 + $0x934] ss:$24 sps:$4 sm:$0xff]  }
 0x2a6   : > { %v9987_v55 = vadd.f32 %v3113_v46, %v9799_v63  ;;  %v3115_v47 = vpop.f32.mrb[22].mxu0  ;;  %v7994_v63 = vld [vmem:[%s9299_s23 + $0x640] ss:$24 sps:$4 sm:$0xff]   ;;  %v8035_v44 = vld [vmem:[%s9299_s23 + $0xa54] ss:$24 sps:$4 sm:$0xff]  }
 0x2a7   : > { %12353 = vst [vmem:[#allocation37_spill] sm:$0xff] %v9984_v49  ;;  %v9992_v14 = vadd.f32 %v3115_v47, %v9803_v8  ;;  %v3117_v16 = vpop.f32.mrb[23].mxu0  ;;  %v7997_v8 = vld [vmem:[%s9299_s23 + $0x930] ss:$24 sps:$4 sm:$0xff]   ;;  %v8030_v46 = vld [vmem:[%s9299_s23 + $0x760] ss:$24 sps:$4 sm:$0xff]  }
 0x2a8   : > { %12354 = vst [vmem:[#allocation38_spill] sm:$0xff] %v9987_v55  ;;  %v9996_v10 = vadd.f32 %v3117_v16, %v9807_v19  ;;  %3339 = vmatmul.mubr.bf16.vlgmr.msra.gmra.mrb[24].mxu1 %v9631_v43  ;;  %v8002_v19 = vld [vmem:[%s9299_s23 + $0x674] ss:$24 sps:$4 sm:$0xff]   ;;  %v8000_v43 = vld [vmem:[%s9299_s23 + $0x670] ss:$24 sps:$4 sm:$0xff]  }
 0x2a9   : > { %12355 = vst [vmem:[#allocation39_spill] sm:$0xff] %v9992_v14  ;;  %3525 = vmatmul.mubr.bf16.vlgmr.msra.gmra.mrb[24].mxu0 %v9810_v23  ;;  %3679 = vmatpush1.bf16.xpose.msra.mxu1 %v7991_v53  ;;  %v8008_v23 = vld [vmem:[%s9299_s23 + $0x6a4] ss:$24 sps:$4 sm:$0xff]   ;;  %v8033_v47 = vld [vmem:[%s9299_s23 + $0xa50] ss:$24 sps:$4 sm:$0xff]  }
 0x2aa   : > { %12356 = vst [vmem:[#allocation40_spill] sm:$0xff] %v9996_v10  ;;  %3586 = vmatpush1.bf16.xpose.msra.mxu0 %v7988_v15  ;;  %3348 = vmatprep.mubr.bf16.mxu1 %v9636_v50  ;;  %v8003_v50 = vld [vmem:[%s9299_s23 + $0x960] ss:$24 sps:$4 sm:$0xff]   ;;  %v8038_v15 = vld [vmem:[%s9299_s23 + $0x794] ss:$24 sps:$4 sm:$0xff]  }
 0x2ab   : > { %3587 = vmatprep.subr.bf16.mxu0 %v7996_v58  ;;  %3680 = vmatprep.subr.bf16.mxu1 %v7999_v62  ;;  %v8041_v53 = vld [vmem:[%s9299_s23 + $0xa84] ss:$24 sps:$4 sm:$0xff]   ;;  %v8039_v16 = vld [vmem:[%s9299_s23 + $0xa80] ss:$24 sps:$4 sm:$0xff]   ;;  %v8047_v62 = vld [vmem:[%s9299_s23 + $0xab4] ss:$24 sps:$4 sm:$0xff]  }
 0x2ac   : > { %3534 = vmatprep.mubr.bf16.mxu0 %v9818_v33  ;;  %v8006_v33 = vld [vmem:[%s9299_s23 + $0x6a0] ss:$24 sps:$4 sm:$0xff]   ;;  %v8044_v58 = vld [vmem:[%s9299_s23 + $0x7c4] ss:$24 sps:$4 sm:$0xff]  }
 0x2b0   : > { %3349 = vmatmul.mubr.bf16.gmra.mrb[28].mxu1 %v9645_v54  ;;  %v8011_v54 = vld [vmem:[%s9299_s23 + $0x994] ss:$24 sps:$4 sm:$0xff]  }
 0x2b1   : > { %3535 = vmatmul.mubr.bf16.gmra.mrb[28].mxu0 %v9830_v56  ;;  %3681 = vmatpush1.bf16.xpose.msra.mxu1 %v7997_v8  ;;  %v8009_v56 = vld [vmem:[%s9299_s23 + $0x990] ss:$24 sps:$4 sm:$0xff]  }
 0x2b2   : > { %3588 = vmatpush1.bf16.xpose.msra.mxu0 %v7994_v63  ;;  %3358 = vmatprep.mubr.bf16.mxu1 %v9650_v57  ;;  %v10019_v57 = vld [vmem:[%s9292_s17 + $0x9c] ss:$24 sps:$4 sm:$0xff]   ;;  %v8042_v63 = vld [vmem:[%s9299_s23 + $0x7c0] ss:$24 sps:$4 sm:$0xff]   ;;  %v8045_v8 = vld [vmem:[%s9299_s23 + $0xab0] ss:$24 sps:$4 sm:$0xff]  }
 0x2b3   : > { %3589 = vmatprep.subr.bf16.mxu0 %v8002_v19  ;;  %3682 = vmatprep.subr.bf16.mxu1 %v8005_v18  ;;  %v8050_v19 = vld [vmem:[%s9299_s23 + $0x7f4] ss:$24 sps:$4 sm:$0xff]   ;;  %v8053_v18 = vld [vmem:[%s9299_s23 + $0xae4] ss:$24 sps:$4 sm:$0xff]  }
 0x2b4   : > { %3544 = vmatprep.mubr.bf16.mxu0 %v9838_v3  ;;  %v8017_v3 = vld [vmem:[%s9299_s23 + $0x9c4] ss:$24 sps:$4 sm:$0xff]  }
 0x2b8   : > { %3359 = vmatmul.mubr.bf16.gmra.mrb[32].mxu1 %v9659_v12  ;;  %v8014_v12 = vld [vmem:[%s9299_s23 + $0x6d4] ss:$24 sps:$4 sm:$0xff]  }
 0x2b9   : > { %3545 = vmatmul.mubr.bf16.gmra.mrb[32].mxu0 %v9850_v36  ;;  %3683 = vmatpush1.bf16.xpose.msra.mxu1 %v8003_v50  ;;  %v10028_v36 = vld [vmem:[%s9292_s17 + $0x98] ss:$24 sps:$4 sm:$0xff]  }
 0x2ba   : > { %3590 = vmatpush1.bf16.xpose.msra.mxu0 %v8000_v43  ;;  %3368 = vmatprep.mubr.bf16.mxu1 %v9664_v61  ;;  %v10033_v61 = vld [vmem:[%s9292_s17 + $0xcc] ss:$24 sps:$4 sm:$0xff]   ;;  %v8048_v43 = vld [vmem:[%s9299_s23 + $0x7f0] ss:$24 sps:$4 sm:$0xff]   ;;  %v8051_v50 = vld [vmem:[%s9299_s23 + $0xae0] ss:$24 sps:$4 sm:$0xff]  }
 0x2bb   : > { %3591 = vmatprep.subr.bf16.mxu0 %v8008_v23  ;;  %3684 = vmatprep.subr.bf16.mxu1 %v8011_v54  ;;  %v8056_v23 = vld [vmem:[%s9299_s23 + $0x824] ss:$24 sps:$4 sm:$0xff]   ;;  %v8059_v54 = vld [vmem:[%s9299_s23 + $0xb14] ss:$24 sps:$4 sm:$0xff]  }
 0x2bc   : > { %3554 = vmatprep.mubr.bf16.mxu0 %v10019_v57 }
 0x2c0   : > { %3369 = vmatmul.mubr.bf16.gmra.mrb[36].mxu1 %v9673_v20  ;;  %v8015_v20 = vld [vmem:[%s9299_s23 + $0x9c0] ss:$24 sps:$4 sm:$0xff]  }
 0x2c1   : > { %3555 = vmatmul.mubr.bf16.gmra.mrb[36].mxu0 %v10028_v36  ;;  %3685 = vmatpush1.bf16.xpose.msra.mxu1 %v8009_v56  ;;  %v8057_v56 = vld [vmem:[%s9299_s23 + $0xb10] ss:$24 sps:$4 sm:$0xff]  }
 0x2c2   : > { %3592 = vmatpush1.bf16.xpose.msra.mxu0 %v8006_v33  ;;  %3378 = vmatprep.mubr.bf16.mxu1 %v9678_v0  ;;  %v10047_v0 = vld [vmem:[%s9292_s17 + $0xfc] ss:$24 sps:$4 sm:$0xff]   ;;  %v8054_v33 = vld [vmem:[%s9299_s23 + $0x820] ss:$24 sps:$4 sm:$0xff]  }
 0x2c3   : > { %3593 = vmatprep.subr.bf16.mxu0 %v8014_v12  ;;  %3686 = vmatprep.subr.bf16.mxu1 %v8017_v3  ;;  %v8062_v12 = vld [vmem:[%s9299_s23 + $0x854] ss:$24 sps:$4 sm:$0xff]   ;;  %v8065_v3 = vld [vmem:[%s9299_s23 + $0xb44] ss:$24 sps:$4 sm:$0xff]  }
 0x2c4   : > { %3564 = vmatprep.mubr.bf16.mxu0 %v10033_v61 }
 0x2c8   : > { %3379 = vmatmul.mubr.bf16.gmra.mrb[40].mxu1 %v9687_v2  ;;  %v8021_v2 = vld [vmem:[%s9299_s23 + $0x9f0] ss:$24 sps:$4 sm:$0xff]  }
 0x2c9   : > { %3565 = vmatmul.mubr.bf16.gmra.mrb[40].mxu0 %v10042_v30  ;;  %3687 = vmatpush1.bf16.xpose.msra.mxu1 %v8015_v20  ;;  %v8063_v20 = vld [vmem:[%s9299_s23 + $0xb40] ss:$24 sps:$4 sm:$0xff]  }
 0x2ca   : > { %3594 = vmatpush1.bf16.xpose.msra.mxu0 %v8012_v51  ;;  %3388 = vmatprep.mubr.bf16.mxu1 %v9692_v5  ;;  %v10060_v5 = vld [vmem:[%s9292_s17 + $0x14] ss:$24 sps:$4 sm:$0xff]   ;;  %v8060_v51 = vld [vmem:[%s9299_s23 + $0x850] ss:$24 sps:$4 sm:$0xff]  }
 0x2cb   : > { %3595 = vmatprep.subr.bf16.mxu0 %v8020_v52  ;;  %3688 = vmatprep.subr.bf16.mxu1 %v8023_v27  ;;  %v8068_v52 = vld [vmem:[%s9299_s23 + $0x884] ss:$24 sps:$4 sm:$0xff]   ;;  %v8071_v27 = vld [vmem:[%s9299_s23 + $0xb74] ss:$24 sps:$4 sm:$0xff]  }
 0x2cc   : > { %3574 = vmatprep.mubr.bf16.mxu0 %v10047_v0 }
 0x2d0   : > { %3389 = vmatmul.mubr.bf16.gmra.mrb[44].mxu1 %v9701_v9  ;;  %v8027_v9 = vld [vmem:[%s9299_s23 + $0xa20] ss:$24 sps:$4 sm:$0xff]  }
 0x2d1   : > { %3575 = vmatmul.mubr.bf16.gmra.mrb[44].mxu0 %v10056_v32  ;;  %3689 = vmatpush1.bf16.xpose.msra.mxu1 %v8021_v2  ;;  %v8069_v2 = vld [vmem:[%s9299_s23 + $0xb70] ss:$24 sps:$4 sm:$0xff]  }
 0x2d2   : > { %3596 = vmatpush1.bf16.xpose.msra.mxu0 %v8018_v34  ;;  %3690 = vmatprep.subr.bf16.mxu1 %v8029_v31  ;;  %v8066_v34 = vld [vmem:[%s9299_s23 + $0x880] ss:$24 sps:$4 sm:$0xff]   ;;  %v8077_v31 = vld [vmem:[%s9299_s23 + $0xba4] ss:$24 sps:$4 sm:$0xff]  }
 0x2d3   : > { %3597 = vmatprep.subr.bf16.mxu0 %v8026_v1  ;;  %3617 = vmatprep.mubr.bf16.mxu0 %v10060_v5  ;;  %v8074_v1 = vld [vmem:[%s9299_s23 + $0x8b4] ss:$24 sps:$4 sm:$0xff]  }
 0x2d4   : > { %3710 = vmatprep.mubr.bf16.mxu1 %v9714_v17  ;;  %v8036_v17 = vld [vmem:[%s9299_s23 + $0x790] ss:$24 sps:$4 sm:$0xff]  }
 0x2d9   : > { %3691 = vmatpush1.bf16.xpose.msra.mxu1 %v8027_v9  ;;  %v8075_v9 = vld [vmem:[%s9299_s23 + $0xba0] ss:$24 sps:$4 sm:$0xff]  }
 0x2da   : > { %3598 = vmatpush1.bf16.xpose.msra.mxu0 %v8024_v37  ;;  %3692 = vmatprep.subr.bf16.mxu1 %v8035_v44  ;;  %v8072_v37 = vld [vmem:[%s9299_s23 + $0x8b0] ss:$24 sps:$4 sm:$0xff]   ;;  %v8083_v44 = vld [vmem:[%s9299_s23 + $0xbd4] ss:$24 sps:$4 sm:$0xff]  }
 0x2db   : > { %3599 = vmatprep.subr.bf16.mxu0 %v8032_v39  ;;  %v8080_v39 = vld [vmem:[%s9299_s23 + $0x8e4] ss:$24 sps:$4 sm:$0xff]  }
 0x2e1   : > { %3693 = vmatpush1.bf16.xpose.msra.mxu1 %v8033_v47  ;;  %v8081_v47 = vld [vmem:[%s9299_s23 + $0xbd0] ss:$24 sps:$4 sm:$0xff]  }
 0x2e2   : > { %3600 = vmatpush1.bf16.xpose.msra.mxu0 %v8030_v46  ;;  %3694 = vmatprep.subr.bf16.mxu1 %v8041_v53  ;;  %v8078_v46 = vld [vmem:[%s9299_s23 + $0x8e0] ss:$24 sps:$4 sm:$0xff]   ;;  %v8415_v53 = vld [vmem:[%s9299_s23 + $0x4] ss:$24 sps:$4 sm:$0xff]  }
 0x2e3   : > { %3601 = vmatprep.subr.bf16.mxu0 %v8038_v15  ;;  %v8086_v15 = vld [vmem:[%s9299_s23 + $0x90c] ss:$24 sps:$4 sm:$0xff]  }
 0x2e9   : > { %3695 = vmatpush1.bf16.xpose.msra.mxu1 %v8039_v16  ;;  %v8089_v16 = vld [vmem:[%s9299_s23 + $0x93c] ss:$24 sps:$4 sm:$0xff]  }
 0x2ea   : > { %3602 = vmatpush1.bf16.xpose.msra.mxu0 %v8036_v17  ;;  %3696 = vmatprep.subr.bf16.mxu1 %v8047_v62  ;;  %v8084_v17 = vld [vmem:[%s9299_s23 + $0x908] ss:$24 sps:$4 sm:$0xff]  }
 0x2eb   : > { %3603 = vmatprep.subr.bf16.mxu0 %v8044_v58  ;;  %v10107_v58 = vld [vmem:[%s9292_s17 + $0x10] ss:$24 sps:$4 sm:$0xff]   ;;  %v12357_v62 = vld [vmem:[#allocation20_spill] sm:$0xff] }
 0x2f1   : > { %3697 = vmatpush1.bf16.xpose.msra.mxu1 %v8045_v8  ;;  %v12358_v8 = vld [vmem:[#allocation21_spill] sm:$0xff] }
 0x2f2   : > { %3604 = vmatpush1.bf16.xpose.msra.mxu0 %v8042_v63  ;;  %3698 = vmatprep.subr.bf16.mxu1 %v8053_v18  ;;  %v10112_v63 = vld [vmem:[%s9292_s17 + $0x44] ss:$24 sps:$4 sm:$0xff]   ;;  %v8419_v18 = vld [vmem:[%s9299_s23 + $0x34] ss:$24 sps:$4 sm:$0xff]  }
 0x2f3   : > { %3605 = vmatprep.subr.bf16.mxu0 %v8050_v19  ;;  %v8418_v19 = vld [vmem:[%s9299_s23] ss:$24 sps:$4 sm:$0xff]  }
 0x2f9   : > { %3699 = vmatpush1.bf16.xpose.msra.mxu1 %v8051_v50  ;;  %v8092_v50 = vld [vmem:[%s9299_s23 + $0x96c] ss:$24 sps:$4 sm:$0xff]  }
 0x2fa   : > { %3606 = vmatpush1.bf16.xpose.msra.mxu0 %v8048_v43  ;;  %3700 = vmatprep.subr.bf16.mxu1 %v8059_v54  ;;  %v8087_v43 = vld [vmem:[%s9299_s23 + $0x938] ss:$24 sps:$4 sm:$0xff]  }
 0x2fb   : > { %3607 = vmatprep.subr.bf16.mxu0 %v8056_v23  ;;  %v8420_v23 = vld [vmem:[%s9299_s23 + $0x30] ss:$24 sps:$4 sm:$0xff]   ;;  %v10122_v54 = vld [vmem:[%s9292_s17 + $0x40] ss:$24 sps:$4 sm:$0xff]  }
 0x301   : > { %3701 = vmatpush1.bf16.xpose.msra.mxu1 %v8057_v56  ;;  %v10127_v56 = vld [vmem:[%s9292_s17 + $0x74] ss:$24 sps:$4 sm:$0xff]  }
 0x302   : > { %3608 = vmatpush1.bf16.xpose.msra.mxu0 %v8054_v33  ;;  %3702 = vmatprep.subr.bf16.mxu1 %v8065_v3  ;;  %v12359_v33 = vld [vmem:[#allocation22_spill] sm:$0xff]  ;;  %v8423_v3 = vld [vmem:[%s9299_s23 + $0x64] ss:$24 sps:$4 sm:$0xff]  }
 0x303   : > { %3609 = vmatprep.subr.bf16.mxu0 %v8062_v12  ;;  %v12360_v12 = vld [vmem:[#allocation23_spill] sm:$0xff] }
 0x309   : > { %3703 = vmatpush1.bf16.xpose.msra.mxu1 %v8063_v20  ;;  %v8090_v20 = vld [vmem:[%s9299_s23 + $0x968] ss:$24 sps:$4 sm:$0xff]  }
 0x30a   : > { %3610 = vmatpush1.bf16.xpose.msra.mxu0 %v8060_v51  ;;  %3704 = vmatprep.subr.bf16.mxu1 %v8071_v27  ;;  %v8424_v51 = vld [vmem:[%s9299_s23 + $0x60] ss:$24 sps:$4 sm:$0xff]   ;;  %v8095_v27 = vld [vmem:[%s9299_s23 + $0x99c] ss:$24 sps:$4 sm:$0xff]  }
 0x30b   : > { %3611 = vmatprep.subr.bf16.mxu0 %v8068_v52  ;;  %v8425_v52 = vld [vmem:[%s9299_s23 + $0x94] ss:$24 sps:$4 sm:$0xff]  }
 0x311   : > { %3705 = vmatpush1.bf16.xpose.msra.mxu1 %v8069_v2  ;;  %v10142_v2 = vld [vmem:[%s9292_s17 + $0xa4] ss:$24 sps:$4 sm:$0xff]  }
 0x312   : > { %3612 = vmatpush1.bf16.xpose.msra.mxu0 %v8066_v34  ;;  %3706 = vmatprep.subr.bf16.mxu1 %v8077_v31  ;;  %v10137_v34 = vld [vmem:[%s9292_s17 + $0x70] ss:$24 sps:$4 sm:$0xff]  }
 0x313   : > { %3613 = vmatprep.subr.bf16.mxu0 %v8074_v1  ;;  %v8428_v1 = vld [vmem:[%s9292_s17 + $0x94] ss:$24 sps:$4 sm:$0xff]   ;;  %v8429_v31 = vld [vmem:[%s9299_s23 + $0x90] ss:$24 sps:$4 sm:$0xff]  }
 0x319   : > { %3707 = vmatpush1.bf16.xpose.msra.mxu1 %v8075_v9  ;;  %v8093_v9 = vld [vmem:[%s9299_s23 + $0x998] ss:$24 sps:$4 sm:$0xff]  }
 0x31a   : > { %3614 = vmatpush1.bf16.xpose.msra.mxu0 %v8072_v37  ;;  %3708 = vmatprep.subr.bf16.mxu1 %v8083_v44  ;;  %v8430_v37 = vld [vmem:[%s9299_s23 + $0xc4] ss:$24 sps:$4 sm:$0xff]   ;;  %v10152_v44 = vld [vmem:[%s9292_s17 + $0xa0] ss:$24 sps:$4 sm:$0xff]  }
 0x31b   : > { %3615 = vmatprep.subr.bf16.mxu0 %v8080_v39  ;;  %v8098_v39 = vld [vmem:[%s9299_s23 + $0x9cc] ss:$24 sps:$4 sm:$0xff]  }
 0x321   : > { %3709 = vmatpush1.bf16.xpose.msra.mxu1 %v8081_v47  ;;  %v10157_v47 = vld [vmem:[%s9292_s17 + $0xd4] ss:$24 sps:$4 sm:$0xff]  }
 0x322   : > { %3616 = vmatpush1.bf16.xpose.msra.mxu0 %v8078_v46  ;;  %3771 = vmatprep.subr.bf16.mxu1 %v8086_v15  ;;  %v8433_v46 = vld [vmem:[%s9292_s17 + $0x90] ss:$24 sps:$4 sm:$0xff]   ;;  %v8435_v15 = vld [vmem:[%s9292_s17 + $0xc4] ss:$24 sps:$4 sm:$0xff]  }
 0x323   : > { %4882 = vmatprep.subr.bf16.mxu0 %v8415_v53  ;;  %v8436_v53 = vld [vmem:[%s9299_s23 + $0xf4] ss:$24 sps:$4 sm:$0xff]  }
 0x328   : > { %3711 = vmatmul.mubr.bf16.vlgmr.msra.gmra.mrb[48].mxu1 %v12357_v62  ;;  %v8438_v62 = vld [vmem:[%s9299_s23 + $0x124] ss:$24 sps:$4 sm:$0xff]  }
 0x329   : > { %3618 = vmatmul.mubr.bf16.vlgmr.msra.gmra.mrb[24].mxu0 %v10107_v58  ;;  %3772 = vmatpush1.bf16.xpose.msra.mxu1 %v8084_v17  ;;  %v8437_v17 = vld [vmem:[%s9299_s23 + $0xf0] ss:$24 sps:$4 sm:$0xff]  }
 0x32a   : > { %3627 = vmatprep.mubr.bf16.mxu0 %v10112_v63  ;;  %3773 = vmatprep.subr.bf16.mxu1 %v8089_v16  ;;  %v8096_v16 = vld [vmem:[%s9299_s23 + $0x9c8] ss:$24 sps:$4 sm:$0xff]  }
 0x32b   : > { %3720 = vmatprep.mubr.bf16.mxu1 %v12358_v8  ;;  %4883 = vmatpush1.bf16.msra.mxu0 %v8418_v19  ;;  %v8101_v8 = vld [vmem:[%s9299_s23 + $0x9fc] ss:$24 sps:$4 sm:$0xff]   ;;  %v10167_v19 = vld [vmem:[%s9292_s17 + $0xd0] ss:$24 sps:$4 sm:$0xff]  }
 0x32c   : > { %4884 = vmatprep.subr.bf16.mxu0 %v8419_v18  ;;  %v8440_v18 = vld [vmem:[%s9292_s17 + $0xc0] ss:$24 sps:$4 sm:$0xff]  }
 0x32f   : > { %4885 = vmatpush1.bf16.msra.mxu0 %v8420_v23  ;;  %v8443_v23 = vld [vmem:[%s9299_s23 + $0x120] ss:$24 sps:$4 sm:$0xff]  }
 0x330   : > { %3721 = vmatmul.mubr.bf16.gmra.mrb[52].mxu1 %v12359_v33  ;;  %4886 = vmatprep.subr.bf16.mxu0 %v8423_v3  ;;  %v8444_v33 = vld [vmem:[%s9299_s23 + $0x154] ss:$24 sps:$4 sm:$0xff]  }
 0x331   : > { %3628 = vmatmul.mubr.bf16.gmra.mrb[28].mxu0 %v10122_v54  ;;  %3774 = vmatpush1.bf16.xpose.msra.mxu1 %v8087_v43  ;;  %v10172_v43 = vld [vmem:[%s9292_s17 + $0x104] ss:$24 sps:$4 sm:$0xff]  }
 0x332   : > { %3637 = vmatprep.mubr.bf16.mxu0 %v10127_v56  ;;  %3775 = vmatprep.subr.bf16.mxu1 %v8092_v50  ;;  %v8442_v50 = vld [vmem:[%s9292_s17 + $0xf4] ss:$24 sps:$4 sm:$0xff]  }
 0x333   : > { %3730 = vmatprep.mubr.bf16.mxu1 %v12360_v12  ;;  %4887 = vmatpush1.bf16.msra.mxu0 %v8424_v51  ;;  %v8099_v12 = vld [vmem:[%s9299_s23 + $0x9f8] ss:$24 sps:$4 sm:$0xff]   ;;  %v8104_v3 = vld [vmem:[%s9299_s23 + $0xa2c] ss:$24 sps:$4 sm:$0xff]  }
 0x334   : > { %4888 = vmatprep.subr.bf16.mxu0 %v8425_v52  ;;  %v8445_v51 = vld [vmem:[%s9299_s23 + $0x150] ss:$24 sps:$4 sm:$0xff]  }
 0x335   : > { %v8447_v52 = vld [vmem:[%s9292_s17 + $0xf0] ss:$24 sps:$4 sm:$0xff]  }
 0x337   : > { %4889 = vmatpush1.bf16.msra.mxu0 %v8429_v31  ;;  %v8450_v31 = vld [vmem:[%s9299_s23 + $0x180] ss:$24 sps:$4 sm:$0xff]  }
 0x338   : > { %3731 = vmatmul.mubr.bf16.gmra.mrb[56].mxu1 %v9854_v41  ;;  %4890 = vmatprep.subr.bf16.mxu0 %v8430_v37  ;;  %v8431_v41 = vld [vmem:[%s9299_s23 + $0xc0] ss:$24 sps:$4 sm:$0xff]   ;;  %v8451_v37 = vld [vmem:[%s9299_s23 + $0x1b4] ss:$24 sps:$4 sm:$0xff]  }
 0x339   : > { %3638 = vmatmul.mubr.bf16.gmra.mrb[32].mxu0 %v10137_v34  ;;  %3776 = vmatpush1.bf16.xpose.msra.mxu1 %v8090_v20  ;;  %v10182_v20 = vld [vmem:[%s9292_s17 + $0x100] ss:$24 sps:$4 sm:$0xff]  }
 0x33a   : > { %3647 = vmatprep.mubr.bf16.mxu0 %v10142_v2  ;;  %3777 = vmatprep.subr.bf16.mxu1 %v8095_v27  ;;  %v8448_v27 = vld [vmem:[%s9292_s17 + $0xc] ss:$24 sps:$4 sm:$0xff]  }
 0x33b   : > { %3740 = vmatprep.mubr.bf16.mxu1 %v8428_v1  ;;  %4891 = vmatpush1.bf16.msra.mxu0 %v8431_v41  ;;  %v8449_v1 = vld [vmem:[%s9299_s23 + $0x184] ss:$24 sps:$4 sm:$0xff]   ;;  %v8452_v41 = vld [vmem:[%s9299_s23 + $0x1b0] ss:$24 sps:$4 sm:$0xff]  }
 0x33c   : > { %4892 = vmatprep.subr.bf16.mxu0 %v8436_v53  ;;  %v8455_v53 = vld [vmem:[%s9299_s23 + $0x214] ss:$24 sps:$4 sm:$0xff]  }
 0x33f   : > { %4893 = vmatpush1.bf16.msra.mxu0 %v8437_v17  ;;  %v8105_v17 = vld [vmem:[%s9299_s23 + $0xa58] ss:$24 sps:$4 sm:$0xff]  }
 0x340   : > { %3741 = vmatmul.mubr.bf16.gmra.mrb[60].mxu1 %v8433_v46  ;;  %4894 = vmatprep.subr.bf16.mxu0 %v8438_v62  ;;  %v8453_v46 = vld [vmem:[%s9299_s23 + $0x1e4] ss:$24 sps:$4 sm:$0xff]   ;;  %v8456_v62 = vld [vmem:[%s9299_s23 + $0x210] ss:$24 sps:$4 sm:$0xff]  }
 0x341   : > { %3648 = vmatmul.mubr.bf16.gmra.mrb[36].mxu0 %v10152_v44  ;;  %3778 = vmatpush1.bf16.xpose.msra.mxu1 %v8093_v9  ;;  %v8102_v9 = vld [vmem:[%s9299_s23 + $0xa28] ss:$24 sps:$4 sm:$0xff]  }
 0x342   : > { %3657 = vmatprep.mubr.bf16.mxu0 %v10157_v47  ;;  %3779 = vmatprep.subr.bf16.mxu1 %v8098_v39  ;;  %v8107_v39 = vld [vmem:[%s9299_s23 + $0xa5c] ss:$24 sps:$4 sm:$0xff]  }
 0x343   : > { %3750 = vmatprep.mubr.bf16.mxu1 %v8435_v15  ;;  %4895 = vmatpush1.bf16.msra.mxu0 %v8443_v23  ;;  %v8454_v15 = vld [vmem:[%s9299_s23 + $0x1e0] ss:$24 sps:$4 sm:$0xff]  }
 0x344   : > { %4896 = vmatprep.subr.bf16.mxu0 %v8444_v33  ;;  %v8108_v23 = vld [vmem:[%s9299_s23 + $0xa88] ss:$24 sps:$4 sm:$0xff]   ;;  %v8113_v33 = vld [vmem:[%s9299_s23 + $0xabc] ss:$24 sps:$4 sm:$0xff]  }
 0x347   : > { %4897 = vmatpush1.bf16.msra.mxu0 %v8445_v51  ;;  %v8462_v51 = vld [vmem:[%s9299_s23 + $0x2a0] ss:$24 sps:$4 sm:$0xff]  }
 0x348   : > { %3751 = vmatmul.mubr.bf16.gmra.mrb[64].mxu1 %v8440_v18  ;;  %4898 = vmatprep.subr.bf16.mxu0 %v8449_v1  ;;  %v8458_v18 = vld [vmem:[%s9299_s23 + $0x240] ss:$24 sps:$4 sm:$0xff]   ;;  %v8116_v1 = vld [vmem:[%s9299_s23 + $0xaec] ss:$24 sps:$4 sm:$0xff]  }
 0x349   : > { %3658 = vmatmul.mubr.bf16.gmra.mrb[40].mxu0 %v10167_v19  ;;  %3780 = vmatpush1.bf16.xpose.msra.mxu1 %v8096_v16  ;;  %v8110_v16 = vld [vmem:[%s9299_s23 + $0xa8c] ss:$24 sps:$4 sm:$0xff]  }
 0x34a   : > { %3667 = vmatprep.mubr.bf16.mxu0 %v10172_v43  ;;  %3781 = vmatprep.subr.bf16.mxu1 %v8101_v8  ;;  %v8457_v8 = vld [vmem:[%s9299_s23 + $0x244] ss:$24 sps:$4 sm:$0xff]  }
 0x34b   : > { %3760 = vmatprep.mubr.bf16.mxu1 %v8442_v50  ;;  %4899 = vmatpush1.bf16.msra.mxu0 %v8450_v31  ;;  %v8459_v50 = vld [vmem:[%s9299_s23 + $0x274] ss:$24 sps:$4 sm:$0xff]   ;;  %v8464_v31 = vld [vmem:[%s9299_s23 + $0x2d0] ss:$24 sps:$4 sm:$0xff]  }
 0x34c   : > { %4900 = vmatprep.subr.bf16.mxu0 %v8451_v37  ;;  %v8465_v37 = vld [vmem:[%s9299_s23 + $0x304] ss:$24 sps:$4 sm:$0xff]  }
 0x34f   : > { %4901 = vmatpush1.bf16.msra.mxu0 %v8452_v41  ;;  %v3969_v41 = vmax.f32 %v9904_v38, %v9907_v40 }
 0x350   : > { %3761 = vmatmul.mubr.bf16.gmra.mrb[68].mxu1 %v8447_v52  ;;  %4902 = vmatprep.subr.bf16.mxu0 %v8453_v46  ;;  %v8463_v52 = vld [vmem:[%s9299_s23 + $0x2d4] ss:$24 sps:$4 sm:$0xff]  }
 0x351   : > { %3668 = vmatmul.mubr.bf16.gmra.mrb[44].mxu0 %v10182_v20  ;;  %3782 = vmatpush1.bf16.xpose.msra.mxu1 %v8099_v12  ;;  %v8460_v12 = vld [vmem:[%s9299_s23 + $0x270] ss:$24 sps:$4 sm:$0xff]  }
 0x352   : > { %3803 = vmatprep.mubr.bf16.mxu1 %v8448_v27  ;;  %3783 = vmatprep.subr.bf16.mxu1 %v8104_v3  ;;  %v8461_v3 = vld [vmem:[%s9299_s23 + $0x2a4] ss:$24 sps:$4 sm:$0xff]   ;;  %v8111_v27 = vld [vmem:[%s9299_s23 + $0xab8] ss:$24 sps:$4 sm:$0xff]  }
 0x353   : > { %4903 = vmatpush1.bf16.msra.mxu0 %v8454_v15  ;;  %v3978_v15 = vmax.f32 %v9912_v48, %v9917_v6 }
 0x354   : > { %4904 = vmatprep.subr.bf16.mxu0 %v8455_v53 }
 0x357   : > { %4905 = vmatpush1.bf16.msra.mxu0 %v8456_v62  ;;  %v8117_v62 = vld [vmem:[%s9299_s23 + $0xb18] ss:$24 sps:$4 sm:$0xff]  }
 0x358   : > { %4906 = vmatprep.subr.bf16.mxu0 %v8457_v8  ;;  %v8123_v8 = vld [vmem:[%s9299_s23 + $0xb78] ss:$24 sps:$4 sm:$0xff]  }
 0x359   : > { %3784 = vmatpush1.bf16.xpose.msra.mxu1 %v8102_v9  ;;  %v8114_v9 = vld [vmem:[%s9299_s23 + $0xae8] ss:$24 sps:$4 sm:$0xff]  }
 0x35a   : > { %3785 = vmatprep.subr.bf16.mxu1 %v8107_v39  ;;  %v8119_v39 = vld [vmem:[%s9299_s23 + $0xb1c] ss:$24 sps:$4 sm:$0xff]  }
 0x35b   : > { %4907 = vmatpush1.bf16.msra.mxu0 %v8458_v18 }
 0x35c   : > { %4908 = vmatprep.subr.bf16.mxu0 %v8459_v50 }
 0x35f   : > { %4909 = vmatpush1.bf16.msra.mxu0 %v8460_v12  ;;  %v3987_v12 = vmax.f32 %v9920_v4, %v9923_v59 }
 0x360   : > { %4910 = vmatprep.subr.bf16.mxu0 %v8461_v3 }
 0x361   : > { %3786 = vmatpush1.bf16.xpose.msra.mxu1 %v8105_v17 }
 0x362   : > { %3787 = vmatprep.subr.bf16.mxu1 %v8110_v16 }
 0x363   : > { %4911 = vmatpush1.bf16.msra.mxu0 %v8462_v51  ;;  %v3996_v51 = vmax.f32 %v9928_v28, %v9933_v22  ;;  %v8470_v28 = vld [vmem:[%s9292_s17 + $0x68] ss:$24 sps:$4 sm:$0xff]  }
 0x364   : > { %4912 = vmatprep.subr.bf16.mxu0 %v8463_v52 }
 0x367   : > { %4913 = vmatpush1.bf16.msra.mxu0 %v8464_v31  ;;  %v8120_v31 = vld [vmem:[%s9299_s23 + $0xb48] ss:$24 sps:$4 sm:$0xff]  }
 0x368   : > { %4975 = vmatprep.subr.bf16.mxu0 %v8465_v37 }
 0x369   : > { %3788 = vmatpush1.bf16.xpose.msra.mxu1 %v8108_v23  ;;  %v8122_v23 = vld [vmem:[%s9299_s23 + $0xb4c] ss:$24 sps:$4 sm:$0xff]  }
 0x36a   : > { %3789 = vmatprep.subr.bf16.mxu1 %v8113_v33 }
 0x371   : > { %3790 = vmatpush1.bf16.xpose.msra.mxu1 %v8111_v27 }
 0x372   : > { %3791 = vmatprep.subr.bf16.mxu1 %v8116_v1 }
 0x379   : > { %3792 = vmatpush1.bf16.xpose.msra.mxu1 %v8114_v9 }
 0x37a   : > { %3793 = vmatprep.subr.bf16.mxu1 %v8119_v39 }
 0x37b   : > { %v10216_v46 = vpop.f32.mrb[24].mxu1 }
 0x37c   : > { %v10221_v53 = vmax.f32 %v3969_v41, %v10216_v46  ;;  %v10223_v17 = vpop.f32.mrb[25].mxu1  ;;  %v8125_v41 = vld [vmem:[%s9299_s23 + $0xb7c] ss:$24 sps:$4 sm:$0xff]  }
 0x37d   : > { %v10225_v16 = vpop.f32.mrb[26].mxu1 }
 0x37e   : > { %v10231_v18 = vmax.f32 %v3978_v15, %v10225_v16  ;;  %v10233_v50 = vpop.f32.mrb[27].mxu1 }
 0x381   : > { %3794 = vmatpush1.bf16.xpose.msra.mxu1 %v8117_v62  ;;  %v4005_v62 = vmax.f32 %v9936_v60, %v9939_v7  ;;  %v8128_v60 = vld [vmem:[%s9299_s23 + $0xbac] ss:$24 sps:$4 sm:$0xff]  }
 0x382   : > { %3795 = vmatprep.subr.bf16.mxu1 %v8122_v23 }
 0x383   : > { %v10240_v3 = vpop.f32.mrb[28].mxu1 }
 0x384   : > { %v10245_v52 = vmax.f32 %v3987_v12, %v10240_v3  ;;  %v10247_v27 = vpop.f32.mrb[29].mxu1  ;;  %v4014_v12 = vmax.f32 %v9944_v11, %v9949_v13  ;;  %v4023_v11 = vmax.f32 %v9952_v24, %v9955_v21  ;;  %v8131_v24 = vld [vmem:[%s9299_s23 + $0xbdc] ss:$24 sps:$4 sm:$0xff]  }
 0x385   : > { %v10249_v1 = vpop.f32.mrb[30].mxu1 }
 0x386   : > { %v10255_v9 = vmax.f32 %v3996_v51, %v10249_v1  ;;  %v10257_v39 = vpop.f32.mrb[31].mxu1 }
 0x389   : > { %3796 = vmatpush1.bf16.xpose.msra.mxu1 %v8120_v31  ;;  %v4032_v31 = vmax.f32 %v9960_v25, %v9965_v26  ;;  %v4041_v25 = vmax.f32 %v9968_v29, %v9971_v35  ;;  %v8134_v29 = vld [vmem:[%s9299_s23 + $0x914] ss:$24 sps:$4 sm:$0xff]  }
 0x38a   : > { %3797 = vmatprep.subr.bf16.mxu1 %v8125_v41 }
 0x38b   : > { %v10264_v23 = vpop.f32.mrb[32].mxu1 }
 0x38c   : > { %12361 = vst [vmem:[#allocation20_spill] sm:$0xff] %v10264_v23  ;;  %v10269_v51 = vmax.f32 %v4005_v62, %v10264_v23  ;;  %v10271_v37 = vpop.f32.mrb[33].mxu1  ;;  %v8126_v23 = vld [vmem:[%s9299_s23 + $0xba8] ss:$24 sps:$4 sm:$0xff]  }
 0x38d   : > { %v10273_v33 = vpop.f32.mrb[34].mxu1 }
 0x38e   : > { %12362 = vst [vmem:[#allocation21_spill] sm:$0xff] %v10273_v33  ;;  %v10279_v15 = vmax.f32 %v4014_v12, %v10273_v33  ;;  %v10281_v41 = vpop.f32.mrb[35].mxu1 }
 0x38f   : > { %12363 = vst [vmem:[#allocation22_spill] sm:$0xff] %v10281_v41 }
 0x391   : > { %3798 = vmatpush1.bf16.xpose.msra.mxu1 %v8123_v8  ;;  %v4050_v8 = vmax.f32 %v9976_v42, %v9981_v45  ;;  %v4059_v42 = vmax.f32 %v9984_v49, %v9987_v55  ;;  %v8135_v49 = vld [vmem:[%s9299_s23 + $0x940] ss:$24 sps:$4 sm:$0xff]  }
 0x392   : > { %3799 = vmatprep.subr.bf16.mxu1 %v8128_v60 }
 0x393   : > { %v10288_v13 = vpop.f32.mrb[36].mxu1 }
 0x394   : > { %12364 = vst [vmem:[#allocation23_spill] sm:$0xff] %v10288_v13  ;;  %v10293_v12 = vmax.f32 %v4023_v11, %v10288_v13  ;;  %v10295_v7 = vpop.f32.mrb[37].mxu1  ;;  %v8129_v13 = vld [vmem:[%s9299_s23 + $0xbd8] ss:$24 sps:$4 sm:$0xff]  }
 0x395   : > { %12365 = vst [vmem:[#allocation41_spill] sm:$0xff] %v10295_v7  ;;  %v10297_v33 = vpop.f32.mrb[38].mxu1 }
 0x396   : > { %12366 = vst [vmem:[#allocation42_spill] sm:$0xff] %v10297_v33  ;;  %v10303_v62 = vmax.f32 %v4032_v31, %v10297_v33  ;;  %v10305_v60 = vpop.f32.mrb[39].mxu1 }
 0x397   : > { %12367 = vst [vmem:[#allocation43_spill] sm:$0xff] %v10305_v60 }
 0x399   : > { %3800 = vmatpush1.bf16.xpose.msra.mxu1 %v8126_v23 }
 0x39a   : > { %3801 = vmatprep.subr.bf16.mxu1 %v8131_v24 }
 0x39b   : > { %v10312_v26 = vpop.f32.mrb[40].mxu1 }
 0x39c   : > { %12368 = vst [vmem:[#allocation44_spill] sm:$0xff] %v10312_v26  ;;  %v10317_v31 = vmax.f32 %v4041_v25, %v10312_v26  ;;  %v10319_v21 = vpop.f32.mrb[41].mxu1  ;;  %v8143_v26 = vld [vmem:[%s9299_s23 + $0x9a4] ss:$24 sps:$4 sm:$0xff]  }
 0x39d   : > { %v10321_v33 = vpop.f32.mrb[42].mxu1 }
 0x39e   : > { %12369 = vst [vmem:[#allocation45_spill] sm:$0xff] %v10321_v33  ;;  %v10327_v11 = vmax.f32 %v4050_v8, %v10321_v33  ;;  %v10329_v24 = vpop.f32.mrb[43].mxu1  ;;  %v4068_v8 = vmax.f32 %v9992_v14, %v9996_v10  ;;  %v8137_v14 = vld [vmem:[%s9299_s23 + $0x944] ss:$24 sps:$4 sm:$0xff]   ;;  %v8466_v10 = vld [vmem:[%s9292_s17 + $0x8] ss:$24 sps:$4 sm:$0xff]  }
 0x39f   : > { %12370 = vst [vmem:[#allocation46_spill] sm:$0xff] %v10329_v24  ;;  %v8469_v33 = vld [vmem:[%s9292_s17 + $0x6c] ss:$24 sps:$4 sm:$0xff]  }
 0x3a1   : > { %3802 = vmatpush1.bf16.xpose.msra.mxu1 %v8129_v13  ;;  %v8132_v13 = vld [vmem:[%s9299_s23 + $0x910] ss:$24 sps:$4 sm:$0xff]  }
 0x3a2   : > { %3864 = vmatprep.subr.bf16.mxu1 %v8134_v29 }
 0x3a3   : > { %v10336_v45 = vpop.f32.mrb[44].mxu1 }
 0x3a4   : > { %12371 = vst [vmem:[#allocation47_spill] sm:$0xff] %v10336_v45  ;;  %v10341_v23 = vmax.f32 %v4059_v42, %v10336_v45  ;;  %v10343_v35 = vpop.f32.mrb[45].mxu1  ;;  %v8467_v45 = vld [vmem:[%s9292_s17 + $0x3c] ss:$24 sps:$4 sm:$0xff]   ;;  %v8138_v42 = vld [vmem:[%s9299_s23 + $0x970] ss:$24 sps:$4 sm:$0xff]  }
 0x3a5   : > { %12372 = vst [vmem:[#allocation48_spill] sm:$0xff] %v10343_v35  ;;  %v10345_v25 = vpop.f32.mrb[46].mxu1 }
 0x3a6   : > { %12373 = vst [vmem:[#allocation49_spill] sm:$0xff] %v10345_v25  ;;  %v10351_v29 = vmax.f32 %v4068_v8, %v10345_v25  ;;  %v10353_v55 = vpop.f32.mrb[47].mxu1  ;;  %v8140_v8 = vld [vmem:[%s9299_s23 + $0x974] ss:$24 sps:$4 sm:$0xff]   ;;  %v8468_v25 = vld [vmem:[%s9292_s17 + $0x38] ss:$24 sps:$4 sm:$0xff]  }
 0x3a7   : > { %12374 = vst [vmem:[#allocation50_spill] sm:$0xff] %v10353_v55 }
 0x3a8   : > { %3804 = vmatmul.mubr.bf16.vlgmr.msra.gmra.mrb[48].mxu1 %v8466_v10  ;;  %v8149_v10 = vld [vmem:[%s9299_s23 + $0xa04] ss:$24 sps:$4 sm:$0xff]  }
 0x3a9   : > { %3865 = vmatpush1.bf16.xpose.msra.mxu1 %v8132_v13  ;;  %3813 = vmatprep.mubr.bf16.mxu1 %v8467_v45  ;;  %v8141_v45 = vld [vmem:[%s9299_s23 + $0x9a0] ss:$24 sps:$4 sm:$0xff]   ;;  %v8167_v13 = vld [vmem:[%s9299_s23 + $0xb24] ss:$24 sps:$4 sm:$0xff]  }
 0x3aa   : > { %3866 = vmatprep.subr.bf16.mxu1 %v8137_v14  ;;  %v8146_v14 = vld [vmem:[%s9299_s23 + $0x9d4] ss:$24 sps:$4 sm:$0xff]  }
 0x3b0   : > { %3814 = vmatmul.mubr.bf16.gmra.mrb[52].mxu1 %v8468_v25  ;;  %v8164_v25 = vld [vmem:[%s9299_s23 + $0xaf4] ss:$24 sps:$4 sm:$0xff]  }
 0x3b1   : > { %3867 = vmatpush1.bf16.xpose.msra.mxu1 %v8135_v49  ;;  %3823 = vmatprep.mubr.bf16.mxu1 %v8469_v33  ;;  %v8144_v49 = vld [vmem:[%s9299_s23 + $0x9d0] ss:$24 sps:$4 sm:$0xff]   ;;  %v8161_v33 = vld [vmem:[%s9299_s23 + $0xac4] ss:$24 sps:$4 sm:$0xff]  }
 0x3b2   : > { %3868 = vmatprep.subr.bf16.mxu1 %v8140_v8  ;;  %v12375_v8 = vmax.f32 %v10221_v53, %v10223_v17  ;;  %v8170_v53 = vld [vmem:[%s9299_s23 + $0xb54] ss:$24 sps:$4 sm:$0xff]  }
 0x3b8   : > { %3824 = vmatmul.mubr.bf16.gmra.mrb[56].mxu1 %v8470_v28  ;;  %v8147_v28 = vld [vmem:[%s9299_s23 + $0xa00] ss:$24 sps:$4 sm:$0xff]  }
 0x3b9   : > { %3869 = vmatpush1.bf16.xpose.msra.mxu1 %v8138_v42  ;;  %3833 = vmatprep.mubr.bf16.mxu1 %v10019_v57  ;;  %v8150_v57 = vld [vmem:[%s9299_s23 + $0xa30] ss:$24 sps:$4 sm:$0xff]  }
 0x3ba   : > { %3870 = vmatprep.subr.bf16.mxu1 %v8143_v26  ;;  %v8152_v26 = vld [vmem:[%s9299_s23 + $0xa34] ss:$24 sps:$4 sm:$0xff]  }
 0x3c0   : > { %3834 = vmatmul.mubr.bf16.gmra.mrb[60].mxu1 %v10028_v36  ;;  %v8155_v36 = vld [vmem:[%s9299_s23 + $0xa64] ss:$24 sps:$4 sm:$0xff]  }
 0x3c1   : > { %3871 = vmatpush1.bf16.xpose.msra.mxu1 %v8141_v45  ;;  %3843 = vmatprep.mubr.bf16.mxu1 %v10033_v61  ;;  %v8153_v61 = vld [vmem:[%s9299_s23 + $0xa60] ss:$24 sps:$4 sm:$0xff]  }
 0x3c2   : > { %3872 = vmatprep.subr.bf16.mxu1 %v8146_v14 }
 0x3c8   : > { %3844 = vmatmul.mubr.bf16.gmra.mrb[64].mxu1 %v10042_v30  ;;  %v8158_v30 = vld [vmem:[%s9299_s23 + $0xa94] ss:$24 sps:$4 sm:$0xff]  }
 0x3c9   : > { %3873 = vmatpush1.bf16.xpose.msra.mxu1 %v8144_v49  ;;  %3853 = vmatprep.mubr.bf16.mxu1 %v10047_v0  ;;  %v8156_v0 = vld [vmem:[%s9299_s23 + $0xa90] ss:$24 sps:$4 sm:$0xff]  }
 0x3ca   : > { %3874 = vmatprep.subr.bf16.mxu1 %v8149_v10  ;;  %v8165_v10 = vld [vmem:[%s9299_s23 + $0xb20] ss:$24 sps:$4 sm:$0xff]  }
 0x3d0   : > { %3854 = vmatmul.mubr.bf16.gmra.mrb[68].mxu1 %v10056_v32  ;;  %v8159_v32 = vld [vmem:[%s9299_s23 + $0xac0] ss:$24 sps:$4 sm:$0xff]  }
 0x3d1   : > { %3875 = vmatpush1.bf16.xpose.msra.mxu1 %v8147_v28  ;;  %3896 = vmatprep.mubr.bf16.mxu1 %v10060_v5  ;;  %v8162_v5 = vld [vmem:[%s9299_s23 + $0xaf0] ss:$24 sps:$4 sm:$0xff]  }
 0x3d2   : > { %3876 = vmatprep.subr.bf16.mxu1 %v8152_v26  ;;  %v12376_v26 = vmax.f32 %v10231_v18, %v10233_v50 }
 0x3d9   : > { %3877 = vmatpush1.bf16.xpose.msra.mxu1 %v8150_v57 }
 0x3da   : > { %3878 = vmatprep.subr.bf16.mxu1 %v8155_v36 }
 0x3e1   : > { %3879 = vmatpush1.bf16.xpose.msra.mxu1 %v8153_v61  ;;  %v8171_v61 = vld [vmem:[%s9299_s23 + $0xb80] ss:$24 sps:$4 sm:$0xff]  }
 0x3e2   : > { %3880 = vmatprep.subr.bf16.mxu1 %v8158_v30 }
 0x3e9   : > { %3881 = vmatpush1.bf16.xpose.msra.mxu1 %v8156_v0  ;;  %v12377_v0 = vmax.f32 %v10245_v52, %v10247_v27  ;;  %v8173_v52 = vld [vmem:[%s9299_s23 + $0xb84] ss:$24 sps:$4 sm:$0xff]  }
 0x3ea   : > { %3882 = vmatprep.subr.bf16.mxu1 %v8161_v33 }
 0x3f1   : > { %3883 = vmatpush1.bf16.xpose.msra.mxu1 %v8159_v32 }
 0x3f2   : > { %3884 = vmatprep.subr.bf16.mxu1 %v8164_v25  ;;  %v8168_v25 = vld [vmem:[%s9299_s23 + $0xb50] ss:$24 sps:$4 sm:$0xff]  }
 0x3f9   : > { %3885 = vmatpush1.bf16.xpose.msra.mxu1 %v8162_v5 }
 0x3fa   : > { %3886 = vmatprep.subr.bf16.mxu1 %v8167_v13  ;;  %v12379_v13 = vmax.f32 %v10255_v9, %v10257_v39 }
 0x3fc   : > { %v10390_v42 = vpop.f32.mrb[24].mxu0 }
 0x3fd   : > { %v10396_v45 = vmax.f32 %v12375_v8, %v10390_v42  ;;  %v10398_v14 = vpop.f32.mrb[25].mxu0 }
 0x3fe   : > { %v10400_v49 = vpop.f32.mrb[26].mxu0 }
 0x3ff   : > { %v10409_v57 = vmax.f32 %v12376_v26, %v10400_v49  ;;  %v10411_v36 = vpop.f32.mrb[27].mxu0  ;;  %v12386_v26 = vmax.f32 %v10293_v12, %v10295_v7  ;;  %v8179_v12 = vld [vmem:[%s9299_s23 + $0xbe4] ss:$24 sps:$4 sm:$0xff]  }
 0x401   : > { %3887 = vmatpush1.bf16.xpose.msra.mxu1 %v8165_v10 }
 0x402   : > { %3888 = vmatprep.subr.bf16.mxu1 %v8170_v53 }
 0x404   : > { %v10416_v30 = vpop.f32.mrb[28].mxu0 }
 0x405   : > { %v10422_v33 = vmax.f32 %v12377_v0, %v10416_v30  ;;  %v10424_v18 = vpop.f32.mrb[29].mxu0  ;;  %v12381_v0 = vmax.f32 %v10269_v51, %v10271_v37  ;;  %v8176_v51 = vld [vmem:[%s9299_s23 + $0xbb4] ss:$24 sps:$4 sm:$0xff]  }
 0x406   : > { %v10426_v32 = vpop.f32.mrb[30].mxu0 }
 0x407   : > { %12378 = vst [vmem:[#allocation51_spill] sm:$0xff] %v10426_v32  ;;  %v10435_v8 = vmax.f32 %v12379_v13, %v10426_v32  ;;  %v10437_v10 = vpop.f32.mrb[31].mxu0 }
 0x409   : > { %3889 = vmatpush1.bf16.xpose.msra.mxu1 %v8168_v25  ;;  %v12383_v25 = vmax.f32 %v10279_v15, %v10281_v41  ;;  %v12392_v41 = vmax.f32 %v10317_v31, %v10319_v21  ;;  %v8471_v31 = vld [vmem:[%s9299_s23 + $0xc] ss:$24 sps:$4 sm:$0xff]  }
 0x40a   : > { %3890 = vmatprep.subr.bf16.mxu1 %v8173_v52 }
 0x40c   : > { %v10442_v53 = vpop.f32.mrb[32].mxu0 }
 0x40d   : > { %12380 = vst [vmem:[#allocation52_spill] sm:$0xff] %v10442_v53  ;;  %v10448_v5 = vmax.f32 %v12381_v0, %v10442_v53  ;;  %v10450_v9 = vpop.f32.mrb[33].mxu0 }
 0x40e   : > { %v10452_v13 = vpop.f32.mrb[34].mxu0 }
 0x40f   : > { %12382 = vst [vmem:[#allocation53_spill] sm:$0xff] %v10452_v13  ;;  %v10461_v52 = vmax.f32 %v12383_v25, %v10452_v13  ;;  %v10463_v28 = vpop.f32.mrb[35].mxu0  ;;  %v8174_v13 = vld [vmem:[%s9299_s23 + $0xbb0] ss:$24 sps:$4 sm:$0xff]  }
 0x410   : > { %12384 = vst [vmem:[#allocation54_spill] sm:$0xff] %v10463_v28 }
 0x411   : > { %3891 = vmatpush1.bf16.xpose.msra.mxu1 %v8171_v61  ;;  %v12389_v61 = vmax.f32 %v10303_v62, %v10305_v60  ;;  %v12398_v60 = vmax.f32 %v10341_v23, %v10343_v35  ;;  %v8472_v23 = vld [vmem:[%s9299_s23 + $0x8] ss:$24 sps:$4 sm:$0xff]  }
 0x412   : > { %3892 = vmatprep.subr.bf16.mxu1 %v8176_v51 }
 0x414   : > { %v10468_v53 = vpop.f32.mrb[36].mxu0 }
 0x415   : > { %12385 = vst [vmem:[#allocation55_spill] sm:$0xff] %v10468_v53  ;;  %v10474_v32 = vmax.f32 %v12386_v26, %v10468_v53  ;;  %v10476_v15 = vpop.f32.mrb[37].mxu0 }
 0x416   : > { %12387 = vst [vmem:[#allocation56_spill] sm:$0xff] %v10476_v15  ;;  %v10478_v25 = vpop.f32.mrb[38].mxu0 }
 0x417   : > { %12388 = vst [vmem:[#allocation57_spill] sm:$0xff] %v10478_v25  ;;  %v10487_v51 = vmax.f32 %v12389_v61, %v10478_v25  ;;  %v10489_v0 = vpop.f32.mrb[39].mxu0  ;;  %v8177_v25 = vld [vmem:[%s9299_s23 + $0xbe0] ss:$24 sps:$4 sm:$0xff]  }
 0x418   : > { %12390 = vst [vmem:[#allocation58_spill] sm:$0xff] %v10489_v0 }
 0x419   : > { %3893 = vmatpush1.bf16.xpose.msra.mxu1 %v8174_v13  ;;  %v12395_v13 = vmax.f32 %v10327_v11, %v10329_v24 }
 0x41a   : > { %3894 = vmatprep.subr.bf16.mxu1 %v8179_v12 }
 0x41c   : > { %v10494_v53 = vpop.f32.mrb[40].mxu0 }
 0x41d   : > { %12391 = vst [vmem:[#allocation59_spill] sm:$0xff] %v10494_v53  ;;  %v10500_v7 = vmax.f32 %v12392_v41, %v10494_v53  ;;  %v10502_v62 = vpop.f32.mrb[41].mxu0  ;;  %v8473_v41 = vld [vmem:[%s9299_s23 + $0x3c] ss:$24 sps:$4 sm:$0xff]  }
 0x41e   : > { %12393 = vst [vmem:[#allocation60_spill] sm:$0xff] %v10502_v62  ;;  %v10504_v61 = vpop.f32.mrb[42].mxu0 }
 0x41f   : > { %12394 = vst [vmem:[#allocation61_spill] sm:$0xff] %v10504_v61  ;;  %v10513_v12 = vmax.f32 %v12395_v13, %v10504_v61  ;;  %v10515_v26 = vpop.f32.mrb[43].mxu0 }
 0x420   : > { %12396 = vst [vmem:[#allocation62_spill] sm:$0xff] %v10515_v26 }
 0x421   : > { %3895 = vmatpush1.bf16.xpose.msra.mxu1 %v8177_v25  ;;  %v12401_v25 = vmax.f32 %v10351_v29, %v10353_v55  ;;  %v8474_v29 = vld [vmem:[%s9299_s23 + $0x38] ss:$24 sps:$4 sm:$0xff]  }
 0x422   : > { %5254 = vmatprep.subr.bf16.mxu1 %v8471_v31 }
 0x424   : > { %v10520_v53 = vpop.f32.mrb[44].mxu0 }
 0x425   : > { %12397 = vst [vmem:[#allocation63_spill] sm:$0xff] %v10520_v53  ;;  %v10526_v11 = vmax.f32 %v12398_v60, %v10520_v53  ;;  %v10528_v13 = vpop.f32.mrb[45].mxu0  ;;  %v8478_v60 = vld [vmem:[%s9299_s23 + $0x98] ss:$24 sps:$4 sm:$0xff]  }
 0x426   : > { %12399 = vst [vmem:[#allocation64_spill] sm:$0xff] %v10528_v13  ;;  %v10530_v61 = vpop.f32.mrb[46].mxu0 }
 0x427   : > { %12400 = vst [vmem:[#allocation65_spill] sm:$0xff] %v10530_v61  ;;  %v10538_v31 = vmax.f32 %v12401_v25, %v10530_v61  ;;  %v10540_v24 = vpop.f32.mrb[47].mxu0  ;;  %v8475_v25 = vld [vmem:[%s9299_s23 + $0x6c] ss:$24 sps:$4 sm:$0xff]  }
 0x428   : > { %12402 = vst [vmem:[#allocation66_spill] sm:$0xff] %v10540_v24  ;;  %3897 = vmatmul.mubr.bf16.vlgmr.msra.gmra.mrb[48].mxu1 %v10107_v58  ;;  %v8476_v58 = vld [vmem:[%s9299_s23 + $0x68] ss:$24 sps:$4 sm:$0xff]  }
 0x429   : > { %3906 = vmatprep.mubr.bf16.mxu1 %v10112_v63  ;;  %5255 = vmatpush1.bf16.msra.mxu1 %v8472_v23  ;;  %v8477_v63 = vld [vmem:[%s9299_s23 + $0x9c] ss:$24 sps:$4 sm:$0xff]   ;;  %v8482_v23 = vld [vmem:[%s9299_s23 + $0xf8] ss:$24 sps:$4 sm:$0xff]  }
 0x42a   : > { %5256 = vmatprep.subr.bf16.mxu1 %v8473_v41  ;;  %v8479_v41 = vld [vmem:[%s9299_s23 + $0xcc] ss:$24 sps:$4 sm:$0xff]  }
 0x42d   : > { %5257 = vmatpush1.bf16.msra.mxu1 %v8474_v29  ;;  %v8483_v29 = vld [vmem:[%s9299_s23 + $0x12c] ss:$24 sps:$4 sm:$0xff]  }
 0x42e   : > { %5258 = vmatprep.subr.bf16.mxu1 %v8475_v25  ;;  %v8487_v25 = vld [vmem:[%s9299_s23 + $0x18c] ss:$24 sps:$4 sm:$0xff]  }
 0x430   : > { %3907 = vmatmul.mubr.bf16.gmra.mrb[52].mxu1 %v10122_v54  ;;  %v8480_v54 = vld [vmem:[%s9299_s23 + $0xc8] ss:$24 sps:$4 sm:$0xff]  }
 0x431   : > { %3916 = vmatprep.mubr.bf16.mxu1 %v10127_v56  ;;  %5259 = vmatpush1.bf16.msra.mxu1 %v8476_v58  ;;  %v8481_v56 = vld [vmem:[%s9299_s23 + $0xfc] ss:$24 sps:$4 sm:$0xff]   ;;  %v8490_v58 = vld [vmem:[%s9299_s23 + $0x1b8] ss:$24 sps:$4 sm:$0xff]  }
 0x432   : > { %5260 = vmatprep.subr.bf16.mxu1 %v8477_v63  ;;  %v8491_v63 = vld [vmem:[%s9299_s23 + $0x1ec] ss:$24 sps:$4 sm:$0xff]  }
 0x435   : > { %5261 = vmatpush1.bf16.msra.mxu1 %v8478_v60  ;;  %v8486_v60 = vld [vmem:[%s9299_s23 + $0x158] ss:$24 sps:$4 sm:$0xff]  }
 0x436   : > { %5262 = vmatprep.subr.bf16.mxu1 %v8479_v41  ;;  %v8492_v41 = vld [vmem:[%s9299_s23 + $0x1e8] ss:$24 sps:$4 sm:$0xff]  }
 0x438   : > { %3917 = vmatmul.mubr.bf16.gmra.mrb[56].mxu1 %v10137_v34  ;;  %v8484_v34 = vld [vmem:[%s9299_s23 + $0x128] ss:$24 sps:$4 sm:$0xff]  }
 0x439   : > { %3926 = vmatprep.mubr.bf16.mxu1 %v10142_v2  ;;  %5263 = vmatpush1.bf16.msra.mxu1 %v8480_v54  ;;  %v8485_v2 = vld [vmem:[%s9299_s23 + $0x15c] ss:$24 sps:$4 sm:$0xff]   ;;  %v8495_v54 = vld [vmem:[%s9299_s23 + $0x24c] ss:$24 sps:$4 sm:$0xff]  }
 0x43a   : > { %5264 = vmatprep.subr.bf16.mxu1 %v8481_v56  ;;  %v8496_v56 = vld [vmem:[%s9299_s23 + $0x248] ss:$24 sps:$4 sm:$0xff]  }
 0x43d   : > { %5265 = vmatpush1.bf16.msra.mxu1 %v8482_v23  ;;  %v8497_v23 = vld [vmem:[%s9299_s23 + $0x27c] ss:$24 sps:$4 sm:$0xff]  }
 0x43e   : > { %5266 = vmatprep.subr.bf16.mxu1 %v8483_v29  ;;  %v8498_v29 = vld [vmem:[%s9299_s23 + $0x278] ss:$24 sps:$4 sm:$0xff]  }
 0x440   : > { %3927 = vmatmul.mubr.bf16.gmra.mrb[60].mxu1 %v10152_v44  ;;  %v8488_v44 = vld [vmem:[%s9299_s23 + $0x188] ss:$24 sps:$4 sm:$0xff]  }
 0x441   : > { %3936 = vmatprep.mubr.bf16.mxu1 %v10157_v47  ;;  %5267 = vmatpush1.bf16.msra.mxu1 %v8484_v34  ;;  %v8489_v47 = vld [vmem:[%s9299_s23 + $0x1bc] ss:$24 sps:$4 sm:$0xff]   ;;  %v8499_v34 = vld [vmem:[%s9299_s23 + $0x2ac] ss:$24 sps:$4 sm:$0xff]  }
 0x442   : > { %5268 = vmatprep.subr.bf16.mxu1 %v8485_v2  ;;  %v8501_v2 = vld [vmem:[%s9299_s23 + $0x2dc] ss:$24 sps:$4 sm:$0xff]  }
 0x445   : > { %5269 = vmatpush1.bf16.msra.mxu1 %v8486_v60  ;;  %v8502_v60 = vld [vmem:[%s9299_s23 + $0x2d8] ss:$24 sps:$4 sm:$0xff]  }
 0x446   : > { %5270 = vmatprep.subr.bf16.mxu1 %v8487_v25  ;;  %v8503_v25 = vld [vmem:[%s9299_s23 + $0x30c] ss:$24 sps:$4 sm:$0xff]  }
 0x448   : > { %3937 = vmatmul.mubr.bf16.gmra.mrb[64].mxu1 %v10167_v19  ;;  %v8493_v19 = vld [vmem:[%s9299_s23 + $0x21c] ss:$24 sps:$4 sm:$0xff]  }
 0x449   : > { %3946 = vmatprep.mubr.bf16.mxu1 %v10172_v43  ;;  %5271 = vmatpush1.bf16.msra.mxu1 %v8488_v44  ;;  %v8494_v43 = vld [vmem:[%s9299_s23 + $0x218] ss:$24 sps:$4 sm:$0xff]  }
 0x44a   : > { %5272 = vmatprep.subr.bf16.mxu1 %v8489_v47  ;;  %v12403_v47 = vmax.f32 %v10396_v45, %v10398_v14  ;;  %v12405_v45 = vmax.f32 %v10422_v33, %v10424_v18  ;;  %v12407_v33 = vmax.f32 %v10448_v5, %v10450_v9 }
 0x44d   : > { %5273 = vmatpush1.bf16.msra.mxu1 %v8490_v58 }
 0x44e   : > { %5274 = vmatprep.subr.bf16.mxu1 %v8491_v63 }
 0x450   : > { %3947 = vmatmul.mubr.bf16.gmra.mrb[68].mxu1 %v10182_v20  ;;  %v8500_v20 = vld [vmem:[%s9299_s23 + $0x2a8] ss:$24 sps:$4 sm:$0xff]  }
 0x451   : > { %5275 = vmatpush1.bf16.msra.mxu1 %v8492_v41 }
 0x452   : > { %5276 = vmatprep.subr.bf16.mxu1 %v8493_v19  ;;  %v12404_v19 = vmax.f32 %v10409_v57, %v10411_v36  ;;  %v12406_v57 = vmax.f32 %v10435_v8, %v10437_v10  ;;  %v12409_v8 = vmax.f32 %v10461_v52, %v10463_v28 }
 0x455   : > { %5277 = vmatpush1.bf16.msra.mxu1 %v8494_v43 }
 0x456   : > { %5278 = vmatprep.subr.bf16.mxu1 %v8495_v54 }
 0x459   : > { %5279 = vmatpush1.bf16.msra.mxu1 %v8496_v56 }
 0x45a   : > { %5280 = vmatprep.subr.bf16.mxu1 %v8497_v23 }
 0x45d   : > { %5281 = vmatpush1.bf16.msra.mxu1 %v8498_v29 }
 0x45e   : > { %5282 = vmatprep.subr.bf16.mxu1 %v8499_v34 }
 0x461   : > { %5283 = vmatpush1.bf16.msra.mxu1 %v8500_v20 }
 0x462   : > { %5284 = vmatprep.subr.bf16.mxu1 %v8501_v2 }
 0x465   : > { %5285 = vmatpush1.bf16.msra.mxu1 %v8502_v60 }
 0x466   : > { %5347 = vmatprep.subr.bf16.mxu1 %v8503_v25 }
 0x4fb   : > { %v10587_v44 = vpop.f32.mrb[48].mxu1 }
 0x4fc   : > { %v3974_v58 = vmax.f32 %v12403_v47, %v10587_v44  ;;  %v10593_v63 = vpop.f32.mrb[49].mxu1 }
 0x4fd   : > { %v10595_v41 = vpop.f32.mrb[50].mxu1 }
 0x4fe   : > { %v3983_v43 = vmax.f32 %v12404_v19, %v10595_v41  ;;  %v10601_v54 = vpop.f32.mrb[51].mxu1  ;;  %v3975_v56 = vmax.f32 %v3974_v58, %v10593_v63 }
 0x500   : > { %3976 = vmax.xlane.f32.xlu0 %v3975_v56  ;;  %v3984_v23 = vmax.f32 %v3983_v43, %v10601_v54 }
 0x503   : > { %v10605_v29 = vpop.f32.mrb[52].mxu1 }
 0x504   : > { %v3992_v34 = vmax.f32 %v12405_v45, %v10605_v29  ;;  %3985 = vmax.xlane.f32.xlu0 %v3984_v23  ;;  %v10611_v20 = vpop.f32.mrb[53].mxu1 }
 0x505   : > { %v10613_v2 = vpop.f32.mrb[54].mxu1 }
 0x506   : > { %v4001_v60 = vmax.f32 %v12406_v57, %v10613_v2  ;;  %v10619_v25 = vpop.f32.mrb[55].mxu1  ;;  %v3993_v47 = vmax.f32 %v3992_v34, %v10611_v20 }
 0x508   : > { %3994 = vmax.xlane.f32.xlu1 %v3993_v47  ;;  %v4002_v58 = vmax.f32 %v4001_v60, %v10619_v25  ;;  %v9042_v60 = vmov 0  }
 0x509   : > { %7548 = vset.pattern.permute.xlu0 %v9042_v60  ;;  %7549 = vset.pattern.permute.xlu1 %v9042_v60 }
 0x50b   : > { %v10623_v19 = vpop.f32.mrb[56].mxu1 }
 0x50c   : > { %v4010_v43 = vmax.f32 %v12407_v33, %v10623_v19  ;;  %4003 = vmax.xlane.f32.xlu1 %v4002_v58  ;;  %v10629_v56 = vpop.f32.mrb[57].mxu1  ;;  %v12412_v58 = vmax.f32 %v10474_v32, %v10476_v15  ;;  %v12418_v32 = vmax.f32 %v10500_v7, %v10502_v62  ;;  %v12424_v7 = vmax.f32 %v10526_v11, %v10528_v13 }
 0x50d   : > { %v10631_v23 = vpop.f32.mrb[58].mxu1 }
 0x50e   : > { %12408 = vst [vmem:[#allocation67_spill] sm:$0xff] %v10631_v23  ;;  %v4019_v45 = vmax.f32 %v12409_v8, %v10631_v23  ;;  %v10637_v34 = vpop.f32.mrb[59].mxu1  ;;  %v4011_v57 = vmax.f32 %v4010_v43, %v10629_v56  ;;  %v12415_v43 = vmax.f32 %v10487_v51, %v10489_v0  ;;  %v12421_v51 = vmax.f32 %v10513_v12, %v10515_v26  ;;  %v3964_v26 = vld [vmem:[#allocation2 + $0x38] sm:$0xff]  ;;  %v3965_v0 = vld [vmem:[#allocation2 + $0x40] sm:$0xff] }
 0x50f   : > { %12410 = vst [vmem:[#allocation68_spill] sm:$0xff] %v10637_v34  ;;  %v12427_v12 = vmax.f32 %v10538_v31, %v10540_v24  ;;  %v3959_v31 = vld [vmem:[#allocation2 + $0x10] sm:$0xff] }
 0x510   : > { %4012 = vmax.xlane.f32.xlu0 %v4011_v57  ;;  %v4020_v5 = vmax.f32 %v4019_v45, %v10637_v34  ;;  %v3966_v34 = vld [vmem:[#allocation2 + $0x48] sm:$0xff] }
 0x512   : > { %4021 = vmax.xlane.f32.xlu1 %v4020_v5 }
 0x513   : > { %v10641_v47 = vpop.f32.mrb[60].mxu1 }
 0x514   : > { %12411 = vst [vmem:[#allocation69_spill] sm:$0xff] %v10641_v47  ;;  %v4028_v33 = vmax.f32 %v12412_v58, %v10641_v47  ;;  %v10647_v52 = vpop.f32.mrb[61].mxu1 }
 0x515   : > { %12413 = vst [vmem:[#allocation70_spill] sm:$0xff] %v10647_v52  ;;  %v10649_v8 = vpop.f32.mrb[62].mxu1 }
 0x516   : > { %12414 = vst [vmem:[#allocation71_spill] sm:$0xff] %v10649_v8  ;;  %v4037_v60 = vmax.f32 %v12415_v43, %v10649_v8  ;;  %v10655_v57 = vpop.f32.mrb[63].mxu1  ;;  %v4029_v45 = vmax.f32 %v4028_v33, %v10647_v52 }
 0x517   : > { %12416 = vst [vmem:[#allocation72_spill] sm:$0xff] %v10655_v57 }
 0x518   : > { %4030 = vmax.xlane.f32.xlu0 %v4029_v45  ;;  %v4038_v5 = vmax.f32 %v4037_v60, %v10655_v57 }
 0x51a   : > { %4039 = vmax.xlane.f32.xlu1 %v4038_v5 }
 0x51b   : > { %v10659_v61 = vpop.f32.mrb[64].mxu1 }
 0x51c   : > { %12417 = vst [vmem:[#allocation73_spill] sm:$0xff] %v10659_v61  ;;  %v4046_v58 = vmax.f32 %v12418_v32, %v10659_v61  ;;  %v10665_v53 = vpop.f32.mrb[65].mxu1 }
 0x51d   : > { %12419 = vst [vmem:[#allocation74_spill] sm:$0xff] %v10665_v53  ;;  %v10667_v47 = vpop.f32.mrb[66].mxu1 }
 0x51e   : > { %12420 = vst [vmem:[#allocation75_spill] sm:$0xff] %v10667_v47  ;;  %v4055_v33 = vmax.f32 %v12421_v51, %v10667_v47  ;;  %v10673_v43 = vpop.f32.mrb[67].mxu1  ;;  %v4047_v60 = vmax.f32 %v4046_v58, %v10665_v53 }
 0x51f   : > { %12422 = vst [vmem:[#allocation76_spill] sm:$0xff] %v10673_v43 }
 0x520   : > { %4048 = vmax.xlane.f32.xlu0 %v4047_v60  ;;  %v4056_v45 = vmax.f32 %v4055_v33, %v10673_v43 }
 0x522   : > { %4057 = vmax.xlane.f32.xlu1 %v4056_v45  ;;  %v3957_v45 = vld [vmem:[#allocation2] sm:$0xff] }
 0x523   : > { %v10677_v5 = vpop.f32.mrb[68].mxu1 }
 0x524   : > { %12423 = vst [vmem:[#allocation77_spill] sm:$0xff] %v10677_v5  ;;  %v4064_v32 = vmax.f32 %v12424_v7, %v10677_v5  ;;  %v10683_v61 = vpop.f32.mrb[69].mxu1  ;;  %v3958_v5 = vld [vmem:[#allocation2 + $0x8] sm:$0xff] }
 0x525   : > { %12425 = vst [vmem:[#allocation78_spill] sm:$0xff] %v10683_v61  ;;  %v10685_v62 = vpop.f32.mrb[70].mxu1 }
 0x526   : > { %12426 = vst [vmem:[#allocation79_spill] sm:$0xff] %v10685_v62  ;;  %v4073_v58 = vmax.f32 %v12427_v12, %v10685_v62  ;;  %v10691_v51 = vpop.f32.mrb[71].mxu1  ;;  %v4065_v33 = vmax.f32 %v4064_v32, %v10683_v61  ;;  %v3962_v62 = vld [vmem:[#allocation2 + $0x28] sm:$0xff] }
 0x527   : > { %12428 = vst [vmem:[#allocation80_spill] sm:$0xff] %v10691_v51 }
 0x528   : > { %4066 = vmax.xlane.f32.xlu0 %v4065_v33  ;;  %v4074_v60 = vmax.f32 %v4073_v58, %v10691_v51  ;;  %v3960_v33 = vld [vmem:[#allocation2 + $0x18] sm:$0xff]  ;;  %v3961_v51 = vld [vmem:[#allocation2 + $0x20] sm:$0xff] }
 0x52a   : > { %4075 = vmax.xlane.f32.xlu1 %v4074_v60 }
 0x58d   : > { %v3977_v11 = vpop.xlane.xlu0 %3976 }
 0x58e   : > { %v4077_v7 = vmax.f32 %v3957_v45, %v3977_v11 }
 0x590   : > { %6142 = vst.msk [vmem:[#allocation2] sm:$0xff] %vm4617_vm1, %v4077_v7  ;;  %4127 = vperm.xlu0 %7548, %v4077_v7  }
 0x591   : > { %v3986_v13 = vpop.xlane.xlu0 %3985 }
 0x592   : > { %v4078_v43 = vmax.f32 %v3958_v5, %v3986_v13 }
 0x594   : > { %6143 = vst.msk [vmem:[#allocation2 + $0x8] sm:$0xff] %vm4617_vm1, %v4078_v43  ;;  %4132 = vperm.xlu1 %7549, %v4078_v43   ;;  %v4090_v8 = vsub.f32 %v3958_v5, %v4078_v43 }
 0x595   : > { %v3995_v12 = vpop.xlane.xlu1 %3994 }
 0x596   : > { %v4079_v32 = vmax.f32 %v3959_v31, %v3995_v12  ;;  %v3963_v12 = vld [vmem:[#allocation2 + $0x30] sm:$0xff] }
 0x598   : > { %6144 = vst.msk [vmem:[#allocation2 + $0x10] sm:$0xff] %vm4617_vm1, %v4079_v32  ;;  %4137 = vperm.xlu1 %7549, %v4079_v32   ;;  %v4091_v52 = vsub.f32 %v3959_v31, %v4079_v32  ;;  %v10707_v32 = vld [vmem:[#allocation2 + $0x58] sm:$0xff] }
 0x599   : > { %v4004_v58 = vpop.xlane.xlu1 %4003  ;;  %12430 = vst [vmem:[#allocation82_spill] sm:$0xff] %v10707_v32 }
 0x59a   : > { %v4080_v60 = vmax.f32 %v3960_v33, %v4004_v58 }
 0x59c   : > { %6145 = vst.msk [vmem:[#allocation2 + $0x18] sm:$0xff] %vm4617_vm1, %v4080_v60  ;;  %4142 = vperm.xlu1 %7549, %v4080_v60   ;;  %v4092_v55 = vsub.f32 %v3960_v33, %v4080_v60 }
 0x59d   : > { %v4013_v11 = vpop.xlane.xlu0 %4012 }
 0x59e   : > { %v4081_v24 = vmax.f32 %v3961_v51, %v4013_v11  ;;  %v4089_v11 = vsub.f32 %v3957_v45, %v4077_v7  ;;  %v4107_v5 = vmul.f32 1.442695, %v4092_v55  ;;  %v10705_v45 = vld [vmem:[#allocation2 + $0x50] sm:$0xff] }
 0x59f   : > { %v4022_v13 = vpop.xlane.xlu1 %4021  ;;  %12429 = vst [vmem:[#allocation81_spill] sm:$0xff] %v10705_v45 }
 0x5a0   : > { %6146 = vst.msk [vmem:[#allocation2 + $0x20] sm:$0xff] %vm4617_vm1, %v4081_v24  ;;  %v4082_v61 = vmax.f32 %v3962_v62, %v4022_v13  ;;  %4147 = vperm.xlu1 %7549, %v4081_v24   ;;  %v4103_v13 = vmul.f32 1.442695, %v4090_v8  ;;  %v4101_v28 = vmul.f32 1.442695, %v4089_v11  ;;  %v4093_v43 = vsub.f32 %v3961_v51, %v4081_v24 }
 0x5a2   : > { %6147 = vst.msk [vmem:[#allocation2 + $0x28] sm:$0xff] %vm4617_vm1, %v4082_v61  ;;  %8180 = vpow2.f32 %v4103_v13  ;;  %v4094_v8 = vsub.f32 %v3962_v62, %v4082_v61 }
 0x5a3   : > { %8182 = vpow2.f32 %v4101_v28 }
 0x5a4   : > { %4152 = vperm.xlu1 %7549, %v4082_v61  }
 0x5a5   : > { %v4031_v47 = vpop.xlane.xlu0 %4030 }
 0x5a6   : > { %v4083_v53 = vmax.f32 %v3963_v12, %v4031_v47 }
 0x5a7   : > { %v4040_v58 = vpop.xlane.xlu1 %4039 }
 0x5a8   : > { %6148 = vst.msk [vmem:[#allocation2 + $0x30] sm:$0xff] %vm4617_vm1, %v4083_v53  ;;  %v4084_v57 = vmax.f32 %v3964_v26, %v4040_v58  ;;  %4157 = vperm.xlu1 %7549, %v4083_v53   ;;  %v4105_v58 = vmul.f32 1.442695, %v4091_v52  ;;  %v4095_v7 = vsub.f32 %v3963_v12, %v4083_v53  ;;  %v4111_v52 = vmul.f32 1.442695, %v4094_v8 }
 0x5aa   : > { %6149 = vst.msk [vmem:[#allocation2 + $0x38] sm:$0xff] %vm4617_vm1, %v4084_v57  ;;  %8184 = vpow2.f32 %v4105_v58  ;;  %v4096_v24 = vsub.f32 %v3964_v26, %v4084_v57  ;;  %v4113_v53 = vmul.f32 1.442695, %v4095_v7 }
 0x5ab   : > { %8186 = vpow2.f32 %v4107_v5 }
 0x5ac   : > { %4162 = vperm.xlu1 %7549, %v4084_v57   ;;  %v10725_v26 = vpop.eup %8180  ;;  %v4115_v57 = vmul.f32 1.442695, %v4096_v24 }
 0x5ad   : > { %v4049_v15 = vpop.xlane.xlu0 %4048  ;;  %12433 = vst [vmem:[#allocation85_spill] sm:$0xff] %v10725_v26  ;;  %v10728_v60 = vpop.eup %8182 }
 0x5ae   : > { %v4085_v23 = vmax.f32 %v3965_v0, %v4049_v15  ;;  %v4109_v15 = vmul.f32 1.442695, %v4093_v43  ;;  %12434 = vst [vmem:[#allocation86_spill] sm:$0xff] %v10728_v60 }
 0x5af   : > { %v4058_v35 = vpop.xlane.xlu1 %4057 }
 0x5b0   : > { %6150 = vst.msk [vmem:[#allocation2 + $0x40] sm:$0xff] %vm4617_vm1, %v4085_v23  ;;  %v4086_v47 = vmax.f32 %v3966_v34, %v4058_v35  ;;  %4167 = vperm.xlu1 %7549, %v4085_v23   ;;  %8188 = vpow2.f32 %v4109_v15  ;;  %v4097_v62 = vsub.f32 %v3965_v0, %v4085_v23 }
 0x5b1   : > { %8190 = vpow2.f32 %v4111_v52 }
 0x5b2   : > { %6151 = vst.msk [vmem:[#allocation2 + $0x48] sm:$0xff] %vm4617_vm1, %v4086_v47  ;;  %4172 = vperm.xlu0 %7548, %v4086_v47   ;;  %v4098_v33 = vsub.f32 %v3966_v34, %v4086_v47  ;;  %8192 = vpow2.f32 %v4113_v53  ;;  %v4117_v12 = vmul.f32 1.442695, %v4097_v62 }
 0x5b3   : > { %8194 = vpow2.f32 %v4115_v57 }
 0x5b4   : > { %v10731_v0 = vpop.eup %8184  ;;  %v4119_v23 = vmul.f32 1.442695, %v4098_v33  ;;  %8196 = vpow2.f32 %v4117_v12 }
 0x5b5   : > { %v4067_v31 = vpop.xlane.xlu0 %4066  ;;  %12435 = vst [vmem:[#allocation87_spill] sm:$0xff] %v10731_v0  ;;  %v10734_v11 = vpop.eup %8186 }
 0x5b6   : > { %v10710_v35 = vmax.f32 %v10705_v45, %v4067_v31  ;;  %12436 = vst [vmem:[#allocation88_spill] sm:$0xff] %v10734_v11  ;;  %8198 = vpow2.f32 %v4119_v23  ;;  %v8539_v45 = vld [vmem:[%s9299_s23 + $0x4bc] ss:$24 sps:$4 sm:$0xff]  }
 0x5b7   : > { %v4076_v51 = vpop.xlane.xlu1 %4075 }
 0x5b8   : > { %12431 = vst [vmem:[#allocation83_spill] sm:$0xff] %v10710_v35  ;;  %6152 = vst.msk [vmem:[#allocation2 + $0x50] sm:$0xff] %vm4617_vm1, %v10710_v35  ;;  %v10717_v55 = vmax.f32 %v10707_v32, %v4076_v51  ;;  %4177 = vperm.xlu1 %7549, %v10710_v35   ;;  %v8536_v35 = vld [vmem:[%s9299_s23 + $0x480] ss:$24 sps:$4 sm:$0xff]  }
 0x5ba   : > { %12432 = vst [vmem:[#allocation84_spill] sm:$0xff] %v10717_v55  ;;  %6153 = vst.msk [vmem:[#allocation2 + $0x58] sm:$0xff] %vm4617_vm1, %v10717_v55  ;;  %4182 = vperm.xlu0 %7548, %v10717_v55   ;;  %v10737_v34 = vpop.eup %8188  ;;  %v12485_v55 = vld [vmem:[#allocation68_spill] sm:$0xff] }
 0x5bb   : > { %12437 = vst [vmem:[#allocation89_spill] sm:$0xff] %v10737_v34  ;;  %v10740_v13 = vpop.eup %8190 }
 0x5bc   : > { %4709 = vperm.xlu1 %7549, %v10725_v26   ;;  %12438 = vst [vmem:[#allocation90_spill] sm:$0xff] %v10740_v13  ;;  %v10743_v47 = vpop.eup %8192  ;;  %v8526_v26 = vld [vmem:[%s9299_s23 + $0x424] ss:$24 sps:$4 sm:$0xff]  }
 0x5bd   : > { %12439 = vst [vmem:[#allocation91_spill] sm:$0xff] %v10743_v47  ;;  %v10746_v58 = vpop.eup %8194 }
 0x5be   : > { %4704 = vperm.xlu0 %7548, %v10728_v60   ;;  %12440 = vst [vmem:[#allocation92_spill] sm:$0xff] %v10746_v58  ;;  %v10749_v43 = vpop.eup %8196 }
 0x5bf   : > { %12441 = vst [vmem:[#allocation93_spill] sm:$0xff] %v10749_v43 }
 0x5c0   : > { %4714 = vperm.xlu1 %7549, %v10731_v0   ;;  %v10752_v5 = vpop.eup %8198 }
 0x5c1   : > { %12442 = vst [vmem:[#allocation94_spill] sm:$0xff] %v10752_v5 }
 0x5c2   : > { %4719 = vperm.xlu0 %7548, %v10734_v11  }
 0x5c4   : > { %4724 = vperm.xlu1 %7549, %v10737_v34  }
 0x5c6   : > { %4729 = vperm.xlu0 %7548, %v10740_v13   ;;  %v8522_v13 = vld [vmem:[%s9299_s23 + $0x3f4] ss:$24 sps:$4 sm:$0xff]  }
 0x5c8   : > { %4734 = vperm.xlu1 %7549, %v10743_v47  }
 0x5ca   : > { %4739 = vperm.xlu0 %7548, %v10746_v58  }
 0x5cc   : > { %4744 = vperm.xlu1 %7549, %v10749_v43  }
 0x5ce   : > { %4749 = vperm.xlu0 %7548, %v10752_v5   ;;  %v8510_v5 = vld [vmem:[%s9299_s23 + $0x364] ss:$24 sps:$4 sm:$0xff]  }
 0x60f   : > { %v4128_v8 = vpop.permute.xlu0 %4127 }
 0x610   : > { %v4185_v15 = vsub.f32 %v9904_v38, %v4128_v8  ;;  %v4187_v7 = vsub.f32 %v10216_v46, %v4128_v8  ;;  %v4188_v31 = vsub.f32 %v10223_v17, %v4128_v8  ;;  %v4186_v52 = vsub.f32 %v9907_v40, %v4128_v8 }
 0x611   : > { %v4189_v24 = vsub.f32 %v10390_v42, %v4128_v8  ;;  %v4190_v12 = vsub.f32 %v10398_v14, %v4128_v8  ;;  %v4191_v23 = vsub.f32 %v10587_v44, %v4128_v8  ;;  %v4192_v17 = vsub.f32 %v10593_v63, %v4128_v8 }
 0x612   : > { %v4281_v51 = vmul.f32 1.442695, %v4185_v15  ;;  %v4285_v53 = vmul.f32 1.442695, %v4187_v7  ;;  %v4287_v62 = vmul.f32 1.442695, %v4188_v31 }
 0x613   : > { %v10760_v57 = vpop.permute.xlu1 %4132  ;;  %v4283_v33 = vmul.f32 1.442695, %v4186_v52  ;;  %v4289_v42 = vmul.f32 1.442695, %v4189_v24  ;;  %v4293_v52 = vmul.f32 1.442695, %v4191_v23 }
 0x614   : > { %8200 = vpow2.f32 %v4281_v51  ;;  %v4193_v38 = vsub.f32 %v9912_v48, %v10760_v57  ;;  %v4195_v46 = vsub.f32 %v10225_v16, %v10760_v57  ;;  %v4194_v40 = vsub.f32 %v9917_v6, %v10760_v57 }
 0x615   : > { %8202 = vpow2.f32 %v4285_v53  ;;  %v4196_v15 = vsub.f32 %v10233_v50, %v10760_v57  ;;  %v4291_v48 = vmul.f32 1.442695, %v4190_v12  ;;  %v4295_v50 = vmul.f32 1.442695, %v4192_v17 }
 0x616   : > { %v4297_v14 = vmul.f32 1.442695, %v4193_v38  ;;  %v4301_v7 = vmul.f32 1.442695, %v4195_v46  ;;  %8204 = vpow2.f32 %v4283_v33  ;;  %v4299_v31 = vmul.f32 1.442695, %v4194_v40 }
 0x617   : > { %v10773_v44 = vpop.permute.xlu1 %4137  ;;  %8206 = vpow2.f32 %v4287_v62  ;;  %v4197_v24 = vsub.f32 %v10400_v49, %v10760_v57  ;;  %v4303_v51 = vmul.f32 1.442695, %v4196_v15 }
 0x618   : > { %8208 = vpow2.f32 %v4297_v14  ;;  %v4203_v16 = vsub.f32 %v10240_v3, %v10773_v44  ;;  %v4204_v6 = vsub.f32 %v10247_v27, %v10773_v44  ;;  %v4202_v63 = vsub.f32 %v9923_v59, %v10773_v44 }
 0x619   : > { %8210 = vpow2.f32 %v4301_v7  ;;  %v4201_v8 = vsub.f32 %v9920_v4, %v10773_v44  ;;  %v4198_v3 = vsub.f32 %v10411_v36, %v10760_v57  ;;  %v4199_v59 = vsub.f32 %v10595_v41, %v10760_v57  ;;  %v12443_v36 = vld [vmem:[#allocation24_spill] sm:$0xff] }
 0x61a   : > { %v4317_v53 = vmul.f32 1.442695, %v4203_v16  ;;  %8212 = vpow2.f32 %v4299_v31  ;;  %v10787_v62 = vmul.f32 1.442695, %v4204_v6  ;;  %v4200_v4 = vsub.f32 %v10601_v54, %v10760_v57  ;;  %v12444_v7 = vld [vmem:[#allocation20_spill] sm:$0xff] }
 0x61b   : > { %v10789_v27 = vpop.permute.xlu1 %4142  ;;  %8214 = vpow2.f32 %v4289_v42  ;;  %v4315_v12 = vmul.f32 1.442695, %v4202_v63  ;;  %v4313_v38 = vmul.f32 1.442695, %v4201_v8  ;;  %v4305_v46 = vmul.f32 1.442695, %v4197_v24 }
 0x61c   : > { %8216 = vpow2.f32 %v4317_v53  ;;  %v4211_v49 = vsub.f32 %v10249_v1, %v10789_v27  ;;  %v4210_v33 = vsub.f32 %v9933_v22, %v10789_v27  ;;  %v4209_v23 = vsub.f32 %v12443_v36, %v10789_v27 }
 0x61d   : > { %8218 = vpow2.f32 %v4291_v48  ;;  %v4212_v41 = vsub.f32 %v10257_v39, %v10789_v27  ;;  %v10807_v22 = vmul.f32 1.442695, %v4198_v3  ;;  %v10809_v42 = vmul.f32 1.442695, %v4199_v59 }
 0x61e   : > { %v8201_v40 = vpop.eup %8200  ;;  %v4333_v17 = vmul.f32 1.442695, %v4211_v49  ;;  %8220 = vpow2.f32 %v4293_v52  ;;  %v4331_v54 = vmul.f32 1.442695, %v4210_v33  ;;  %v4205_v15 = vsub.f32 %v10416_v30, %v10773_v44  ;;  %v12445_v33 = vld [vmem:[#allocation21_spill] sm:$0xff] }
 0x61f   : > { %v10803_v57 = vpop.eup %8202  ;;  %v10805_v1 = vpop.permute.xlu1 %4147  ;;  %8222 = vpow2.f32 %v4295_v50  ;;  %v4206_v48 = vsub.f32 %v10424_v18, %v10773_v44  ;;  %v4329_v6 = vmul.f32 1.442695, %v4209_v23  ;;  %v10821_v63 = vmul.f32 1.442695, %v4200_v4 }
 0x620   : > { %v8205_v14 = vpop.eup %8204  ;;  %8224 = vpow2.f32 %v4333_v17  ;;  %v4219_v39 = vsub.f32 %v12444_v7, %v10805_v1  ;;  %v4220_v31 = vsub.f32 %v10271_v37, %v10805_v1  ;;  %v10823_v30 = vmul.f32 1.442695, %v4212_v41 }
 0x621   : > { %v10819_v52 = vpop.eup %8206  ;;  %v4497_v16 = vadd.f32 %v8205_v14, %v8201_v40  ;;  %8226 = vpow2.f32 %v4315_v12  ;;  %v4207_v8 = vsub.f32 %v10605_v29, %v10773_v44  ;;  %v4208_v37 = vsub.f32 %v10611_v20, %v10773_v44  ;;  %v12448_v44 = vld [vmem:[#allocation22_spill] sm:$0xff] }
 0x622   : > { %v8209_v50 = vpop.eup %8208  ;;  %8228 = vpow2.f32 %v4331_v54  ;;  %v4349_v18 = vmul.f32 1.442695, %v4219_v39  ;;  %v10834_v59 = vmul.f32 1.442695, %v4205_v15  ;;  %v10836_v49 = vmul.f32 1.442695, %v4220_v31 }
 0x623   : > { %v10829_v24 = vpop.eup %8210  ;;  %v10831_v53 = vpop.permute.xlu1 %4152  ;;  %v4498_v3 = vadd.f32 %v10803_v57, %v4497_v16  ;;  %8230 = vpow2.f32 %v4313_v38  ;;  %v10840_v29 = vpack.c.bf16 %v8209_v50, %v8201_v40  ;;  %v10842_v36 = vmul.f32 1.442695, %v4206_v48  ;;  %v12450_v31 = vld [vmem:[#allocation26_spill] sm:$0xff] }
 0x624   : > { %v8213_v4 = vpop.eup %8212  ;;  %v4227_v12 = vsub.f32 %v12445_v33, %v10831_v53  ;;  %v4228_v23 = vsub.f32 %v12448_v44, %v10831_v53  ;;  %8232 = vpow2.f32 %v4329_v6  ;;  %v10853_v7 = vmul.f32 1.442695, %v4207_v8  ;;  %v8504_v44 = vld [vmem:[%s9299_s23 + $0x300] ss:$24 sps:$4 sm:$0xff]  }
 0x625   : > { %12446 = vst [vmem:[#allocation24_spill] sm:$0xff] %v10840_v29  ;;  %v10844_v20 = vpop.eup %8214  ;;  %v10848_v41 = vpack.c.bf16 %v8213_v4, %v8205_v14  ;;  %v4499_v38 = vadd.f32 %v10819_v52, %v4498_v3  ;;  %8234 = vpow2.f32 %v4303_v51  ;;  %v4506_v15 = vadd.f32 %v8213_v4, %v8209_v50  ;;  %v12451_v51 = vld [vmem:[#allocation28_spill] sm:$0xff]  ;;  %v12453_v50 = vld [vmem:[#allocation23_spill] sm:$0xff] }
 0x626   : > { %12447 = vst [vmem:[#allocation20_spill] sm:$0xff] %v10844_v20  ;;  %v10851_v17 = vpop.eup %8216  ;;  %v4365_v54 = vmul.f32 1.442695, %v4227_v12  ;;  %8236 = vpow2.f32 %v4349_v18  ;;  %v4218_v48 = vsub.f32 %v12450_v31, %v10805_v1  ;;  %v4226_v16 = vsub.f32 %v12451_v51, %v10831_v53  ;;  %v12454_v18 = vld [vmem:[#allocation41_spill] sm:$0xff] }
 0x627   : > { %12449 = vst [vmem:[#allocation21_spill] sm:$0xff] %v10848_v41  ;;  %v10855_v40 = vpop.eup %8218  ;;  %4914 = vmatprep.mubr.bf16.mxu0 %v10848_v41  ;;  %5286 = vmatprep.mubr.bf16.mxu1 %v10848_v41  ;;  %v10859_v14 = vpop.permute.xlu1 %4157  ;;  %v4500_v39 = vadd.f32 %v10844_v20, %v4499_v38  ;;  %8238 = vpow2.f32 %v4305_v46  ;;  %v10874_v4 = vmul.f32 1.442695, %v4208_v37  ;;  %v10878_v12 = vmul.f32 1.442695, %v4228_v23  ;;  %v12456_v51 = vld [vmem:[#allocation25_spill] sm:$0xff] }
 0x628   : > { %v10866_v6 = vpop.eup %8220  ;;  %4915 = vmatmul.mubr.bf16.vlgmr.msra.gmra.mrb[48].mxu0 %v10840_v29  ;;  %5287 = vmatmul.mubr.bf16.vlgmr.msra.gmra.mrb[72].mxu1 %v10840_v29  ;;  %v4235_v8 = vsub.f32 %v12453_v50, %v10859_v14  ;;  %v4236_v3 = vsub.f32 %v12454_v18, %v10859_v14  ;;  %8240 = vpow2.f32 %v4365_v54  ;;  %v8505_v38 = vld [vmem:[%s9299_s23 + $0x308] ss:$24 sps:$4 sm:$0xff]   ;;  %v4217_v50 = vsub.f32 %v12456_v51, %v10805_v1  ;;  %v8506_v46 = vld [vmem:[%s9299_s23 + $0x334] ss:$24 sps:$4 sm:$0xff]   ;;  %v12457_v54 = vld [vmem:[#allocation27_spill] sm:$0xff] }
 0x629   : > { %12452 = vst [vmem:[#allocation22_spill] sm:$0xff] %v10866_v6  ;;  %v10876_v33 = vpop.eup %8222  ;;  %4976 = vmatpush1.bf16.msra.mxu0 %v8504_v44  ;;  %5348 = vmatpush1.bf16.msra.mxu1 %v8505_v38  ;;  %v4501_v31 = vadd.f32 %v10855_v40, %v4500_v39  ;;  %v8507_v37 = vld [vmem:[%s9299_s23 + $0x33c] ss:$24 sps:$4 sm:$0xff]   ;;  %8242 = vpow2.f32 %v10807_v22  ;;  %v4507_v23 = vadd.f32 %v10829_v24, %v4506_v15 }
 0x62a   : > { %12455 = vst [vmem:[#allocation26_spill] sm:$0xff] %v10876_v33  ;;  %v10885_v61 = vpop.eup %8224  ;;  %v4381_v18 = vmul.f32 1.442695, %v4235_v8  ;;  %4977 = vmatprep.subr.bf16.mxu0 %v8506_v46  ;;  %5349 = vmatprep.subr.bf16.mxu1 %v8507_v37  ;;  %v4225_v44 = vsub.f32 %v12457_v54, %v10831_v53  ;;  %8244 = vpow2.f32 %v10809_v42  ;;  %v10897_v8 = vmul.f32 1.442695, %v4218_v48  ;;  %v12458_v15 = vld [vmem:[#allocation42_spill] sm:$0xff] }
 0x62b   : > { %v8227_v39 = vpop.eup %8226  ;;  %v10893_v38 = vpop.permute.xlu1 %4162  ;;  %v4502_v51 = vadd.f32 %v10866_v6, %v4501_v31  ;;  %v10899_v46 = vmul.f32 1.442695, %v4226_v16  ;;  %v10903_v22 = vmul.f32 1.442695, %v4236_v3  ;;  %v12459_v54 = vld [vmem:[#allocation43_spill] sm:$0xff]  ;;  %8246 = vpow2.f32 %v10821_v63 }
 0x62c   : > { %v10901_v37 = vpop.eup %8228  ;;  %v4243_v28 = vsub.f32 %v12458_v15, %v10893_v38  ;;  %v4244_v29 = vsub.f32 %v12459_v54, %v10893_v38  ;;  %v8508_v42 = vld [vmem:[%s9299_s23 + $0x330] ss:$24 sps:$4 sm:$0xff]   ;;  %8248 = vpow2.f32 %v10787_v62  ;;  %v10917_v3 = vmul.f32 1.442695, %v4217_v50  ;;  %v8511_v54 = vld [vmem:[%s9299_s23 + $0x36c] ss:$24 sps:$4 sm:$0xff]  }
 0x62d   : > { %v8231_v31 = vpop.eup %8230  ;;  %4978 = vmatpush1.bf16.msra.mxu0 %v8508_v42  ;;  %v8509_v48 = vld [vmem:[%s9299_s23 + $0x338] ss:$24 sps:$4 sm:$0xff]   ;;  %v4503_v16 = vadd.f32 %v10876_v33, %v4502_v51  ;;  %v10914_v41 = vpack.c.bf16 %v10901_v37, %v8227_v39  ;;  %8250 = vpow2.f32 %v4381_v18  ;;  %v10921_v63 = vmul.f32 1.442695, %v4225_v44  ;;  %v8547_v33 = vld [vmem:[%s9299_s23 + $0x51c] ss:$24 sps:$4 sm:$0xff]  }
 0x62e   : > { %5350 = vmatpush1.bf16.msra.mxu1 %v8509_v48  ;;  %v4397_v15 = vmul.f32 1.442695, %v4243_v28  ;;  %4979 = vmatprep.subr.bf16.mxu0 %v8510_v5  ;;  %v12461_v42 = vld [vmem:[#allocation51_spill] sm:$0xff]  ;;  %v8233_v43 = vpop.eup %8232  ;;  %v10925_v51 = vmul.f32 1.442695, %v4244_v29  ;;  %8252 = vpow2.f32 %v10834_v59  ;;  %v4515_v28 = vadd.f32 %v8231_v31, %v8227_v39  ;;  %v12463_v29 = vld [vmem:[#allocation44_spill] sm:$0xff] }
 0x62f   : > { %12460 = vst [vmem:[#allocation28_spill] sm:$0xff] %v10914_v41  ;;  %5351 = vmatprep.subr.bf16.mxu1 %v8511_v54  ;;  %v4213_v48 = vsub.f32 %v12461_v42, %v10789_v27  ;;  %4504 = vadd.xlane.f32.xlu1 %v4503_v16  ;;  %v10928_v62 = vpop.permute.xlu1 %4167  ;;  %v4214_v5 = vsub.f32 %v10437_v10, %v10789_v27  ;;  %v10933_v50 = vpop.eup %8234  ;;  %8254 = vpow2.f32 %v10842_v36  ;;  %v8512_v59 = vld [vmem:[%s9299_s23 + $0x360] ss:$24 sps:$4 sm:$0xff]  }
 0x630   : > { %4924 = vmatprep.mubr.bf16.mxu0 %v10914_v41  ;;  %5296 = vmatprep.mubr.bf16.mxu1 %v10914_v41  ;;  %v10936_v18 = vpack.c.bf16 %v8233_v43, %v8231_v31  ;;  %v4251_v44 = vsub.f32 %v12463_v29, %v10928_v62  ;;  %v4215_v16 = vsub.f32 %v10613_v2, %v10789_v27  ;;  %v10943_v54 = vpop.eup %8236  ;;  %8256 = vpow2.f32 %v4397_v15  ;;  %v8513_v10 = vld [vmem:[%s9299_s23 + $0x368] ss:$24 sps:$4 sm:$0xff]  }
 0x631   : > { %4980 = vmatpush1.bf16.msra.mxu0 %v8512_v59  ;;  %v4252_v39 = vsub.f32 %v10319_v21, %v10928_v62  ;;  %v10949_v31 = vpop.permute.xlu0 %4172  ;;  %v4508_v42 = vadd.f32 %v10933_v50, %v4507_v23  ;;  %v4216_v36 = vsub.f32 %v10619_v25, %v10789_v27  ;;  %v10954_v2 = vpop.eup %8238  ;;  %v12465_v29 = vld [vmem:[#allocation45_spill] sm:$0xff]  ;;  %8258 = vpow2.f32 %v10853_v7  ;;  %v8515_v25 = vld [vmem:[%s9299_s23 + $0x39c] ss:$24 sps:$4 sm:$0xff]  }
 0x632   : > { %12462 = vst [vmem:[#allocation23_spill] sm:$0xff] %v10936_v18  ;;  %5352 = vmatpush1.bf16.msra.mxu1 %v8513_v10  ;;  %12464 = vst [vmem:[#allocation41_spill] sm:$0xff] %v10954_v2  ;;  %4925 = vmatmul.mubr.bf16.gmra.mrb[52].mxu0 %v10936_v18  ;;  %v4413_v15 = vmul.f32 1.442695, %v4251_v44  ;;  %v4259_v59 = vsub.f32 %v12465_v29, %v10949_v31  ;;  %v12466_v10 = vld [vmem:[#allocation46_spill] sm:$0xff]  ;;  %v10963_v41 = vpop.eup %8240  ;;  %8260 = vpow2.f32 %v10874_v4 }
 0x633   : > { %5297 = vmatmul.mubr.bf16.gmra.mrb[76].mxu1 %v10936_v18  ;;  %v4260_v21 = vsub.f32 %v12466_v10, %v10949_v31  ;;  %v8514_v23 = vld [vmem:[%s9299_s23 + $0x394] ss:$24 sps:$4 sm:$0xff]   ;;  %5353 = vmatprep.subr.bf16.mxu1 %v8515_v25  ;;  %v4509_v27 = vadd.f32 %v10954_v2, %v4508_v42  ;;  %v4516_v44 = vadd.f32 %v10851_v17, %v4515_v28  ;;  %v10970_v29 = vmul.f32 1.442695, %v4213_v48  ;;  %v10972_v18 = vpop.eup %8242  ;;  %v8516_v42 = vld [vmem:[%s9299_s23 + $0x390] ss:$24 sps:$4 sm:$0xff]  }
 0x634   : > { %4981 = vmatprep.subr.bf16.mxu0 %v8514_v23  ;;  %8262 = vpow2.f32 %v4413_v15  ;;  %v4429_v7 = vmul.f32 1.442695, %v4259_v59  ;;  %v10974_v10 = vmul.f32 1.442695, %v4214_v5  ;;  %v4524_v23 = vadd.f32 %v8233_v43, %v10901_v37  ;;  %v10977_v6 = vpop.eup %8244  ;;  %v8517_v48 = vld [vmem:[%s9299_s23 + $0x398] ss:$24 sps:$4 sm:$0xff]  }
 0x635   : > { %12467 = vst [vmem:[#allocation25_spill] sm:$0xff] %v10977_v6  ;;  %v10979_v25 = vmul.f32 1.442695, %v4252_v39  ;;  %v4510_v4 = vadd.f32 %v10972_v18, %v4509_v27  ;;  %4982 = vmatpush1.bf16.msra.mxu0 %v8516_v42  ;;  %8264 = vpow2.f32 %v10897_v8  ;;  %v12468_v28 = vld [vmem:[#allocation52_spill] sm:$0xff]  ;;  %v10987_v5 = vpop.eup %8246  ;;  %v10989_v59 = vmul.f32 1.442695, %v4260_v21 }
 0x636   : > { %5354 = vmatpush1.bf16.msra.mxu1 %v8517_v48  ;;  %v4221_v15 = vsub.f32 %v12468_v28, %v10805_v1  ;;  %12469 = vst [vmem:[#allocation27_spill] sm:$0xff] %v10987_v5  ;;  %8266 = vpow2.f32 %v4429_v7  ;;  %v8518_v43 = vld [vmem:[%s9299_s23 + $0x3c4] ss:$24 sps:$4 sm:$0xff]   ;;  %v10993_v39 = vmul.f32 1.442695, %v4215_v16  ;;  %v10997_v42 = vpop.eup %8248  ;;  %v11004_v21 = vadd.f32 %v10885_v61, %v4524_v23 }
 0x637   : > { %4983 = vmatprep.subr.bf16.mxu0 %v8518_v43  ;;  %v8519_v37 = vld [vmem:[%s9299_s23 + $0x3cc] ss:$24 sps:$4 sm:$0xff]   ;;  %v10995_v27 = vmul.f32 1.442695, %v4216_v36  ;;  %v4511_v8 = vadd.f32 %v10977_v6, %v4510_v4  ;;  %8268 = vpow2.f32 %v10899_v46  ;;  %v11001_v48 = vpop.permute.xlu1 %4177  ;;  %v4222_v7 = vsub.f32 %v10450_v9, %v10805_v1  ;;  %v11008_v16 = vpop.eup %8250  ;;  %v12470_v28 = vld [vmem:[#allocation47_spill] sm:$0xff] }
 0x638   : > { %5355 = vmatprep.subr.bf16.mxu1 %v8519_v37  ;;  %v4517_v36 = vadd.f32 %v10997_v42, %v4516_v44  ;;  %8270 = vpow2.f32 %v10917_v3  ;;  %v4267_v43 = vsub.f32 %v12470_v28, %v11001_v48  ;;  %v4223_v46 = vsub.f32 %v10623_v19, %v10805_v1  ;;  %v11016_v4 = vpop.eup %8252  ;;  %v8520_v9 = vld [vmem:[%s9299_s23 + $0x3c0] ss:$24 sps:$4 sm:$0xff]  }
 0x639   : > { %v4512_v23 = vadd.f32 %v10987_v5, %v4511_v8  ;;  %8272 = vpow2.f32 %v10921_v63  ;;  %4984 = vmatpush1.bf16.msra.mxu0 %v8520_v9  ;;  %v8521_v37 = vld [vmem:[%s9299_s23 + $0x3c8] ss:$24 sps:$4 sm:$0xff]   ;;  %v11022_v44 = vpop.permute.xlu0 %4182  ;;  %v4224_v3 = vsub.f32 %v10629_v56, %v10805_v1  ;;  %v11026_v28 = vmul.f32 1.442695, %v4221_v15  ;;  %v11028_v19 = vpop.eup %8254  ;;  %v12473_v1 = vld [vmem:[#allocation50_spill] sm:$0xff] }
 0x63a   : > { %5356 = vmatpush1.bf16.msra.mxu1 %v8521_v37  ;;  %v4518_v6 = vadd.f32 %v11016_v4, %v4517_v36  ;;  %v12471_v8 = vld [vmem:[#allocation48_spill] sm:$0xff]  ;;  %v4445_v47 = vmul.f32 1.442695, %v4267_v43  ;;  %v12472_v63 = vld [vmem:[#allocation49_spill] sm:$0xff]  ;;  %4985 = vmatprep.subr.bf16.mxu0 %v8522_v13  ;;  %v8523_v37 = vld [vmem:[%s9299_s23 + $0x3fc] ss:$24 sps:$4 sm:$0xff]   ;;  %v11037_v56 = vpop.eup %8256  ;;  %v4276_v15 = vsub.f32 %v12473_v1, %v11022_v44  ;;  %8274 = vpow2.f32 %v10823_v30 }
 0x63b   : > { %v4268_v58 = vsub.f32 %v12471_v8, %v11001_v48  ;;  %v4275_v9 = vsub.f32 %v12472_v63, %v11022_v44  ;;  %5357 = vmatprep.subr.bf16.mxu1 %v8523_v37  ;;  %4513 = vadd.xlane.f32.xlu0 %v4512_v23  ;;  %v4355_v36 = vmul.f32 1.442695, %v4222_v7  ;;  %v12474_v43 = vld [vmem:[#allocation30_spill] sm:$0xff]  ;;  %v11044_v34 = vpop.eup %8258  ;;  %v12476_v37 = vld [vmem:[#allocation32_spill] sm:$0xff]  ;;  %v4357_v1 = vmul.f32 1.442695, %v4223_v46 }
 0x63c   : > { %v4234_v8 = vsub.f32 %v12474_v43, %v10859_v14  ;;  %12475 = vst [vmem:[#allocation42_spill] sm:$0xff] %v11044_v34  ;;  %v4519_v13 = vadd.f32 %v11028_v19, %v4518_v6  ;;  %8276 = vpow2.f32 %v4445_v47  ;;  %v4242_v11 = vsub.f32 %v12476_v37, %v10893_v38  ;;  %v11049_v23 = vpop.eup %8260  ;;  %v8524_v30 = vld [vmem:[%s9299_s23 + $0x3f0] ss:$24 sps:$4 sm:$0xff]  }
 0x63d   : > { %v4461_v63 = vmul.f32 1.442695, %v4275_v9  ;;  %12477 = vst [vmem:[#allocation43_spill] sm:$0xff] %v11049_v23  ;;  %8278 = vpow2.f32 %v10970_v29  ;;  %4986 = vmatpush1.bf16.msra.mxu0 %v8524_v30  ;;  %v8525_v7 = vld [vmem:[%s9299_s23 + $0x3f8] ss:$24 sps:$4 sm:$0xff]   ;;  %v12478_v6 = vld [vmem:[#allocation29_spill] sm:$0xff] }
 0x63e   : > { %5358 = vmatpush1.bf16.msra.mxu1 %v8525_v7  ;;  %v11054_v43 = vmul.f32 1.442695, %v4224_v3  ;;  %v4233_v47 = vsub.f32 %v12478_v6, %v10859_v14  ;;  %v11058_v0 = vpop.eup %8262  ;;  %v4520_v9 = vadd.f32 %v11044_v34, %v4519_v13  ;;  %v11061_v37 = vmul.f32 1.442695, %v4268_v58  ;;  %4987 = vmatprep.subr.bf16.mxu0 %v8526_v26  ;;  %v8527_v29 = vld [vmem:[%s9299_s23 + $0x42c] ss:$24 sps:$4 sm:$0xff]  }
 0x63f   : > { %8280 = vpow2.f32 %v4461_v63  ;;  %5359 = vmatprep.subr.bf16.mxu1 %v8527_v29  ;;  %v12480_v30 = vld [vmem:[#allocation31_spill] sm:$0xff]  ;;  %v8265_v3 = vpop.eup %8264  ;;  %v11067_v7 = vmul.f32 1.442695, %v4276_v15  ;;  %v12482_v6 = vld [vmem:[#allocation53_spill] sm:$0xff]  ;;  %v12483_v58 = vld [vmem:[#allocation54_spill] sm:$0xff] }
 0x640   : > { %12479 = vst [vmem:[#allocation51_spill] sm:$0xff] %v11061_v37  ;;  %v4241_v46 = vsub.f32 %v12480_v30, %v10893_v38  ;;  %8282 = vpow2.f32 %v10974_v10  ;;  %v4229_v13 = vsub.f32 %v12482_v6, %v10831_v53  ;;  %v4230_v63 = vsub.f32 %v12483_v58, %v10831_v53  ;;  %v11074_v60 = vpop.eup %8266  ;;  %v8528_v10 = vld [vmem:[%s9299_s23 + $0x420] ss:$24 sps:$4 sm:$0xff]  }
 0x641   : > { %12481 = vst [vmem:[#allocation44_spill] sm:$0xff] %v11067_v7  ;;  %v4521_v26 = vadd.f32 %v11049_v23, %v4520_v9  ;;  %8284 = vpow2.f32 %v10993_v39  ;;  %v4379_v29 = vmul.f32 1.442695, %v4234_v8  ;;  %v4395_v30 = vmul.f32 1.442695, %v4242_v11  ;;  %v8269_v2 = vpop.eup %8268  ;;  %4988 = vmatpush1.bf16.msra.mxu0 %v8528_v10  ;;  %v12484_v58 = vld [vmem:[#allocation67_spill] sm:$0xff] }
 0x642   : > { %8286 = vpow2.f32 %v10995_v27  ;;  %v4377_v15 = vmul.f32 1.442695, %v4233_v47  ;;  %v8529_v6 = vld [vmem:[%s9299_s23 + $0x428] ss:$24 sps:$4 sm:$0xff]   ;;  %v4231_v20 = vsub.f32 %v12484_v58, %v10831_v53  ;;  %v4232_v9 = vsub.f32 %v12485_v55, %v10831_v53  ;;  %v8271_v32 = vpop.eup %8270  ;;  %v8530_v27 = vld [vmem:[%s9299_s23 + $0x454] ss:$24 sps:$4 sm:$0xff]  }
 0x643   : > { %5360 = vmatpush1.bf16.msra.mxu1 %v8529_v6  ;;  %4522 = vadd.xlane.f32.xlu0 %v4521_v26  ;;  %v11085_v39 = vpack.c.bf16 %v8269_v2, %v8265_v3  ;;  %8288 = vpow2.f32 %v10836_v49  ;;  %v4393_v11 = vmul.f32 1.442695, %v4241_v46  ;;  %v11089_v8 = vmul.f32 1.442695, %v4229_v13  ;;  %v8273_v47 = vpop.eup %8272  ;;  %v8531_v6 = vld [vmem:[%s9299_s23 + $0x45c] ss:$24 sps:$4 sm:$0xff]  }
 0x644   : > { %4989 = vmatprep.subr.bf16.mxu0 %v8530_v27  ;;  %8290 = vpow2.f32 %v11026_v28  ;;  %v4533_v10 = vadd.f32 %v8271_v32, %v8265_v3  ;;  %5361 = vmatprep.subr.bf16.mxu1 %v8531_v6  ;;  %v11093_v55 = vmul.f32 1.442695, %v4230_v63  ;;  %v12487_v53 = vld [vmem:[#allocation34_spill] sm:$0xff]  ;;  %v11099_v49 = vpack.c.bf16 %v8273_v47, %v8271_v32  ;;  %v12489_v28 = vld [vmem:[#allocation36_spill] sm:$0xff]  ;;  %v11103_v3 = vpop.eup %8274  ;;  %v12490_v32 = vld [vmem:[#allocation55_spill] sm:$0xff] }
 0x645   : > { %12486 = vst [vmem:[#allocation45_spill] sm:$0xff] %v11085_v39  ;;  %v4250_v26 = vsub.f32 %v12487_v53, %v10928_v62  ;;  %4934 = vmatprep.mubr.bf16.mxu0 %v11085_v39  ;;  %5306 = vmatprep.mubr.bf16.mxu1 %v11085_v39  ;;  %8292 = vpow2.f32 %v4355_v36  ;;  %v4542_v46 = vadd.f32 %v8273_v47, %v8269_v2  ;;  %v11105_v58 = vmul.f32 1.442695, %v4231_v20  ;;  %v8532_v27 = vld [vmem:[%s9299_s23 + $0x450] ss:$24 sps:$4 sm:$0xff]  }
 0x646   : > { %12488 = vst [vmem:[#allocation46_spill] sm:$0xff] %v11099_v49  ;;  %v4258_v13 = vsub.f32 %v12489_v28, %v10949_v31  ;;  %8294 = vpow2.f32 %v4357_v1  ;;  %v11107_v63 = vmul.f32 1.442695, %v4232_v9  ;;  %4990 = vmatpush1.bf16.msra.mxu0 %v8532_v27  ;;  %v8533_v6 = vld [vmem:[%s9299_s23 + $0x458] ss:$24 sps:$4 sm:$0xff]   ;;  %v4237_v36 = vsub.f32 %v12490_v32, %v10859_v14  ;;  %v11113_v2 = vpop.eup %8276  ;;  %5307 = vmatmul.mubr.bf16.gmra.mrb[80].mxu1 %v11099_v49  ;;  %v12491_v1 = vld [vmem:[#allocation56_spill] sm:$0xff] }
 0x647   : > { %5362 = vmatpush1.bf16.msra.mxu1 %v8533_v6  ;;  %4935 = vmatmul.mubr.bf16.gmra.mrb[56].mxu0 %v11099_v49  ;;  %v4526_v20 = vadd.f32 %v11103_v3, %v11004_v21  ;;  %8296 = vpow2.f32 %v11054_v43  ;;  %v4238_v9 = vsub.f32 %v12491_v1, %v10859_v14  ;;  %v12492_v47 = vld [vmem:[#allocation69_spill] sm:$0xff]  ;;  %v11124_v28 = vpop.eup %8278  ;;  %v4534_v27 = vadd.f32 %v10943_v54, %v4533_v10  ;;  %v8534_v32 = vld [vmem:[%s9299_s23 + $0x484] ss:$24 sps:$4 sm:$0xff]   ;;  %v12493_v43 = vld [vmem:[#allocation70_spill] sm:$0xff] }
 0x648   : > { %v4239_v53 = vsub.f32 %v12492_v47, %v10859_v14  ;;  %8298 = vpow2.f32 %v4379_v29  ;;  %v11127_v6 = vmul.f32 1.442695, %v4250_v26  ;;  %4991 = vmatprep.subr.bf16.mxu0 %v8534_v32  ;;  %v8535_v21 = vld [vmem:[%s9299_s23 + $0x48c] ss:$24 sps:$4 sm:$0xff]   ;;  %v4240_v49 = vsub.f32 %v12493_v43, %v10859_v14  ;;  %v12495_v14 = vld [vmem:[#allocation35_spill] sm:$0xff] }
 0x649   : > { %5363 = vmatprep.subr.bf16.mxu1 %v8535_v21  ;;  %v11133_v1 = vpop.eup %8280  ;;  %v4527_v47 = vadd.f32 %v11124_v28, %v4526_v20  ;;  %8300 = vpow2.f32 %v4395_v30  ;;  %v11137_v39 = vadd.f32 %v10963_v41, %v4542_v46  ;;  %v4427_v29 = vmul.f32 1.442695, %v4258_v13  ;;  %v12494_v32 = vld [vmem:[#allocation33_spill] sm:$0xff] }
 0x64a   : > { %v11139_v10 = vpop.eup %8282  ;;  %8302 = vpow2.f32 %v4377_v15  ;;  %v11141_v26 = vmul.f32 1.442695, %v4237_v36  ;;  %v4249_v21 = vsub.f32 %v12494_v32, %v10928_v62  ;;  %v4257_v43 = vsub.f32 %v12495_v14, %v10949_v31  ;;  %4992 = vmatpush1.bf16.msra.mxu0 %v8536_v35  ;;  %v8537_v30 = vld [vmem:[%s9299_s23 + $0x488] ss:$24 sps:$4 sm:$0xff]   ;;  %v8538_v36 = vld [vmem:[%s9299_s23 + $0x4b4] ss:$24 sps:$4 sm:$0xff]  }
 0x64b   : > { %5364 = vmatpush1.bf16.msra.mxu1 %v8537_v30  ;;  %v11149_v46 = vpop.eup %8284  ;;  %v4528_v13 = vadd.f32 %v11139_v10, %v4527_v47  ;;  %8304 = vpow2.f32 %v4393_v11  ;;  %v11152_v20 = vmul.f32 1.442695, %v4238_v9  ;;  %v11154_v15 = vmul.f32 1.442695, %v4239_v53  ;;  %4993 = vmatprep.subr.bf16.mxu0 %v8538_v36  ;;  %v12498_v14 = vld [vmem:[#allocation57_spill] sm:$0xff]  ;;  %v12499_v11 = vld [vmem:[#allocation58_spill] sm:$0xff] }
 0x64c   : > { %12496 = vst [vmem:[#allocation52_spill] sm:$0xff] %v11149_v46  ;;  %5365 = vmatprep.subr.bf16.mxu1 %v8539_v45  ;;  %v11158_v32 = vpop.eup %8286  ;;  %8306 = vpow2.f32 %v10878_v12  ;;  %v11161_v35 = vmul.f32 1.442695, %v4240_v49  ;;  %v4245_v47 = vsub.f32 %v12498_v14, %v10893_v38  ;;  %v4246_v9 = vsub.f32 %v12499_v11, %v10893_v38  ;;  %v12500_v45 = vld [vmem:[#allocation71_spill] sm:$0xff]  ;;  %v12501_v12 = vld [vmem:[#allocation72_spill] sm:$0xff] }
 0x64d   : > { %12497 = vst [vmem:[#allocation47_spill] sm:$0xff] %v11158_v32  ;;  %v11167_v53 = vpop.eup %8288  ;;  %v4529_v30 = vadd.f32 %v11149_v46, %v4528_v13  ;;  %8308 = vpow2.f32 %v11089_v8  ;;  %v4247_v36 = vsub.f32 %v12500_v45, %v10893_v38  ;;  %v4248_v49 = vsub.f32 %v12501_v12, %v10893_v38  ;;  %v8540_v13 = vld [vmem:[%s9299_s23 + $0x4b0] ss:$24 sps:$4 sm:$0xff]  }
 0x64e   : > { %v11175_v7 = vpop.eup %8290  ;;  %v4535_v14 = vadd.f32 %v11167_v53, %v4534_v27  ;;  %8310 = vpow2.f32 %v11093_v55  ;;  %v11179_v11 = vmul.f32 1.442695, %v4249_v21  ;;  %v11181_v34 = vmul.f32 1.442695, %v4257_v43  ;;  %4994 = vmatpush1.bf16.msra.mxu0 %v8540_v13  ;;  %v8541_v8 = vld [vmem:[%s9299_s23 + $0x4b8] ss:$24 sps:$4 sm:$0xff]  }
 0x64f   : > { %5366 = vmatpush1.bf16.msra.mxu1 %v8541_v8  ;;  %v11185_v45 = vpop.eup %8292  ;;  %v4530_v46 = vadd.f32 %v11158_v32, %v4529_v30  ;;  %8312 = vpow2.f32 %v11105_v58  ;;  %v12502_v38 = vld [vmem:[#allocation38_spill] sm:$0xff]  ;;  %v12503_v27 = vld [vmem:[#allocation40_spill] sm:$0xff]  ;;  %v11199_v30 = vmul.f32 1.442695, %v4245_v47  ;;  %v12505_v58 = vld [vmem:[#allocation59_spill] sm:$0xff] }
 0x650   : > { %v4266_v12 = vsub.f32 %v12502_v38, %v11001_v48  ;;  %v4274_v55 = vsub.f32 %v12503_v27, %v11022_v44  ;;  %v8542_v21 = vld [vmem:[%s9299_s23 + $0x4e4] ss:$24 sps:$4 sm:$0xff]   ;;  %v11195_v23 = vpop.eup %8294  ;;  %v4536_v13 = vadd.f32 %v11175_v7, %v4535_v14  ;;  %8314 = vpow2.f32 %v11107_v63 }
 0x651   : > { %4995 = vmatprep.subr.bf16.mxu0 %v8542_v21  ;;  %v8543_v43 = vld [vmem:[%s9299_s23 + $0x4ec] ss:$24 sps:$4 sm:$0xff]   ;;  %12504 = vst [vmem:[#allocation48_spill] sm:$0xff] %v11195_v23  ;;  %v4253_v8 = vsub.f32 %v12505_v58, %v10928_v62  ;;  %v11203_v38 = vpop.eup %8296  ;;  %4531 = vadd.xlane.f32.xlu1 %v4530_v46  ;;  %8316 = vpow2.f32 %v11127_v6  ;;  %v11206_v27 = vmul.f32 1.442695, %v4246_v9 }
 0x652   : > { %5367 = vmatprep.subr.bf16.mxu1 %v8543_v43  ;;  %v11208_v21 = vmul.f32 1.442695, %v4247_v36  ;;  %v11210_v43 = vmul.f32 1.442695, %v4248_v49  ;;  %v8299_v14 = vpop.eup %8298  ;;  %v4537_v63 = vadd.f32 %v11185_v45, %v4536_v13  ;;  %8318 = vpow2.f32 %v4427_v29  ;;  %v12506_v58 = vld [vmem:[#allocation60_spill] sm:$0xff]  ;;  %v12507_v49 = vld [vmem:[#allocation73_spill] sm:$0xff] }
 0x653   : > { %v11213_v47 = vmul.f32 1.442695, %v4266_v12  ;;  %v4254_v32 = vsub.f32 %v12506_v58, %v10928_v62  ;;  %v8544_v46 = vld [vmem:[%s9299_s23 + $0x4e0] ss:$24 sps:$4 sm:$0xff]   ;;  %v8301_v9 = vpop.eup %8300  ;;  %8320 = vpow2.f32 %v10903_v22  ;;  %v11220_v36 = vmul.f32 1.442695, %v4274_v55 }
 0x654   : > { %4996 = vmatpush1.bf16.msra.mxu0 %v8544_v46  ;;  %v8545_v6 = vld [vmem:[%s9299_s23 + $0x4e8] ss:$24 sps:$4 sm:$0xff]   ;;  %v4255_v5 = vsub.f32 %v12507_v49, %v10928_v62  ;;  %v12508_v13 = vld [vmem:[#allocation74_spill] sm:$0xff]  ;;  %v8303_v58 = vpop.eup %8302  ;;  %v4538_v46 = vadd.f32 %v11195_v23, %v4537_v63  ;;  %v11229_v37 = vpack.c.bf16 %v8301_v9, %v8299_v14  ;;  %8322 = vpow2.f32 %v11141_v26 }
 0x655   : > { %5368 = vmatpush1.bf16.msra.mxu1 %v8545_v6  ;;  %v4256_v29 = vsub.f32 %v12508_v13, %v10928_v62  ;;  %v8546_v12 = vld [vmem:[%s9299_s23 + $0x514] ss:$24 sps:$4 sm:$0xff]   ;;  %v11232_v22 = vmul.f32 1.442695, %v4253_v8  ;;  %v8305_v55 = vpop.eup %8304  ;;  %8324 = vpow2.f32 %v11152_v20  ;;  %v4551_v6 = vadd.f32 %v8303_v58, %v8299_v14  ;;  %v12511_v13 = vld [vmem:[#allocation39_spill] sm:$0xff] }
 0x656   : > { %4997 = vmatprep.subr.bf16.mxu0 %v8546_v12  ;;  %5369 = vmatprep.subr.bf16.mxu1 %v8547_v33  ;;  %12509 = vst [vmem:[#allocation49_spill] sm:$0xff] %v11229_v37  ;;  %v12510_v62 = vld [vmem:[#allocation37_spill] sm:$0xff]  ;;  %v4273_v33 = vsub.f32 %v12511_v13, %v11022_v44  ;;  %v11239_v12 = vpop.eup %8306  ;;  %v4539_v63 = vadd.f32 %v11203_v38, %v4538_v46  ;;  %8326 = vpow2.f32 %v11154_v15  ;;  %v11254_v13 = vmul.f32 1.442695, %v4255_v5  ;;  %v12514_v5 = vld [vmem:[#allocation62_spill] sm:$0xff] }
 0x657   : > { %v4265_v49 = vsub.f32 %v12510_v62, %v11001_v48  ;;  %4944 = vmatprep.mubr.bf16.mxu0 %v11229_v37  ;;  %5316 = vmatprep.mubr.bf16.mxu1 %v11229_v37  ;;  %v11244_v26 = vpack.c.bf16 %v8305_v55, %v8303_v58  ;;  %v4560_v20 = vadd.f32 %v8305_v55, %v8301_v9  ;;  %v11247_v8 = vpop.eup %8308  ;;  %8328 = vpow2.f32 %v11161_v35  ;;  %v8548_v46 = vld [vmem:[%s9299_s23 + $0x510] ss:$24 sps:$4 sm:$0xff]  }
 0x658   : > { %v4544_v14 = vadd.f32 %v11239_v12, %v11137_v39  ;;  %v11252_v62 = vmul.f32 1.442695, %v4254_v32  ;;  %4998 = vmatpush1.bf16.msra.mxu0 %v8548_v46  ;;  %v8549_v37 = vld [vmem:[%s9299_s23 + $0x518] ss:$24 sps:$4 sm:$0xff]   ;;  %v11258_v58 = vpop.eup %8310  ;;  %4540 = vadd.xlane.f32.xlu0 %v4539_v63  ;;  %8330 = vpow2.f32 %v11179_v11  ;;  %v11262_v15 = vmul.f32 1.442695, %v4256_v29 }
 0x659   : > { %12512 = vst [vmem:[#allocation50_spill] sm:$0xff] %v11244_v26  ;;  %5370 = vmatpush1.bf16.msra.mxu1 %v8549_v37  ;;  %4945 = vmatmul.mubr.bf16.gmra.mrb[60].mxu0 %v11244_v26  ;;  %v12513_v39 = vld [vmem:[#allocation61_spill] sm:$0xff]  ;;  %v4262_v35 = vsub.f32 %v12514_v5, %v10949_v31  ;;  %v11268_v9 = vpop.eup %8312  ;;  %v4552_v55 = vadd.f32 %v11008_v16, %v4551_v6  ;;  %8332 = vpow2.f32 %v11181_v34  ;;  %v11274_v11 = vmul.f32 1.442695, %v4265_v49  ;;  %v8550_v29 = vld [vmem:[%s9299_s23 + $0x544] ss:$24 sps:$4 sm:$0xff]  }
 0x65a   : > { %v4261_v32 = vsub.f32 %v12513_v39, %v10949_v31  ;;  %12515 = vst [vmem:[#allocation30_spill] sm:$0xff] %v11268_v9  ;;  %5317 = vmatmul.mubr.bf16.gmra.mrb[84].mxu1 %v11244_v26  ;;  %v4545_v37 = vadd.f32 %v11247_v8, %v4544_v14  ;;  %4999 = vmatprep.subr.bf16.mxu0 %v8550_v29  ;;  %v11277_v63 = vpop.eup %8314  ;;  %8334 = vpow2.f32 %v10925_v51  ;;  %v11283_v39 = vmul.f32 1.442695, %v4273_v33  ;;  %v8551_v34 = vld [vmem:[%s9299_s23 + $0x54c] ss:$24 sps:$4 sm:$0xff]   ;;  %v12517_v51 = vld [vmem:[#allocation75_spill] sm:$0xff] }
 0x65b   : > { %v11281_v46 = vadd.f32 %v11037_v56, %v4560_v20  ;;  %v11287_v6 = vpack.c.bf16 %v10933_v50, %v10819_v52  ;;  %5371 = vmatprep.subr.bf16.mxu1 %v8551_v34  ;;  %v8317_v49 = vpop.eup %8316  ;;  %8336 = vpow2.f32 %v11199_v30  ;;  %v4263_v5 = vsub.f32 %v12517_v51, %v10949_v31  ;;  %v12518_v20 = vld [vmem:[#allocation76_spill] sm:$0xff]  ;;  %v12519_v30 = vld [vmem:[#allocation63_spill] sm:$0xff]  ;;  %v8556_v23 = vld [vmem:[%s9299_s23 + $0x570] ss:$24 sps:$4 sm:$0xff]  }
 0x65c   : > { %v4546_v14 = vadd.f32 %v11258_v58, %v4545_v37  ;;  %v4264_v33 = vsub.f32 %v12518_v20, %v10949_v31  ;;  %v8552_v29 = vld [vmem:[%s9299_s23 + $0x540] ss:$24 sps:$4 sm:$0xff]   ;;  %v11298_v52 = vpop.eup %8318  ;;  %8338 = vpow2.f32 %v11206_v27  ;;  %v11301_v50 = vmul.f32 1.442695, %v4261_v32  ;;  %v8555_v51 = vld [vmem:[%s9299_s23 + $0x57c] ss:$24 sps:$4 sm:$0xff]  }
 0x65d   : > { %12516 = vst [vmem:[#allocation32_spill] sm:$0xff] %v11287_v6  ;;  %5000 = vmatpush1.bf16.msra.mxu0 %v8552_v29  ;;  %v8553_v26 = vld [vmem:[%s9299_s23 + $0x548] ss:$24 sps:$4 sm:$0xff]   ;;  %v11303_v34 = vmul.f32 1.442695, %v4262_v35  ;;  %v4269_v37 = vsub.f32 %v12519_v30, %v11001_v48  ;;  %v11309_v31 = vpop.eup %8320  ;;  %8340 = vpow2.f32 %v11208_v21 }
 0x65e   : > { %5372 = vmatpush1.bf16.msra.mxu1 %v8553_v26  ;;  %v8554_v6 = vld [vmem:[%s9299_s23 + $0x574] ss:$24 sps:$4 sm:$0xff]   ;;  %v4547_v20 = vadd.f32 %v11268_v9, %v4546_v14  ;;  %v11313_v26 = vpack.c.bf16 %v11298_v52, %v8317_v49  ;;  %v12521_v27 = vld [vmem:[#allocation64_spill] sm:$0xff]  ;;  %v11318_v35 = vpop.eup %8322  ;;  %v4553_v29 = vadd.f32 %v11309_v31, %v4552_v55  ;;  %8342 = vpow2.f32 %v11210_v43 }
 0x65f   : > { %5001 = vmatprep.subr.bf16.mxu0 %v8554_v6  ;;  %5373 = vmatprep.subr.bf16.mxu1 %v8555_v51  ;;  %v4270_v32 = vsub.f32 %v12521_v27, %v11001_v48  ;;  %v12522_v6 = vld [vmem:[#allocation77_spill] sm:$0xff]  ;;  %v12523_v14 = vld [vmem:[#allocation78_spill] sm:$0xff]  ;;  %v11326_v9 = vpop.eup %8324  ;;  %8344 = vpow2.f32 %v11213_v47  ;;  %v11332_v55 = vmul.f32 1.442695, %v4263_v5  ;;  %v11334_v43 = vmul.f32 1.442695, %v4264_v33 }
 0x660   : > { %12520 = vst [vmem:[#allocation29_spill] sm:$0xff] %v11313_v26  ;;  %v4271_v30 = vsub.f32 %v12522_v6, %v11001_v48  ;;  %v4272_v51 = vsub.f32 %v12523_v14, %v11001_v48  ;;  %v4548_v21 = vadd.f32 %v11277_v63, %v4547_v20  ;;  %4954 = vmatprep.mubr.bf16.mxu0 %v11313_v26  ;;  %v11336_v27 = vpop.eup %8326  ;;  %8346 = vpow2.f32 %v11220_v36  ;;  %v12524_v20 = vld [vmem:[#allocation65_spill] sm:$0xff]  ;;  %v8557_v47 = vld [vmem:[%s9299_s23 + $0x578] ss:$24 sps:$4 sm:$0xff]  }
 0x661   : > { %5326 = vmatprep.mubr.bf16.mxu1 %v11313_v26  ;;  %v4554_v6 = vadd.f32 %v11318_v35, %v4553_v29  ;;  %v11340_v48 = vmul.f32 1.442695, %v4269_v37  ;;  %v4277_v14 = vsub.f32 %v12524_v20, %v11022_v44  ;;  %5002 = vmatpush1.bf16.msra.mxu0 %v8556_v23  ;;  %v11346_v5 = vpop.eup %8328  ;;  %8348 = vpow2.f32 %v10979_v25  ;;  %v12525_v29 = vld [vmem:[#allocation66_spill] sm:$0xff]  ;;  %v8558_v37 = vld [vmem:[%s9299_s23 + $0x5a4] ss:$24 sps:$4 sm:$0xff]  }
 0x662   : > { %5374 = vmatpush1.bf16.msra.mxu1 %v8557_v47  ;;  %4549 = vadd.xlane.f32.xlu1 %v4548_v21  ;;  %v11349_v33 = vmul.f32 1.442695, %v4270_v32  ;;  %v4278_v36 = vsub.f32 %v12525_v29, %v11022_v44  ;;  %v11356_v20 = vpack.c.bf16 %v10829_v24, %v10803_v57  ;;  %v8331_v23 = vpop.eup %8330  ;;  %8350 = vpow2.f32 %v11232_v22  ;;  %v8559_v32 = vld [vmem:[%s9299_s23 + $0x5ac] ss:$24 sps:$4 sm:$0xff]   ;;  %v12527_v57 = vld [vmem:[#allocation79_spill] sm:$0xff] }
 0x663   : > { %5003 = vmatprep.subr.bf16.mxu0 %v8558_v37  ;;  %v4555_v26 = vadd.f32 %v11326_v9, %v4554_v6  ;;  %v11360_v21 = vmul.f32 1.442695, %v4271_v30  ;;  %v11362_v25 = vmul.f32 1.442695, %v4272_v51  ;;  %5375 = vmatprep.subr.bf16.mxu1 %v8559_v32  ;;  %v8333_v47 = vpop.eup %8332  ;;  %8352 = vpow2.f32 %v11252_v62  ;;  %v8560_v32 = vld [vmem:[%s9299_s23 + $0x5a0] ss:$24 sps:$4 sm:$0xff]  }
 0x664   : > { %12526 = vst [vmem:[#allocation31_spill] sm:$0xff] %v11356_v20  ;;  %v4569_v29 = vadd.f32 %v8331_v23, %v8317_v49  ;;  %v8335_v22 = vpop.eup %8334  ;;  %v11371_v20 = vpack.c.bf16 %v8333_v47, %v8331_v23  ;;  %8354 = vpow2.f32 %v11254_v13  ;;  %v11374_v51 = vmul.f32 1.442695, %v4277_v14  ;;  %v8561_v62 = vld [vmem:[%s9299_s23 + $0x5a8] ss:$24 sps:$4 sm:$0xff]  }
 0x665   : > { %v4556_v30 = vadd.f32 %v11336_v27, %v4555_v26  ;;  %5004 = vmatpush1.bf16.msra.mxu0 %v8560_v32  ;;  %v8337_v49 = vpop.eup %8336  ;;  %v4562_v24 = vadd.f32 %v8335_v22, %v11281_v46  ;;  %8356 = vpow2.f32 %v11262_v15  ;;  %v11380_v37 = vmul.f32 1.442695, %v4278_v36  ;;  %v8562_v6 = vld [vmem:[%s9299_s23 + $0x5d4] ss:$24 sps:$4 sm:$0xff]   ;;  %v12532_v32 = vld [vmem:[#allocation43_spill] sm:$0xff] }
 0x666   : > { %5376 = vmatpush1.bf16.msra.mxu1 %v8561_v62  ;;  %5005 = vmatprep.subr.bf16.mxu0 %v8562_v6  ;;  %v8563_v26 = vld [vmem:[%s9299_s23 + $0x5dc] ss:$24 sps:$4 sm:$0xff]   ;;  %v11386_v13 = vpack.c.bf16 %v11103_v3, %v10997_v42  ;;  %v8339_v14 = vpop.eup %8338  ;;  %v4570_v15 = vadd.f32 %v11058_v0, %v4569_v29  ;;  %8358 = vpow2.f32 %v11274_v11  ;;  %v11395_v46 = vpack.c.bf16 %v10885_v61, %v10851_v17  ;;  %v8564_v61 = vld [vmem:[%s9299_s23 + $0x5d0] ss:$24 sps:$4 sm:$0xff]  }
 0x667   : > { %5377 = vmatprep.subr.bf16.mxu1 %v8563_v26  ;;  %v4557_v23 = vadd.f32 %v11346_v5, %v4556_v30  ;;  %4955 = vmatmul.mubr.bf16.gmra.mrb[64].mxu0 %v11371_v20  ;;  %v8341_v36 = vpop.eup %8340  ;;  %v4563_v42 = vadd.f32 %v8337_v49, %v4562_v24  ;;  %8360 = vpow2.f32 %v11283_v39  ;;  %v11400_v3 = vpack.c.bf16 %v11239_v12, %v11167_v53  ;;  %v8565_v12 = vld [vmem:[%s9299_s23 + $0x5d8] ss:$24 sps:$4 sm:$0xff]  }
 0x668   : > { %5327 = vmatmul.mubr.bf16.gmra.mrb[88].mxu1 %v11371_v20  ;;  %v11404_v6 = vpack.c.bf16 %v10963_v41, %v10943_v54  ;;  %v8343_v29 = vpop.eup %8342  ;;  %8362 = vpow2.f32 %v10989_v59  ;;  %v11409_v17 = vpack.c.bf16 %v8335_v22, %v11309_v31  ;;  %v11413_v11 = vpack.c.bf16 %v11037_v56, %v11008_v16  ;;  %v8566_v59 = vld [vmem:[%s9299_s23 + $0x604] ss:$24 sps:$4 sm:$0xff]  }
 0x669   : > { %4558 = vadd.xlane.f32.xlu0 %v4557_v23  ;;  %5006 = vmatpush1.bf16.msra.mxu0 %v8564_v61  ;;  %v11417_v53 = vpack.c.bf16 %v11074_v60, %v11058_v0  ;;  %v8345_v41 = vpop.eup %8344  ;;  %v4564_v54 = vadd.f32 %v8339_v14, %v4563_v42  ;;  %8364 = vpow2.f32 %v11301_v50  ;;  %v11424_v39 = vpack.c.bf16 %v11133_v1, %v11113_v2  ;;  %v8567_v31 = vld [vmem:[%s9299_s23 + $0x60c] ss:$24 sps:$4 sm:$0xff]   ;;  %v12533_v62 = vld [vmem:[#allocation47_spill] sm:$0xff] }
 0x66a   : > { %5378 = vmatpush1.bf16.msra.mxu1 %v8565_v12  ;;  %5068 = vmatprep.subr.bf16.mxu0 %v8566_v59  ;;  %v11428_v16 = vpack.c.bf16 %v10972_v18, %v10855_v40  ;;  %v11430_v56 = vpop.eup %8346  ;;  %8366 = vpow2.f32 %v11303_v34  ;;  %v4578_v0 = vadd.f32 %v8333_v47, %v11298_v52  ;;  %v11437_v50 = vpack.c.bf16 %v11139_v10, %v11028_v19  ;;  %v12536_v42 = vld [vmem:[#allocation48_spill] sm:$0xff] }
 0x66b   : > { %5440 = vmatprep.subr.bf16.mxu1 %v8567_v31  ;;  %v11441_v24 = vpack.c.bf16 %v11124_v28, %v11016_v4  ;;  %v8349_v22 = vpop.eup %8348  ;;  %v4565_v30 = vadd.f32 %v8341_v36, %v4564_v54  ;;  %v11444_v40 = vpack.c.bf16 %v11430_v56, %v8345_v41  ;;  %8368 = vpow2.f32 %v11332_v55  ;;  %v12529_v55 = vld [vmem:[#allocation51_spill] sm:$0xff] }
 0x66c   : > { %v11449_v18 = vpack.c.bf16 %v11258_v58, %v11185_v45  ;;  %v8351_v52 = vpop.eup %8350  ;;  %v4571_v34 = vadd.f32 %v8349_v22, %v4570_v15  ;;  %8370 = vpow2.f32 %v11334_v43  ;;  %v11454_v19 = vpack.c.bf16 %v11247_v8, %v11175_v7  ;;  %v12530_v58 = vld [vmem:[#allocation26_spill] sm:$0xff]  ;;  %v12531_v43 = vld [vmem:[#allocation27_spill] sm:$0xff] }
 0x66d   : > { %v11457_v4 = vpack.c.bf16 %v8339_v14, %v11326_v9  ;;  %v8353_v28 = vpop.eup %8352  ;;  %v4566_v10 = vadd.f32 %v8343_v29, %v4565_v30  ;;  %4964 = vmatprep.mubr.bf16.mxu0 %v11444_v40  ;;  %5336 = vmatprep.mubr.bf16.mxu1 %v11444_v40  ;;  %8372 = vpow2.f32 %v12529_v55  ;;  %v11463_v45 = vpack.c.bf16 %v8337_v49, %v11318_v35  ;;  %v12534_v35 = vld [vmem:[#allocation42_spill] sm:$0xff]  ;;  %v12535_v49 = vld [vmem:[#allocation52_spill] sm:$0xff] }
 0x66e   : > { %v11467_v47 = vpack.c.bf16 %v12531_v43, %v12530_v58  ;;  %v8355_v7 = vpop.eup %8354  ;;  %v4572_v8 = vadd.f32 %v8351_v52, %v4571_v34  ;;  %v4579_v9 = vadd.f32 %v11074_v60, %v4578_v0  ;;  %8374 = vpow2.f32 %v11340_v48  ;;  %v12537_v60 = vld [vmem:[#allocation30_spill] sm:$0xff] }
 0x66f   : > { %v11473_v26 = vpack.c.bf16 %v12533_v62, %v12532_v32  ;;  %v8357_v14 = vpop.eup %8356  ;;  %4567 = vadd.xlane.f32.xlu1 %v4566_v10  ;;  %8376 = vpow2.f32 %v11349_v33  ;;  %v11478_v23 = vpack.c.bf16 %v12535_v49, %v12534_v35  ;;  %v11482_v15 = vpack.c.bf16 %v11277_v63, %v11203_v38  ;;  %v12539_v10 = vld [vmem:[#allocation44_spill] sm:$0xff] }
 0x670   : > { %v11486_v61 = vpack.c.bf16 %v12537_v60, %v12536_v42  ;;  %v8359_v48 = vpop.eup %8358  ;;  %v4573_v54 = vadd.f32 %v8353_v28, %v4572_v8  ;;  %8378 = vpow2.f32 %v11360_v21  ;;  %v11490_v12 = vpack.c.bf16 %v8343_v29, %v11346_v5  ;;  %v12540_v21 = vld [vmem:[#allocation80_spill] sm:$0xff] }
 0x671   : > { %v11493_v33 = vpack.c.bf16 %v8341_v36, %v11336_v27  ;;  %v8361_v59 = vpop.eup %8360  ;;  %8380 = vpow2.f32 %v11362_v25  ;;  %v4587_v0 = vadd.f32 %v8359_v48, %v8345_v41  ;;  %v12538_v38 = vsub.f32 %v12527_v57, %v11022_v44  ;;  %v12542_v8 = vld [vmem:[#allocation32_spill] sm:$0xff] }
 0x672   : > { %v8363_v31 = vpop.eup %8362  ;;  %v4574_v30 = vadd.f32 %v8355_v7, %v4573_v54  ;;  %v11499_v34 = vpack.c.bf16 %v8361_v59, %v8359_v48  ;;  %8382 = vpow2.f32 %v12539_v10  ;;  %v12541_v5 = vsub.f32 %v12540_v21, %v11022_v44 }
 0x673   : > { %v4469_v63 = vmul.f32 1.442695, %v12538_v38  ;;  %v8365_v27 = vpop.eup %8364  ;;  %v4580_v36 = vadd.f32 %v8363_v31, %v4579_v9  ;;  %8384 = vpow2.f32 %v11374_v51  ;;  %v11506_v25 = vpack.c.bf16 %v8363_v31, %v8349_v22  ;;  %v12543_v38 = vld [vmem:[#allocation31_spill] sm:$0xff] }
 0x674   : > { %v4471_v29 = vmul.f32 1.442695, %v12541_v5  ;;  %v8367_v41 = vpop.eup %8366  ;;  %v4575_v55 = vadd.f32 %v8357_v14, %v4574_v30  ;;  %4965 = vmatmul.mubr.bf16.gmra.mrb[68].mxu0 %v11499_v34  ;;  %5337 = vmatmul.mubr.bf16.gmra.mrb[92].mxu1 %v11499_v34  ;;  %v4588_v57 = vadd.f32 %v11113_v2, %v4587_v0  ;;  %8386 = vpow2.f32 %v11380_v37  ;;  %v8568_v30 = vld [vmem:[%s9299_s23 + $0x600] ss:$24 sps:$4 sm:$0xff]  }
 0x675   : > { %v11512_v58 = vpack.c.bf16 %v8365_v27, %v8351_v52  ;;  %v8369_v44 = vpop.eup %8368  ;;  %v4581_v43 = vadd.f32 %v8365_v27, %v4580_v36  ;;  %5007 = vmatprep.mubr.bf16.mxu0 %v12542_v8  ;;  %5379 = vmatprep.mubr.bf16.mxu1 %v12542_v8  ;;  %8388 = vpow2.f32 %v4469_v63  ;;  %v4596_v51 = vadd.f32 %v8361_v59, %v11430_v56  ;;  %v8570_v27 = vld [vmem:[%s9299_s23 + $0x634] ss:$24 sps:$4 sm:$0xff]  }
 0x676   : > { %v11517_v22 = vpack.c.bf16 %v8367_v41, %v8353_v28  ;;  %v8371_v9 = vpop.eup %8370  ;;  %4576 = vadd.xlane.f32.xlu0 %v4575_v55  ;;  %8390 = vpow2.f32 %v4471_v29  ;;  %v11519_v32 = vpack.c.bf16 %v8369_v44, %v8355_v7  ;;  %v8569_v29 = vld [vmem:[%s9299_s23 + $0x608] ss:$24 sps:$4 sm:$0xff]  }
 0x677   : > { %v8373_v2 = vpop.eup %8372  ;;  %v4582_v37 = vadd.f32 %v8367_v41, %v4581_v43  ;;  %v11521_v52 = vpack.c.bf16 %v8371_v9, %v8357_v14  ;;  %v4597_v60 = vadd.f32 %v11133_v1, %v4596_v51 }
 0x678   : > { %v8375_v62 = vpop.eup %8374  ;;  %v4589_v35 = vadd.f32 %v8373_v2, %v4588_v57  ;;  %v8571_v57 = vld [vmem:[%s9299_s23 + $0x63c] ss:$24 sps:$4 sm:$0xff]  }
 0x679   : > { %v8377_v49 = vpop.eup %8376  ;;  %v4583_v42 = vadd.f32 %v8369_v44, %v4582_v37  ;;  %v8573_v37 = vld [vmem:[%s9299_s23 + $0x638] ss:$24 sps:$4 sm:$0xff]  }
 0x67a   : > { %v8379_v48 = vpop.eup %8378  ;;  %v4590_v56 = vadd.f32 %v8375_v62, %v4589_v35 }
 0x67b   : > { %v8381_v28 = vpop.eup %8380  ;;  %v4584_v54 = vadd.f32 %v8371_v9, %v4583_v42  ;;  %v8572_v9 = vld [vmem:[%s9299_s23 + $0x630] ss:$24 sps:$4 sm:$0xff]   ;;  %v8576_v42 = vld [vmem:[%s9299_s23 + $0x660] ss:$24 sps:$4 sm:$0xff]  }
 0x67c   : > { %v8383_v59 = vpop.eup %8382  ;;  %v4591_v0 = vadd.f32 %v8377_v49, %v4590_v56  ;;  %5008 = vmatmul.mubr.bf16.vlgmr.msra.gmra.mrb[48].mxu0 %v12543_v38  ;;  %5380 = vmatmul.mubr.bf16.vlgmr.msra.gmra.mrb[72].mxu1 %v12543_v38  ;;  %v12545_v56 = vld [vmem:[#allocation83_spill] sm:$0xff] }
 0x67d   : > { %v8385_v7 = vpop.eup %8384  ;;  %4585 = vadd.xlane.f32.xlu1 %v4584_v54  ;;  %v4598_v14 = vadd.f32 %v8383_v59, %v4597_v60  ;;  %5017 = vmatprep.mubr.bf16.mxu0 %v11386_v13  ;;  %v11527_v63 = vpack.c.bf16 %v8383_v59, %v8373_v2  ;;  %v8577_v60 = vld [vmem:[%s9299_s23 + $0x668] ss:$24 sps:$4 sm:$0xff]   ;;  %v8578_v59 = vld [vmem:[%s9299_s23 + $0x694] ss:$24 sps:$4 sm:$0xff]  }
 0x67e   : > { %v8387_v1 = vpop.eup %8386  ;;  %v4592_v31 = vadd.f32 %v8379_v48, %v4591_v0  ;;  %5069 = vmatpush1.bf16.msra.mxu0 %v8568_v30  ;;  %5389 = vmatprep.mubr.bf16.mxu1 %v11386_v13  ;;  %v11531_v10 = vpack.c.bf16 %v8385_v7, %v8375_v62  ;;  %v8574_v62 = vld [vmem:[%s9299_s23 + $0x664] ss:$24 sps:$4 sm:$0xff]   ;;  %v8580_v30 = vld [vmem:[%s9299_s23 + $0x690] ss:$24 sps:$4 sm:$0xff]  }
 0x67f   : > { %v8389_v21 = vpop.eup %8388  ;;  %v4599_v5 = vadd.f32 %v8385_v7, %v4598_v14  ;;  %5441 = vmatpush1.bf16.msra.mxu1 %v8569_v29  ;;  %5070 = vmatprep.subr.bf16.mxu0 %v8570_v27  ;;  %v11535_v36 = vpack.c.bf16 %v8387_v1, %v8377_v49  ;;  %v8575_v49 = vld [vmem:[%s9299_s23 + $0x66c] ss:$24 sps:$4 sm:$0xff]   ;;  %v8579_v0 = vld [vmem:[%s9299_s23 + $0x69c] ss:$24 sps:$4 sm:$0xff]   ;;  %v8584_v27 = vld [vmem:[%s9299_s23 + $0x6c0] ss:$24 sps:$4 sm:$0xff]  }
 0x680   : > { %v8391_v41 = vpop.eup %8390  ;;  %v4593_v55 = vadd.f32 %v8381_v28, %v4592_v31  ;;  %5442 = vmatprep.subr.bf16.mxu1 %v8571_v57  ;;  %v11538_v44 = vpack.c.bf16 %v8389_v21, %v8379_v48  ;;  %v12544_v48 = vld [vmem:[#allocation81_spill] sm:$0xff]  ;;  %v12547_v7 = vld [vmem:[#allocation82_spill] sm:$0xff]  ;;  %v12548_v14 = vld [vmem:[#allocation84_spill] sm:$0xff] }
 0x681   : > { %v4600_v43 = vadd.f32 %v8387_v1, %v4599_v5  ;;  %v11540_v51 = vpack.c.bf16 %v8391_v41, %v8381_v28  ;;  %v12546_v28 = vsub.f32 %v12544_v48, %v12545_v56  ;;  %v12549_v1 = vsub.f32 %v12547_v7, %v12548_v14  ;;  %v8582_v5 = vld [vmem:[%s9299_s23 + $0x6c4] ss:$24 sps:$4 sm:$0xff]   ;;  %v8596_v56 = vld [vmem:[%s9299_s23 + $0x750] ss:$24 sps:$4 sm:$0xff]   ;;  %v8602_v14 = vld [vmem:[%s9299_s23 + $0x7b4] ss:$24 sps:$4 sm:$0xff]  }
 0x682   : > { %4594 = vadd.xlane.f32.xlu0 %v4593_v55  ;;  %5071 = vmatpush1.bf16.msra.mxu0 %v8572_v9  ;;  %v8583_v29 = vld [vmem:[%s9299_s23 + $0x6cc] ss:$24 sps:$4 sm:$0xff]   ;;  %v8587_v57 = vld [vmem:[%s9299_s23 + $0x6fc] ss:$24 sps:$4 sm:$0xff]   ;;  %v8589_v9 = vld [vmem:[%s9299_s23 + $0x6f8] ss:$24 sps:$4 sm:$0xff]  }
 0x683   : > { %v4601_v2 = vadd.f32 %v8389_v21, %v4600_v43  ;;  %5443 = vmatpush1.bf16.msra.mxu1 %v8573_v37  ;;  %5072 = vmatprep.subr.bf16.mxu0 %v8574_v62  ;;  %v4121_v54 = vmul.f32 1.442695, %v12546_v28  ;;  %v4123_v31 = vmul.f32 1.442695, %v12549_v1  ;;  %v8581_v21 = vld [vmem:[%s9299_s23 + $0x698] ss:$24 sps:$4 sm:$0xff]  }
 0x684   : > { %5018 = vmatmul.mubr.bf16.gmra.mrb[52].mxu0 %v11395_v46  ;;  %5390 = vmatmul.mubr.bf16.gmra.mrb[76].mxu1 %v11395_v46  ;;  %v8586_v55 = vld [vmem:[%s9299_s23 + $0x6f4] ss:$24 sps:$4 sm:$0xff]   ;;  %v8588_v43 = vld [vmem:[%s9299_s23 + $0x6f0] ss:$24 sps:$4 sm:$0xff]  }
 0x685   : > { %v4602_v35 = vadd.f32 %v8391_v41, %v4601_v2  ;;  %5444 = vmatprep.subr.bf16.mxu1 %v8575_v49  ;;  %5027 = vmatprep.mubr.bf16.mxu0 %v11400_v3  ;;  %8392 = vpow2.f32 %v4121_v54  ;;  %v8585_v41 = vld [vmem:[%s9299_s23 + $0x6c8] ss:$24 sps:$4 sm:$0xff]   ;;  %v8590_v2 = vld [vmem:[%s9299_s23 + $0x724] ss:$24 sps:$4 sm:$0xff]   ;;  %v8597_v28 = vld [vmem:[%s9299_s23 + $0x758] ss:$24 sps:$4 sm:$0xff]  }
 0x686   : > { %5073 = vmatpush1.bf16.msra.mxu0 %v8576_v42  ;;  %5399 = vmatprep.mubr.bf16.mxu1 %v11400_v3  ;;  %8394 = vpow2.f32 %v4123_v31  ;;  %v8591_v37 = vld [vmem:[%s9299_s23 + $0x72c] ss:$24 sps:$4 sm:$0xff]   ;;  %v8593_v42 = vld [vmem:[%s9299_s23 + $0x728] ss:$24 sps:$4 sm:$0xff]   ;;  %v8595_v48 = vld [vmem:[%s9299_s23 + $0x75c] ss:$24 sps:$4 sm:$0xff]   ;;  %v11602_v31 = vpop.permute.xlu1 %4709 }
 0x687   : > { %4603 = vadd.xlane.f32.xlu1 %v4602_v35  ;;  %5445 = vmatpush1.bf16.msra.mxu1 %v8577_v60  ;;  %v8592_v35 = vld [vmem:[%s9299_s23 + $0x720] ss:$24 sps:$4 sm:$0xff]   ;;  %v8594_v60 = vld [vmem:[%s9299_s23 + $0x754] ss:$24 sps:$4 sm:$0xff]   ;;  %v8598_v54 = vld [vmem:[%s9299_s23 + $0x784] ss:$24 sps:$4 sm:$0xff]  }
 0x688   : > { %5074 = vmatprep.subr.bf16.mxu0 %v8578_v59  ;;  %5446 = vmatprep.subr.bf16.mxu1 %v8579_v0  ;;  %v8599_v59 = vld [vmem:[%s9299_s23 + $0x78c] ss:$24 sps:$4 sm:$0xff]   ;;  %v8600_v0 = vld [vmem:[%s9299_s23 + $0x780] ss:$24 sps:$4 sm:$0xff]   ;;  %v8603_v1 = vld [vmem:[%s9299_s23 + $0x7bc] ss:$24 sps:$4 sm:$0xff]  }
 0x689   : > { %v8601_v7 = vld [vmem:[%s9299_s23 + $0x788] ss:$24 sps:$4 sm:$0xff]  }
 0x68a   : > { %5075 = vmatpush1.bf16.msra.mxu0 %v8580_v30  ;;  %v8604_v30 = vld [vmem:[%s9299_s23 + $0x7b0] ss:$24 sps:$4 sm:$0xff]  }
 0x68b   : > { %5447 = vmatpush1.bf16.msra.mxu1 %v8581_v21  ;;  %5076 = vmatprep.subr.bf16.mxu0 %v8582_v5  ;;  %v8605_v21 = vld [vmem:[%s9299_s23 + $0x7b8] ss:$24 sps:$4 sm:$0xff]   ;;  %v8606_v5 = vld [vmem:[%s9299_s23 + $0x7e4] ss:$24 sps:$4 sm:$0xff]  }
 0x68c   : > { %5028 = vmatmul.mubr.bf16.gmra.mrb[56].mxu0 %v11404_v6  ;;  %5400 = vmatmul.mubr.bf16.gmra.mrb[80].mxu1 %v11404_v6 }
 0x68d   : > { %5448 = vmatprep.subr.bf16.mxu1 %v8583_v29  ;;  %5037 = vmatprep.mubr.bf16.mxu0 %v11409_v17  ;;  %v8607_v29 = vld [vmem:[%s9299_s23 + $0x7ec] ss:$24 sps:$4 sm:$0xff]  }
 0x68e   : > { %5077 = vmatpush1.bf16.msra.mxu0 %v8584_v27  ;;  %5409 = vmatprep.mubr.bf16.mxu1 %v11409_v17  ;;  %v8608_v27 = vld [vmem:[%s9299_s23 + $0x7e0] ss:$24 sps:$4 sm:$0xff]  }
 0x68f   : > { %5449 = vmatpush1.bf16.msra.mxu1 %v8585_v41  ;;  %5078 = vmatprep.subr.bf16.mxu0 %v8586_v55  ;;  %v11579_v62 = vpop.eup %8392  ;;  %v11613_v41 = vpop.permute.xlu1 %4714  ;;  %v8609_v55 = vld [vmem:[%s9299_s23 + $0x7e8] ss:$24 sps:$4 sm:$0xff]  }
 0x690   : > { %5450 = vmatprep.subr.bf16.mxu1 %v8587_v57  ;;  %v11583_v49 = vpop.eup %8394  ;;  %v8610_v57 = vld [vmem:[%s9299_s23 + $0x814] ss:$24 sps:$4 sm:$0xff]  }
 0x692   : > { %5079 = vmatpush1.bf16.msra.mxu0 %v8588_v43  ;;  %v8611_v43 = vld [vmem:[%s9299_s23 + $0x81c] ss:$24 sps:$4 sm:$0xff]  }
 0x693   : > { %5451 = vmatpush1.bf16.msra.mxu1 %v8589_v9  ;;  %5080 = vmatprep.subr.bf16.mxu0 %v8590_v2  ;;  %v8612_v9 = vld [vmem:[%s9299_s23 + $0x810] ss:$24 sps:$4 sm:$0xff]  }
 0x694   : > { %5038 = vmatmul.mubr.bf16.gmra.mrb[60].mxu0 %v11413_v11  ;;  %5410 = vmatmul.mubr.bf16.gmra.mrb[84].mxu1 %v11413_v11  ;;  %v8613_v2 = vld [vmem:[%s9299_s23 + $0x818] ss:$24 sps:$4 sm:$0xff]  }
 0x695   : > { %5452 = vmatprep.subr.bf16.mxu1 %v8591_v37  ;;  %5047 = vmatprep.mubr.bf16.mxu0 %v11506_v25  ;;  %v8614_v37 = vld [vmem:[%s9299_s23 + $0x844] ss:$24 sps:$4 sm:$0xff]  }
 0x696   : > { %5081 = vmatpush1.bf16.msra.mxu0 %v8592_v35  ;;  %5419 = vmatprep.mubr.bf16.mxu1 %v11506_v25  ;;  %v8615_v35 = vld [vmem:[%s9299_s23 + $0x84c] ss:$24 sps:$4 sm:$0xff]  }
 0x697   : > { %5453 = vmatpush1.bf16.msra.mxu1 %v8593_v42  ;;  %5082 = vmatprep.subr.bf16.mxu0 %v8594_v60  ;;  %v11622_v42 = vpop.permute.xlu0 %4704  ;;  %v11624_v60 = vpop.permute.xlu1 %4724 }
 0x698   : > { %4754 = vperm.xlu1 %7549, %v11579_v62   ;;  %4759 = vperm.xlu0 %7548, %v11583_v49  }
 0x699   : > { %5454 = vmatprep.subr.bf16.mxu1 %v8595_v48  ;;  %v8616_v48 = vld [vmem:[%s9299_s23 + $0x840] ss:$24 sps:$4 sm:$0xff]  }
 0x69a   : > { %5083 = vmatpush1.bf16.msra.mxu0 %v8596_v56  ;;  %v8617_v56 = vld [vmem:[%s9299_s23 + $0x848] ss:$24 sps:$4 sm:$0xff]  }
 0x69b   : > { %5455 = vmatpush1.bf16.msra.mxu1 %v8597_v28  ;;  %5084 = vmatprep.subr.bf16.mxu0 %v8598_v54  ;;  %v8618_v28 = vld [vmem:[%s9299_s23 + $0x874] ss:$24 sps:$4 sm:$0xff]  }
 0x69c   : > { %5048 = vmatmul.mubr.bf16.gmra.mrb[64].mxu0 %v11417_v53  ;;  %5420 = vmatmul.mubr.bf16.gmra.mrb[88].mxu1 %v11417_v53  ;;  %v8619_v54 = vld [vmem:[%s9299_s23 + $0x87c] ss:$24 sps:$4 sm:$0xff]  }
 0x69d   : > { %5456 = vmatprep.subr.bf16.mxu1 %v8599_v59  ;;  %5057 = vmatprep.mubr.bf16.mxu0 %v11527_v63  ;;  %v8620_v59 = vld [vmem:[%s9299_s23 + $0x870] ss:$24 sps:$4 sm:$0xff]  }
 0x69e   : > { %5085 = vmatpush1.bf16.msra.mxu0 %v8600_v0  ;;  %5429 = vmatprep.mubr.bf16.mxu1 %v11527_v63  ;;  %v11631_v0 = vpop.permute.xlu0 %4719 }
 0x69f   : > { %5457 = vmatpush1.bf16.msra.mxu1 %v8601_v7  ;;  %5086 = vmatprep.subr.bf16.mxu0 %v8602_v14  ;;  %v11633_v7 = vpop.permute.xlu1 %4734  ;;  %v8621_v14 = vld [vmem:[%s9299_s23 + $0x878] ss:$24 sps:$4 sm:$0xff]  }
 0x6a0   : > { %5458 = vmatprep.subr.bf16.mxu1 %v8603_v1  ;;  %v8622_v1 = vld [vmem:[%s9299_s23 + $0x8a4] ss:$24 sps:$4 sm:$0xff]  }
 0x6a2   : > { %5087 = vmatpush1.bf16.msra.mxu0 %v8604_v30  ;;  %v8623_v30 = vld [vmem:[%s9299_s23 + $0x8ac] ss:$24 sps:$4 sm:$0xff]  }
 0x6a3   : > { %5459 = vmatpush1.bf16.msra.mxu1 %v8605_v21  ;;  %5088 = vmatprep.subr.bf16.mxu0 %v8606_v5  ;;  %v8624_v21 = vld [vmem:[%s9299_s23 + $0x8a0] ss:$24 sps:$4 sm:$0xff]  }
 0x6a4   : > { %5058 = vmatmul.mubr.bf16.gmra.mrb[68].mxu0 %v11424_v39  ;;  %5430 = vmatmul.mubr.bf16.gmra.mrb[92].mxu1 %v11424_v39  ;;  %v8625_v5 = vld [vmem:[%s9299_s23 + $0x8a8] ss:$24 sps:$4 sm:$0xff]  }
 0x6a5   : > { %5460 = vmatprep.subr.bf16.mxu1 %v8607_v29  ;;  %5100 = vmatprep.mubr.bf16.mxu0 %v11428_v16  ;;  %v8626_v29 = vld [vmem:[%s9299_s23 + $0x8d4] ss:$24 sps:$4 sm:$0xff]  }
 0x6a6   : > { %5089 = vmatpush1.bf16.msra.mxu0 %v8608_v27  ;;  %5472 = vmatprep.mubr.bf16.mxu1 %v11428_v16  ;;  %v8627_v27 = vld [vmem:[%s9299_s23 + $0x8dc] ss:$24 sps:$4 sm:$0xff]  }
 0x6a7   : > { %5461 = vmatpush1.bf16.msra.mxu1 %v8609_v55  ;;  %5090 = vmatprep.subr.bf16.mxu0 %v8610_v57  ;;  %v11642_v55 = vpop.permute.xlu0 %4729  ;;  %v11644_v57 = vpop.permute.xlu1 %4744 }
 0x6a8   : > { %5462 = vmatprep.subr.bf16.mxu1 %v8611_v43  ;;  %v4473_v43 = vld [vmem:[#allocation3] sm:$0xff] }
 0x6aa   : > { %5091 = vmatpush1.bf16.msra.mxu0 %v8612_v9  ;;  %v8628_v9 = vld [vmem:[%s9299_s23 + $0x8d0] ss:$24 sps:$4 sm:$0xff]  }
 0x6ab   : > { %5463 = vmatpush1.bf16.msra.mxu1 %v8613_v2  ;;  %5092 = vmatprep.subr.bf16.mxu0 %v8614_v37  ;;  %v8629_v2 = vld [vmem:[%s9299_s23 + $0x8d8] ss:$24 sps:$4 sm:$0xff]   ;;  %v12550_v37 = vld [vmem:[#allocation20_spill] sm:$0xff] }
 0x6ac   : > { %5464 = vmatprep.subr.bf16.mxu1 %v8615_v35  ;;  %v12551_v35 = vld [vmem:[#allocation41_spill] sm:$0xff] }
 0x6ae   : > { %5093 = vmatpush1.bf16.msra.mxu0 %v8616_v48  ;;  %v11650_v48 = vpack.c.bf16 %v12551_v35, %v12550_v37  ;;  %v8639_v35 = vld [vmem:[%s9299_s23 + $0x96c] ss:$24 sps:$4 sm:$0xff]  }
 0x6af   : > { %5465 = vmatpush1.bf16.msra.mxu1 %v8617_v56  ;;  %5094 = vmatprep.subr.bf16.mxu0 %v8618_v28  ;;  %v8630_v56 = vld [vmem:[%s9299_s23 + $0x904] ss:$24 sps:$4 sm:$0xff]  }
 0x6b0   : > { %5466 = vmatprep.subr.bf16.mxu1 %v8619_v54  ;;  %v8631_v28 = vld [vmem:[%s9299_s23 + $0x90c] ss:$24 sps:$4 sm:$0xff]   ;;  %v12552_v54 = vld [vmem:[#allocation86_spill] sm:$0xff] }
 0x6b2   : > { %5095 = vmatpush1.bf16.msra.mxu0 %v8620_v59  ;;  %v4485_v59 = vmul.f32 %v12552_v54, %v4473_v43  ;;  %v8636_v43 = vld [vmem:[%s9299_s23 + $0x930] ss:$24 sps:$4 sm:$0xff]  }
 0x6b3   : > { %5467 = vmatpush1.bf16.msra.mxu1 %v8621_v14  ;;  %5096 = vmatprep.subr.bf16.mxu0 %v8622_v1  ;;  %v8641_v54 = vld [vmem:[%s9299_s23 + $0x968] ss:$24 sps:$4 sm:$0xff]  }
 0x6b4   : > { %5468 = vmatprep.subr.bf16.mxu1 %v8623_v30  ;;  %v11658_v30 = vpop.permute.xlu0 %4739 }
 0x6b6   : > { %5097 = vmatpush1.bf16.msra.mxu0 %v8624_v21  ;;  %v8632_v21 = vld [vmem:[%s9299_s23 + $0x900] ss:$24 sps:$4 sm:$0xff]  }
 0x6b7   : > { %5469 = vmatpush1.bf16.msra.mxu1 %v8625_v5  ;;  %5098 = vmatprep.subr.bf16.mxu0 %v8626_v29  ;;  %v8633_v5 = vld [vmem:[%s9299_s23 + $0x908] ss:$24 sps:$4 sm:$0xff]   ;;  %v8634_v29 = vld [vmem:[%s9299_s23 + $0x934] ss:$24 sps:$4 sm:$0xff]  }
 0x6b8   : > { %5470 = vmatprep.subr.bf16.mxu1 %v8627_v27  ;;  %v8635_v27 = vld [vmem:[%s9299_s23 + $0x93c] ss:$24 sps:$4 sm:$0xff]   ;;  %v11669_v37 = vpop.permute.xlu0 %4749 }
 0x6ba   : > { %5099 = vmatpush1.bf16.msra.mxu0 %v8628_v9  ;;  %v8637_v9 = vld [vmem:[%s9299_s23 + $0x938] ss:$24 sps:$4 sm:$0xff]  }
 0x6bb   : > { %5471 = vmatpush1.bf16.msra.mxu1 %v8629_v2  ;;  %5161 = vmatprep.subr.bf16.mxu0 %v8630_v56  ;;  %v8638_v2 = vld [vmem:[%s9299_s23 + $0x964] ss:$24 sps:$4 sm:$0xff]   ;;  %v4474_v56 = vld [vmem:[#allocation3 + $0x8] sm:$0xff] }
 0x6bc   : > { %5533 = vmatprep.subr.bf16.mxu1 %v8631_v28  ;;  %v4505_v14 = vpop.xlane.xlu1 %4504  ;;  %v8640_v28 = vld [vmem:[%s9299_s23 + $0x960] ss:$24 sps:$4 sm:$0xff]  }
 0x6bd   : > { %5101 = vmatmul.mubr.bf16.vlgmr.msra.gmra.mrb[48].mxu0 %v11650_v48  ;;  %v4605_v1 = vadd.f32 %v4505_v14, %v4485_v59  ;;  %v8642_v59 = vld [vmem:[%s9299_s23 + $0x994] ss:$24 sps:$4 sm:$0xff]  }
 0x6be   : > { %5473 = vmatmul.mubr.bf16.vlgmr.msra.gmra.mrb[72].mxu1 %v11650_v48  ;;  %5110 = vmatprep.mubr.bf16.mxu0 %v11437_v50  ;;  %v12553_v14 = vld [vmem:[#allocation85_spill] sm:$0xff] }
 0x6bf   : > { %5162 = vmatpush1.bf16.msra.mxu0 %v8632_v21  ;;  %5482 = vmatprep.mubr.bf16.mxu1 %v11437_v50  ;;  %4618 = vst.msk [vmem:[#allocation3] sm:$0xff] %vm4617_vm1, %v4605_v1  ;;  %v4486_v1 = vmul.f32 %v12553_v14, %v4474_v56  ;;  %v8643_v21 = vld [vmem:[%s9299_s23 + $0x99c] ss:$24 sps:$4 sm:$0xff]   ;;  %v8648_v56 = vld [vmem:[%s9299_s23 + $0x9c0] ss:$24 sps:$4 sm:$0xff]  }
 0x6c0   : > { %5534 = vmatpush1.bf16.msra.mxu1 %v8633_v5  ;;  %5163 = vmatprep.subr.bf16.mxu0 %v8634_v29  ;;  %v8650_v14 = vld [vmem:[%s9299_s23 + $0x9f4] ss:$24 sps:$4 sm:$0xff]  }
 0x6c1   : > { %5535 = vmatprep.subr.bf16.mxu1 %v8635_v27  ;;  %v8644_v27 = vld [vmem:[%s9299_s23 + $0x990] ss:$24 sps:$4 sm:$0xff]  }
 0x6c3   : > { %5164 = vmatpush1.bf16.msra.mxu0 %v8636_v43  ;;  %v8645_v43 = vld [vmem:[%s9299_s23 + $0x998] ss:$24 sps:$4 sm:$0xff]  }
 0x6c4   : > { %5536 = vmatpush1.bf16.msra.mxu1 %v8637_v9  ;;  %5165 = vmatprep.subr.bf16.mxu0 %v8638_v2  ;;  %v8646_v9 = vld [vmem:[%s9299_s23 + $0x9c4] ss:$24 sps:$4 sm:$0xff]   ;;  %v4475_v2 = vld [vmem:[#allocation3 + $0x10] sm:$0xff] }
 0x6c5   : > { %5111 = vmatmul.mubr.bf16.gmra.mrb[52].mxu0 %v11441_v24  ;;  %5537 = vmatprep.subr.bf16.mxu1 %v8639_v35  ;;  %v8647_v35 = vld [vmem:[%s9299_s23 + $0x9cc] ss:$24 sps:$4 sm:$0xff]  }
 0x6c6   : > { %5483 = vmatmul.mubr.bf16.gmra.mrb[76].mxu1 %v11441_v24  ;;  %5120 = vmatprep.mubr.bf16.mxu0 %v11449_v18 }
 0x6c7   : > { %5166 = vmatpush1.bf16.msra.mxu0 %v8640_v28  ;;  %5492 = vmatprep.mubr.bf16.mxu1 %v11449_v18  ;;  %v12554_v28 = vld [vmem:[#allocation87_spill] sm:$0xff] }
 0x6c8   : > { %5538 = vmatpush1.bf16.msra.mxu1 %v8641_v54  ;;  %5167 = vmatprep.subr.bf16.mxu0 %v8642_v59  ;;  %v4514_v5 = vpop.xlane.xlu0 %4513  ;;  %v4487_v54 = vmul.f32 %v12554_v28, %v4475_v2  ;;  %v8649_v59 = vld [vmem:[%s9299_s23 + $0x9c8] ss:$24 sps:$4 sm:$0xff]   ;;  %v8659_v28 = vld [vmem:[%s9299_s23 + $0xa5c] ss:$24 sps:$4 sm:$0xff]  }
 0x6c9   : > { %5539 = vmatprep.subr.bf16.mxu1 %v8643_v21  ;;  %v4606_v29 = vadd.f32 %v4514_v5, %v4486_v1  ;;  %v8651_v21 = vld [vmem:[%s9299_s23 + $0x9fc] ss:$24 sps:$4 sm:$0xff]   ;;  %v8656_v2 = vld [vmem:[%s9299_s23 + $0xa20] ss:$24 sps:$4 sm:$0xff]  }
 0x6cb   : > { %5168 = vmatpush1.bf16.msra.mxu0 %v8644_v27  ;;  %4619 = vst.msk [vmem:[#allocation3 + $0x8] sm:$0xff] %vm4617_vm1, %v4606_v29  ;;  %v8652_v29 = vld [vmem:[%s9299_s23 + $0x9f0] ss:$24 sps:$4 sm:$0xff]  }
 0x6cc   : > { %5540 = vmatpush1.bf16.msra.mxu1 %v8645_v43  ;;  %5169 = vmatprep.subr.bf16.mxu0 %v8646_v9  ;;  %v8653_v27 = vld [vmem:[%s9299_s23 + $0x9f8] ss:$24 sps:$4 sm:$0xff]   ;;  %v8654_v43 = vld [vmem:[%s9299_s23 + $0xa24] ss:$24 sps:$4 sm:$0xff]  }
 0x6cd   : > { %5121 = vmatmul.mubr.bf16.gmra.mrb[56].mxu0 %v11454_v19  ;;  %5541 = vmatprep.subr.bf16.mxu1 %v8647_v35  ;;  %v8655_v9 = vld [vmem:[%s9299_s23 + $0xa2c] ss:$24 sps:$4 sm:$0xff]   ;;  %v8657_v35 = vld [vmem:[%s9299_s23 + $0xa28] ss:$24 sps:$4 sm:$0xff]  }
 0x6ce   : > { %5493 = vmatmul.mubr.bf16.gmra.mrb[80].mxu1 %v11454_v19  ;;  %5130 = vmatprep.mubr.bf16.mxu0 %v11457_v4 }
 0x6cf   : > { %5170 = vmatpush1.bf16.msra.mxu0 %v8648_v56  ;;  %5502 = vmatprep.mubr.bf16.mxu1 %v11457_v4  ;;  %v8658_v56 = vld [vmem:[%s9299_s23 + $0xa54] ss:$24 sps:$4 sm:$0xff]  }
 0x6d0   : > { %5542 = vmatpush1.bf16.msra.mxu1 %v8649_v59  ;;  %5171 = vmatprep.subr.bf16.mxu0 %v8650_v14  ;;  %v4523_v1 = vpop.xlane.xlu0 %4522  ;;  %v8660_v59 = vld [vmem:[%s9299_s23 + $0xa50] ss:$24 sps:$4 sm:$0xff]  }
 0x6d1   : > { %5543 = vmatprep.subr.bf16.mxu1 %v8651_v21  ;;  %v4607_v5 = vadd.f32 %v4523_v1, %v4487_v54  ;;  %v4476_v54 = vld [vmem:[#allocation3 + $0x18] sm:$0xff]  ;;  %v8663_v21 = vld [vmem:[%s9299_s23 + $0xa8c] ss:$24 sps:$4 sm:$0xff]  }
 0x6d2   : > { %v8661_v14 = vld [vmem:[%s9299_s23 + $0xa58] ss:$24 sps:$4 sm:$0xff]   ;;  %v8662_v1 = vld [vmem:[%s9299_s23 + $0xa84] ss:$24 sps:$4 sm:$0xff]  }
 0x6d3   : > { %5172 = vmatpush1.bf16.msra.mxu0 %v8652_v29  ;;  %4620 = vst.msk [vmem:[#allocation3 + $0x10] sm:$0xff] %vm4617_vm1, %v4607_v5  ;;  %v12555_v5 = vld [vmem:[#allocation88_spill] sm:$0xff] }
 0x6d4   : > { %5544 = vmatpush1.bf16.msra.mxu1 %v8653_v27  ;;  %5173 = vmatprep.subr.bf16.mxu0 %v8654_v43  ;;  %v4488_v29 = vmul.f32 %v12555_v5, %v4476_v54  ;;  %v8664_v43 = vld [vmem:[%s9299_s23 + $0xa80] ss:$24 sps:$4 sm:$0xff]   ;;  %v8668_v54 = vld [vmem:[%s9299_s23 + $0xab0] ss:$24 sps:$4 sm:$0xff]  }
 0x6d5   : > { %5131 = vmatmul.mubr.bf16.gmra.mrb[60].mxu0 %v11463_v45  ;;  %5545 = vmatprep.subr.bf16.mxu1 %v8655_v9 }
 0x6d6   : > { %5503 = vmatmul.mubr.bf16.gmra.mrb[84].mxu1 %v11463_v45  ;;  %5140 = vmatprep.mubr.bf16.mxu0 %v11517_v22 }
 0x6d7   : > { %5174 = vmatpush1.bf16.msra.mxu0 %v8656_v2  ;;  %5512 = vmatprep.mubr.bf16.mxu1 %v11517_v22  ;;  %v8665_v2 = vld [vmem:[%s9299_s23 + $0xa88] ss:$24 sps:$4 sm:$0xff]  }
 0x6d8   : > { %5546 = vmatpush1.bf16.msra.mxu1 %v8657_v35  ;;  %5175 = vmatprep.subr.bf16.mxu0 %v8658_v56  ;;  %v8666_v35 = vld [vmem:[%s9299_s23 + $0xab4] ss:$24 sps:$4 sm:$0xff]  }
 0x6d9   : > { %5547 = vmatprep.subr.bf16.mxu1 %v8659_v28  ;;  %v8667_v56 = vld [vmem:[%s9299_s23 + $0xabc] ss:$24 sps:$4 sm:$0xff]   ;;  %v4477_v28 = vld [vmem:[#allocation3 + $0x20] sm:$0xff] }
 0x6db   : > { %5176 = vmatpush1.bf16.msra.mxu0 %v8660_v59  ;;  %v12556_v59 = vld [vmem:[#allocation89_spill] sm:$0xff] }
 0x6dc   : > { %5548 = vmatpush1.bf16.msra.mxu1 %v8661_v14  ;;  %5177 = vmatprep.subr.bf16.mxu0 %v8662_v1  ;;  %v4489_v14 = vmul.f32 %v12556_v59, %v4477_v28  ;;  %v8669_v1 = vld [vmem:[%s9299_s23 + $0xab8] ss:$24 sps:$4 sm:$0xff]   ;;  %v8678_v59 = vld [vmem:[%s9299_s23 + $0xb44] ss:$24 sps:$4 sm:$0xff]  }
 0x6dd   : > { %5141 = vmatmul.mubr.bf16.gmra.mrb[64].mxu0 %v11512_v58  ;;  %5549 = vmatprep.subr.bf16.mxu1 %v8663_v21  ;;  %v8670_v21 = vld [vmem:[%s9299_s23 + $0xae4] ss:$24 sps:$4 sm:$0xff]   ;;  %v8676_v28 = vld [vmem:[%s9299_s23 + $0xb10] ss:$24 sps:$4 sm:$0xff]  }
 0x6de   : > { %5513 = vmatmul.mubr.bf16.gmra.mrb[88].mxu1 %v11512_v58  ;;  %5150 = vmatprep.mubr.bf16.mxu0 %v11535_v36  ;;  %v4532_v27 = vpop.xlane.xlu1 %4531 }
 0x6df   : > { %5178 = vmatpush1.bf16.msra.mxu0 %v8664_v43  ;;  %5522 = vmatprep.mubr.bf16.mxu1 %v11535_v36  ;;  %v4608_v9 = vadd.f32 %v4532_v27, %v4488_v29  ;;  %v8671_v29 = vld [vmem:[%s9299_s23 + $0xaec] ss:$24 sps:$4 sm:$0xff]   ;;  %v8672_v43 = vld [vmem:[%s9299_s23 + $0xae0] ss:$24 sps:$4 sm:$0xff]  }
 0x6e0   : > { %5550 = vmatpush1.bf16.msra.mxu1 %v8665_v2  ;;  %5179 = vmatprep.subr.bf16.mxu0 %v8666_v35  ;;  %v8674_v2 = vld [vmem:[%s9299_s23 + $0xb14] ss:$24 sps:$4 sm:$0xff]  }
 0x6e1   : > { %4621 = vst.msk [vmem:[#allocation3 + $0x18] sm:$0xff] %vm4617_vm1, %v4608_v9  ;;  %5551 = vmatprep.subr.bf16.mxu1 %v8667_v56  ;;  %v8673_v9 = vld [vmem:[%s9299_s23 + $0xae8] ss:$24 sps:$4 sm:$0xff]   ;;  %v8675_v35 = vld [vmem:[%s9299_s23 + $0xb1c] ss:$24 sps:$4 sm:$0xff]  }
 0x6e2   : > { %v4478_v56 = vld [vmem:[#allocation3 + $0x28] sm:$0xff] }
 0x6e3   : > { %5180 = vmatpush1.bf16.msra.mxu0 %v8668_v54  ;;  %v8677_v54 = vld [vmem:[%s9299_s23 + $0xb18] ss:$24 sps:$4 sm:$0xff]  }
 0x6e4   : > { %5552 = vmatpush1.bf16.msra.mxu1 %v8669_v1  ;;  %5181 = vmatprep.subr.bf16.mxu0 %v8670_v21  ;;  %v8679_v21 = vld [vmem:[%s9299_s23 + $0xb4c] ss:$24 sps:$4 sm:$0xff]  }
 0x6e5   : > { %v4541_v5 = vpop.xlane.xlu0 %4540  ;;  %5151 = vmatmul.mubr.bf16.gmra.mrb[68].mxu0 %v11531_v10  ;;  %5553 = vmatprep.subr.bf16.mxu1 %v8671_v29 }
 0x6e6   : > { %v4609_v27 = vadd.f32 %v4541_v5, %v4489_v14  ;;  %5523 = vmatmul.mubr.bf16.gmra.mrb[92].mxu1 %v11531_v10  ;;  %5193 = vmatprep.mubr.bf16.mxu0 %v11467_v47  ;;  %v12557_v14 = vld [vmem:[#allocation90_spill] sm:$0xff] }
 0x6e7   : > { %5182 = vmatpush1.bf16.msra.mxu0 %v8672_v43  ;;  %5565 = vmatprep.mubr.bf16.mxu1 %v11467_v47  ;;  %v4490_v1 = vmul.f32 %v12557_v14, %v4478_v56  ;;  %v8681_v43 = vld [vmem:[%s9299_s23 + $0xb48] ss:$24 sps:$4 sm:$0xff]   ;;  %v8686_v14 = vld [vmem:[%s9299_s23 + $0xba4] ss:$24 sps:$4 sm:$0xff]  }
 0x6e8   : > { %4622 = vst.msk [vmem:[#allocation3 + $0x20] sm:$0xff] %vm4617_vm1, %v4609_v27  ;;  %5554 = vmatpush1.bf16.msra.mxu1 %v8673_v9  ;;  %5183 = vmatprep.subr.bf16.mxu0 %v8674_v2  ;;  %v8680_v27 = vld [vmem:[%s9299_s23 + $0xb40] ss:$24 sps:$4 sm:$0xff]   ;;  %v8682_v9 = vld [vmem:[%s9299_s23 + $0xb74] ss:$24 sps:$4 sm:$0xff]  }
 0x6e9   : > { %5555 = vmatprep.subr.bf16.mxu1 %v8675_v35  ;;  %v4479_v2 = vld [vmem:[#allocation3 + $0x30] sm:$0xff] }
 0x6ea   : > { %v8683_v35 = vld [vmem:[%s9299_s23 + $0xb7c] ss:$24 sps:$4 sm:$0xff]   ;;  %v8684_v56 = vld [vmem:[%s9299_s23 + $0xb70] ss:$24 sps:$4 sm:$0xff]  }
 0x6eb   : > { %5184 = vmatpush1.bf16.msra.mxu0 %v8676_v28  ;;  %v12558_v28 = vld [vmem:[#allocation91_spill] sm:$0xff] }
 0x6ec   : > { %5556 = vmatpush1.bf16.msra.mxu1 %v8677_v54  ;;  %5185 = vmatprep.subr.bf16.mxu0 %v8678_v59  ;;  %v4491_v54 = vmul.f32 %v12558_v28, %v4479_v2  ;;  %v8685_v59 = vld [vmem:[%s9299_s23 + $0xb78] ss:$24 sps:$4 sm:$0xff]   ;;  %v8691_v2 = vld [vmem:[%s9299_s23 + $0xbdc] ss:$24 sps:$4 sm:$0xff]  }
 0x6ed   : > { %5557 = vmatprep.subr.bf16.mxu1 %v8679_v21  ;;  %v8687_v21 = vld [vmem:[%s9299_s23 + $0xbac] ss:$24 sps:$4 sm:$0xff]   ;;  %v8692_v28 = vld [vmem:[%s9299_s23 + $0xbd0] ss:$24 sps:$4 sm:$0xff]  }
 0x6ef   : > { %v4550_v5 = vpop.xlane.xlu1 %4549  ;;  %5186 = vmatpush1.bf16.msra.mxu0 %v8680_v27  ;;  %v4480_v27 = vld [vmem:[#allocation3 + $0x38] sm:$0xff] }
 0x6f0   : > { %v4610_v29 = vadd.f32 %v4550_v5, %v4490_v1  ;;  %5558 = vmatpush1.bf16.msra.mxu1 %v8681_v43  ;;  %5187 = vmatprep.subr.bf16.mxu0 %v8682_v9  ;;  %v8689_v43 = vld [vmem:[%s9299_s23 + $0xba8] ss:$24 sps:$4 sm:$0xff]   ;;  %v8690_v9 = vld [vmem:[%s9299_s23 + $0xbd4] ss:$24 sps:$4 sm:$0xff]  }
 0x6f1   : > { %5559 = vmatprep.subr.bf16.mxu1 %v8683_v35  ;;  %v12559_v35 = vld [vmem:[#allocation92_spill] sm:$0xff] }
 0x6f2   : > { %4623 = vst.msk [vmem:[#allocation3 + $0x28] sm:$0xff] %vm4617_vm1, %v4610_v29  ;;  %v8688_v29 = vld [vmem:[%s9299_s23 + $0xba0] ss:$24 sps:$4 sm:$0xff]  }
 0x6f3   : > { %5188 = vmatpush1.bf16.msra.mxu0 %v8684_v56  ;;  %v4492_v56 = vmul.f32 %v12559_v35, %v4480_v27  ;;  %v4481_v27 = vld [vmem:[#allocation3 + $0x40] sm:$0xff] }
 0x6f4   : > { %5560 = vmatpush1.bf16.msra.mxu1 %v8685_v59  ;;  %5189 = vmatprep.subr.bf16.mxu0 %v8686_v14  ;;  %v12560_v14 = vld [vmem:[#allocation22_spill] sm:$0xff] }
 0x6f5   : > { %5561 = vmatprep.subr.bf16.mxu1 %v8687_v21 }
 0x6f6   : > { %v4559_v1 = vpop.xlane.xlu0 %4558 }
 0x6f7   : > { %v4611_v5 = vadd.f32 %v4559_v1, %v4491_v54  ;;  %5190 = vmatpush1.bf16.msra.mxu0 %v8688_v29  ;;  %v8693_v54 = vld [vmem:[%s9299_s23 + $0xbd8] ss:$24 sps:$4 sm:$0xff]   ;;  %v12561_v1 = vld [vmem:[#allocation25_spill] sm:$0xff] }
 0x6f8   : > { %5562 = vmatpush1.bf16.msra.mxu1 %v8689_v43  ;;  %5191 = vmatprep.subr.bf16.mxu0 %v8690_v9  ;;  %v11761_v21 = vpack.c.bf16 %v12561_v1, %v12560_v14  ;;  %v8695_v43 = vld [vmem:[%s9299_s23 + $0x10] ss:$24 sps:$4 sm:$0xff]   ;;  %v8696_v9 = vld [vmem:[%s9299_s23 + $0x44] ss:$24 sps:$4 sm:$0xff]  }
 0x6f9   : > { %4624 = vst.msk [vmem:[#allocation3 + $0x30] sm:$0xff] %vm4617_vm1, %v4611_v5  ;;  %5563 = vmatprep.subr.bf16.mxu1 %v8691_v2  ;;  %v8694_v5 = vld [vmem:[%s9299_s23 + $0x14] ss:$24 sps:$4 sm:$0xff]   ;;  %v8699_v1 = vld [vmem:[%s9299_s23 + $0x70] ss:$24 sps:$4 sm:$0xff]  }
 0x6fa   : > { %v12562_v2 = vld [vmem:[#allocation93_spill] sm:$0xff] }
 0x6fb   : > { %5192 = vmatpush1.bf16.msra.mxu0 %v8692_v28  ;;  %v4493_v35 = vmul.f32 %v12562_v2, %v4481_v27  ;;  %v4482_v14 = vld [vmem:[#allocation3 + $0x48] sm:$0xff]  ;;  %v8700_v27 = vld [vmem:[%s9299_s23 + $0xa4] ss:$24 sps:$4 sm:$0xff]   ;;  %v4483_v2 = vld [vmem:[#allocation3 + $0x50] sm:$0xff] }
 0x6fc   : > { %v4568_v59 = vpop.xlane.xlu1 %4567  ;;  %5564 = vmatpush1.bf16.msra.mxu1 %v8693_v54  ;;  %5626 = vmatprep.subr.bf16.mxu0 %v8694_v5  ;;  %v8698_v54 = vld [vmem:[%s9299_s23 + $0x74] ss:$24 sps:$4 sm:$0xff]  }
 0x6fd   : > { %v4612_v29 = vadd.f32 %v4568_v59, %v4492_v56  ;;  %v8697_v59 = vld [vmem:[%s9299_s23 + $0x40] ss:$24 sps:$4 sm:$0xff]   ;;  %v12563_v5 = vld [vmem:[#allocation94_spill] sm:$0xff] }
 0x6fe   : > { %5194 = vmatmul.mubr.bf16.vlgmr.msra.gmra.mrb[48].mxu0 %v11761_v21 }
 0x6ff   : > { %4625 = vst.msk [vmem:[#allocation3 + $0x38] sm:$0xff] %vm4617_vm1, %v4612_v29  ;;  %5566 = vmatmul.mubr.bf16.vlgmr.msra.gmra.mrb[72].mxu1 %v11761_v21  ;;  %5203 = vmatprep.mubr.bf16.mxu0 %v11473_v26  ;;  %v4494_v29 = vmul.f32 %v12563_v5, %v4482_v14  ;;  %v4484_v14 = vld [vmem:[#allocation3 + $0x58] sm:$0xff] }
 0x700   : > { %5575 = vmatprep.mubr.bf16.mxu1 %v11473_v26  ;;  %5627 = vmatpush1.bf16.msra.mxu0 %v8695_v43  ;;  %v8704_v5 = vld [vmem:[%s9299_s23 + $0x104] ss:$24 sps:$4 sm:$0xff]  }
 0x701   : > { %5628 = vmatprep.subr.bf16.mxu0 %v8696_v9 }
 0x703   : > { %v4577_v56 = vpop.xlane.xlu0 %4576 }
 0x704   : > { %v4613_v28 = vadd.f32 %v4577_v56, %v4493_v35  ;;  %5629 = vmatpush1.bf16.msra.mxu0 %v8697_v59  ;;  %v8701_v35 = vld [vmem:[%s9299_s23 + $0xa0] ss:$24 sps:$4 sm:$0xff]   ;;  %v8702_v56 = vld [vmem:[%s9299_s23 + $0xd4] ss:$24 sps:$4 sm:$0xff]  }
 0x705   : > { %5630 = vmatprep.subr.bf16.mxu0 %v8698_v54 }
 0x706   : > { %4626 = vst.msk [vmem:[#allocation3 + $0x40] sm:$0xff] %vm4617_vm1, %v4613_v28  ;;  %5204 = vmatmul.mubr.bf16.gmra.mrb[52].mxu0 %v11478_v23  ;;  %v4495_v28 = vmul.f32 %v11579_v62, %v4483_v2  ;;  %v4496_v62 = vmul.f32 %v11583_v49, %v4484_v14  ;;  %v8707_v49 = vld [vmem:[%s9299_s23 + $0x130] ss:$24 sps:$4 sm:$0xff]   ;;  %v8708_v2 = vld [vmem:[%s9299_s23 + $0x164] ss:$24 sps:$4 sm:$0xff]  }
 0x707   : > { %5576 = vmatmul.mubr.bf16.gmra.mrb[76].mxu1 %v11478_v23  ;;  %5213 = vmatprep.mubr.bf16.mxu0 %v11482_v15  ;;  %v8714_v14 = vld [vmem:[%s9299_s23 + $0x1f4] ss:$24 sps:$4 sm:$0xff]  }
 0x708   : > { %5585 = vmatprep.mubr.bf16.mxu1 %v11482_v15  ;;  %5631 = vmatpush1.bf16.msra.mxu0 %v8699_v1  ;;  %v8703_v1 = vld [vmem:[%s9299_s23 + $0xd0] ss:$24 sps:$4 sm:$0xff]  }
 0x709   : > { %5632 = vmatprep.subr.bf16.mxu0 %v8700_v27  ;;  %v8705_v27 = vld [vmem:[%s9299_s23 + $0x100] ss:$24 sps:$4 sm:$0xff]  }
 0x70a   : > { %v4586_v43 = vpop.xlane.xlu1 %4585 }
 0x70b   : > { %v4614_v9 = vadd.f32 %v4586_v43, %v4494_v29 }
 0x70c   : > { %5633 = vmatpush1.bf16.msra.mxu0 %v8701_v35  ;;  %v8709_v35 = vld [vmem:[%s9299_s23 + $0x160] ss:$24 sps:$4 sm:$0xff]  }
 0x70d   : > { %4627 = vst.msk [vmem:[#allocation3 + $0x48] sm:$0xff] %vm4617_vm1, %v4614_v9  ;;  %5634 = vmatprep.subr.bf16.mxu0 %v8702_v56  ;;  %v8706_v9 = vld [vmem:[%s9299_s23 + $0x134] ss:$24 sps:$4 sm:$0xff]  }
 0x70e   : > { %5214 = vmatmul.mubr.bf16.gmra.mrb[56].mxu0 %v11486_v61  ;;  %v8710_v56 = vld [vmem:[%s9299_s23 + $0x194] ss:$24 sps:$4 sm:$0xff]  }
 0x70f   : > { %v4595_v59 = vpop.xlane.xlu0 %4594  ;;  %5586 = vmatmul.mubr.bf16.gmra.mrb[80].mxu1 %v11486_v61  ;;  %5223 = vmatprep.mubr.bf16.mxu0 %v11490_v12 }
 0x710   : > { %v4615_v54 = vadd.f32 %v4595_v59, %v4495_v28  ;;  %5595 = vmatprep.mubr.bf16.mxu1 %v11490_v12  ;;  %5635 = vmatpush1.bf16.msra.mxu0 %v8703_v1  ;;  %v8711_v28 = vld [vmem:[%s9299_s23 + $0x190] ss:$24 sps:$4 sm:$0xff]   ;;  %v8712_v59 = vld [vmem:[%s9299_s23 + $0x1c4] ss:$24 sps:$4 sm:$0xff]  }
 0x711   : > { %5636 = vmatprep.subr.bf16.mxu0 %v8704_v5  ;;  %v12564_v1 = vld [vmem:[#allocation21_spill] sm:$0xff] }
 0x712   : > { %4628 = vst.msk [vmem:[#allocation3 + $0x50] sm:$0xff] %vm4617_vm1, %v4615_v54  ;;  %v8713_v54 = vld [vmem:[%s9299_s23 + $0x1c0] ss:$24 sps:$4 sm:$0xff]   ;;  %v8715_v5 = vld [vmem:[%s9299_s23 + $0x1f0] ss:$24 sps:$4 sm:$0xff]  }
 0x714   : > { %v4604_v29 = vpop.xlane.xlu1 %4603  ;;  %5637 = vmatpush1.bf16.msra.mxu0 %v8705_v27  ;;  %v8718_v27 = vld [vmem:[%s9299_s23 + $0x254] ss:$24 sps:$4 sm:$0xff]  }
 0x715   : > { %v4616_v43 = vadd.f32 %v4604_v29, %v4496_v62  ;;  %5638 = vmatprep.subr.bf16.mxu0 %v8706_v9  ;;  %v8716_v62 = vld [vmem:[%s9299_s23 + $0x224] ss:$24 sps:$4 sm:$0xff]   ;;  %v8717_v29 = vld [vmem:[%s9299_s23 + $0x220] ss:$24 sps:$4 sm:$0xff]  }
 0x716   : > { %5224 = vmatmul.mubr.bf16.gmra.mrb[60].mxu0 %v11493_v33  ;;  %v8720_v9 = vld [vmem:[%s9299_s23 + $0x284] ss:$24 sps:$4 sm:$0xff]  }
 0x717   : > { %4629 = vst.msk [vmem:[#allocation3 + $0x58] sm:$0xff] %vm4617_vm1, %v4616_v43  ;;  %5596 = vmatmul.mubr.bf16.gmra.mrb[84].mxu1 %v11493_v33  ;;  %5233 = vmatprep.mubr.bf16.mxu0 %v11521_v52  ;;  %v8719_v43 = vld [vmem:[%s9299_s23 + $0x250] ss:$24 sps:$4 sm:$0xff]  }
 0x718   : > { %5605 = vmatprep.mubr.bf16.mxu1 %v11521_v52  ;;  %5639 = vmatpush1.bf16.msra.mxu0 %v8707_v49  ;;  %v8721_v49 = vld [vmem:[%s9299_s23 + $0x280] ss:$24 sps:$4 sm:$0xff]  }
 0x719   : > { %5640 = vmatprep.subr.bf16.mxu0 %v8708_v2  ;;  %v8722_v2 = vld [vmem:[%s9299_s23 + $0x2b4] ss:$24 sps:$4 sm:$0xff]  }
 0x71c   : > { %5641 = vmatpush1.bf16.msra.mxu0 %v8709_v35  ;;  %v8723_v35 = vld [vmem:[%s9299_s23 + $0x2b0] ss:$24 sps:$4 sm:$0xff]  }
 0x71d   : > { %5642 = vmatprep.subr.bf16.mxu0 %v8710_v56  ;;  %v8724_v56 = vld [vmem:[%s9299_s23 + $0x2e4] ss:$24 sps:$4 sm:$0xff]  }
 0x71e   : > { %5234 = vmatmul.mubr.bf16.gmra.mrb[64].mxu0 %v11519_v32 }
 0x71f   : > { %5606 = vmatmul.mubr.bf16.gmra.mrb[88].mxu1 %v11519_v32  ;;  %5243 = vmatprep.mubr.bf16.mxu0 %v11540_v51 }
 0x720   : > { %5615 = vmatprep.mubr.bf16.mxu1 %v11540_v51  ;;  %5643 = vmatpush1.bf16.msra.mxu0 %v8711_v28  ;;  %v8725_v28 = vld [vmem:[%s9299_s23 + $0x2e0] ss:$24 sps:$4 sm:$0xff]  }
 0x721   : > { %5644 = vmatprep.subr.bf16.mxu0 %v8712_v59  ;;  %v8726_v59 = vld [vmem:[%s9299_s23 + $0x314] ss:$24 sps:$4 sm:$0xff]  }
 0x724   : > { %5645 = vmatpush1.bf16.msra.mxu0 %v8713_v54  ;;  %v12565_v54 = vld [vmem:[#allocation24_spill] sm:$0xff] }
 0x725   : > { %5646 = vmatprep.subr.bf16.mxu0 %v8714_v14  ;;  %v12566_v14 = vld [vmem:[#allocation28_spill] sm:$0xff] }
 0x726   : > { %5244 = vmatmul.mubr.bf16.gmra.mrb[68].mxu0 %v11538_v44 }
 0x727   : > { %5616 = vmatmul.mubr.bf16.gmra.mrb[92].mxu1 %v11538_v44  ;;  %5658 = vmatprep.mubr.bf16.mxu0 %v12564_v1  ;;  %v8727_v1 = vld [vmem:[%s9299_s23 + $0x310] ss:$24 sps:$4 sm:$0xff]  }
 0x728   : > { %5647 = vmatpush1.bf16.msra.mxu0 %v8715_v5  ;;  %v8728_v5 = vld [vmem:[%s9299_s23 + $0x344] ss:$24 sps:$4 sm:$0xff]  }
 0x729   : > { %5648 = vmatprep.subr.bf16.mxu0 %v8716_v62  ;;  %v8729_v62 = vld [vmem:[%s9299_s23 + $0x340] ss:$24 sps:$4 sm:$0xff]  }
 0x72c   : > { %5649 = vmatpush1.bf16.msra.mxu0 %v8717_v29  ;;  %v8730_v29 = vld [vmem:[%s9299_s23 + $0x374] ss:$24 sps:$4 sm:$0xff]  }
 0x72d   : > { %5650 = vmatprep.subr.bf16.mxu0 %v8718_v27  ;;  %v12567_v27 = vld [vmem:[#allocation23_spill] sm:$0xff] }
 0x730   : > { %5651 = vmatpush1.bf16.msra.mxu0 %v8719_v43  ;;  %v12568_v43 = vld [vmem:[#allocation45_spill] sm:$0xff] }
 0x731   : > { %5652 = vmatprep.subr.bf16.mxu0 %v8720_v9  ;;  %v8731_v9 = vld [vmem:[%s9299_s23 + $0x370] ss:$24 sps:$4 sm:$0xff]  }
 0x734   : > { %5653 = vmatpush1.bf16.msra.mxu0 %v8721_v49  ;;  %v8732_v49 = vld [vmem:[%s9299_s23 + $0x3a4] ss:$24 sps:$4 sm:$0xff]  }
 0x735   : > { %5654 = vmatprep.subr.bf16.mxu0 %v8722_v2  ;;  %v8733_v2 = vld [vmem:[%s9299_s23 + $0x3a0] ss:$24 sps:$4 sm:$0xff]  }
 0x738   : > { %5655 = vmatpush1.bf16.msra.mxu0 %v8723_v35  ;;  %v8734_v35 = vld [vmem:[%s9299_s23 + $0x3d4] ss:$24 sps:$4 sm:$0xff]  }
 0x739   : > { %5656 = vmatprep.subr.bf16.mxu0 %v8724_v56  ;;  %v12569_v56 = vld [vmem:[#allocation46_spill] sm:$0xff] }
 0x73c   : > { %5657 = vmatpush1.bf16.msra.mxu0 %v8725_v28  ;;  %v12570_v28 = vld [vmem:[#allocation49_spill] sm:$0xff] }
 0x73d   : > { %5719 = vmatprep.subr.bf16.mxu0 %v8726_v59  ;;  %v8735_v59 = vld [vmem:[%s9299_s23 + $0x3d0] ss:$24 sps:$4 sm:$0xff]  }
 0x73f   : > { %5659 = vmatmul.mubr.bf16.vlgmr.msra.gmra.mrb[72].mxu0 %v12565_v54  ;;  %v8736_v54 = vld [vmem:[%s9299_s23 + $0x404] ss:$24 sps:$4 sm:$0xff]  }
 0x740   : > { %5668 = vmatprep.mubr.bf16.mxu0 %v12566_v14  ;;  %5720 = vmatpush1.bf16.msra.mxu0 %v8727_v1  ;;  %v8737_v14 = vld [vmem:[%s9299_s23 + $0x400] ss:$24 sps:$4 sm:$0xff]   ;;  %v8738_v1 = vld [vmem:[%s9299_s23 + $0x434] ss:$24 sps:$4 sm:$0xff]  }
 0x741   : > { %5721 = vmatprep.subr.bf16.mxu0 %v8728_v5  ;;  %v12571_v5 = vld [vmem:[#allocation50_spill] sm:$0xff] }
 0x744   : > { %5722 = vmatpush1.bf16.msra.mxu0 %v8729_v62  ;;  %v12572_v62 = vld [vmem:[#allocation29_spill] sm:$0xff] }
 0x745   : > { %5723 = vmatprep.subr.bf16.mxu0 %v8730_v29  ;;  %v8739_v29 = vld [vmem:[%s9299_s23 + $0x430] ss:$24 sps:$4 sm:$0xff]  }
 0x747   : > { %5669 = vmatmul.mubr.bf16.gmra.mrb[76].mxu0 %v12567_v27  ;;  %v8740_v27 = vld [vmem:[%s9299_s23 + $0x464] ss:$24 sps:$4 sm:$0xff]  }
 0x748   : > { %5678 = vmatprep.mubr.bf16.mxu0 %v12568_v43  ;;  %5724 = vmatpush1.bf16.msra.mxu0 %v8731_v9  ;;  %v8741_v43 = vld [vmem:[%s9299_s23 + $0x460] ss:$24 sps:$4 sm:$0xff]   ;;  %v8742_v9 = vld [vmem:[%s9299_s23 + $0x494] ss:$24 sps:$4 sm:$0xff]  }
 0x749   : > { %5725 = vmatprep.subr.bf16.mxu0 %v8732_v49  ;;  %v8743_v49 = vld [vmem:[%s9299_s23 + $0x490] ss:$24 sps:$4 sm:$0xff]  }
 0x74c   : > { %5726 = vmatpush1.bf16.msra.mxu0 %v8733_v2  ;;  %v8744_v2 = vld [vmem:[%s9299_s23 + $0x4c4] ss:$24 sps:$4 sm:$0xff]  }
 0x74d   : > { %5727 = vmatprep.subr.bf16.mxu0 %v8734_v35  ;;  %v8745_v35 = vld [vmem:[%s9299_s23 + $0x4c0] ss:$24 sps:$4 sm:$0xff]  }
 0x74f   : > { %5679 = vmatmul.mubr.bf16.gmra.mrb[80].mxu0 %v12569_v56  ;;  %v8746_v56 = vld [vmem:[%s9299_s23 + $0x4f4] ss:$24 sps:$4 sm:$0xff]  }
 0x750   : > { %5688 = vmatprep.mubr.bf16.mxu0 %v12570_v28  ;;  %5728 = vmatpush1.bf16.msra.mxu0 %v8735_v59  ;;  %v8747_v28 = vld [vmem:[%s9299_s23 + $0x4f0] ss:$24 sps:$4 sm:$0xff]   ;;  %v8750_v59 = vld [vmem:[%s9299_s23 + $0x554] ss:$24 sps:$4 sm:$0xff]  }
 0x751   : > { %5729 = vmatprep.subr.bf16.mxu0 %v8736_v54  ;;  %v8751_v54 = vld [vmem:[%s9299_s23 + $0x550] ss:$24 sps:$4 sm:$0xff]  }
 0x754   : > { %5730 = vmatpush1.bf16.msra.mxu0 %v8737_v14  ;;  %v8752_v14 = vld [vmem:[%s9299_s23 + $0x584] ss:$24 sps:$4 sm:$0xff]  }
 0x755   : > { %5731 = vmatprep.subr.bf16.mxu0 %v8738_v1  ;;  %v8754_v1 = vld [vmem:[%s9299_s23 + $0x5b4] ss:$24 sps:$4 sm:$0xff]  }
 0x757   : > { %5689 = vmatmul.mubr.bf16.gmra.mrb[84].mxu0 %v12571_v5  ;;  %v8756_v5 = vld [vmem:[%s9299_s23 + $0x5e4] ss:$24 sps:$4 sm:$0xff]  }
 0x758   : > { %5698 = vmatprep.mubr.bf16.mxu0 %v12572_v62  ;;  %5732 = vmatpush1.bf16.msra.mxu0 %v8739_v29  ;;  %v8757_v62 = vld [vmem:[%s9299_s23 + $0x5e0] ss:$24 sps:$4 sm:$0xff]   ;;  %v8758_v29 = vld [vmem:[%s9299_s23 + $0x614] ss:$24 sps:$4 sm:$0xff]  }
 0x759   : > { %5733 = vmatprep.subr.bf16.mxu0 %v8740_v27  ;;  %v8759_v27 = vld [vmem:[%s9299_s23 + $0x610] ss:$24 sps:$4 sm:$0xff]  }
 0x75c   : > { %5734 = vmatpush1.bf16.msra.mxu0 %v8741_v43  ;;  %v8760_v43 = vld [vmem:[%s9299_s23 + $0x644] ss:$24 sps:$4 sm:$0xff]  }
 0x75d   : > { %5735 = vmatprep.subr.bf16.mxu0 %v8742_v9  ;;  %v8761_v9 = vld [vmem:[%s9299_s23 + $0x640] ss:$24 sps:$4 sm:$0xff]  }
 0x75f   : > { %5699 = vmatmul.mubr.bf16.gmra.mrb[88].mxu0 %v11371_v20  ;;  %v8748_v20 = vld [vmem:[%s9299_s23 + $0x524] ss:$24 sps:$4 sm:$0xff]  }
 0x760   : > { %5708 = vmatprep.mubr.bf16.mxu0 %v11444_v40  ;;  %5736 = vmatpush1.bf16.msra.mxu0 %v8743_v49  ;;  %v8749_v40 = vld [vmem:[%s9299_s23 + $0x520] ss:$24 sps:$4 sm:$0xff]   ;;  %v8762_v49 = vld [vmem:[%s9299_s23 + $0x674] ss:$24 sps:$4 sm:$0xff]  }
 0x761   : > { %5737 = vmatprep.subr.bf16.mxu0 %v8744_v2  ;;  %v8765_v2 = vld [vmem:[%s9299_s23 + $0x6a0] ss:$24 sps:$4 sm:$0xff]  }
 0x764   : > { %5738 = vmatpush1.bf16.msra.mxu0 %v8745_v35  ;;  %v8766_v35 = vld [vmem:[%s9299_s23 + $0x6d4] ss:$24 sps:$4 sm:$0xff]  }
 0x765   : > { %5739 = vmatprep.subr.bf16.mxu0 %v8746_v56  ;;  %v8769_v56 = vld [vmem:[%s9299_s23 + $0x700] ss:$24 sps:$4 sm:$0xff]  }
 0x767   : > { %5709 = vmatmul.mubr.bf16.gmra.mrb[92].mxu0 %v11499_v34  ;;  %v8753_v34 = vld [vmem:[%s9299_s23 + $0x580] ss:$24 sps:$4 sm:$0xff]  }
 0x768   : > { %5740 = vmatpush1.bf16.msra.mxu0 %v8747_v28  ;;  %5751 = vmatprep.mubr.bf16.mxu0 %v12542_v8  ;;  %v8755_v8 = vld [vmem:[%s9299_s23 + $0x5b0] ss:$24 sps:$4 sm:$0xff]   ;;  %v8770_v28 = vld [vmem:[%s9299_s23 + $0x734] ss:$24 sps:$4 sm:$0xff]  }
 0x769   : > { %5741 = vmatprep.subr.bf16.mxu0 %v8748_v20  ;;  %v8773_v20 = vld [vmem:[%s9299_s23 + $0x760] ss:$24 sps:$4 sm:$0xff]  }
 0x76c   : > { %5742 = vmatpush1.bf16.msra.mxu0 %v8749_v40  ;;  %v8774_v40 = vld [vmem:[%s9299_s23 + $0x794] ss:$24 sps:$4 sm:$0xff]  }
 0x76d   : > { %5743 = vmatprep.subr.bf16.mxu0 %v8750_v59  ;;  %v8777_v59 = vld [vmem:[%s9299_s23 + $0x7c0] ss:$24 sps:$4 sm:$0xff]  }
 0x770   : > { %5744 = vmatpush1.bf16.msra.mxu0 %v8751_v54  ;;  %v8778_v54 = vld [vmem:[%s9299_s23 + $0x7f4] ss:$24 sps:$4 sm:$0xff]  }
 0x771   : > { %5745 = vmatprep.subr.bf16.mxu0 %v8752_v14  ;;  %v8779_v14 = vld [vmem:[%s9299_s23 + $0x7f0] ss:$24 sps:$4 sm:$0xff]  }
 0x774   : > { %5746 = vmatpush1.bf16.msra.mxu0 %v8753_v34  ;;  %v8782_v34 = vld [vmem:[%s9299_s23 + $0x854] ss:$24 sps:$4 sm:$0xff]  }
 0x775   : > { %5747 = vmatprep.subr.bf16.mxu0 %v8754_v1  ;;  %v8783_v1 = vld [vmem:[%s9299_s23 + $0x850] ss:$24 sps:$4 sm:$0xff]  }
 0x778   : > { %5748 = vmatpush1.bf16.msra.mxu0 %v8755_v8  ;;  %v8784_v8 = vld [vmem:[%s9299_s23 + $0x884] ss:$24 sps:$4 sm:$0xff]  }
 0x779   : > { %5749 = vmatprep.subr.bf16.mxu0 %v8756_v5  ;;  %v8786_v5 = vld [vmem:[%s9299_s23 + $0x8b4] ss:$24 sps:$4 sm:$0xff]  }
 0x77c   : > { %5750 = vmatpush1.bf16.msra.mxu0 %v8757_v62  ;;  %v8788_v62 = vld [vmem:[%s9299_s23 + $0x8e4] ss:$24 sps:$4 sm:$0xff]  }
 0x77d   : > { %5812 = vmatprep.subr.bf16.mxu0 %v8758_v29  ;;  %v8789_v29 = vld [vmem:[%s9299_s23 + $0x8e0] ss:$24 sps:$4 sm:$0xff]  }
 0x77f   : > { %5752 = vmatmul.mubr.bf16.vlgmr.msra.gmra.mrb[72].mxu0 %v12543_v38  ;;  %v8763_v38 = vld [vmem:[%s9299_s23 + $0x670] ss:$24 sps:$4 sm:$0xff]  }
 0x780   : > { %5761 = vmatprep.mubr.bf16.mxu0 %v11386_v13  ;;  %5813 = vmatpush1.bf16.msra.mxu0 %v8759_v27  ;;  %v8764_v13 = vld [vmem:[%s9299_s23 + $0x6a4] ss:$24 sps:$4 sm:$0xff]   ;;  %v8790_v27 = vld [vmem:[%s9299_s23 + $0x914] ss:$24 sps:$4 sm:$0xff]  }
 0x781   : > { %5814 = vmatprep.subr.bf16.mxu0 %v8760_v43  ;;  %v8791_v43 = vld [vmem:[%s9299_s23 + $0x910] ss:$24 sps:$4 sm:$0xff]  }
 0x784   : > { %5815 = vmatpush1.bf16.msra.mxu0 %v8761_v9  ;;  %v8792_v9 = vld [vmem:[%s9299_s23 + $0x944] ss:$24 sps:$4 sm:$0xff]  }
 0x785   : > { %5816 = vmatprep.subr.bf16.mxu0 %v8762_v49  ;;  %v8793_v49 = vld [vmem:[%s9299_s23 + $0x940] ss:$24 sps:$4 sm:$0xff]  }
 0x787   : > { %5762 = vmatmul.mubr.bf16.gmra.mrb[76].mxu0 %v11395_v46  ;;  %v8767_v46 = vld [vmem:[%s9299_s23 + $0x6d0] ss:$24 sps:$4 sm:$0xff]  }
 0x788   : > { %5771 = vmatprep.mubr.bf16.mxu0 %v11400_v3  ;;  %5817 = vmatpush1.bf16.msra.mxu0 %v8763_v38  ;;  %v8768_v3 = vld [vmem:[%s9299_s23 + $0x704] ss:$24 sps:$4 sm:$0xff]   ;;  %v8794_v38 = vld [vmem:[%s9299_s23 + $0x974] ss:$24 sps:$4 sm:$0xff]  }
 0x789   : > { %5818 = vmatprep.subr.bf16.mxu0 %v8764_v13  ;;  %v8795_v13 = vld [vmem:[%s9299_s23 + $0x970] ss:$24 sps:$4 sm:$0xff]  }
 0x78c   : > { %5819 = vmatpush1.bf16.msra.mxu0 %v8765_v2  ;;  %v8797_v2 = vld [vmem:[%s9299_s23 + $0x9a0] ss:$24 sps:$4 sm:$0xff]  }
 0x78d   : > { %5820 = vmatprep.subr.bf16.mxu0 %v8766_v35  ;;  %v4630_v35 = vld [vmem:[#allocation4] sm:$0xff] }
 0x78f   : > { %5772 = vmatmul.mubr.bf16.gmra.mrb[80].mxu0 %v11404_v6  ;;  %v8771_v6 = vld [vmem:[%s9299_s23 + $0x730] ss:$24 sps:$4 sm:$0xff]  }
 0x790   : > { %5781 = vmatprep.mubr.bf16.mxu0 %v11409_v17  ;;  %5821 = vmatpush1.bf16.msra.mxu0 %v8767_v46  ;;  %v8772_v17 = vld [vmem:[%s9299_s23 + $0x764] ss:$24 sps:$4 sm:$0xff]   ;;  %v4632_v46 = vld [vmem:[#allocation4 + $0x10] sm:$0xff] }
 0x791   : > { %5822 = vmatprep.subr.bf16.mxu0 %v8768_v3  ;;  %v4631_v3 = vld [vmem:[#allocation4 + $0x8] sm:$0xff] }
 0x794   : > { %5823 = vmatpush1.bf16.msra.mxu0 %v8769_v56  ;;  %v4633_v56 = vld [vmem:[#allocation4 + $0x18] sm:$0xff] }
 0x795   : > { %5824 = vmatprep.subr.bf16.mxu0 %v8770_v28  ;;  %v4636_v28 = vld [vmem:[#allocation4 + $0x30] sm:$0xff] }
 0x797   : > { %5782 = vmatmul.mubr.bf16.gmra.mrb[84].mxu0 %v11413_v11  ;;  %v8775_v11 = vld [vmem:[%s9299_s23 + $0x790] ss:$24 sps:$4 sm:$0xff]  }
 0x798   : > { %5791 = vmatprep.mubr.bf16.mxu0 %v11506_v25  ;;  %5825 = vmatpush1.bf16.msra.mxu0 %v8771_v6  ;;  %v8776_v25 = vld [vmem:[%s9299_s23 + $0x7c4] ss:$24 sps:$4 sm:$0xff]  }
 0x799   : > { %5826 = vmatprep.subr.bf16.mxu0 %v8772_v17  ;;  %v4638_v6 = vld [vmem:[#allocation4 + $0x40] sm:$0xff]  ;;  %v4637_v17 = vld [vmem:[#allocation4 + $0x38] sm:$0xff] }
 0x79c   : > { %5827 = vmatpush1.bf16.msra.mxu0 %v8773_v20 }
 0x79d   : > { %5828 = vmatprep.subr.bf16.mxu0 %v8774_v40  ;;  %v4764_v40 = vmul.f32 %v11622_v42, %v4632_v46  ;;  %v4643_v46 = vld [vmem:[#allocation4 + $0x68] sm:$0xff] }
 0x79f   : > { %5792 = vmatmul.mubr.bf16.gmra.mrb[88].mxu0 %v11417_v53  ;;  %v8780_v53 = vld [vmem:[%s9299_s23 + $0x824] ss:$24 sps:$4 sm:$0xff]  }
 0x7a0   : > { %5801 = vmatprep.mubr.bf16.mxu0 %v11527_v63  ;;  %5829 = vmatpush1.bf16.msra.mxu0 %v8775_v11  ;;  %v8781_v63 = vld [vmem:[%s9299_s23 + $0x820] ss:$24 sps:$4 sm:$0xff]   ;;  %v4763_v11 = vmul.f32 %v11622_v42, %v4631_v3 }
 0x7a1   : > { %5830 = vmatprep.subr.bf16.mxu0 %v8776_v25  ;;  %v8800_v25 = vld [vmem:[%s9299_s23 + $0xa04] ss:$24 sps:$4 sm:$0xff]  }
 0x7a2   : > { %v4645_v3 = vld [vmem:[#allocation4 + $0x78] sm:$0xff] }
 0x7a4   : > { %5831 = vmatpush1.bf16.msra.mxu0 %v8777_v59  ;;  %v4639_v59 = vld [vmem:[#allocation4 + $0x48] sm:$0xff] }
 0x7a5   : > { %5832 = vmatprep.subr.bf16.mxu0 %v8778_v54 }
 0x7a7   : > { %5802 = vmatmul.mubr.bf16.gmra.mrb[92].mxu0 %v11424_v39  ;;  %v8785_v39 = vld [vmem:[%s9299_s23 + $0x880] ss:$24 sps:$4 sm:$0xff]  }
 0x7a8   : > { %5833 = vmatpush1.bf16.msra.mxu0 %v8779_v14  ;;  %5844 = vmatprep.mubr.bf16.mxu0 %v11428_v16  ;;  %v8787_v16 = vld [vmem:[%s9299_s23 + $0x8b0] ss:$24 sps:$4 sm:$0xff]  }
 0x7a9   : > { %5834 = vmatprep.subr.bf16.mxu0 %v8780_v53  ;;  %v4768_v53 = vmul.f32 %v11602_v31, %v4636_v28  ;;  %v8803_v28 = vld [vmem:[%s9299_s23 + $0xa30] ss:$24 sps:$4 sm:$0xff]  }
 0x7ac   : > { %5835 = vmatpush1.bf16.msra.mxu0 %v8781_v63 }
 0x7ad   : > { %5836 = vmatprep.subr.bf16.mxu0 %v8782_v34 }
 0x7b0   : > { %5837 = vmatpush1.bf16.msra.mxu0 %v8783_v1 }
 0x7b1   : > { %5838 = vmatprep.subr.bf16.mxu0 %v8784_v8 }
 0x7b4   : > { %5839 = vmatpush1.bf16.msra.mxu0 %v8785_v39  ;;  %v4770_v39 = vmul.f32 %v11602_v31, %v4638_v6  ;;  %v4649_v6 = vld [vmem:[#allocation4 + $0x98] sm:$0xff] }
 0x7b5   : > { %5840 = vmatprep.subr.bf16.mxu0 %v8786_v5  ;;  %v4769_v5 = vmul.f32 %v11602_v31, %v4637_v17 }
 0x7b8   : > { %5841 = vmatpush1.bf16.msra.mxu0 %v8787_v16 }
 0x7b9   : > { %5842 = vmatprep.subr.bf16.mxu0 %v8788_v62 }
 0x7bc   : > { %5843 = vmatpush1.bf16.msra.mxu0 %v8789_v29 }
 0x7bd   : > { %5905 = vmatprep.subr.bf16.mxu0 %v8790_v27  ;;  %v8801_v27 = vld [vmem:[%s9299_s23 + $0xa00] ss:$24 sps:$4 sm:$0xff]  }
 0x7bf   : > { %5845 = vmatmul.mubr.bf16.vlgmr.msra.gmra.mrb[72].mxu0 %v11650_v48  ;;  %v8796_v48 = vld [vmem:[%s9299_s23 + $0x9a4] ss:$24 sps:$4 sm:$0xff]  }
 0x7c0   : > { %5854 = vmatprep.mubr.bf16.mxu0 %v11437_v50  ;;  %5906 = vmatpush1.bf16.msra.mxu0 %v8791_v43  ;;  %v8798_v50 = vld [vmem:[%s9299_s23 + $0x9d4] ss:$24 sps:$4 sm:$0xff]  }
 0x7c1   : > { %5907 = vmatprep.subr.bf16.mxu0 %v8792_v9  ;;  %v4771_v9 = vmul.f32 %v11602_v31, %v4639_v59 }
 0x7c4   : > { %5908 = vmatpush1.bf16.msra.mxu0 %v8793_v49 }
 0x7c5   : > { %5909 = vmatprep.subr.bf16.mxu0 %v8794_v38 }
 0x7c7   : > { %5855 = vmatmul.mubr.bf16.gmra.mrb[76].mxu0 %v11441_v24  ;;  %v8799_v24 = vld [vmem:[%s9299_s23 + $0x9d0] ss:$24 sps:$4 sm:$0xff]  }
 0x7c8   : > { %5864 = vmatprep.mubr.bf16.mxu0 %v11449_v18  ;;  %5910 = vmatpush1.bf16.msra.mxu0 %v8795_v13  ;;  %v4762_v18 = vmul.f32 %v11622_v42, %v4630_v35  ;;  %v4644_v35 = vld [vmem:[#allocation4 + $0x70] sm:$0xff] }
 0x7c9   : > { %5911 = vmatprep.subr.bf16.mxu0 %v8796_v48  ;;  %v8802_v48 = vld [vmem:[%s9299_s23 + $0xa34] ss:$24 sps:$4 sm:$0xff]  }
 0x7cc   : > { %5912 = vmatpush1.bf16.msra.mxu0 %v8797_v2  ;;  %v4642_v2 = vld [vmem:[#allocation4 + $0x60] sm:$0xff] }
 0x7cd   : > { %5913 = vmatprep.subr.bf16.mxu0 %v8798_v50 }
 0x7cf   : > { %5865 = vmatmul.mubr.bf16.gmra.mrb[80].mxu0 %v11454_v19 }
 0x7d0   : > { %5874 = vmatprep.mubr.bf16.mxu0 %v11457_v4  ;;  %5914 = vmatpush1.bf16.msra.mxu0 %v8799_v24  ;;  %v4765_v4 = vmul.f32 %v11622_v42, %v4633_v56  ;;  %v4648_v56 = vld [vmem:[#allocation4 + $0x90] sm:$0xff]  ;;  %v4774_v24 = vmul.f32 %v11613_v41, %v4642_v2  ;;  %v4655_v2 = vld [vmem:[#allocation4 + $0xc8] sm:$0xff] }
 0x7d1   : > { %v5195_v20 = vpop.f32.mrb[48].mxu0  ;;  %5915 = vmatprep.subr.bf16.mxu0 %v8800_v25  ;;  %v4651_v25 = vld [vmem:[#allocation4 + $0xa8] sm:$0xff] }
 0x7d2   : > { %v5998_v19 = vadd.f32 %v5195_v20, %v4762_v18  ;;  %v5567_v54 = vpop.f32.mrb[72].mxu1  ;;  %v5197_v14 = vpop.f32.mrb[49].mxu0  ;;  %v4650_v18 = vld [vmem:[#allocation4 + $0xa0] sm:$0xff]  ;;  %v4776_v20 = vmul.f32 %v11613_v41, %v4644_v35  ;;  %v4660_v35 = vld [vmem:[#allocation4 + $0xf0] sm:$0xff] }
 0x7d3   : > { %v6000_v63 = vadd.f32 %v5567_v54, %v4764_v40  ;;  %v5999_v34 = vadd.f32 %v5197_v14, %v4763_v11  ;;  %v5569_v1 = vpop.f32.mrb[73].mxu1  ;;  %v5199_v8 = vpop.f32.mrb[50].mxu0  ;;  %v4775_v40 = vmul.f32 %v11613_v41, %v4643_v46  ;;  %v8804_v11 = vld [vmem:[%s9299_s23 + $0xa64] ss:$24 sps:$4 sm:$0xff]   ;;  %v4780_v54 = vmul.f32 %v11631_v0, %v4648_v56  ;;  %v8807_v46 = vld [vmem:[%s9299_s23 + $0xa90] ss:$24 sps:$4 sm:$0xff]  }
 0x7d4   : > { %6070 = vst [vmem:[#allocation4] sm:$0xff] %v5998_v19  ;;  %v6001_v16 = vadd.f32 %v5569_v1, %v4765_v4  ;;  %v6004_v62 = vadd.f32 %v5199_v8, %v4768_v53  ;;  %v5571_v29 = vpop.f32.mrb[74].mxu1  ;;  %5916 = vmatpush1.bf16.msra.mxu0 %v8801_v27  ;;  %v5201_v43 = vpop.f32.mrb[51].mxu0  ;;  %v4781_v1 = vmul.f32 %v11631_v0, %v4649_v6  ;;  %v4662_v56 = vld [vmem:[#allocation4 + $0x100] sm:$0xff] }
 0x7d5   : > { %6072 = vst [vmem:[#allocation4 + $0x10] sm:$0xff] %v6000_v63  ;;  %6071 = vst [vmem:[#allocation4 + $0x8] sm:$0xff] %v5999_v34  ;;  %v6006_v49 = vadd.f32 %v5571_v29, %v4770_v39  ;;  %v6005_v38 = vadd.f32 %v5201_v43, %v4769_v5  ;;  %v5573_v13 = vpop.f32.mrb[75].mxu1  ;;  %5917 = vmatprep.subr.bf16.mxu0 %v8802_v48  ;;  %v4782_v34 = vmul.f32 %v11631_v0, %v4650_v18  ;;  %v4656_v48 = vld [vmem:[#allocation4 + $0xd0] sm:$0xff] }
 0x7d6   : > { %6073 = vst [vmem:[#allocation4 + $0x18] sm:$0xff] %v6001_v16  ;;  %6076 = vst [vmem:[#allocation4 + $0x30] sm:$0xff] %v6004_v62  ;;  %v6007_v50 = vadd.f32 %v5573_v13, %v4771_v9  ;;  %v8805_v16 = vld [vmem:[%s9299_s23 + $0xa60] ss:$24 sps:$4 sm:$0xff]   ;;  %v4783_v29 = vmul.f32 %v11631_v0, %v4651_v25  ;;  %v4788_v18 = vmul.f32 %v11624_v60, %v4656_v48 }
 0x7d7   : > { %6078 = vst [vmem:[#allocation4 + $0x40] sm:$0xff] %v6006_v49  ;;  %6077 = vst [vmem:[#allocation4 + $0x38] sm:$0xff] %v6005_v38  ;;  %5875 = vmatmul.mubr.bf16.gmra.mrb[84].mxu0 %v11463_v45  ;;  %v8806_v49 = vld [vmem:[%s9299_s23 + $0xa94] ss:$24 sps:$4 sm:$0xff]   ;;  %v4654_v38 = vld [vmem:[#allocation4 + $0xc0] sm:$0xff]  ;;  %v4787_v6 = vmul.f32 %v11624_v60, %v4655_v2  ;;  %v4792_v25 = vmul.f32 %v11642_v55, %v4660_v35 }
 0x7d8   : > { %6079 = vst [vmem:[#allocation4 + $0x48] sm:$0xff] %v6007_v50  ;;  %5884 = vmatprep.mubr.bf16.mxu0 %v11517_v22  ;;  %5918 = vmatpush1.bf16.msra.mxu0 %v8803_v28  ;;  %v4777_v22 = vmul.f32 %v11613_v41, %v4645_v3  ;;  %v4657_v50 = vld [vmem:[#allocation4 + $0xd8] sm:$0xff]  ;;  %v4786_v3 = vmul.f32 %v11624_v60, %v4654_v38  ;;  %v4672_v38 = vld [vmem:[#allocation4 + $0x150] sm:$0xff]  ;;  %v4674_v2 = vld [vmem:[#allocation4 + $0x160] sm:$0xff] }
 0x7d9   : > { %v5205_v17 = vpop.f32.mrb[52].mxu0  ;;  %5919 = vmatprep.subr.bf16.mxu0 %v8804_v11  ;;  %v4661_v28 = vld [vmem:[#allocation4 + $0xf8] sm:$0xff] }
 0x7da   : > { %v6010_v45 = vadd.f32 %v5205_v17, %v4774_v24  ;;  %v5577_v59 = vpop.f32.mrb[76].mxu1  ;;  %v5207_v19 = vpop.f32.mrb[53].mxu0  ;;  %v8808_v17 = vld [vmem:[%s9299_s23 + $0xac4] ss:$24 sps:$4 sm:$0xff]  }
 0x7db   : > { %v6012_v14 = vadd.f32 %v5577_v59, %v4776_v20  ;;  %v6011_v4 = vadd.f32 %v5207_v19, %v4775_v40  ;;  %v5579_v53 = vpop.f32.mrb[77].mxu1  ;;  %v5209_v63 = vpop.f32.mrb[54].mxu0  ;;  %v4663_v20 = vld [vmem:[#allocation4 + $0x108] sm:$0xff] }
 0x7dc   : > { %6082 = vst [vmem:[#allocation4 + $0x60] sm:$0xff] %v6010_v45  ;;  %v6013_v8 = vadd.f32 %v5579_v53, %v4777_v22  ;;  %v6016_v39 = vadd.f32 %v5209_v63, %v4780_v54  ;;  %v5581_v5 = vpop.f32.mrb[78].mxu1  ;;  %5920 = vmatpush1.bf16.msra.mxu0 %v8805_v16  ;;  %v5211_v62 = vpop.f32.mrb[55].mxu0  ;;  %v4794_v54 = vmul.f32 %v11642_v55, %v4662_v56  ;;  %v8812_v56 = vld [vmem:[%s9299_s23 + $0xb24] ss:$24 sps:$4 sm:$0xff]  }
 0x7dd   : > { %6084 = vst [vmem:[#allocation4 + $0x70] sm:$0xff] %v6012_v14  ;;  %6083 = vst [vmem:[#allocation4 + $0x68] sm:$0xff] %v6011_v4  ;;  %v6018_v27 = vadd.f32 %v5581_v5, %v4782_v34  ;;  %v6017_v43 = vadd.f32 %v5211_v62, %v4781_v1  ;;  %v5583_v9 = vpop.f32.mrb[79].mxu1  ;;  %5921 = vmatprep.subr.bf16.mxu0 %v8806_v49  ;;  %v4793_v14 = vmul.f32 %v11642_v55, %v4661_v28  ;;  %v8809_v34 = vld [vmem:[%s9299_s23 + $0xac0] ss:$24 sps:$4 sm:$0xff]   ;;  %v4675_v28 = vld [vmem:[#allocation4 + $0x168] sm:$0xff] }
 0x7de   : > { %6085 = vst [vmem:[#allocation4 + $0x78] sm:$0xff] %v6013_v8  ;;  %6088 = vst [vmem:[#allocation4 + $0x90] sm:$0xff] %v6016_v39  ;;  %v6019_v13 = vadd.f32 %v5583_v9, %v4783_v29  ;;  %v4795_v8 = vmul.f32 %v11642_v55, %v4663_v20  ;;  %v8810_v62 = vld [vmem:[%s9299_s23 + $0xaf4] ss:$24 sps:$4 sm:$0xff]   ;;  %v4666_v29 = vld [vmem:[#allocation4 + $0x120] sm:$0xff] }
 0x7df   : > { %6090 = vst [vmem:[#allocation4 + $0xa0] sm:$0xff] %v6018_v27  ;;  %6089 = vst [vmem:[#allocation4 + $0x98] sm:$0xff] %v6017_v43  ;;  %5885 = vmatmul.mubr.bf16.gmra.mrb[88].mxu0 %v11512_v58  ;;  %v4668_v43 = vld [vmem:[#allocation4 + $0x130] sm:$0xff]  ;;  %v4667_v9 = vld [vmem:[#allocation4 + $0x128] sm:$0xff]  ;;  %v4798_v48 = vmul.f32 %v11633_v7, %v4666_v29 }
 0x7e0   : > { %6091 = vst [vmem:[#allocation4 + $0xa8] sm:$0xff] %v6019_v13  ;;  %5894 = vmatprep.mubr.bf16.mxu0 %v11535_v36  ;;  %5922 = vmatpush1.bf16.msra.mxu0 %v8807_v46  ;;  %v4789_v36 = vmul.f32 %v11624_v60, %v4657_v50  ;;  %v4669_v49 = vld [vmem:[#allocation4 + $0x138] sm:$0xff]  ;;  %v8811_v13 = vld [vmem:[%s9299_s23 + $0xaf0] ss:$24 sps:$4 sm:$0xff]   ;;  %v4800_v46 = vmul.f32 %v11633_v7, %v4668_v43 }
 0x7e1   : > { %v5215_v24 = vpop.f32.mrb[56].mxu0  ;;  %5923 = vmatprep.subr.bf16.mxu0 %v8808_v17  ;;  %v4673_v50 = vld [vmem:[#allocation4 + $0x158] sm:$0xff] }
 0x7e2   : > { %v6022_v58 = vadd.f32 %v5215_v24, %v4786_v3  ;;  %v5587_v40 = vpop.f32.mrb[80].mxu1  ;;  %v5217_v11 = vpop.f32.mrb[57].mxu0  ;;  %v4799_v3 = vmul.f32 %v11633_v7, %v4667_v9  ;;  %v4685_v43 = vld [vmem:[#allocation4 + $0x1b8] sm:$0xff] }
 0x7e3   : > { %v6024_v45 = vadd.f32 %v5587_v40, %v4788_v18  ;;  %v6023_v59 = vadd.f32 %v5217_v11, %v4787_v6  ;;  %v5589_v19 = vpop.f32.mrb[81].mxu1  ;;  %v5219_v22 = vpop.f32.mrb[58].mxu0  ;;  %v4801_v6 = vmul.f32 %v11633_v7, %v4669_v49  ;;  %v4806_v11 = vmul.f32 %v11658_v30, %v4674_v2 }
 0x7e4   : > { %6094 = vst [vmem:[#allocation4 + $0xc0] sm:$0xff] %v6022_v58  ;;  %v6025_v4 = vadd.f32 %v5589_v19, %v4789_v36  ;;  %v6028_v53 = vadd.f32 %v5219_v22, %v4792_v25  ;;  %v5591_v63 = vpop.f32.mrb[82].mxu1  ;;  %5924 = vmatpush1.bf16.msra.mxu0 %v8809_v34  ;;  %v5221_v1 = vpop.f32.mrb[59].mxu0  ;;  %v4805_v36 = vmul.f32 %v11658_v30, %v4673_v50  ;;  %v8813_v19 = vld [vmem:[%s9299_s23 + $0xb20] ss:$24 sps:$4 sm:$0xff]  }
 0x7e5   : > { %6096 = vst [vmem:[#allocation4 + $0xd0] sm:$0xff] %v6024_v45  ;;  %6095 = vst [vmem:[#allocation4 + $0xc8] sm:$0xff] %v6023_v59  ;;  %v6030_v39 = vadd.f32 %v5591_v63, %v4794_v54  ;;  %v6029_v5 = vadd.f32 %v5221_v1, %v4793_v14  ;;  %v5593_v16 = vpop.f32.mrb[83].mxu1  ;;  %5925 = vmatprep.subr.bf16.mxu0 %v8810_v62  ;;  %v4807_v54 = vmul.f32 %v11658_v30, %v4675_v28  ;;  %v8814_v63 = vld [vmem:[%s9299_s23 + $0xb54] ss:$24 sps:$4 sm:$0xff]   ;;  %v4678_v34 = vld [vmem:[#allocation4 + $0x180] sm:$0xff] }
 0x7e6   : > { %6097 = vst [vmem:[#allocation4 + $0xd8] sm:$0xff] %v6025_v4  ;;  %6100 = vst [vmem:[#allocation4 + $0xf0] sm:$0xff] %v6028_v53  ;;  %v6031_v27 = vadd.f32 %v5593_v16, %v4795_v8  ;;  %v4680_v8 = vld [vmem:[#allocation4 + $0x190] sm:$0xff]  ;;  %v4810_v29 = vmul.f32 %v11644_v57, %v4678_v34 }
 0x7e7   : > { %6102 = vst [vmem:[#allocation4 + $0x100] sm:$0xff] %v6030_v39  ;;  %6101 = vst [vmem:[#allocation4 + $0xf8] sm:$0xff] %v6029_v5  ;;  %5895 = vmatmul.mubr.bf16.gmra.mrb[92].mxu0 %v11531_v10  ;;  %v4679_v39 = vld [vmem:[#allocation4 + $0x188] sm:$0xff]  ;;  %v4681_v5 = vld [vmem:[#allocation4 + $0x198] sm:$0xff]  ;;  %v4812_v49 = vmul.f32 %v11644_v57, %v4680_v8 }
 0x7e8   : > { %6103 = vst [vmem:[#allocation4 + $0x108] sm:$0xff] %v6031_v27  ;;  %5926 = vmatpush1.bf16.msra.mxu0 %v8811_v13  ;;  %5937 = vmatprep.mubr.bf16.mxu0 %v11467_v47  ;;  %v4804_v47 = vmul.f32 %v11658_v30, %v4672_v38  ;;  %v4684_v16 = vld [vmem:[#allocation4 + $0x1b0] sm:$0xff]  ;;  %v4686_v27 = vld [vmem:[#allocation4 + $0x1c0] sm:$0xff]  ;;  %v4811_v38 = vmul.f32 %v11644_v57, %v4679_v39 }
 0x7e9   : > { %v5225_v35 = vpop.f32.mrb[60].mxu0  ;;  %5927 = vmatprep.subr.bf16.mxu0 %v8812_v56  ;;  %v8815_v62 = vld [vmem:[%s9299_s23 + $0xb50] ss:$24 sps:$4 sm:$0xff]   ;;  %v8816_v13 = vld [vmem:[%s9299_s23 + $0xb84] ss:$24 sps:$4 sm:$0xff]  }
 0x7ea   : > { %v6034_v10 = vadd.f32 %v5225_v35, %v4798_v48  ;;  %v5597_v24 = vpop.f32.mrb[84].mxu1  ;;  %v5227_v18 = vpop.f32.mrb[61].mxu0  ;;  %v4687_v48 = vld [vmem:[#allocation4 + $0x1c8] sm:$0xff]  ;;  %v4696_v34 = vld [vmem:[#allocation4 + $0x210] sm:$0xff]  ;;  %v4698_v39 = vld [vmem:[#allocation4 + $0x220] sm:$0xff] }
 0x7eb   : > { %v6036_v17 = vadd.f32 %v5597_v24, %v4800_v46  ;;  %v6035_v20 = vadd.f32 %v5227_v18, %v4799_v3  ;;  %v5599_v58 = vpop.f32.mrb[85].mxu1  ;;  %v5229_v40 = vpop.f32.mrb[62].mxu0  ;;  %v4813_v46 = vmul.f32 %v11644_v57, %v4681_v5  ;;  %v4816_v3 = vmul.f32 %v11669_v37, %v4684_v16  ;;  %v4697_v5 = vld [vmem:[#allocation4 + $0x218] sm:$0xff] }
 0x7ec   : > { %6106 = vst [vmem:[#allocation4 + $0x120] sm:$0xff] %v6034_v10  ;;  %v6037_v25 = vadd.f32 %v5599_v58, %v4801_v6  ;;  %v6040_v45 = vadd.f32 %v5229_v40, %v4804_v47  ;;  %v5601_v59 = vpop.f32.mrb[86].mxu1  ;;  %5928 = vmatpush1.bf16.msra.mxu0 %v8813_v19  ;;  %v5231_v22 = vpop.f32.mrb[63].mxu0  ;;  %v4818_v18 = vmul.f32 %v11669_v37, %v4686_v27  ;;  %v8817_v58 = vld [vmem:[%s9299_s23 + $0xb80] ss:$24 sps:$4 sm:$0xff]  }
 0x7ed   : > { %6108 = vst [vmem:[#allocation4 + $0x130] sm:$0xff] %v6036_v17  ;;  %6107 = vst [vmem:[#allocation4 + $0x128] sm:$0xff] %v6035_v20  ;;  %v6042_v14 = vadd.f32 %v5601_v59, %v4806_v11  ;;  %v6041_v4 = vadd.f32 %v5231_v22, %v4805_v36  ;;  %v5603_v53 = vpop.f32.mrb[87].mxu1  ;;  %5929 = vmatprep.subr.bf16.mxu0 %v8814_v63  ;;  %v4817_v6 = vmul.f32 %v11669_v37, %v4685_v43  ;;  %v11995_v36 = vpop.permute.xlu1 %4754  ;;  %v8818_v19 = vld [vmem:[%s9299_s23 + $0xbb4] ss:$24 sps:$4 sm:$0xff]   ;;  %v4690_v22 = vld [vmem:[#allocation4 + $0x1e0] sm:$0xff] }
 0x7ee   : > { %6109 = vst [vmem:[#allocation4 + $0x138] sm:$0xff] %v6037_v25  ;;  %6112 = vst [vmem:[#allocation4 + $0x150] sm:$0xff] %v6040_v45  ;;  %v6043_v1 = vadd.f32 %v5603_v53, %v4807_v54  ;;  %v4819_v11 = vmul.f32 %v11669_v37, %v4687_v48  ;;  %v11998_v53 = vpop.permute.xlu0 %4759  ;;  %v4693_v63 = vld [vmem:[#allocation4 + $0x1f8] sm:$0xff]  ;;  %v4822_v8 = vmul.f32 %v11995_v36, %v4690_v22  ;;  %v4699_v43 = vld [vmem:[#allocation4 + $0x228] sm:$0xff] }
 0x7ef   : > { %6114 = vst [vmem:[#allocation4 + $0x160] sm:$0xff] %v6042_v14  ;;  %6113 = vst [vmem:[#allocation4 + $0x158] sm:$0xff] %v6041_v4  ;;  %v4692_v14 = vld [vmem:[#allocation4 + $0x1f0] sm:$0xff]  ;;  %v4691_v4 = vld [vmem:[#allocation4 + $0x1e8] sm:$0xff]  ;;  %v4828_v48 = vmul.f32 %v11998_v53, %v4696_v34 }
 0x7f0   : > { %6115 = vst [vmem:[#allocation4 + $0x168] sm:$0xff] %v6043_v1  ;;  %5930 = vmatpush1.bf16.msra.mxu0 %v8815_v62  ;;  %v8819_v1 = vld [vmem:[%s9299_s23 + $0xbb0] ss:$24 sps:$4 sm:$0xff]   ;;  %v4824_v62 = vmul.f32 %v11995_v36, %v4692_v14  ;;  %v8820_v27 = vld [vmem:[%s9299_s23 + $0xbe4] ss:$24 sps:$4 sm:$0xff]  }
 0x7f1   : > { %v5235_v9 = vpop.f32.mrb[64].mxu0  ;;  %5931 = vmatprep.subr.bf16.mxu0 %v8816_v13  ;;  %v4825_v13 = vmul.f32 %v11995_v36, %v4693_v63  ;;  %v4646_v22 = vld [vmem:[#allocation4 + $0x80] sm:$0xff]  ;;  %v4652_v14 = vld [vmem:[#allocation4 + $0xb0] sm:$0xff] }
 0x7f2   : > { %v6046_v2 = vadd.f32 %v5235_v9, %v4810_v29  ;;  %v5607_v50 = vpop.f32.mrb[88].mxu1  ;;  %v5237_v35 = vpop.f32.mrb[65].mxu0  ;;  %v4823_v29 = vmul.f32 %v11995_v36, %v4691_v4  ;;  %v4653_v4 = vld [vmem:[#allocation4 + $0xb8] sm:$0xff] }
 0x7f3   : > { %v6048_v56 = vadd.f32 %v5607_v50, %v4812_v49  ;;  %v6047_v28 = vadd.f32 %v5237_v35, %v4811_v38  ;;  %v5609_v10 = vpop.f32.mrb[89].mxu1  ;;  %v5239_v24 = vpop.f32.mrb[66].mxu0 }
 0x7f4   : > { %6118 = vst [vmem:[#allocation4 + $0x180] sm:$0xff] %v6046_v2  ;;  %v6049_v47 = vadd.f32 %v5609_v10, %v4813_v46  ;;  %v6052_v17 = vadd.f32 %v5239_v24, %v4816_v3  ;;  %v5611_v20 = vpop.f32.mrb[90].mxu1  ;;  %5932 = vmatpush1.bf16.msra.mxu0 %v8817_v58  ;;  %v5241_v40 = vpop.f32.mrb[67].mxu0  ;;  %v4830_v3 = vmul.f32 %v11998_v53, %v4698_v39 }
 0x7f5   : > { %6120 = vst [vmem:[#allocation4 + $0x190] sm:$0xff] %v6048_v56  ;;  %6119 = vst [vmem:[#allocation4 + $0x188] sm:$0xff] %v6047_v28  ;;  %v6054_v25 = vadd.f32 %v5611_v20, %v4818_v18  ;;  %v6053_v45 = vadd.f32 %v5241_v40, %v4817_v6  ;;  %v5613_v59 = vpop.f32.mrb[91].mxu1  ;;  %5933 = vmatprep.subr.bf16.mxu0 %v8818_v19  ;;  %v4829_v56 = vmul.f32 %v11998_v53, %v4697_v5  ;;  %v8821_v18 = vld [vmem:[%s9299_s23 + $0xbe0] ss:$24 sps:$4 sm:$0xff]  }
 0x7f6   : > { %6121 = vst [vmem:[#allocation4 + $0x198] sm:$0xff] %v6049_v47  ;;  %6124 = vst [vmem:[#allocation4 + $0x1b0] sm:$0xff] %v6052_v17  ;;  %v6055_v54 = vadd.f32 %v5613_v59, %v4819_v11  ;;  %v4831_v47 = vmul.f32 %v11998_v53, %v4699_v43  ;;  %v4640_v11 = vld [vmem:[#allocation4 + $0x50] sm:$0xff]  ;;  %v4658_v43 = vld [vmem:[#allocation4 + $0xe0] sm:$0xff] }
 0x7f7   : > { %6126 = vst [vmem:[#allocation4 + $0x1c0] sm:$0xff] %v6054_v25  ;;  %6125 = vst [vmem:[#allocation4 + $0x1b8] sm:$0xff] %v6053_v45 }
 0x7f8   : > { %6127 = vst [vmem:[#allocation4 + $0x1c8] sm:$0xff] %v6055_v54  ;;  %5934 = vmatpush1.bf16.msra.mxu0 %v8819_v1  ;;  %v4647_v54 = vld [vmem:[#allocation4 + $0x88] sm:$0xff] }
 0x7f9   : > { %v5245_v16 = vpop.f32.mrb[68].mxu0  ;;  %5935 = vmatprep.subr.bf16.mxu0 %v8820_v27  ;;  %v4779_v34 = vmul.f32 %v11613_v41, %v4647_v54 }
 0x7fa   : > { %v6058_v9 = vadd.f32 %v5245_v16, %v4822_v8  ;;  %v5617_v49 = vpop.f32.mrb[92].mxu1  ;;  %v5247_v38 = vpop.f32.mrb[69].mxu0  ;;  %v4785_v16 = vmul.f32 %v11631_v0, %v4653_v4  ;;  %v4694_v4 = vld [vmem:[#allocation4 + $0x200] sm:$0xff] }
 0x7fb   : > { %v6060_v2 = vadd.f32 %v5617_v49, %v4824_v62  ;;  %v6059_v50 = vadd.f32 %v5247_v38, %v4823_v29  ;;  %v5619_v35 = vpop.f32.mrb[93].mxu1  ;;  %v5249_v46 = vpop.f32.mrb[70].mxu0  ;;  %v4664_v49 = vld [vmem:[#allocation4 + $0x110] sm:$0xff]  ;;  %v4665_v38 = vld [vmem:[#allocation4 + $0x118] sm:$0xff] }
 0x7fc   : > { %6130 = vst [vmem:[#allocation4 + $0x1e0] sm:$0xff] %v6058_v9  ;;  %v6061_v28 = vadd.f32 %v5619_v35, %v4825_v13  ;;  %v6064_v10 = vadd.f32 %v5249_v46, %v4828_v48  ;;  %v5621_v24 = vpop.f32.mrb[94].mxu1  ;;  %5936 = vmatpush1.bf16.msra.mxu0 %v8821_v18  ;;  %v5251_v6 = vpop.f32.mrb[71].mxu0  ;;  %v4659_v9 = vld [vmem:[#allocation4 + $0xe8] sm:$0xff] }
 0x7fd   : > { %6132 = vst [vmem:[#allocation4 + $0x1f0] sm:$0xff] %v6060_v2  ;;  %6131 = vst [vmem:[#allocation4 + $0x1e8] sm:$0xff] %v6059_v50  ;;  %v6066_v17 = vadd.f32 %v5621_v24, %v4830_v3  ;;  %v6065_v20 = vadd.f32 %v5251_v6, %v4829_v56  ;;  %v5623_v58 = vpop.f32.mrb[95].mxu1  ;;  %v4791_v48 = vmul.f32 %v11624_v60, %v4659_v9  ;;  %v4670_v24 = vld [vmem:[#allocation4 + $0x140] sm:$0xff]  ;;  %v4671_v18 = vld [vmem:[#allocation4 + $0x148] sm:$0xff] }
 0x7fe   : > { %6133 = vst [vmem:[#allocation4 + $0x1f8] sm:$0xff] %v6061_v28  ;;  %6136 = vst [vmem:[#allocation4 + $0x210] sm:$0xff] %v6064_v10  ;;  %v6067_v40 = vadd.f32 %v5623_v58, %v4831_v47  ;;  %v4797_v3 = vmul.f32 %v11642_v55, %v4665_v38  ;;  %v4676_v6 = vld [vmem:[#allocation4 + $0x170] sm:$0xff]  ;;  %v4677_v47 = vld [vmem:[#allocation4 + $0x178] sm:$0xff]  ;;  %v9043_v38 = vmov (!%p7012_p6), 0  }
 0x7ff   : > { %6138 = vst [vmem:[#allocation4 + $0x220] sm:$0xff] %v6066_v17  ;;  %6137 = vst [vmem:[#allocation4 + $0x218] sm:$0xff] %v6065_v20  ;;  %5938 = vmatmul.mubr.bf16.vlgmr.msra.gmra.mrb[72].mxu0 %v11761_v21  ;;  %v4634_v21 = vld [vmem:[#allocation4 + $0x20] sm:$0xff]  ;;  %v4803_v20 = vmul.f32 %v11633_v7, %v4671_v18  ;;  %8823 = vset.pattern.permute.xlu1 (!%p7012_p6), %v9043_v38  ;;  %v6168_v18 = vld [vmem:[#allocation3 + $0x50] sm:$0xff] (!%p7012_p6) }
 0x800   : > { %6139 = vst [vmem:[#allocation4 + $0x228] sm:$0xff] %v6067_v40  ;;  %5947 = vmatprep.mubr.bf16.mxu0 %v11473_v26  ;;  %v4635_v26 = vld [vmem:[#allocation4 + $0x28] sm:$0xff]  ;;  %8822 = vset.pattern.permute.xlu0 (!%p7012_p6), %v9043_v38 }
 0x807   : > { %5948 = vmatmul.mubr.bf16.gmra.mrb[76].mxu0 %v11478_v23  ;;  %v4766_v23 = vmul.f32 %v11622_v42, %v4634_v21 }
 0x808   : > { %5957 = vmatprep.mubr.bf16.mxu0 %v11482_v15  ;;  %v4641_v15 = vld [vmem:[#allocation4 + $0x58] sm:$0xff] }
 0x80f   : > { %5958 = vmatmul.mubr.bf16.gmra.mrb[80].mxu0 %v11486_v61  ;;  %v4767_v61 = vmul.f32 %v11622_v42, %v4635_v26  ;;  %v4778_v42 = vmul.f32 %v11613_v41, %v4646_v22  ;;  %v4790_v41 = vmul.f32 %v11624_v60, %v4658_v43  ;;  %v4802_v60 = vmul.f32 %v11633_v7, %v4670_v24 }
 0x810   : > { %5967 = vmatprep.mubr.bf16.mxu0 %v11490_v12 }
 0x817   : > { %5968 = vmatmul.mubr.bf16.gmra.mrb[84].mxu0 %v11493_v33  ;;  %v4772_v33 = vmul.f32 %v11602_v31, %v4640_v11  ;;  %v4809_v11 = vmul.f32 %v11658_v30, %v4677_v47 }
 0x818   : > { %5977 = vmatprep.mubr.bf16.mxu0 %v11521_v52 }
 0x81f   : > { %5978 = vmatmul.mubr.bf16.gmra.mrb[88].mxu0 %v11519_v32  ;;  %v4773_v32 = vmul.f32 %v11602_v31, %v4641_v15  ;;  %v4784_v31 = vmul.f32 %v11631_v0, %v4652_v14  ;;  %v4796_v0 = vmul.f32 %v11642_v55, %v4664_v49  ;;  %v4808_v55 = vmul.f32 %v11658_v30, %v4676_v6  ;;  %v6160_v49 = vld [vmem:[#allocation3 + $0x10] sm:$0xff] (!%p7012_p6) }
 0x820   : > { %5987 = vmatprep.mubr.bf16.mxu0 %v11540_v51  ;;  %8824 = vrcp.f32 (!%p7012_p6), %v6160_v49 }
 0x827   : > { %5988 = vmatmul.mubr.bf16.gmra.mrb[92].mxu0 %v11538_v44 }
 0x8d2   : > { %v5939_v25 = vpop.f32.mrb[72].mxu0 }
 0x8d3   : > { %v6002_v12 = vadd.f32 %v5939_v25, %v4766_v23  ;;  %v5941_v45 = vpop.f32.mrb[73].mxu0 }
 0x8d4   : > { %v6003_v52 = vadd.f32 %v5941_v45, %v4767_v61  ;;  %v5943_v59 = vpop.f32.mrb[74].mxu0  ;;  %v4682_v61 = vld [vmem:[#allocation4 + $0x1a0] sm:$0xff]  ;;  %v4688_v45 = vld [vmem:[#allocation4 + $0x1d0] sm:$0xff] }
 0x8d5   : > { %6074 = vst [vmem:[#allocation4 + $0x20] sm:$0xff] %v6002_v12  ;;  %v6008_v51 = vadd.f32 %v5943_v59, %v4772_v33  ;;  %v5945_v44 = vpop.f32.mrb[75].mxu0  ;;  %v4683_v12 = vld [vmem:[#allocation4 + $0x1a8] sm:$0xff]  ;;  %v4814_v7 = vmul.f32 %v11644_v57, %v4682_v61  ;;  %v4689_v33 = vld [vmem:[#allocation4 + $0x1d8] sm:$0xff]  ;;  %v4820_v30 = vmul.f32 %v11669_v37, %v4688_v45 }
 0x8d6   : > { %6075 = vst [vmem:[#allocation4 + $0x28] sm:$0xff] %v6003_v52  ;;  %v6009_v19 = vadd.f32 %v5945_v44, %v4773_v32  ;;  %v4815_v59 = vmul.f32 %v11644_v57, %v4683_v12  ;;  %v4821_v22 = vmul.f32 %v11669_v37, %v4689_v33  ;;  %v4826_v57 = vmul.f32 %v11995_v36, %v4694_v4  ;;  %v6183_v61 = vld [vmem:[#allocation4 + $0x8] sm:$0xff] (!%p7012_p6)  ;;  %v6184_v12 = vld [vmem:[#allocation4 + $0x10] sm:$0xff] (!%p7012_p6) }
 0x8d7   : > { %6080 = vst [vmem:[#allocation4 + $0x50] sm:$0xff] %v6008_v51 }
 0x8d8   : > { %6081 = vst [vmem:[#allocation4 + $0x58] sm:$0xff] %v6009_v19 }
 0x8da   : > { %v5949_v63 = vpop.f32.mrb[76].mxu0 }
 0x8db   : > { %v6014_v1 = vadd.f32 %v5949_v63, %v4778_v42  ;;  %v5951_v8 = vpop.f32.mrb[77].mxu0  ;;  %v4695_v63 = vld [vmem:[#allocation4 + $0x208] sm:$0xff] }
 0x8dc   : > { %v6015_v39 = vadd.f32 %v5951_v8, %v4779_v34  ;;  %v5953_v5 = vpop.f32.mrb[78].mxu0  ;;  %v4700_v34 = vld [vmem:[#allocation4 + $0x230] sm:$0xff]  ;;  %v6186_v33 = vld [vmem:[#allocation4 + $0x20] sm:$0xff] (!%p7012_p6) }
 0x8dd   : > { %6086 = vst [vmem:[#allocation4 + $0x80] sm:$0xff] %v6014_v1  ;;  %v6020_v62 = vadd.f32 %v5953_v5, %v4784_v31  ;;  %v5955_v29 = vpop.f32.mrb[79].mxu0  ;;  %v4701_v1 = vld [vmem:[#allocation4 + $0x238] sm:$0xff]  ;;  %v4827_v31 = vmul.f32 %v11995_v36, %v4695_v63  ;;  %v4832_v37 = vmul.f32 %v11998_v53, %v4700_v34  ;;  %v6158_v36 = vld [vmem:[#allocation3] sm:$0xff] (!%p7012_p6)  ;;  %v6203_v34 = vld [vmem:[#allocation4 + $0xa8] sm:$0xff] (!%p7012_p6) }
 0x8de   : > { %6087 = vst [vmem:[#allocation4 + $0x88] sm:$0xff] %v6015_v39  ;;  %v6021_v27 = vadd.f32 %v5955_v29, %v4785_v16  ;;  %v4833_v29 = vmul.f32 %v11998_v53, %v4701_v1  ;;  %8826 = vrcp.f32 (!%p7012_p6), %v6158_v36  ;;  %v6163_v53 = vld [vmem:[#allocation3 + $0x28] sm:$0xff] (!%p7012_p6) }
 0x8df   : > { %6092 = vst [vmem:[#allocation4 + $0xb0] sm:$0xff] %v6020_v62 }
 0x8e0   : > { %6093 = vst [vmem:[#allocation4 + $0xb8] sm:$0xff] %v6021_v27 }
 0x8e2   : > { %v5959_v13 = vpop.f32.mrb[80].mxu0 }
 0x8e3   : > { %v6026_v2 = vadd.f32 %v5959_v13, %v4790_v41  ;;  %v5961_v50 = vpop.f32.mrb[81].mxu0  ;;  %v6161_v41 = vld [vmem:[#allocation3 + $0x18] sm:$0xff] (!%p7012_p6)  ;;  %v6159_v13 = vld [vmem:[#allocation3 + $0x8] sm:$0xff] (!%p7012_p6) }
 0x8e4   : > { %v6027_v35 = vadd.f32 %v5961_v50, %v4791_v48  ;;  %v5963_v46 = vpop.f32.mrb[82].mxu0  ;;  %8828 = vrcp.f32 (!%p7012_p6), %v6161_v41  ;;  %v6162_v48 = vld [vmem:[#allocation3 + $0x20] sm:$0xff] (!%p7012_p6)  ;;  %v6164_v50 = vld [vmem:[#allocation3 + $0x30] sm:$0xff] (!%p7012_p6) }
 0x8e5   : > { %6098 = vst [vmem:[#allocation4 + $0xe0] sm:$0xff] %v6026_v2  ;;  %v6032_v56 = vadd.f32 %v5963_v46, %v4796_v0  ;;  %v5965_v28 = vpop.f32.mrb[83].mxu0  ;;  %8830 = vrcp.f32 (!%p7012_p6), %v6159_v13  ;;  %v6165_v2 = vld [vmem:[#allocation3 + $0x38] sm:$0xff] (!%p7012_p6)  ;;  %v8825_v0 = vpop.eup (!%p7012_p6), %8824  ;;  %v6167_v46 = vld [vmem:[#allocation3 + $0x48] sm:$0xff] (!%p7012_p6) }
 0x8e6   : > { %6099 = vst [vmem:[#allocation4 + $0xe8] sm:$0xff] %v6027_v35  ;;  %v6033_v10 = vadd.f32 %v5965_v28, %v4797_v3  ;;  %8832 = vrcp.f32 (!%p7012_p6), %v6163_v53  ;;  %6266 = vperm.xlu1 (!%p7012_p6), %8823, %v8825_v0   ;;  %v6212_v53 = vld [vmem:[#allocation4 + $0xf0] sm:$0xff] (!%p7012_p6) }
 0x8e7   : > { %6104 = vst [vmem:[#allocation4 + $0x110] sm:$0xff] %v6032_v56  ;;  %8834 = vrcp.f32 (!%p7012_p6), %v6162_v48  ;;  %v6166_v56 = vld [vmem:[#allocation3 + $0x40] sm:$0xff] (!%p7012_p6)  ;;  %v6205_v1 = vld [vmem:[#allocation4 + $0xb8] sm:$0xff] (!%p7012_p6) }
 0x8e8   : > { %6105 = vst [vmem:[#allocation4 + $0x118] sm:$0xff] %v6033_v10  ;;  %8836 = vrcp.f32 (!%p7012_p6), %v6165_v2  ;;  %v8827_v35 = vpop.eup (!%p7012_p6), %8826  ;;  %v6169_v10 = vld [vmem:[#allocation3 + $0x58] sm:$0xff] (!%p7012_p6)  ;;  %v6214_v2 = vld [vmem:[#allocation4 + $0x100] sm:$0xff] (!%p7012_p6) }
 0x8e9   : > { %8838 = vrcp.f32 (!%p7012_p6), %v6164_v50  ;;  %6256 = vperm.xlu0 (!%p7012_p6), %8822, %v8827_v35   ;;  %v6213_v48 = vld [vmem:[#allocation4 + $0xf8] sm:$0xff] (!%p7012_p6) }
 0x8ea   : > { %v5969_v17 = vpop.f32.mrb[84].mxu0  ;;  %8840 = vrcp.f32 (!%p7012_p6), %v6167_v46 }
 0x8eb   : > { %v6038_v58 = vadd.f32 %v5969_v17, %v4802_v60  ;;  %v5971_v40 = vpop.f32.mrb[85].mxu0  ;;  %8842 = vrcp.f32 (!%p7012_p6), %v6166_v56 }
 0x8ec   : > { %v6039_v21 = vadd.f32 %v5971_v40, %v4803_v20  ;;  %v5973_v26 = vpop.f32.mrb[86].mxu0  ;;  %8844 = vrcp.f32 (!%p7012_p6), %v6169_v10 }
 0x8ed   : > { %6110 = vst [vmem:[#allocation4 + $0x140] sm:$0xff] %v6038_v58  ;;  %v6044_v23 = vadd.f32 %v5973_v26, %v4808_v55  ;;  %v5975_v15 = vpop.f32.mrb[87].mxu0  ;;  %8846 = vrcp.f32 (!%p7012_p6), %v6168_v18  ;;  %v6194_v55 = vld [vmem:[#allocation4 + $0x60] sm:$0xff] (!%p7012_p6)  ;;  %v6196_v26 = vld [vmem:[#allocation4 + $0x70] sm:$0xff] (!%p7012_p6) }
 0x8ee   : > { %6111 = vst [vmem:[#allocation4 + $0x148] sm:$0xff] %v6039_v21  ;;  %v6045_v25 = vadd.f32 %v5975_v15, %v4809_v11  ;;  %v8829_v3 = vpop.eup (!%p7012_p6), %8828  ;;  %v6195_v21 = vld [vmem:[#allocation4 + $0x68] sm:$0xff] (!%p7012_p6)  ;;  %v6197_v11 = vld [vmem:[#allocation4 + $0x78] sm:$0xff] (!%p7012_p6)  ;;  %v6216_v56 = vld [vmem:[#allocation4 + $0x110] sm:$0xff] (!%p7012_p6) }
 0x8ef   : > { %6116 = vst [vmem:[#allocation4 + $0x170] sm:$0xff] %v6044_v23  ;;  %v8831_v28 = vpop.eup (!%p7012_p6), %8830  ;;  %6271 = vperm.xlu1 (!%p7012_p6), %8823, %v8829_v3   ;;  %v6198_v23 = vld [vmem:[#allocation4 + $0x80] sm:$0xff] (!%p7012_p6)  ;;  %v6199_v15 = vld [vmem:[#allocation4 + $0x88] sm:$0xff] (!%p7012_p6) }
 0x8f0   : > { %6117 = vst [vmem:[#allocation4 + $0x178] sm:$0xff] %v6045_v25  ;;  %v8833_v24 = vpop.eup (!%p7012_p6), %8832  ;;  %6261 = vperm.xlu0 (!%p7012_p6), %8822, %v8831_v28   ;;  %v6182_v25 = vld [vmem:[#allocation4] sm:$0xff] (!%p7012_p6)  ;;  %v6215_v3 = vld [vmem:[#allocation4 + $0x108] sm:$0xff] (!%p7012_p6)  ;;  %v6217_v28 = vld [vmem:[#allocation4 + $0x118] sm:$0xff] (!%p7012_p6) }
 0x8f1   : > { %v8835_v6 = vpop.eup (!%p7012_p6), %8834 }
 0x8f2   : > { %v5979_v52 = vpop.f32.mrb[88].mxu0  ;;  %v8837_v60 = vpop.eup (!%p7012_p6), %8836 }
 0x8f3   : > { %v6050_v32 = vadd.f32 %v5979_v52, %v4814_v7  ;;  %v5981_v51 = vpop.f32.mrb[89].mxu0  ;;  %6281 = vperm.xlu1 (!%p7012_p6), %8823, %v8833_v24   ;;  %v8839_v47 = vpop.eup (!%p7012_p6), %8838  ;;  %v6185_v7 = vld [vmem:[#allocation4 + $0x18] sm:$0xff] (!%p7012_p6)  ;;  %v6187_v52 = vld [vmem:[#allocation4 + $0x28] sm:$0xff] (!%p7012_p6) }
 0x8f4   : > { %v6051_v44 = vadd.f32 %v5981_v51, %v4815_v59  ;;  %v5983_v19 = vpop.f32.mrb[90].mxu0  ;;  %6276 = vperm.xlu0 (!%p7012_p6), %8822, %v8835_v6   ;;  %v8841_v17 = vpop.eup (!%p7012_p6), %8840 }
 0x8f5   : > { %6122 = vst [vmem:[#allocation4 + $0x1a0] sm:$0xff] %v6050_v32  ;;  %v6056_v54 = vadd.f32 %v5983_v19, %v4820_v30  ;;  %v5985_v14 = vpop.f32.mrb[91].mxu0  ;;  %v8843_v20 = vpop.eup (!%p7012_p6), %8842  ;;  %v6200_v19 = vld [vmem:[#allocation4 + $0x90] sm:$0xff] (!%p7012_p6) }
 0x8f6   : > { %6123 = vst [vmem:[#allocation4 + $0x1a8] sm:$0xff] %v6051_v44  ;;  %v6057_v42 = vadd.f32 %v5985_v14, %v4821_v22  ;;  %v8845_v58 = vpop.eup (!%p7012_p6), %8844  ;;  %v6201_v22 = vld [vmem:[#allocation4 + $0x98] sm:$0xff] (!%p7012_p6) }
 0x8f7   : > { %6128 = vst [vmem:[#allocation4 + $0x1d0] sm:$0xff] %v6056_v54  ;;  %6291 = vperm.xlu1 (!%p7012_p6), %8823, %v8837_v60   ;;  %v8847_v40 = vpop.eup (!%p7012_p6), %8846  ;;  %v6202_v54 = vld [vmem:[#allocation4 + $0xa0] sm:$0xff] (!%p7012_p6) }
 0x8f8   : > { %6129 = vst [vmem:[#allocation4 + $0x1d8] sm:$0xff] %v6057_v42  ;;  %6286 = vperm.xlu0 (!%p7012_p6), %8822, %v8839_v47   ;;  %v6206_v60 = vld [vmem:[#allocation4 + $0xc0] sm:$0xff] (!%p7012_p6)  ;;  %v6207_v47 = vld [vmem:[#allocation4 + $0xc8] sm:$0xff] (!%p7012_p6) }
 0x8fa   : > { %v5989_v8 = vpop.f32.mrb[92].mxu0  ;;  %6157 = sbr.rel (%p7012_p6) target bundleno = 2447 (0x98f), region = 44 }
 0x8fb   : > { %v6062_v39 = vadd.f32 %v5989_v8, %v4826_v57  ;;  %v5991_v5 = vpop.f32.mrb[93].mxu0  ;;  %6301 = vperm.xlu1 (!%p7012_p6), %8823, %v8841_v17   ;;  %v6204_v57 = vld [vmem:[#allocation4 + $0xb0] sm:$0xff] (!%p7012_p6) }
 0x8fc   : > { %v6063_v16 = vadd.f32 %v5991_v5, %v4827_v31  ;;  %v5993_v62 = vpop.f32.mrb[94].mxu0  ;;  %6296 = vperm.xlu0 (!%p7012_p6), %8822, %v8843_v20   ;;  %v6208_v17 = vld [vmem:[#allocation4 + $0xd0] sm:$0xff] (!%p7012_p6) }
 0x8fd   : > { %6134 = vst [vmem:[#allocation4 + $0x200] sm:$0xff] %v6062_v39  ;;  %v6068_v27 = vadd.f32 %v5993_v62, %v4832_v37  ;;  %v5995_v43 = vpop.f32.mrb[95].mxu0  ;;  %v6188_v37 = vld [vmem:[#allocation4 + $0x30] sm:$0xff] (!%p7012_p6)  ;;  %v6190_v62 = vld [vmem:[#allocation4 + $0x40] sm:$0xff] (!%p7012_p6) }
 0x8fe   : > { %6135 = vst [vmem:[#allocation4 + $0x208] sm:$0xff] %v6063_v16  ;;  %v6069_v9 = vadd.f32 %v5995_v43, %v4833_v29  ;;  %v6189_v16 = vld [vmem:[#allocation4 + $0x38] sm:$0xff] (!%p7012_p6)  ;;  %v6192_v43 = vld [vmem:[#allocation4 + $0x50] sm:$0xff] (!%p7012_p6) }
 0x8ff   : > { %6140 = vst [vmem:[#allocation4 + $0x230] sm:$0xff] %v6068_v27  ;;  %6311 = vperm.xlu1 (!%p7012_p6), %8823, %v8845_v58   ;;  %v6191_v27 = vld [vmem:[#allocation4 + $0x48] sm:$0xff] (!%p7012_p6)  ;;  %v6209_v58 = vld [vmem:[#allocation4 + $0xd8] sm:$0xff] (!%p7012_p6) }
 0x900   : > { %6141 = vst [vmem:[#allocation4 + $0x238] sm:$0xff] %v6069_v9  ;;  %6306 = vperm.xlu0 (!%p7012_p6), %8822, %v8847_v40   ;;  %v6193_v9 = vld [vmem:[#allocation4 + $0x58] sm:$0xff] (!%p7012_p6)  ;;  %v6210_v40 = vld [vmem:[#allocation4 + $0xe0] sm:$0xff] (!%p7012_p6) }
 0x965   : > { %v6267_v45 = vpop.permute.xlu1 %6266 }
 0x966   : > { %v6326_v59 = vmul.f32 %v6267_v45, %v6194_v55  ;;  %v6327_v32 = vmul.f32 %v6267_v45, %v6195_v21  ;;  %v6328_v51 = vmul.f32 %v6267_v45, %v6196_v26  ;;  %v6329_v30 = vmul.f32 %v6267_v45, %v6197_v11  ;;  %v6211_v55 = vld [vmem:[#allocation4 + $0xe8] sm:$0xff] }
 0x967   : > { %v6330_v14 = vmul.f32 %v6267_v45, %v6198_v23  ;;  %v6331_v42 = vmul.f32 %v6267_v45, %v6199_v15 }
 0x968   : > { %v6257_v44 = vpop.permute.xlu0 %6256  ;;  %6398 = vst [vmem:[%s9306_s26 + $0x60] sm:$0xff] %v6326_v59  ;;  %6399 = vst [vmem:[%s9306_s26 + $0x68] sm:$0xff] %v6327_v32  ;;  %v6227_v59 = vld [vmem:[#allocation4 + $0x168] sm:$0xff]  ;;  %v6228_v32 = vld [vmem:[#allocation4 + $0x170] sm:$0xff] }
 0x969   : > { %v6314_v4 = vmul.f32 %v6257_v44, %v6182_v25  ;;  %v6315_v63 = vmul.f32 %v6257_v44, %v6183_v61  ;;  %6400 = vst [vmem:[%s9306_s26 + $0x70] sm:$0xff] %v6328_v51  ;;  %6401 = vst [vmem:[%s9306_s26 + $0x78] sm:$0xff] %v6329_v30  ;;  %v6316_v8 = vmul.f32 %v6257_v44, %v6184_v12  ;;  %v6224_v25 = vld [vmem:[#allocation4 + $0x150] sm:$0xff]  ;;  %v6225_v61 = vld [vmem:[#allocation4 + $0x158] sm:$0xff] }
 0x96a   : > { %v6317_v31 = vmul.f32 %v6257_v44, %v6185_v7  ;;  %v6318_v39 = vmul.f32 %v6257_v44, %v6186_v33  ;;  %v6319_v5 = vmul.f32 %v6257_v44, %v6187_v52  ;;  %6402 = vst [vmem:[%s9306_s26 + $0x80] sm:$0xff] %v6330_v14  ;;  %6403 = vst [vmem:[%s9306_s26 + $0x88] sm:$0xff] %v6331_v42  ;;  %v6226_v12 = vld [vmem:[#allocation4 + $0x160] sm:$0xff]  ;;  %v6229_v51 = vld [vmem:[#allocation4 + $0x178] sm:$0xff] }
 0x96b   : > { %6386 = vst [vmem:[%s9306_s26] sm:$0xff] %v6314_v4  ;;  %6387 = vst [vmem:[%s9306_s26 + $0x8] sm:$0xff] %v6315_v63  ;;  %v6219_v14 = vld [vmem:[#allocation4 + $0x128] sm:$0xff]  ;;  %v6220_v42 = vld [vmem:[#allocation4 + $0x130] sm:$0xff] }
 0x96c   : > { %6388 = vst [vmem:[%s9306_s26 + $0x10] sm:$0xff] %v6316_v8  ;;  %6389 = vst [vmem:[%s9306_s26 + $0x18] sm:$0xff] %v6317_v31  ;;  %v6221_v63 = vld [vmem:[#allocation4 + $0x138] sm:$0xff] }
 0x96d   : > { %6390 = vst [vmem:[%s9306_s26 + $0x20] sm:$0xff] %v6318_v39  ;;  %6391 = vst [vmem:[%s9306_s26 + $0x28] sm:$0xff] %v6319_v5 }
 0x96e   : > { %v6272_v29 = vpop.permute.xlu1 %6271 }
 0x96f   : > { %v6332_v49 = vmul.f32 %v6272_v29, %v6200_v19  ;;  %v6333_v36 = vmul.f32 %v6272_v29, %v6201_v22  ;;  %v6334_v41 = vmul.f32 %v6272_v29, %v6202_v54  ;;  %v6335_v38 = vmul.f32 %v6272_v29, %v6203_v34  ;;  %v6262_v13 = vpop.permute.xlu0 %6261  ;;  %v6218_v54 = vld [vmem:[#allocation4 + $0x120] sm:$0xff] }
 0x970   : > { %v6336_v50 = vmul.f32 %v6272_v29, %v6204_v57  ;;  %v6337_v0 = vmul.f32 %v6272_v29, %v6205_v1  ;;  %v6320_v35 = vmul.f32 %v6262_v13, %v6188_v37  ;;  %v6321_v46 = vmul.f32 %v6262_v13, %v6189_v16  ;;  %v6222_v34 = vld [vmem:[#allocation4 + $0x140] sm:$0xff]  ;;  %v6223_v57 = vld [vmem:[#allocation4 + $0x148] sm:$0xff]  ;;  %v6236_v37 = vld [vmem:[#allocation4 + $0x1b0] sm:$0xff] }
 0x971   : > { %6404 = vst [vmem:[%s9306_s26 + $0x90] sm:$0xff] %v6332_v49  ;;  %6405 = vst [vmem:[%s9306_s26 + $0x98] sm:$0xff] %v6333_v36  ;;  %v6322_v10 = vmul.f32 %v6262_v13, %v6190_v62  ;;  %v6323_v24 = vmul.f32 %v6262_v13, %v6191_v27  ;;  %v6324_v18 = vmul.f32 %v6262_v13, %v6192_v43  ;;  %v6237_v16 = vld [vmem:[#allocation4 + $0x1b8] sm:$0xff]  ;;  %v6238_v62 = vld [vmem:[#allocation4 + $0x1c0] sm:$0xff] }
 0x972   : > { %6406 = vst [vmem:[%s9306_s26 + $0xa0] sm:$0xff] %v6334_v41  ;;  %6407 = vst [vmem:[%s9306_s26 + $0xa8] sm:$0xff] %v6335_v38  ;;  %v6325_v6 = vmul.f32 %v6262_v13, %v6193_v9  ;;  %v6282_v20 = vpop.permute.xlu1 %6281  ;;  %v6239_v49 = vld [vmem:[#allocation4 + $0x1c8] sm:$0xff]  ;;  %v6240_v36 = vld [vmem:[#allocation4 + $0x1d0] sm:$0xff] }
 0x973   : > { %6408 = vst [vmem:[%s9306_s26 + $0xb0] sm:$0xff] %v6336_v50  ;;  %6409 = vst [vmem:[%s9306_s26 + $0xb8] sm:$0xff] %v6337_v0  ;;  %v6344_v21 = vmul.f32 %v6282_v20, %v6212_v53  ;;  %v6345_v26 = vmul.f32 %v6282_v20, %v6213_v48  ;;  %v6346_v11 = vmul.f32 %v6282_v20, %v6214_v2  ;;  %v6277_v15 = vpop.permute.xlu0 %6276  ;;  %v6241_v41 = vld [vmem:[#allocation4 + $0x1d8] sm:$0xff]  ;;  %v6230_v2 = vld [vmem:[#allocation4 + $0x180] sm:$0xff] }
 0x974   : > { %6392 = vst [vmem:[%s9306_s26 + $0x30] sm:$0xff] %v6320_v35  ;;  %6393 = vst [vmem:[%s9306_s26 + $0x38] sm:$0xff] %v6321_v46  ;;  %v6347_v23 = vmul.f32 %v6282_v20, %v6215_v3  ;;  %v6348_v45 = vmul.f32 %v6282_v20, %v6216_v56  ;;  %v6349_v7 = vmul.f32 %v6282_v20, %v6217_v28  ;;  %v6231_v50 = vld [vmem:[#allocation4 + $0x188] sm:$0xff]  ;;  %v6232_v0 = vld [vmem:[#allocation4 + $0x190] sm:$0xff] }
 0x975   : > { %6394 = vst [vmem:[%s9306_s26 + $0x40] sm:$0xff] %v6322_v10  ;;  %6395 = vst [vmem:[%s9306_s26 + $0x48] sm:$0xff] %v6323_v24  ;;  %v6338_v33 = vmul.f32 %v6277_v15, %v6206_v60  ;;  %v6339_v52 = vmul.f32 %v6277_v15, %v6207_v47  ;;  %v6340_v30 = vmul.f32 %v6277_v15, %v6208_v17  ;;  %v6233_v46 = vld [vmem:[#allocation4 + $0x198] sm:$0xff]  ;;  %v6234_v3 = vld [vmem:[#allocation4 + $0x1a0] sm:$0xff] }
 0x976   : > { %6396 = vst [vmem:[%s9306_s26 + $0x50] sm:$0xff] %v6324_v18  ;;  %6397 = vst [vmem:[%s9306_s26 + $0x58] sm:$0xff] %v6325_v6  ;;  %v6341_v44 = vmul.f32 %v6277_v15, %v6209_v58  ;;  %v6342_v19 = vmul.f32 %v6277_v15, %v6210_v40  ;;  %v6343_v22 = vmul.f32 %v6277_v15, %v6211_v55  ;;  %v6292_v4 = vpop.permute.xlu1 %6291  ;;  %v6235_v56 = vld [vmem:[#allocation4 + $0x1a8] sm:$0xff]  ;;  %v6248_v60 = vld [vmem:[#allocation4 + $0x210] sm:$0xff] }
 0x977   : > { %6416 = vst [vmem:[%s9306_s26 + $0xf0] sm:$0xff] %v6344_v21  ;;  %6417 = vst [vmem:[%s9306_s26 + $0xf8] sm:$0xff] %v6345_v26  ;;  %v6356_v1 = vmul.f32 %v6292_v4, %v6224_v25  ;;  %v6357_v8 = vmul.f32 %v6292_v4, %v6225_v61  ;;  %v6358_v31 = vmul.f32 %v6292_v4, %v6226_v12  ;;  %v6287_v5 = vpop.permute.xlu0 %6286  ;;  %v6249_v47 = vld [vmem:[#allocation4 + $0x218] sm:$0xff]  ;;  %v6250_v17 = vld [vmem:[#allocation4 + $0x220] sm:$0xff] }
 0x978   : > { %6418 = vst [vmem:[%s9306_s26 + $0x100] sm:$0xff] %v6346_v11  ;;  %6419 = vst [vmem:[%s9306_s26 + $0x108] sm:$0xff] %v6347_v23  ;;  %v6359_v39 = vmul.f32 %v6292_v4, %v6227_v59  ;;  %v6360_v29 = vmul.f32 %v6292_v4, %v6228_v32  ;;  %v6361_v27 = vmul.f32 %v6292_v4, %v6229_v51  ;;  %v6251_v21 = vld [vmem:[#allocation4 + $0x228] sm:$0xff]  ;;  %v6252_v26 = vld [vmem:[#allocation4 + $0x230] sm:$0xff] }
 0x979   : > { %6420 = vst [vmem:[%s9306_s26 + $0x110] sm:$0xff] %v6348_v45  ;;  %6421 = vst [vmem:[%s9306_s26 + $0x118] sm:$0xff] %v6349_v7  ;;  %v6350_v43 = vmul.f32 %v6287_v5, %v6218_v54  ;;  %v6351_v9 = vmul.f32 %v6287_v5, %v6219_v14  ;;  %v6352_v38 = vmul.f32 %v6287_v5, %v6220_v42  ;;  %v6253_v11 = vld [vmem:[#allocation4 + $0x238] sm:$0xff]  ;;  %v6242_v12 = vld [vmem:[#allocation4 + $0x1e0] sm:$0xff] }
 0x97a   : > { %6410 = vst [vmem:[%s9306_s26 + $0xc0] sm:$0xff] %v6338_v33  ;;  %6411 = vst [vmem:[%s9306_s26 + $0xc8] sm:$0xff] %v6339_v52  ;;  %v6353_v13 = vmul.f32 %v6287_v5, %v6221_v63  ;;  %v6354_v53 = vmul.f32 %v6287_v5, %v6222_v34  ;;  %v6355_v48 = vmul.f32 %v6287_v5, %v6223_v57  ;;  %v6302_v35 = vpop.permute.xlu1 %6301  ;;  %v6243_v45 = vld [vmem:[#allocation4 + $0x1e8] sm:$0xff]  ;;  %v6244_v7 = vld [vmem:[#allocation4 + $0x1f0] sm:$0xff] }
 0x97b   : > { %6412 = vst [vmem:[%s9306_s26 + $0xd0] sm:$0xff] %v6340_v30  ;;  %6413 = vst [vmem:[%s9306_s26 + $0xd8] sm:$0xff] %v6341_v44  ;;  %v6368_v28 = vmul.f32 %v6302_v35, %v6236_v37  ;;  %v6369_v10 = vmul.f32 %v6302_v35, %v6237_v16  ;;  %v6370_v24 = vmul.f32 %v6302_v35, %v6238_v62  ;;  %v6297_v6 = vpop.permute.xlu0 %6296  ;;  %v6245_v52 = vld [vmem:[#allocation4 + $0x1f8] sm:$0xff]  ;;  %v6246_v59 = vld [vmem:[#allocation4 + $0x200] sm:$0xff] }
 0x97c   : > { %6414 = vst [vmem:[%s9306_s26 + $0xe0] sm:$0xff] %v6342_v19  ;;  %6415 = vst [vmem:[%s9306_s26 + $0xe8] sm:$0xff] %v6343_v22  ;;  %v6371_v18 = vmul.f32 %v6302_v35, %v6239_v49  ;;  %v6372_v20 = vmul.f32 %v6302_v35, %v6240_v36  ;;  %v6373_v58 = vmul.f32 %v6302_v35, %v6241_v41  ;;  %v6247_v32 = vld [vmem:[#allocation4 + $0x208] sm:$0xff] }
 0x97d   : > { %6428 = vst [vmem:[%s9306_s26 + $0x150] sm:$0xff] %v6356_v1  ;;  %6429 = vst [vmem:[%s9306_s26 + $0x158] sm:$0xff] %v6357_v8  ;;  %v6362_v40 = vmul.f32 %v6297_v6, %v6230_v2  ;;  %v6363_v55 = vmul.f32 %v6297_v6, %v6231_v50  ;;  %v6364_v23 = vmul.f32 %v6297_v6, %v6232_v0 }
 0x97e   : > { %6430 = vst [vmem:[%s9306_s26 + $0x160] sm:$0xff] %v6358_v31  ;;  %6431 = vst [vmem:[%s9306_s26 + $0x168] sm:$0xff] %v6359_v39  ;;  %v6365_v15 = vmul.f32 %v6297_v6, %v6233_v46  ;;  %v6366_v25 = vmul.f32 %v6297_v6, %v6234_v3  ;;  %v6367_v61 = vmul.f32 %v6297_v6, %v6235_v56  ;;  %v6312_v33 = vpop.permute.xlu1 %6311 }
 0x97f   : > { %6432 = vst [vmem:[%s9306_s26 + $0x170] sm:$0xff] %v6360_v29  ;;  %6433 = vst [vmem:[%s9306_s26 + $0x178] sm:$0xff] %v6361_v27  ;;  %v6380_v51 = vmul.f32 %v6312_v33, %v6248_v60  ;;  %v6381_v30 = vmul.f32 %v6312_v33, %v6249_v47  ;;  %v6382_v44 = vmul.f32 %v6312_v33, %v6250_v17  ;;  %v6307_v22 = vpop.permute.xlu0 %6306 }
 0x980   : > { %6422 = vst [vmem:[%s9306_s26 + $0x120] sm:$0xff] %v6350_v43  ;;  %6423 = vst [vmem:[%s9306_s26 + $0x128] sm:$0xff] %v6351_v9  ;;  %v6383_v19 = vmul.f32 %v6312_v33, %v6251_v21  ;;  %v6384_v54 = vmul.f32 %v6312_v33, %v6252_v26  ;;  %v6385_v14 = vmul.f32 %v6312_v33, %v6253_v11 }
 0x981   : > { %6424 = vst [vmem:[%s9306_s26 + $0x130] sm:$0xff] %v6352_v38  ;;  %6425 = vst [vmem:[%s9306_s26 + $0x138] sm:$0xff] %v6353_v13  ;;  %v6374_v42 = vmul.f32 %v6307_v22, %v6242_v12  ;;  %v6375_v4 = vmul.f32 %v6307_v22, %v6243_v45  ;;  %v6376_v63 = vmul.f32 %v6307_v22, %v6244_v7 }
 0x982   : > { %6426 = vst [vmem:[%s9306_s26 + $0x140] sm:$0xff] %v6354_v53  ;;  %6427 = vst [vmem:[%s9306_s26 + $0x148] sm:$0xff] %v6355_v48  ;;  %v6377_v34 = vmul.f32 %v6307_v22, %v6245_v52  ;;  %v6378_v57 = vmul.f32 %v6307_v22, %v6246_v59  ;;  %v6379_v1 = vmul.f32 %v6307_v22, %v6247_v32 }
 0x983   : > { %6440 = vst [vmem:[%s9306_s26 + $0x1b0] sm:$0xff] %v6368_v28  ;;  %6441 = vst [vmem:[%s9306_s26 + $0x1b8] sm:$0xff] %v6369_v10 }
 0x984   : > { %6442 = vst [vmem:[%s9306_s26 + $0x1c0] sm:$0xff] %v6370_v24  ;;  %6443 = vst [vmem:[%s9306_s26 + $0x1c8] sm:$0xff] %v6371_v18 }
 0x985   : > { %6444 = vst [vmem:[%s9306_s26 + $0x1d0] sm:$0xff] %v6372_v20  ;;  %6445 = vst [vmem:[%s9306_s26 + $0x1d8] sm:$0xff] %v6373_v58 }
 0x986   : > { %6434 = vst [vmem:[%s9306_s26 + $0x180] sm:$0xff] %v6362_v40  ;;  %6435 = vst [vmem:[%s9306_s26 + $0x188] sm:$0xff] %v6363_v55 }
 0x987   : > { %6436 = vst [vmem:[%s9306_s26 + $0x190] sm:$0xff] %v6364_v23  ;;  %6437 = vst [vmem:[%s9306_s26 + $0x198] sm:$0xff] %v6365_v15 }
 0x988   : > { %6438 = vst [vmem:[%s9306_s26 + $0x1a0] sm:$0xff] %v6366_v25  ;;  %6439 = vst [vmem:[%s9306_s26 + $0x1a8] sm:$0xff] %v6367_v61 }
 0x989   : > { %6452 = vst [vmem:[%s9306_s26 + $0x210] sm:$0xff] %v6380_v51  ;;  %6453 = vst [vmem:[%s9306_s26 + $0x218] sm:$0xff] %v6381_v30 }
 0x98a   : > { %6454 = vst [vmem:[%s9306_s26 + $0x220] sm:$0xff] %v6382_v44  ;;  %6455 = vst [vmem:[%s9306_s26 + $0x228] sm:$0xff] %v6383_v19 }
 0x98b   : > { %6456 = vst [vmem:[%s9306_s26 + $0x230] sm:$0xff] %v6384_v54  ;;  %6457 = vst [vmem:[%s9306_s26 + $0x238] sm:$0xff] %v6385_v14 }
 0x98c   : > { %6446 = vst [vmem:[%s9306_s26 + $0x1e0] sm:$0xff] %v6374_v42  ;;  %6447 = vst [vmem:[%s9306_s26 + $0x1e8] sm:$0xff] %v6375_v4 }
 0x98d   : > { %6448 = vst [vmem:[%s9306_s26 + $0x1f0] sm:$0xff] %v6376_v63  ;;  %6449 = vst [vmem:[%s9306_s26 + $0x1f8] sm:$0xff] %v6377_v34 }
 0x98e   : > { %6450 = vst [vmem:[%s9306_s26 + $0x200] sm:$0xff] %v6378_v57  ;;  %6451 = vst [vmem:[%s9306_s26 + $0x208] sm:$0xff] %v6379_v1 }
 0x98f PF: > { %s12573_s15 = sld [smem:[#allocation15_spill]]  ;;  %s12574_s25 = sld [smem:[#allocation17_spill]] }
 0x990   : > { %s6472_s3 = sshll.u32 %s9306_s26, 4  ;;  %s12575_s8 = sld [smem:[#allocation96_spill]]  ;;  %s12126_s3 = int_to_ptr.vmem [resolvable:$true] %s6472_s3 }
 0x991   : > { %s6459_s28 = scalar_lea.sflag [#allocation7], %s9288_s22  ;;  %s8908_s30 = scalar_lea.vmem %s12126_s3, 9216 }
 0x992   : > { %p8909_p13 = scmp.ne.s32.totalorder %s12126_s3, %s8908_s30  ;;  %s9044_s7 = smov [#allocation10]  }
 0x993   : > { %s8912_s21 = sshll.u32 %s9044_s7, 4  ;;  %s8913_s21 = int_to_ptr.vmem [resolvable:$false] %s8912_s21 }
 0x994   : > { %s8914_s2 = scalar_lea.vmem %s8913_s21, 18432  ;;  %p8915_p3 = scmp.lt.s32.totalorder %s12126_s3, %s8913_s21 }
 0x995   : > { %s7432_s20 = smul.u32 9216, %s12573_s15  ;;  %p12576_p12 = scmp.ne.s32.totalorder %s12574_s25, 0 }
 0x996   : > { %p8916_p1 = scmp.lt.s32.totalorder %s8914_s2, %s8908_s30 }
 0x997   : > { %s12124_s9 = scalar_lea.hbm %s12575_s8, %s7432_s20  ;;  %p8910_p4 = pnand %p8909_p13, %p12576_p12 }
 0x998   : > { %p8917_p9 = por %p8916_p1, %p8915_p3 }
 0x999   : > { %p8911_p5 = pneg %p8910_p4 }
 0x99b   : > { %p8918_p2 = pnand %p8917_p9, %p8911_p5 }
 0x99d   : > { %8921 = shalt.err (!%p8918_p2)
}
 0x99e   : > { %s8922_s17 = scalar_lea.hbm %s12124_s9, 9216  ;;  %s8926_s29 = scalar_lea.hbm %s12575_s8, 18432 }
 0x99f   : > { %p8923_p11 = scmp.ne.s32.totalorder %s12124_s9, %s8922_s17  ;;  %p8927_p8 = scmp.lt.u32.totalorder %s12124_s9, %s12575_s8 }
 0x9a0   : > { %p8928_p10 = scmp.lt.u32.totalorder %s8926_s29, %s8922_s17  ;;  %p8930_p13 = scmp.lt.u32.totalorder %s8922_s17, %s12124_s9 }
 0x9a1   : > { %p8924_p7 = pnand %p8923_p11, %p12576_p12 }
 0x9a2   : > { %p8929_p6 = por %p8928_p10, %p8927_p8 }
 0x9a3   : > { %p8925_p0 = pneg %p8924_p7 }
 0x9a4   : > { %p8931_p4 = por %p8930_p13, %p8929_p6 }
 0x9a6   : > { %p8932_p5 = pnand %p8931_p4, %p8925_p0 }
 0x9a8   : > { %8935 = shalt.err (!%p8932_p5)
}
 0x9a9   : > { %s9045_s26 = smov 768   ;;  %s9046_s15 = smov 48  }
 0x9aa   : > { %7437 = dma.vmem_to_hbm [thread:$0]  (%p12576_p12), %s12126_s3, 9216, %s12124_s9, %s6459_s28, %s9045_s26, %s9045_s26, %s9046_s15  }
 0x9ab PF: > { %s12577_s20 = sld [smem:[#allocation14_spill]]  ;;  %s12578_s4 = sld [smem:[#allocation18_spill]] }
 0x9ac   : > { %p7451_p3 = scmp.ge.s32.totalorder %s9034_s19, 2 }
 0x9b1   : > { %s6487_s5 = sand.u32 1, %s12577_s20   ;;  %p12579_p1 = scmp.ne.s32.totalorder %s12578_s4, 0 }
 0x9b2   : > { %s6488_s30 = scalar_lea.sflag [#allocation7], %s6487_s5 }
 0x9b3   : > { %p7447_p9 = pnand %p7451_p3, %p12579_p1 }
 0x9b5   : > { %8989 = dma.done.wait (!%p7447_p9), %s6488_s30, 9216  }
 0x9b6   : > { %8991 = vsyncadd (!%p7447_p9), %s6488_s30, 4294958080  ;;  %s21_s19 = sadd.s32 1, %s9034_s19   ;;  %s12580_s15 = sld [smem:[#allocation16_spill]] }
 0x9b7   : > { %p18_p2 = scmp.ge.s32.totalorder %s21_s19, 8   ;;  %s12581_s17 = sld [smem:[#allocation19_spill]] }
 0x9b8   : > { %s12582_s9 = smov %s8998_s10  ;;  %s12583_s10 = smov %s9002_s11 }
 0x9b9   : > { %s12584_s11 = smov %s9237_s24  ;;  %s12585_s12 = smov %s9010_s13 }
 0x9ba   : > { %s12586_s13 = smov %s9014_s14  ;;  %s12587_s14 = smov %s9234_s0 }
 0x9bb   : > { %s12588_s16 = smov %s9030_s18  ;;  %s12589_s18 = smov %s12595_s6 }
 0x9bc   :  { %20 = sbr.rel (!%p18_p2) target bundleno = 14 (0xe), region = 94 }
 0x9c3   :  { %6493 = vsyncpa [#allocation6], 1 }
 0x9c4   :  { %6495 = vsyncpa [#allocation6 + $0x1], 1 }
 0x9c5   :  { %6496 = vsyncpa [#allocation9], 1 }
 0x9c6   :  { %6498 = vsyncpa [#allocation9 + $0x1], 1 }
 0x9c7   :  { %6499 = vsyncpa [#allocation7], 1 }
 0x9c8   :  { %6501 = vsyncpa [#allocation7 + $0x1], 1 }

</bundles_post_ra>
